<compile_context>
chip_gen: v5e
topology: v5e:2x2
jax: 0.10.0
libtpu: 0.0.40
codegen_flags: <defaults>
</compile_context>

<pallas_src>
import math
import functools

import jax
import jax.numpy as jnp
from jax.experimental import pallas as pl
from jax.experimental.pallas import tpu as pltpu


# ----------------------------- small config ---------------------------------
B = 2                      # batch
C = 4                      # image channels
IMG = 16                   # image spatial size (IMG x IMG)
PATCH = 4                  # patch size -> P = (IMG // PATCH) ** 2 = 16 tokens
PATCH_DIM = C * PATCH * PATCH
N_PATCH = (IMG // PATCH) ** 2
D_MODEL = 128              # hidden size (PyTorch default 1024, scaled, lane-dense)
N_HEAD = 4                 # heads (PyTorch default 16, scaled down)
D_HEAD = D_MODEL // N_HEAD
T_DEC = 8                  # decoder sequence length
VOCAB = 128                # vocab size (synthetic, lane-dense)
N_BLOCKS = 2               # number of decoder blocks
MLP_HIDDEN = 4 * D_MODEL

# --- packed per-block matmul slab layout (bf16, all with K = D_MODEL), in lanes ---
_W_SA_QKV = 0 * D_MODEL            # (D, 3D)  GPT-2 c_attn [q|k|v]
_W_SA_O = 3 * D_MODEL              # (D, D)   GPT-2 c_proj
_W_CA_Q = 4 * D_MODEL              # (D, D)   cross-attn W_q
_W_CA_KV = 5 * D_MODEL             # (D, 2D)  cross-attn [W_k|W_v]
_W_CA_O = 7 * D_MODEL              # (D, D)   cross-attn W_o
_W_MLP_FC = 8 * D_MODEL            # (D, 4D)  mlp c_fc
_W_COLS = 12 * D_MODEL

# --- packed per-block bias / LayerNorm vector layout (f32), in lanes ---
_V_LN1_G = 0 * D_MODEL
_V_LN1_B = 1 * D_MODEL
_V_SA_QKV_B = 2 * D_MODEL          # 3D wide
_V_SA_O_B = 5 * D_MODEL
_V_LN2_G = 6 * D_MODEL
_V_LN2_B = 7 * D_MODEL
_V_CA_Q_B = 8 * D_MODEL
_V_CA_KV_B = 9 * D_MODEL           # 2D wide
_V_CA_O_B = 11 * D_MODEL
_V_LN3_G = 12 * D_MODEL
_V_LN3_B = 13 * D_MODEL
_V_MLP_FC_B = 14 * D_MODEL         # 4D wide
_V_MLP_PJ_B = 18 * D_MODEL
_V_COLS = 19 * D_MODEL


# ----------------------------- kernel helpers --------------------------------
def _layernorm(h, g, b, eps=1e-5):
    mu = jnp.mean(h, axis=-1, keepdims=True)
    var = jnp.mean(jnp.square(h - mu), axis=-1, keepdims=True)
    return (h - mu) * jax.lax.rsqrt(var + eps) * g + b


# ----------------------------- fused forward kernel ---------------------------
def _fused_forward_kernel(hid_ref, patch_ref, pw_ref, pb_ref,
                          wslab_ref, mlp_pj_ref, vec_ref,
                          head_w_ref, head_b_ref, out_ref,
                          *, b, t, p, d_model, n_head, n_blocks):
    d = d_model
    dh = d // n_head

    # ---- synthetic vision encoder: stride=PATCH conv expressed as one matmul ----
    enc = (jnp.dot(patch_ref[...], pw_ref[...],
                   preferred_element_type=jnp.float32) + pb_ref[...])   # (B*P, D)
    enc_bf = enc.astype(jnp.bfloat16)

    # ---- causal additive mask, hoisted out of the per-block loop ----
    row = jax.lax.broadcasted_iota(jnp.int32, (1, t, t), 1)
    col = jax.lax.broadcasted_iota(jnp.int32, (1, t, t), 2)
    causal_bias = jnp.where(row >= col, 0.0, -1e9).astype(jnp.float32)

    def split_heads(x, seq):
        # (B*seq, H*DH) -> (B*H, seq, DH): heads split only for the tiny score step.
        return jnp.stack([x[bi * seq:(bi + 1) * seq, hh * dh:(hh + 1) * dh]
                          for bi in range(b) for hh in range(n_head)], axis=0)

    def merge_heads(o, seq):
        # (B*H, seq, DH) -> (B*seq, H*DH), lane-dense for the output projection.
        rows = [jnp.concatenate([o[bi * n_head + hh] for hh in range(n_head)],
                                axis=-1) for bi in range(b)]
        return jnp.concatenate(rows, axis=0)

    def attend(q, k, v, bias):
        # q: (B*H, tq, DH), k/v: (B*H, tk, DH) — head-and-batch batched score step.
        scale = 1.0 / math.sqrt(dh)
        s = jnp.einsum("bqf,bkf->bqk", q.astype(jnp.bfloat16),
                       k.astype(jnp.bfloat16),
                       preferred_element_type=jnp.float32) * scale
        if bias is not None:
            s = s + bias
        s = s - jnp.max(s, axis=-1, keepdims=True)
        e = jnp.exp(s)
        pr = e * pl.reciprocal(jnp.sum(e, axis=-1, keepdims=True), approx=True)
        return jnp.einsum("bqk,bkf->bqf", pr.astype(jnp.bfloat16),
                          v.astype(jnp.bfloat16),
                          preferred_element_type=jnp.float32)           # (B*H, tq, DH)

    h = hid_ref[...]                                                    # (B*T, D) f32

    for blk in range(n_blocks):   # static unroll; all activations stay in VMEM/vregs
        def ws(off, width):
            return wslab_ref[blk, :, off:off + width]                   # (D, width) bf16

        def vs(off, width=d):
            return vec_ref[blk, :, off:off + width]                     # (1, width) f32

        # ---- GPT-2 causal self-attention: ln_1 -> attn -> residual ----
        h1 = _layernorm(h, vs(_V_LN1_G), vs(_V_LN1_B)).astype(jnp.bfloat16)
        qkv = (jnp.dot(h1, ws(_W_SA_QKV, 3 * d),
                       preferred_element_type=jnp.float32)
               + vs(_V_SA_QKV_B, 3 * d))                                # (B*T, 3D)
        q = split_heads(qkv[:, 0:d], t)
        k = split_heads(qkv[:, d:2 * d], t)
        v = split_heads(qkv[:, 2 * d:3 * d], t)
        o = merge_heads(attend(q, k, v, causal_bias), t)                # (B*T, D) f32
        sa = (jnp.dot(o.astype(jnp.bfloat16), ws(_W_SA_O, d),
                      preferred_element_type=jnp.float32) + vs(_V_SA_O_B))
        r1 = sa + h

        # ---- injected cross-attention over encoder tokens: ln_2 -> xattn -> res ----
        h2 = _layernorm(r1, vs(_V_LN2_G), vs(_V_LN2_B)).astype(jnp.bfloat16)
        qx = (jnp.dot(h2, ws(_W_CA_Q, d),
                      preferred_element_type=jnp.float32) + vs(_V_CA_Q_B))
        kvx = (jnp.dot(enc_bf, ws(_W_CA_KV, 2 * d),
                       preferred_element_type=jnp.float32)
               + vs(_V_CA_KV_B, 2 * d))                                 # (B*P, 2D)
        qh = split_heads(qx, t)
        kh = split_heads(kvx[:, 0:d], p)
        vh = split_heads(kvx[:, d:2 * d], p)
        ox = merge_heads(attend(qh, kh, vh, None), t)                   # (B*T, D) f32
        ca = (jnp.dot(ox.astype(jnp.bfloat16), ws(_W_CA_O, d),
                      preferred_element_type=jnp.float32) + vs(_V_CA_O_B))
        r2 = r1 + ca

        # ---- MLP: ln_3 -> fc -> gelu_new -> proj -> residual ----
        h3 = _layernorm(r2, vs(_V_LN3_G), vs(_V_LN3_B)).astype(jnp.bfloat16)
        a = (jnp.dot(h3, ws(_W_MLP_FC, 4 * d),
                     preferred_element_type=jnp.float32)
             + vs(_V_MLP_FC_B, 4 * d))                                  # (B*T, 4D)
        g = 0.5 * a * (1.0 + jnp.tanh(0.7978845608028654 *
                                      (a + 0.044715 * a * a * a)))
        m = (jnp.dot(g.astype(jnp.bfloat16), mlp_pj_ref[blk],           # (4D, D) slab
                     preferred_element_type=jnp.float32) + vs(_V_MLP_PJ_B))
        h = m + r2

    # ---- fc_head -> logits over vocab (lane-dense (B*T, VOCAB) store) ----
    out_ref[...] = (jnp.dot(h.astype(jnp.bfloat16), head_w_ref[...],
                            preferred_element_type=jnp.float32) + head_b_ref[...])


# ----------------------------- model glue -------------------------------------
def image_captions_forward(params, image_pixel, decoder_input_ids):
    bsz, c, hgt, wdt = image_pixel.shape
    ph, pw_ = hgt // PATCH, wdt // PATCH
    n_patch = ph * pw_
    # NCHW image -> non-overlapping patches -> (B*P, C*PATCH*PATCH) bf16 (cheap glue)
    x = image_pixel.reshape(bsz, c, ph, PATCH, pw_, PATCH)
    patches = x.transpose(0, 2, 4, 1, 3, 5).reshape(
        bsz * n_patch, c * PATCH * PATCH).astype(jnp.bfloat16)

    # wte + wpe embedding lookup (glue: the gather stays outside the kernel)
    t = decoder_input_ids.shape[1]
    hidden = (params["wte"][decoder_input_ids]
              + params["wpe"][:t][None, :, :]).astype(jnp.float32)
    hidden = hidden.reshape(bsz * t, D_MODEL)       # fold batch into rows (M = B*T)

    kernel = functools.partial(_fused_forward_kernel, b=bsz, t=t, p=n_patch,
                               d_model=D_MODEL, n_head=N_HEAD, n_blocks=N_BLOCKS)
    out = pl.pallas_call(
        kernel,
        out_shape=jax.ShapeDtypeStruct((bsz * t, VOCAB), jnp.float32),
        grid=(1,),                                  # single step; batch is in rows
        in_specs=[
            pl.BlockSpec((bsz * t, D_MODEL), lambda i: (0, 0)),
            pl.BlockSpec((bsz * n_patch, PATCH_DIM), lambda i: (0, 0)),
            pl.BlockSpec((PATCH_DIM, D_MODEL), lambda i: (0, 0)),
            pl.BlockSpec((1, D_MODEL), lambda i: (0, 0)),
            pl.BlockSpec((N_BLOCKS, D_MODEL, _W_COLS), lambda i: (0, 0, 0)),
            pl.BlockSpec((N_BLOCKS, MLP_HIDDEN, D_MODEL), lambda i: (0, 0, 0)),
            pl.BlockSpec((N_BLOCKS, 1, _V_COLS), lambda i: (0, 0, 0)),
            pl.BlockSpec((D_MODEL, VOCAB), lambda i: (0, 0)),
            pl.BlockSpec((1, VOCAB), lambda i: (0, 0)),
        ],
        out_specs=pl.BlockSpec((bsz * t, VOCAB), lambda i: (0, 0)),
        compiler_params=pltpu.CompilerParams(
            dimension_semantics=("arbitrary",)),
    )(hidden, patches, params["patch_w"], params["patch_b"],
      params["wslab"], params["mlp_pj"], params["vec_b"],
      params["head_w"], params["head_b"])
    return out.reshape(bsz, t, VOCAB)


# ----------------------------- deterministic init -----------------------------
def init_params(key):
    std = 0.02
    keys = iter(jax.random.split(key, 128))

    def w(shape):
        return (std * jax.random.normal(next(keys), shape)).astype(jnp.float32)

    ones = jnp.ones((1, D_MODEL), jnp.float32)
    zeros = jnp.zeros((1, D_MODEL), jnp.float32)

    wslab, mlp_pj, vec_b = [], [], []
    for _ in range(N_BLOCKS):
        # one lane-dense matmul slab per block: [sa_qkv | sa_o | ca_q | ca_kv | ca_o | mlp_fc]
        wslab.append(jnp.concatenate(
            [w((D_MODEL, 3 * D_MODEL)),      # self-attn c_attn  (q|k|v packed)
             w((D_MODEL, D_MODEL)),          # self-attn c_proj
             w((D_MODEL, D_MODEL)),          # cross-attn W_q
             w((D_MODEL, 2 * D_MODEL)),      # cross-attn [W_k | W_v] packed
             w((D_MODEL, D_MODEL)),          # cross-attn W_o
             w((D_MODEL, MLP_HIDDEN))],      # mlp c_fc
            axis=1))
        # mlp c_proj stored (4D, D) so the kernel uses a straight dot (no relayout)
        mlp_pj.append(w((MLP_HIDDEN, D_MODEL)))
        # packed per-block (1, 19D) vector of LN params and all biases (lane-dense)
        vec_b.append(jnp.concatenate(
            [ones, zeros,                    # ln_1 gamma / beta
             w((1, 3 * D_MODEL)),            # self-attn qkv bias
             w((1, D_MODEL)),                # self-attn c_proj bias
             ones, zeros,                    # ln_2
             w((1, D_MODEL)),                # cross-attn W_q bias
             w((1, 2 * D_MODEL)),            # cross-attn W_k|W_v bias
             w((1, D_MODEL)),                # cross-attn W_o bias
             ones, zeros,                    # ln_3
             w((1, MLP_HIDDEN)),             # mlp fc bias (4D)
             w((1, D_MODEL))],               # mlp proj bias
            axis=1))

    return {
        "patch_w": w((PATCH_DIM, D_MODEL)).astype(jnp.bfloat16),
        "patch_b": w((1, D_MODEL)),
        "wte": w((VOCAB, D_MODEL)),
        "wpe": w((T_DEC, D_MODEL)),
        "head_w": w((D_MODEL, VOCAB)).astype(jnp.bfloat16),
        "head_b": w((1, VOCAB)),
        "wslab": jnp.stack(wslab).astype(jnp.bfloat16),   # (NB, D, 12D)
        "mlp_pj": jnp.stack(mlp_pj).astype(jnp.bfloat16),  # (NB, 4D, D)
        "vec_b": jnp.stack(vec_b),                         # (NB, 1, 19D)
    }


# ----------------------------- main -------------------------------------------
if __name__ == "__main__":
    key = jax.random.PRNGKey(0)
    k_img, k_ids, k_par = jax.random.split(key, 3)

    image_pixel = jax.random.normal(k_img, (B, C, IMG, IMG), dtype=jnp.float32)
    decoder_input_ids = jax.random.randint(k_ids, (B, T_DEC), 0, VOCAB,
                                           dtype=jnp.int32)
    params = init_params(k_par)

    fwd = jax.jit(image_captions_forward)
    logits = fwd(params, image_pixel, decoder_input_ids)
    jax.block_until_ready(logits)

    assert logits.shape == (B, T_DEC, VOCAB)
    assert bool(jnp.all(jnp.isfinite(logits)))
    print("KERNEL_OK")
</pallas_src>

<mosaic_0001>
module attributes {stable_mosaic.version = 11 : i64} {
  func.func @_fused_forward_kernel(%arg0: i32, %arg1: memref<16x128xf32, #tpu.memory_space<vmem>>, %arg2: memref<32x64xbf16, #tpu.memory_space<vmem>>, %arg3: memref<64x128xbf16, #tpu.memory_space<vmem>>, %arg4: memref<1x128xf32, #tpu.memory_space<vmem>>, %arg5: memref<2x128x1536xbf16, #tpu.memory_space<vmem>>, %arg6: memref<2x512x128xbf16, #tpu.memory_space<vmem>>, %arg7: memref<2x1x2432xf32, #tpu.memory_space<vmem>>, %arg8: memref<128x128xbf16, #tpu.memory_space<vmem>>, %arg9: memref<1x128xf32, #tpu.memory_space<vmem>>, %arg10: memref<16x128xf32, #tpu.memory_space<vmem>>) attributes {dimension_semantics = [#tpu.dimension_semantics<arbitrary>], iteration_bounds = array<i64: 1>, scalar_prefetch = 0 : i64, scratch_operands = 0 : i64, tpu.core_type = #tpu.core_type<tc>, window_params = [{pipeline_mode = #tpu.pipeline_mode<synchronous>, transform_indices = @transform_0, window_bounds = array<i64: 16, 128>}, {pipeline_mode = #tpu.pipeline_mode<synchronous>, transform_indices = @transform_1, window_bounds = array<i64: 32, 64>}, {pipeline_mode = #tpu.pipeline_mode<synchronous>, transform_indices = @transform_2, window_bounds = array<i64: 64, 128>}, {pipeline_mode = #tpu.pipeline_mode<synchronous>, transform_indices = @transform_3, window_bounds = array<i64: 1, 128>}, {pipeline_mode = #tpu.pipeline_mode<synchronous>, transform_indices = @transform_4, window_bounds = array<i64: 2, 128, 1536>}, {pipeline_mode = #tpu.pipeline_mode<synchronous>, transform_indices = @transform_5, window_bounds = array<i64: 2, 512, 128>}, {pipeline_mode = #tpu.pipeline_mode<synchronous>, transform_indices = @transform_6, window_bounds = array<i64: 2, 1, 2432>}, {pipeline_mode = #tpu.pipeline_mode<synchronous>, transform_indices = @transform_7, window_bounds = array<i64: 128, 128>}, {pipeline_mode = #tpu.pipeline_mode<synchronous>, transform_indices = @transform_8, window_bounds = array<i64: 1, 128>}, {pipeline_mode = #tpu.pipeline_mode<synchronous>, transform_indices = @transform_9, window_bounds = array<i64: 16, 128>}]} {
    %c0 = arith.constant 0 : index
    %c0_0 = arith.constant 0 : index
    %0 = vector.load %arg2[%c0, %c0_0] : memref<32x64xbf16, #tpu.memory_space<vmem>>, vector<32x64xbf16>
    %c0_1 = arith.constant 0 : index
    %c0_2 = arith.constant 0 : index
    %1 = vector.load %arg3[%c0_1, %c0_2] : memref<64x128xbf16, #tpu.memory_space<vmem>>, vector<64x128xbf16>
    %cst = arith.constant dense<0.000000e+00> : vector<32x128xf32>
    %2 = tpu.matmul %0, %1, %cst {dimension_numbers = #tpu.dot_dimension_numbers<[1], [0], [0], [1], [0, 0, 1, 1], [], []>} : vector<32x64xbf16>, vector<64x128xbf16>, vector<32x128xf32> -> vector<32x128xf32>
    %c0_3 = arith.constant 0 : index
    %c0_4 = arith.constant 0 : index
    %3 = vector.load %arg4[%c0_3, %c0_4] : memref<1x128xf32, #tpu.memory_space<vmem>>, vector<1x128xf32>
    %4 = vector.broadcast %3 : vector<1x128xf32> to vector<32x128xf32>
    %5 = arith.addf %2, %4 : vector<32x128xf32>
    %6 = arith.truncf %5 : vector<32x128xf32> to vector<32x128xbf16>
    %7 = tpu.iota {dimensions = array<i32: 1>} : vector<1x8x8xi32>
    %8 = tpu.iota {dimensions = array<i32: 2>} : vector<1x8x8xi32>
    %9 = arith.cmpi sge, %7, %8 : vector<1x8x8xi32>
    %cst_5 = arith.constant 0.000000e+00 : f32
    %cst_6 = arith.constant -1.000000e+09 : f32
    %10 = vector.broadcast %cst_5 : f32 to vector<1x8x8xf32>
    %11 = vector.broadcast %cst_6 : f32 to vector<1x8x8xf32>
    %12 = arith.select %9, %10, %11 : vector<1x8x8xi1>, vector<1x8x8xf32>
    %c0_7 = arith.constant 0 : index
    %c0_8 = arith.constant 0 : index
    %13 = vector.load %arg1[%c0_7, %c0_8] : memref<16x128xf32, #tpu.memory_space<vmem>>, vector<16x128xf32>
    %c0_9 = arith.constant 0 : index
    %c0_10 = arith.constant 0 : index
    %c0_11 = arith.constant 0 : index
    %14 = vector.load %arg7[%c0_9, %c0_10, %c0_11] : memref<2x1x2432xf32, #tpu.memory_space<vmem>>, vector<1x1x128xf32>
    %15 = vector.shape_cast %14 : vector<1x1x128xf32> to vector<1x128xf32>
    %c0_12 = arith.constant 0 : index
    %c0_13 = arith.constant 0 : index
    %c128 = arith.constant 128 : index
    %16 = vector.load %arg7[%c0_12, %c0_13, %c128] : memref<2x1x2432xf32, #tpu.memory_space<vmem>>, vector<1x1x128xf32>
    %17 = vector.shape_cast %16 : vector<1x1x128xf32> to vector<1x128xf32>
    %cst_14 = arith.constant dense<0.000000e+00> : vector<16xf32>
    %18 = vector.multi_reduction <add>, %13, %cst_14 [1] : vector<16x128xf32> to vector<16xf32>
    %19 = vector.shape_cast %18 : vector<16xf32> to vector<16x1xf32>
    %cst_15 = arith.constant 1.280000e+02 : f32
    %20 = vector.broadcast %cst_15 : f32 to vector<16x1xf32>
    %21 = arith.divf %19, %20 : vector<16x1xf32>
    %22 = vector.broadcast %21 : vector<16x1xf32> to vector<16x128xf32>
    %23 = arith.subf %13, %22 : vector<16x128xf32>
    %24 = arith.mulf %23, %23 : vector<16x128xf32>
    %cst_16 = arith.constant dense<0.000000e+00> : vector<16xf32>
    %25 = vector.multi_reduction <add>, %24, %cst_16 [1] : vector<16x128xf32> to vector<16xf32>
    %26 = vector.shape_cast %25 : vector<16xf32> to vector<16x1xf32>
    %cst_17 = arith.constant 1.280000e+02 : f32
    %27 = vector.broadcast %cst_17 : f32 to vector<16x1xf32>
    %28 = arith.divf %26, %27 : vector<16x1xf32>
    %29 = vector.broadcast %21 : vector<16x1xf32> to vector<16x128xf32>
    %30 = arith.subf %13, %29 : vector<16x128xf32>
    %cst_18 = arith.constant 9.99999974E-6 : f32
    %31 = vector.broadcast %cst_18 : f32 to vector<16x1xf32>
    %32 = arith.addf %28, %31 : vector<16x1xf32>
    %33 = math.rsqrt %32 : vector<16x1xf32>
    %34 = vector.broadcast %33 : vector<16x1xf32> to vector<16x128xf32>
    %35 = arith.mulf %30, %34 : vector<16x128xf32>
    %36 = vector.broadcast %15 : vector<1x128xf32> to vector<16x128xf32>
    %37 = arith.mulf %35, %36 : vector<16x128xf32>
    %38 = vector.broadcast %17 : vector<1x128xf32> to vector<16x128xf32>
    %39 = arith.addf %37, %38 : vector<16x128xf32>
    %40 = arith.truncf %39 : vector<16x128xf32> to vector<16x128xbf16>
    %c0_19 = arith.constant 0 : index
    %c0_20 = arith.constant 0 : index
    %c0_21 = arith.constant 0 : index
    %41 = vector.load %arg5[%c0_19, %c0_20, %c0_21] : memref<2x128x1536xbf16, #tpu.memory_space<vmem>>, vector<1x128x384xbf16>
    %42 = vector.shape_cast %41 : vector<1x128x384xbf16> to vector<128x384xbf16>
    %cst_22 = arith.constant dense<0.000000e+00> : vector<16x384xf32>
    %43 = tpu.matmul %40, %42, %cst_22 {dimension_numbers = #tpu.dot_dimension_numbers<[1], [0], [0], [1], [0, 0, 1, 1], [], []>} : vector<16x128xbf16>, vector<128x384xbf16>, vector<16x384xf32> -> vector<16x384xf32>
    %c0_23 = arith.constant 0 : index
    %c0_24 = arith.constant 0 : index
    %c256 = arith.constant 256 : index
    %44 = vector.load %arg7[%c0_23, %c0_24, %c256] : memref<2x1x2432xf32, #tpu.memory_space<vmem>>, vector<1x1x384xf32>
    %45 = vector.shape_cast %44 : vector<1x1x384xf32> to vector<1x384xf32>
    %46 = vector.broadcast %45 : vector<1x384xf32> to vector<16x384xf32>
    %47 = arith.addf %43, %46 : vector<16x384xf32>
    %48 = vector.extract_strided_slice %47 {offsets = [0, 0], sizes = [16, 128], strides = [1, 1]} : vector<16x384xf32> to vector<16x128xf32>
    %49 = vector.extract_strided_slice %48 {offsets = [0, 0], sizes = [8, 32], strides = [1, 1]} : vector<16x128xf32> to vector<8x32xf32>
    %50 = vector.extract_strided_slice %48 {offsets = [0, 32], sizes = [8, 32], strides = [1, 1]} : vector<16x128xf32> to vector<8x32xf32>
    %51 = vector.extract_strided_slice %48 {offsets = [0, 64], sizes = [8, 32], strides = [1, 1]} : vector<16x128xf32> to vector<8x32xf32>
    %52 = vector.extract_strided_slice %48 {offsets = [0, 96], sizes = [8, 32], strides = [1, 1]} : vector<16x128xf32> to vector<8x32xf32>
    %53 = vector.extract_strided_slice %48 {offsets = [8, 0], sizes = [8, 32], strides = [1, 1]} : vector<16x128xf32> to vector<8x32xf32>
    %54 = vector.extract_strided_slice %48 {offsets = [8, 32], sizes = [8, 32], strides = [1, 1]} : vector<16x128xf32> to vector<8x32xf32>
    %55 = vector.extract_strided_slice %48 {offsets = [8, 64], sizes = [8, 32], strides = [1, 1]} : vector<16x128xf32> to vector<8x32xf32>
    %56 = vector.extract_strided_slice %48 {offsets = [8, 96], sizes = [8, 32], strides = [1, 1]} : vector<16x128xf32> to vector<8x32xf32>
    %57 = vector.shape_cast %49 : vector<8x32xf32> to vector<1x8x32xf32>
    %58 = vector.shape_cast %50 : vector<8x32xf32> to vector<1x8x32xf32>
    %59 = vector.shape_cast %51 : vector<8x32xf32> to vector<1x8x32xf32>
    %60 = vector.shape_cast %52 : vector<8x32xf32> to vector<1x8x32xf32>
    %61 = vector.shape_cast %53 : vector<8x32xf32> to vector<1x8x32xf32>
    %62 = vector.shape_cast %54 : vector<8x32xf32> to vector<1x8x32xf32>
    %63 = vector.shape_cast %55 : vector<8x32xf32> to vector<1x8x32xf32>
    %64 = vector.shape_cast %56 : vector<8x32xf32> to vector<1x8x32xf32>
    %65 = tpu.concatenate %57, %58, %59, %60, %61, %62, %63, %64 in 0 : vector<1x8x32xf32>, vector<1x8x32xf32>, vector<1x8x32xf32>, vector<1x8x32xf32>, vector<1x8x32xf32>, vector<1x8x32xf32>, vector<1x8x32xf32>, vector<1x8x32xf32> -> vector<8x8x32xf32>
    %66 = vector.extract_strided_slice %47 {offsets = [0, 128], sizes = [16, 128], strides = [1, 1]} : vector<16x384xf32> to vector<16x128xf32>
    %67 = vector.extract_strided_slice %66 {offsets = [0, 0], sizes = [8, 32], strides = [1, 1]} : vector<16x128xf32> to vector<8x32xf32>
    %68 = vector.extract_strided_slice %66 {offsets = [0, 32], sizes = [8, 32], strides = [1, 1]} : vector<16x128xf32> to vector<8x32xf32>
    %69 = vector.extract_strided_slice %66 {offsets = [0, 64], sizes = [8, 32], strides = [1, 1]} : vector<16x128xf32> to vector<8x32xf32>
    %70 = vector.extract_strided_slice %66 {offsets = [0, 96], sizes = [8, 32], strides = [1, 1]} : vector<16x128xf32> to vector<8x32xf32>
    %71 = vector.extract_strided_slice %66 {offsets = [8, 0], sizes = [8, 32], strides = [1, 1]} : vector<16x128xf32> to vector<8x32xf32>
    %72 = vector.extract_strided_slice %66 {offsets = [8, 32], sizes = [8, 32], strides = [1, 1]} : vector<16x128xf32> to vector<8x32xf32>
    %73 = vector.extract_strided_slice %66 {offsets = [8, 64], sizes = [8, 32], strides = [1, 1]} : vector<16x128xf32> to vector<8x32xf32>
    %74 = vector.extract_strided_slice %66 {offsets = [8, 96], sizes = [8, 32], strides = [1, 1]} : vector<16x128xf32> to vector<8x32xf32>
    %75 = vector.shape_cast %67 : vector<8x32xf32> to vector<1x8x32xf32>
    %76 = vector.shape_cast %68 : vector<8x32xf32> to vector<1x8x32xf32>
    %77 = vector.shape_cast %69 : vector<8x32xf32> to vector<1x8x32xf32>
    %78 = vector.shape_cast %70 : vector<8x32xf32> to vector<1x8x32xf32>
    %79 = vector.shape_cast %71 : vector<8x32xf32> to vector<1x8x32xf32>
    %80 = vector.shape_cast %72 : vector<8x32xf32> to vector<1x8x32xf32>
    %81 = vector.shape_cast %73 : vector<8x32xf32> to vector<1x8x32xf32>
    %82 = vector.shape_cast %74 : vector<8x32xf32> to vector<1x8x32xf32>
    %83 = tpu.concatenate %75, %76, %77, %78, %79, %80, %81, %82 in 0 : vector<1x8x32xf32>, vector<1x8x32xf32>, vector<1x8x32xf32>, vector<1x8x32xf32>, vector<1x8x32xf32>, vector<1x8x32xf32>, vector<1x8x32xf32>, vector<1x8x32xf32> -> vector<8x8x32xf32>
    %84 = vector.extract_strided_slice %47 {offsets = [0, 256], sizes = [16, 128], strides = [1, 1]} : vector<16x384xf32> to vector<16x128xf32>
    %85 = vector.extract_strided_slice %84 {offsets = [0, 0], sizes = [8, 32], strides = [1, 1]} : vector<16x128xf32> to vector<8x32xf32>
    %86 = vector.extract_strided_slice %84 {offsets = [0, 32], sizes = [8, 32], strides = [1, 1]} : vector<16x128xf32> to vector<8x32xf32>
    %87 = vector.extract_strided_slice %84 {offsets = [0, 64], sizes = [8, 32], strides = [1, 1]} : vector<16x128xf32> to vector<8x32xf32>
    %88 = vector.extract_strided_slice %84 {offsets = [0, 96], sizes = [8, 32], strides = [1, 1]} : vector<16x128xf32> to vector<8x32xf32>
    %89 = vector.extract_strided_slice %84 {offsets = [8, 0], sizes = [8, 32], strides = [1, 1]} : vector<16x128xf32> to vector<8x32xf32>
    %90 = vector.extract_strided_slice %84 {offsets = [8, 32], sizes = [8, 32], strides = [1, 1]} : vector<16x128xf32> to vector<8x32xf32>
    %91 = vector.extract_strided_slice %84 {offsets = [8, 64], sizes = [8, 32], strides = [1, 1]} : vector<16x128xf32> to vector<8x32xf32>
    %92 = vector.extract_strided_slice %84 {offsets = [8, 96], sizes = [8, 32], strides = [1, 1]} : vector<16x128xf32> to vector<8x32xf32>
    %93 = vector.shape_cast %85 : vector<8x32xf32> to vector<1x8x32xf32>
    %94 = vector.shape_cast %86 : vector<8x32xf32> to vector<1x8x32xf32>
    %95 = vector.shape_cast %87 : vector<8x32xf32> to vector<1x8x32xf32>
    %96 = vector.shape_cast %88 : vector<8x32xf32> to vector<1x8x32xf32>
    %97 = vector.shape_cast %89 : vector<8x32xf32> to vector<1x8x32xf32>
    %98 = vector.shape_cast %90 : vector<8x32xf32> to vector<1x8x32xf32>
    %99 = vector.shape_cast %91 : vector<8x32xf32> to vector<1x8x32xf32>
    %100 = vector.shape_cast %92 : vector<8x32xf32> to vector<1x8x32xf32>
    %101 = tpu.concatenate %93, %94, %95, %96, %97, %98, %99, %100 in 0 : vector<1x8x32xf32>, vector<1x8x32xf32>, vector<1x8x32xf32>, vector<1x8x32xf32>, vector<1x8x32xf32>, vector<1x8x32xf32>, vector<1x8x32xf32>, vector<1x8x32xf32> -> vector<8x8x32xf32>
    %102 = arith.truncf %65 : vector<8x8x32xf32> to vector<8x8x32xbf16>
    %103 = arith.truncf %83 : vector<8x8x32xf32> to vector<8x8x32xbf16>
    "tpu.trace_start"() <{level = 10 : i32, message = "bqf,bkf->bqk"}> : () -> ()
    %cst_25 = arith.constant dense<0.000000e+00> : vector<8x8x8xf32>
    %104 = tpu.matmul %102, %103, %cst_25 {dimension_numbers = #tpu.dot_dimension_numbers<[2], [2], [1], [1], [0, 0, 0, 1, 1, 1], [0], [0]>} : vector<8x8x32xbf16>, vector<8x8x32xbf16>, vector<8x8x8xf32> -> vector<8x8x8xf32>
    "tpu.trace_stop"() : () -> ()
    %cst_26 = arith.constant 0.176776692 : f32
    %105 = vector.broadcast %cst_26 : f32 to vector<8x8x8xf32>
    %106 = arith.mulf %104, %105 : vector<8x8x8xf32>
    %107 = vector.broadcast %12 : vector<1x8x8xf32> to vector<8x8x8xf32>
    %108 = arith.addf %106, %107 : vector<8x8x8xf32>
    %cst_27 = arith.constant dense<0xFF800000> : vector<8x8xf32>
    %109 = vector.multi_reduction <maximumf>, %108, %cst_27 [2] : vector<8x8x8xf32> to vector<8x8xf32>
    %110 = vector.shape_cast %109 : vector<8x8xf32> to vector<8x8x1xf32>
    %111 = vector.broadcast %110 : vector<8x8x1xf32> to vector<8x8x8xf32>
    %112 = arith.subf %108, %111 : vector<8x8x8xf32>
    %113 = math.exp %112 : vector<8x8x8xf32>
    %cst_28 = arith.constant dense<0.000000e+00> : vector<8x8xf32>
    %114 = vector.multi_reduction <add>, %113, %cst_28 [2] : vector<8x8x8xf32> to vector<8x8xf32>
    %115 = vector.shape_cast %114 : vector<8x8xf32> to vector<8x8x1xf32>
    %116 = tpu.reciprocal %115 {approx = true} : vector<8x8x1xf32> -> vector<8x8x1xf32>
    %117 = vector.broadcast %116 : vector<8x8x1xf32> to vector<8x8x8xf32>
    %118 = arith.mulf %113, %117 : vector<8x8x8xf32>
    %119 = arith.truncf %118 : vector<8x8x8xf32> to vector<8x8x8xbf16>
    %120 = arith.truncf %101 : vector<8x8x32xf32> to vector<8x8x32xbf16>
    "tpu.trace_start"() <{level = 10 : i32, message = "bqk,bkf->bqf"}> : () -> ()
    %cst_29 = arith.constant dense<0.000000e+00> : vector<8x8x32xf32>
    %121 = tpu.matmul %119, %120, %cst_29 {dimension_numbers = #tpu.dot_dimension_numbers<[2], [1], [1], [2], [0, 0, 0, 1, 1, 2], [0], [0]>} : vector<8x8x8xbf16>, vector<8x8x32xbf16>, vector<8x8x32xf32> -> vector<8x8x32xf32>
    "tpu.trace_stop"() : () -> ()
    %122 = vector.extract_strided_slice %121 {offsets = [0, 0, 0], sizes = [1, 8, 32], strides = [1, 1, 1]} : vector<8x8x32xf32> to vector<1x8x32xf32>
    %123 = vector.shape_cast %122 : vector<1x8x32xf32> to vector<8x32xf32>
    %124 = vector.extract_strided_slice %121 {offsets = [1, 0, 0], sizes = [1, 8, 32], strides = [1, 1, 1]} : vector<8x8x32xf32> to vector<1x8x32xf32>
    %125 = vector.shape_cast %124 : vector<1x8x32xf32> to vector<8x32xf32>
    %126 = vector.extract_strided_slice %121 {offsets = [2, 0, 0], sizes = [1, 8, 32], strides = [1, 1, 1]} : vector<8x8x32xf32> to vector<1x8x32xf32>
    %127 = vector.shape_cast %126 : vector<1x8x32xf32> to vector<8x32xf32>
    %128 = vector.extract_strided_slice %121 {offsets = [3, 0, 0], sizes = [1, 8, 32], strides = [1, 1, 1]} : vector<8x8x32xf32> to vector<1x8x32xf32>
    %129 = vector.shape_cast %128 : vector<1x8x32xf32> to vector<8x32xf32>
    %130 = tpu.concatenate %123, %125, %127, %129 in 1 : vector<8x32xf32>, vector<8x32xf32>, vector<8x32xf32>, vector<8x32xf32> -> vector<8x128xf32>
    %131 = vector.extract_strided_slice %121 {offsets = [4, 0, 0], sizes = [1, 8, 32], strides = [1, 1, 1]} : vector<8x8x32xf32> to vector<1x8x32xf32>
    %132 = vector.shape_cast %131 : vector<1x8x32xf32> to vector<8x32xf32>
    %133 = vector.extract_strided_slice %121 {offsets = [5, 0, 0], sizes = [1, 8, 32], strides = [1, 1, 1]} : vector<8x8x32xf32> to vector<1x8x32xf32>
    %134 = vector.shape_cast %133 : vector<1x8x32xf32> to vector<8x32xf32>
    %135 = vector.extract_strided_slice %121 {offsets = [6, 0, 0], sizes = [1, 8, 32], strides = [1, 1, 1]} : vector<8x8x32xf32> to vector<1x8x32xf32>
    %136 = vector.shape_cast %135 : vector<1x8x32xf32> to vector<8x32xf32>
    %137 = vector.extract_strided_slice %121 {offsets = [7, 0, 0], sizes = [1, 8, 32], strides = [1, 1, 1]} : vector<8x8x32xf32> to vector<1x8x32xf32>
    %138 = vector.shape_cast %137 : vector<1x8x32xf32> to vector<8x32xf32>
    %139 = tpu.concatenate %132, %134, %136, %138 in 1 : vector<8x32xf32>, vector<8x32xf32>, vector<8x32xf32>, vector<8x32xf32> -> vector<8x128xf32>
    %140 = tpu.concatenate %130, %139 in 0 : vector<8x128xf32>, vector<8x128xf32> -> vector<16x128xf32>
    %141 = arith.truncf %140 : vector<16x128xf32> to vector<16x128xbf16>
    %c0_30 = arith.constant 0 : index
    %c0_31 = arith.constant 0 : index
    %c384 = arith.constant 384 : index
    %142 = vector.load %arg5[%c0_30, %c0_31, %c384] : memref<2x128x1536xbf16, #tpu.memory_space<vmem>>, vector<1x128x128xbf16>
    %143 = vector.shape_cast %142 : vector<1x128x128xbf16> to vector<128x128xbf16>
    %cst_32 = arith.constant dense<0.000000e+00> : vector<16x128xf32>
    %144 = tpu.matmul %141, %143, %cst_32 {dimension_numbers = #tpu.dot_dimension_numbers<[1], [0], [0], [1], [0, 0, 1, 1], [], []>} : vector<16x128xbf16>, vector<128x128xbf16>, vector<16x128xf32> -> vector<16x128xf32>
    %c0_33 = arith.constant 0 : index
    %c0_34 = arith.constant 0 : index
    %c640 = arith.constant 640 : index
    %145 = vector.load %arg7[%c0_33, %c0_34, %c640] : memref<2x1x2432xf32, #tpu.memory_space<vmem>>, vector<1x1x128xf32>
    %146 = vector.shape_cast %145 : vector<1x1x128xf32> to vector<1x128xf32>
    %147 = vector.broadcast %146 : vector<1x128xf32> to vector<16x128xf32>
    %148 = arith.addf %144, %147 : vector<16x128xf32>
    %149 = arith.addf %148, %13 : vector<16x128xf32>
    %c0_35 = arith.constant 0 : index
    %c0_36 = arith.constant 0 : index
    %c768 = arith.constant 768 : index
    %150 = vector.load %arg7[%c0_35, %c0_36, %c768] : memref<2x1x2432xf32, #tpu.memory_space<vmem>>, vector<1x1x128xf32>
    %151 = vector.shape_cast %150 : vector<1x1x128xf32> to vector<1x128xf32>
    %c0_37 = arith.constant 0 : index
    %c0_38 = arith.constant 0 : index
    %c896 = arith.constant 896 : index
    %152 = vector.load %arg7[%c0_37, %c0_38, %c896] : memref<2x1x2432xf32, #tpu.memory_space<vmem>>, vector<1x1x128xf32>
    %153 = vector.shape_cast %152 : vector<1x1x128xf32> to vector<1x128xf32>
    %cst_39 = arith.constant dense<0.000000e+00> : vector<16xf32>
    %154 = vector.multi_reduction <add>, %149, %cst_39 [1] : vector<16x128xf32> to vector<16xf32>
    %155 = vector.shape_cast %154 : vector<16xf32> to vector<16x1xf32>
    %cst_40 = arith.constant 1.280000e+02 : f32
    %156 = vector.broadcast %cst_40 : f32 to vector<16x1xf32>
    %157 = arith.divf %155, %156 : vector<16x1xf32>
    %158 = vector.broadcast %157 : vector<16x1xf32> to vector<16x128xf32>
    %159 = arith.subf %149, %158 : vector<16x128xf32>
    %160 = arith.mulf %159, %159 : vector<16x128xf32>
    %cst_41 = arith.constant dense<0.000000e+00> : vector<16xf32>
    %161 = vector.multi_reduction <add>, %160, %cst_41 [1] : vector<16x128xf32> to vector<16xf32>
    %162 = vector.shape_cast %161 : vector<16xf32> to vector<16x1xf32>
    %cst_42 = arith.constant 1.280000e+02 : f32
    %163 = vector.broadcast %cst_42 : f32 to vector<16x1xf32>
    %164 = arith.divf %162, %163 : vector<16x1xf32>
    %165 = vector.broadcast %157 : vector<16x1xf32> to vector<16x128xf32>
    %166 = arith.subf %149, %165 : vector<16x128xf32>
    %cst_43 = arith.constant 9.99999974E-6 : f32
    %167 = vector.broadcast %cst_43 : f32 to vector<16x1xf32>
    %168 = arith.addf %164, %167 : vector<16x1xf32>
    %169 = math.rsqrt %168 : vector<16x1xf32>
    %170 = vector.broadcast %169 : vector<16x1xf32> to vector<16x128xf32>
    %171 = arith.mulf %166, %170 : vector<16x128xf32>
    %172 = vector.broadcast %151 : vector<1x128xf32> to vector<16x128xf32>
    %173 = arith.mulf %171, %172 : vector<16x128xf32>
    %174 = vector.broadcast %153 : vector<1x128xf32> to vector<16x128xf32>
    %175 = arith.addf %173, %174 : vector<16x128xf32>
    %176 = arith.truncf %175 : vector<16x128xf32> to vector<16x128xbf16>
    %c0_44 = arith.constant 0 : index
    %c0_45 = arith.constant 0 : index
    %c512 = arith.constant 512 : index
    %177 = vector.load %arg5[%c0_44, %c0_45, %c512] : memref<2x128x1536xbf16, #tpu.memory_space<vmem>>, vector<1x128x128xbf16>
    %178 = vector.shape_cast %177 : vector<1x128x128xbf16> to vector<128x128xbf16>
    %cst_46 = arith.constant dense<0.000000e+00> : vector<16x128xf32>
    %179 = tpu.matmul %176, %178, %cst_46 {dimension_numbers = #tpu.dot_dimension_numbers<[1], [0], [0], [1], [0, 0, 1, 1], [], []>} : vector<16x128xbf16>, vector<128x128xbf16>, vector<16x128xf32> -> vector<16x128xf32>
    %c0_47 = arith.constant 0 : index
    %c0_48 = arith.constant 0 : index
    %c1024 = arith.constant 1024 : index
    %180 = vector.load %arg7[%c0_47, %c0_48, %c1024] : memref<2x1x2432xf32, #tpu.memory_space<vmem>>, vector<1x1x128xf32>
    %181 = vector.shape_cast %180 : vector<1x1x128xf32> to vector<1x128xf32>
    %182 = vector.broadcast %181 : vector<1x128xf32> to vector<16x128xf32>
    %183 = arith.addf %179, %182 : vector<16x128xf32>
    %c0_49 = arith.constant 0 : index
    %c0_50 = arith.constant 0 : index
    %c640_51 = arith.constant 640 : index
    %184 = vector.load %arg5[%c0_49, %c0_50, %c640_51] : memref<2x128x1536xbf16, #tpu.memory_space<vmem>>, vector<1x128x256xbf16>
    %185 = vector.shape_cast %184 : vector<1x128x256xbf16> to vector<128x256xbf16>
    %cst_52 = arith.constant dense<0.000000e+00> : vector<32x256xf32>
    %186 = tpu.matmul %6, %185, %cst_52 {dimension_numbers = #tpu.dot_dimension_numbers<[1], [0], [0], [1], [0, 0, 1, 1], [], []>} : vector<32x128xbf16>, vector<128x256xbf16>, vector<32x256xf32> -> vector<32x256xf32>
    %c0_53 = arith.constant 0 : index
    %c0_54 = arith.constant 0 : index
    %c1152 = arith.constant 1152 : index
    %187 = vector.load %arg7[%c0_53, %c0_54, %c1152] : memref<2x1x2432xf32, #tpu.memory_space<vmem>>, vector<1x1x256xf32>
    %188 = vector.shape_cast %187 : vector<1x1x256xf32> to vector<1x256xf32>
    %189 = vector.broadcast %188 : vector<1x256xf32> to vector<32x256xf32>
    %190 = arith.addf %186, %189 : vector<32x256xf32>
    %191 = vector.extract_strided_slice %183 {offsets = [0, 0], sizes = [8, 32], strides = [1, 1]} : vector<16x128xf32> to vector<8x32xf32>
    %192 = vector.extract_strided_slice %183 {offsets = [0, 32], sizes = [8, 32], strides = [1, 1]} : vector<16x128xf32> to vector<8x32xf32>
    %193 = vector.extract_strided_slice %183 {offsets = [0, 64], sizes = [8, 32], strides = [1, 1]} : vector<16x128xf32> to vector<8x32xf32>
    %194 = vector.extract_strided_slice %183 {offsets = [0, 96], sizes = [8, 32], strides = [1, 1]} : vector<16x128xf32> to vector<8x32xf32>
    %195 = vector.extract_strided_slice %183 {offsets = [8, 0], sizes = [8, 32], strides = [1, 1]} : vector<16x128xf32> to vector<8x32xf32>
    %196 = vector.extract_strided_slice %183 {offsets = [8, 32], sizes = [8, 32], strides = [1, 1]} : vector<16x128xf32> to vector<8x32xf32>
    %197 = vector.extract_strided_slice %183 {offsets = [8, 64], sizes = [8, 32], strides = [1, 1]} : vector<16x128xf32> to vector<8x32xf32>
    %198 = vector.extract_strided_slice %183 {offsets = [8, 96], sizes = [8, 32], strides = [1, 1]} : vector<16x128xf32> to vector<8x32xf32>
    %199 = vector.shape_cast %191 : vector<8x32xf32> to vector<1x8x32xf32>
    %200 = vector.shape_cast %192 : vector<8x32xf32> to vector<1x8x32xf32>
    %201 = vector.shape_cast %193 : vector<8x32xf32> to vector<1x8x32xf32>
    %202 = vector.shape_cast %194 : vector<8x32xf32> to vector<1x8x32xf32>
    %203 = vector.shape_cast %195 : vector<8x32xf32> to vector<1x8x32xf32>
    %204 = vector.shape_cast %196 : vector<8x32xf32> to vector<1x8x32xf32>
    %205 = vector.shape_cast %197 : vector<8x32xf32> to vector<1x8x32xf32>
    %206 = vector.shape_cast %198 : vector<8x32xf32> to vector<1x8x32xf32>
    %207 = tpu.concatenate %199, %200, %201, %202, %203, %204, %205, %206 in 0 : vector<1x8x32xf32>, vector<1x8x32xf32>, vector<1x8x32xf32>, vector<1x8x32xf32>, vector<1x8x32xf32>, vector<1x8x32xf32>, vector<1x8x32xf32>, vector<1x8x32xf32> -> vector<8x8x32xf32>
    %208 = vector.extract_strided_slice %190 {offsets = [0, 0], sizes = [32, 128], strides = [1, 1]} : vector<32x256xf32> to vector<32x128xf32>
    %209 = vector.extract_strided_slice %208 {offsets = [0, 0], sizes = [16, 32], strides = [1, 1]} : vector<32x128xf32> to vector<16x32xf32>
    %210 = vector.extract_strided_slice %208 {offsets = [0, 32], sizes = [16, 32], strides = [1, 1]} : vector<32x128xf32> to vector<16x32xf32>
    %211 = vector.extract_strided_slice %208 {offsets = [0, 64], sizes = [16, 32], strides = [1, 1]} : vector<32x128xf32> to vector<16x32xf32>
    %212 = vector.extract_strided_slice %208 {offsets = [0, 96], sizes = [16, 32], strides = [1, 1]} : vector<32x128xf32> to vector<16x32xf32>
    %213 = vector.extract_strided_slice %208 {offsets = [16, 0], sizes = [16, 32], strides = [1, 1]} : vector<32x128xf32> to vector<16x32xf32>
    %214 = vector.extract_strided_slice %208 {offsets = [16, 32], sizes = [16, 32], strides = [1, 1]} : vector<32x128xf32> to vector<16x32xf32>
    %215 = vector.extract_strided_slice %208 {offsets = [16, 64], sizes = [16, 32], strides = [1, 1]} : vector<32x128xf32> to vector<16x32xf32>
    %216 = vector.extract_strided_slice %208 {offsets = [16, 96], sizes = [16, 32], strides = [1, 1]} : vector<32x128xf32> to vector<16x32xf32>
    %217 = vector.shape_cast %209 : vector<16x32xf32> to vector<1x16x32xf32>
    %218 = vector.shape_cast %210 : vector<16x32xf32> to vector<1x16x32xf32>
    %219 = vector.shape_cast %211 : vector<16x32xf32> to vector<1x16x32xf32>
    %220 = vector.shape_cast %212 : vector<16x32xf32> to vector<1x16x32xf32>
    %221 = vector.shape_cast %213 : vector<16x32xf32> to vector<1x16x32xf32>
    %222 = vector.shape_cast %214 : vector<16x32xf32> to vector<1x16x32xf32>
    %223 = vector.shape_cast %215 : vector<16x32xf32> to vector<1x16x32xf32>
    %224 = vector.shape_cast %216 : vector<16x32xf32> to vector<1x16x32xf32>
    %225 = tpu.concatenate %217, %218, %219, %220, %221, %222, %223, %224 in 0 : vector<1x16x32xf32>, vector<1x16x32xf32>, vector<1x16x32xf32>, vector<1x16x32xf32>, vector<1x16x32xf32>, vector<1x16x32xf32>, vector<1x16x32xf32>, vector<1x16x32xf32> -> vector<8x16x32xf32>
    %226 = vector.extract_strided_slice %190 {offsets = [0, 128], sizes = [32, 128], strides = [1, 1]} : vector<32x256xf32> to vector<32x128xf32>
    %227 = vector.extract_strided_slice %226 {offsets = [0, 0], sizes = [16, 32], strides = [1, 1]} : vector<32x128xf32> to vector<16x32xf32>
    %228 = vector.extract_strided_slice %226 {offsets = [0, 32], sizes = [16, 32], strides = [1, 1]} : vector<32x128xf32> to vector<16x32xf32>
    %229 = vector.extract_strided_slice %226 {offsets = [0, 64], sizes = [16, 32], strides = [1, 1]} : vector<32x128xf32> to vector<16x32xf32>
    %230 = vector.extract_strided_slice %226 {offsets = [0, 96], sizes = [16, 32], strides = [1, 1]} : vector<32x128xf32> to vector<16x32xf32>
    %231 = vector.extract_strided_slice %226 {offsets = [16, 0], sizes = [16, 32], strides = [1, 1]} : vector<32x128xf32> to vector<16x32xf32>
    %232 = vector.extract_strided_slice %226 {offsets = [16, 32], sizes = [16, 32], strides = [1, 1]} : vector<32x128xf32> to vector<16x32xf32>
    %233 = vector.extract_strided_slice %226 {offsets = [16, 64], sizes = [16, 32], strides = [1, 1]} : vector<32x128xf32> to vector<16x32xf32>
    %234 = vector.extract_strided_slice %226 {offsets = [16, 96], sizes = [16, 32], strides = [1, 1]} : vector<32x128xf32> to vector<16x32xf32>
    %235 = vector.shape_cast %227 : vector<16x32xf32> to vector<1x16x32xf32>
    %236 = vector.shape_cast %228 : vector<16x32xf32> to vector<1x16x32xf32>
    %237 = vector.shape_cast %229 : vector<16x32xf32> to vector<1x16x32xf32>
    %238 = vector.shape_cast %230 : vector<16x32xf32> to vector<1x16x32xf32>
    %239 = vector.shape_cast %231 : vector<16x32xf32> to vector<1x16x32xf32>
    %240 = vector.shape_cast %232 : vector<16x32xf32> to vector<1x16x32xf32>
    %241 = vector.shape_cast %233 : vector<16x32xf32> to vector<1x16x32xf32>
    %242 = vector.shape_cast %234 : vector<16x32xf32> to vector<1x16x32xf32>
    %243 = tpu.concatenate %235, %236, %237, %238, %239, %240, %241, %242 in 0 : vector<1x16x32xf32>, vector<1x16x32xf32>, vector<1x16x32xf32>, vector<1x16x32xf32>, vector<1x16x32xf32>, vector<1x16x32xf32>, vector<1x16x32xf32>, vector<1x16x32xf32> -> vector<8x16x32xf32>
    %244 = arith.truncf %207 : vector<8x8x32xf32> to vector<8x8x32xbf16>
    %245 = arith.truncf %225 : vector<8x16x32xf32> to vector<8x16x32xbf16>
    "tpu.trace_start"() <{level = 10 : i32, message = "bqf,bkf->bqk"}> : () -> ()
    %cst_55 = arith.constant dense<0.000000e+00> : vector<8x8x16xf32>
    %246 = tpu.matmul %244, %245, %cst_55 {dimension_numbers = #tpu.dot_dimension_numbers<[2], [2], [1], [1], [0, 0, 0, 1, 1, 1], [0], [0]>} : vector<8x8x32xbf16>, vector<8x16x32xbf16>, vector<8x8x16xf32> -> vector<8x8x16xf32>
    "tpu.trace_stop"() : () -> ()
    %cst_56 = arith.constant 0.176776692 : f32
    %247 = vector.broadcast %cst_56 : f32 to vector<8x8x16xf32>
    %248 = arith.mulf %246, %247 : vector<8x8x16xf32>
    %cst_57 = arith.constant dense<0xFF800000> : vector<8x8xf32>
    %249 = vector.multi_reduction <maximumf>, %248, %cst_57 [2] : vector<8x8x16xf32> to vector<8x8xf32>
    %250 = vector.shape_cast %249 : vector<8x8xf32> to vector<8x8x1xf32>
    %251 = vector.broadcast %250 : vector<8x8x1xf32> to vector<8x8x16xf32>
    %252 = arith.subf %248, %251 : vector<8x8x16xf32>
    %253 = math.exp %252 : vector<8x8x16xf32>
    %cst_58 = arith.constant dense<0.000000e+00> : vector<8x8xf32>
    %254 = vector.multi_reduction <add>, %253, %cst_58 [2] : vector<8x8x16xf32> to vector<8x8xf32>
    %255 = vector.shape_cast %254 : vector<8x8xf32> to vector<8x8x1xf32>
    %256 = tpu.reciprocal %255 {approx = true} : vector<8x8x1xf32> -> vector<8x8x1xf32>
    %257 = vector.broadcast %256 : vector<8x8x1xf32> to vector<8x8x16xf32>
    %258 = arith.mulf %253, %257 : vector<8x8x16xf32>
    %259 = arith.truncf %258 : vector<8x8x16xf32> to vector<8x8x16xbf16>
    %260 = arith.truncf %243 : vector<8x16x32xf32> to vector<8x16x32xbf16>
    "tpu.trace_start"() <{level = 10 : i32, message = "bqk,bkf->bqf"}> : () -> ()
    %cst_59 = arith.constant dense<0.000000e+00> : vector<8x8x32xf32>
    %261 = tpu.matmul %259, %260, %cst_59 {dimension_numbers = #tpu.dot_dimension_numbers<[2], [1], [1], [2], [0, 0, 0, 1, 1, 2], [0], [0]>} : vector<8x8x16xbf16>, vector<8x16x32xbf16>, vector<8x8x32xf32> -> vector<8x8x32xf32>
    "tpu.trace_stop"() : () -> ()
    %262 = vector.extract_strided_slice %261 {offsets = [0, 0, 0], sizes = [1, 8, 32], strides = [1, 1, 1]} : vector<8x8x32xf32> to vector<1x8x32xf32>
    %263 = vector.shape_cast %262 : vector<1x8x32xf32> to vector<8x32xf32>
    %264 = vector.extract_strided_slice %261 {offsets = [1, 0, 0], sizes = [1, 8, 32], strides = [1, 1, 1]} : vector<8x8x32xf32> to vector<1x8x32xf32>
    %265 = vector.shape_cast %264 : vector<1x8x32xf32> to vector<8x32xf32>
    %266 = vector.extract_strided_slice %261 {offsets = [2, 0, 0], sizes = [1, 8, 32], strides = [1, 1, 1]} : vector<8x8x32xf32> to vector<1x8x32xf32>
    %267 = vector.shape_cast %266 : vector<1x8x32xf32> to vector<8x32xf32>
    %268 = vector.extract_strided_slice %261 {offsets = [3, 0, 0], sizes = [1, 8, 32], strides = [1, 1, 1]} : vector<8x8x32xf32> to vector<1x8x32xf32>
    %269 = vector.shape_cast %268 : vector<1x8x32xf32> to vector<8x32xf32>
    %270 = tpu.concatenate %263, %265, %267, %269 in 1 : vector<8x32xf32>, vector<8x32xf32>, vector<8x32xf32>, vector<8x32xf32> -> vector<8x128xf32>
    %271 = vector.extract_strided_slice %261 {offsets = [4, 0, 0], sizes = [1, 8, 32], strides = [1, 1, 1]} : vector<8x8x32xf32> to vector<1x8x32xf32>
    %272 = vector.shape_cast %271 : vector<1x8x32xf32> to vector<8x32xf32>
    %273 = vector.extract_strided_slice %261 {offsets = [5, 0, 0], sizes = [1, 8, 32], strides = [1, 1, 1]} : vector<8x8x32xf32> to vector<1x8x32xf32>
    %274 = vector.shape_cast %273 : vector<1x8x32xf32> to vector<8x32xf32>
    %275 = vector.extract_strided_slice %261 {offsets = [6, 0, 0], sizes = [1, 8, 32], strides = [1, 1, 1]} : vector<8x8x32xf32> to vector<1x8x32xf32>
    %276 = vector.shape_cast %275 : vector<1x8x32xf32> to vector<8x32xf32>
    %277 = vector.extract_strided_slice %261 {offsets = [7, 0, 0], sizes = [1, 8, 32], strides = [1, 1, 1]} : vector<8x8x32xf32> to vector<1x8x32xf32>
    %278 = vector.shape_cast %277 : vector<1x8x32xf32> to vector<8x32xf32>
    %279 = tpu.concatenate %272, %274, %276, %278 in 1 : vector<8x32xf32>, vector<8x32xf32>, vector<8x32xf32>, vector<8x32xf32> -> vector<8x128xf32>
    %280 = tpu.concatenate %270, %279 in 0 : vector<8x128xf32>, vector<8x128xf32> -> vector<16x128xf32>
    %281 = arith.truncf %280 : vector<16x128xf32> to vector<16x128xbf16>
    %c0_60 = arith.constant 0 : index
    %c0_61 = arith.constant 0 : index
    %c896_62 = arith.constant 896 : index
    %282 = vector.load %arg5[%c0_60, %c0_61, %c896_62] : memref<2x128x1536xbf16, #tpu.memory_space<vmem>>, vector<1x128x128xbf16>
    %283 = vector.shape_cast %282 : vector<1x128x128xbf16> to vector<128x128xbf16>
    %cst_63 = arith.constant dense<0.000000e+00> : vector<16x128xf32>
    %284 = tpu.matmul %281, %283, %cst_63 {dimension_numbers = #tpu.dot_dimension_numbers<[1], [0], [0], [1], [0, 0, 1, 1], [], []>} : vector<16x128xbf16>, vector<128x128xbf16>, vector<16x128xf32> -> vector<16x128xf32>
    %c0_64 = arith.constant 0 : index
    %c0_65 = arith.constant 0 : index
    %c1408 = arith.constant 1408 : index
    %285 = vector.load %arg7[%c0_64, %c0_65, %c1408] : memref<2x1x2432xf32, #tpu.memory_space<vmem>>, vector<1x1x128xf32>
    %286 = vector.shape_cast %285 : vector<1x1x128xf32> to vector<1x128xf32>
    %287 = vector.broadcast %286 : vector<1x128xf32> to vector<16x128xf32>
    %288 = arith.addf %284, %287 : vector<16x128xf32>
    %289 = arith.addf %149, %288 : vector<16x128xf32>
    %c0_66 = arith.constant 0 : index
    %c0_67 = arith.constant 0 : index
    %c1536 = arith.constant 1536 : index
    %290 = vector.load %arg7[%c0_66, %c0_67, %c1536] : memref<2x1x2432xf32, #tpu.memory_space<vmem>>, vector<1x1x128xf32>
    %291 = vector.shape_cast %290 : vector<1x1x128xf32> to vector<1x128xf32>
    %c0_68 = arith.constant 0 : index
    %c0_69 = arith.constant 0 : index
    %c1664 = arith.constant 1664 : index
    %292 = vector.load %arg7[%c0_68, %c0_69, %c1664] : memref<2x1x2432xf32, #tpu.memory_space<vmem>>, vector<1x1x128xf32>
    %293 = vector.shape_cast %292 : vector<1x1x128xf32> to vector<1x128xf32>
    %cst_70 = arith.constant dense<0.000000e+00> : vector<16xf32>
    %294 = vector.multi_reduction <add>, %289, %cst_70 [1] : vector<16x128xf32> to vector<16xf32>
    %295 = vector.shape_cast %294 : vector<16xf32> to vector<16x1xf32>
    %cst_71 = arith.constant 1.280000e+02 : f32
    %296 = vector.broadcast %cst_71 : f32 to vector<16x1xf32>
    %297 = arith.divf %295, %296 : vector<16x1xf32>
    %298 = vector.broadcast %297 : vector<16x1xf32> to vector<16x128xf32>
    %299 = arith.subf %289, %298 : vector<16x128xf32>
    %300 = arith.mulf %299, %299 : vector<16x128xf32>
    %cst_72 = arith.constant dense<0.000000e+00> : vector<16xf32>
    %301 = vector.multi_reduction <add>, %300, %cst_72 [1] : vector<16x128xf32> to vector<16xf32>
    %302 = vector.shape_cast %301 : vector<16xf32> to vector<16x1xf32>
    %cst_73 = arith.constant 1.280000e+02 : f32
    %303 = vector.broadcast %cst_73 : f32 to vector<16x1xf32>
    %304 = arith.divf %302, %303 : vector<16x1xf32>
    %305 = vector.broadcast %297 : vector<16x1xf32> to vector<16x128xf32>
    %306 = arith.subf %289, %305 : vector<16x128xf32>
    %cst_74 = arith.constant 9.99999974E-6 : f32
    %307 = vector.broadcast %cst_74 : f32 to vector<16x1xf32>
    %308 = arith.addf %304, %307 : vector<16x1xf32>
    %309 = math.rsqrt %308 : vector<16x1xf32>
    %310 = vector.broadcast %309 : vector<16x1xf32> to vector<16x128xf32>
    %311 = arith.mulf %306, %310 : vector<16x128xf32>
    %312 = vector.broadcast %291 : vector<1x128xf32> to vector<16x128xf32>
    %313 = arith.mulf %311, %312 : vector<16x128xf32>
    %314 = vector.broadcast %293 : vector<1x128xf32> to vector<16x128xf32>
    %315 = arith.addf %313, %314 : vector<16x128xf32>
    %316 = arith.truncf %315 : vector<16x128xf32> to vector<16x128xbf16>
    %c0_75 = arith.constant 0 : index
    %c0_76 = arith.constant 0 : index
    %c1024_77 = arith.constant 1024 : index
    %317 = vector.load %arg5[%c0_75, %c0_76, %c1024_77] : memref<2x128x1536xbf16, #tpu.memory_space<vmem>>, vector<1x128x512xbf16>
    %318 = vector.shape_cast %317 : vector<1x128x512xbf16> to vector<128x512xbf16>
    %cst_78 = arith.constant dense<0.000000e+00> : vector<16x512xf32>
    %319 = tpu.matmul %316, %318, %cst_78 {dimension_numbers = #tpu.dot_dimension_numbers<[1], [0], [0], [1], [0, 0, 1, 1], [], []>} : vector<16x128xbf16>, vector<128x512xbf16>, vector<16x512xf32> -> vector<16x512xf32>
    %c0_79 = arith.constant 0 : index
    %c0_80 = arith.constant 0 : index
    %c1792 = arith.constant 1792 : index
    %320 = vector.load %arg7[%c0_79, %c0_80, %c1792] : memref<2x1x2432xf32, #tpu.memory_space<vmem>>, vector<1x1x512xf32>
    %321 = vector.shape_cast %320 : vector<1x1x512xf32> to vector<1x512xf32>
    %322 = vector.broadcast %321 : vector<1x512xf32> to vector<16x512xf32>
    %323 = arith.addf %319, %322 : vector<16x512xf32>
    %cst_81 = arith.constant 5.000000e-01 : f32
    %324 = vector.broadcast %cst_81 : f32 to vector<16x512xf32>
    %325 = arith.mulf %324, %323 : vector<16x512xf32>
    %cst_82 = arith.constant 4.471500e-02 : f32
    %326 = vector.broadcast %cst_82 : f32 to vector<16x512xf32>
    %327 = arith.mulf %326, %323 : vector<16x512xf32>
    %328 = arith.mulf %327, %323 : vector<16x512xf32>
    %329 = arith.mulf %328, %323 : vector<16x512xf32>
    %330 = arith.addf %323, %329 : vector<16x512xf32>
    %cst_83 = arith.constant 0.797884583 : f32
    %331 = vector.broadcast %cst_83 : f32 to vector<16x512xf32>
    %332 = arith.mulf %331, %330 : vector<16x512xf32>
    %333 = math.tanh %332 : vector<16x512xf32>
    %cst_84 = arith.constant 1.000000e+00 : f32
    %334 = vector.broadcast %cst_84 : f32 to vector<16x512xf32>
    %335 = arith.addf %334, %333 : vector<16x512xf32>
    %336 = arith.mulf %325, %335 : vector<16x512xf32>
    %337 = arith.truncf %336 : vector<16x512xf32> to vector<16x512xbf16>
    %c0_85 = arith.constant 0 : index
    %c0_86 = arith.constant 0 : index
    %c0_87 = arith.constant 0 : index
    %338 = vector.load %arg6[%c0_85, %c0_86, %c0_87] : memref<2x512x128xbf16, #tpu.memory_space<vmem>>, vector<1x512x128xbf16>
    %339 = vector.shape_cast %338 : vector<1x512x128xbf16> to vector<512x128xbf16>
    %cst_88 = arith.constant dense<0.000000e+00> : vector<16x128xf32>
    %340 = tpu.matmul %337, %339, %cst_88 {dimension_numbers = #tpu.dot_dimension_numbers<[1], [0], [0], [1], [0, 0, 1, 1], [], []>} : vector<16x512xbf16>, vector<512x128xbf16>, vector<16x128xf32> -> vector<16x128xf32>
    %c0_89 = arith.constant 0 : index
    %c0_90 = arith.constant 0 : index
    %c2304 = arith.constant 2304 : index
    %341 = vector.load %arg7[%c0_89, %c0_90, %c2304] : memref<2x1x2432xf32, #tpu.memory_space<vmem>>, vector<1x1x128xf32>
    %342 = vector.shape_cast %341 : vector<1x1x128xf32> to vector<1x128xf32>
    %343 = vector.broadcast %342 : vector<1x128xf32> to vector<16x128xf32>
    %344 = arith.addf %340, %343 : vector<16x128xf32>
    %345 = arith.addf %344, %289 : vector<16x128xf32>
    %c1 = arith.constant 1 : index
    %c0_91 = arith.constant 0 : index
    %c0_92 = arith.constant 0 : index
    %346 = vector.load %arg7[%c1, %c0_91, %c0_92] : memref<2x1x2432xf32, #tpu.memory_space<vmem>>, vector<1x1x128xf32>
    %347 = vector.shape_cast %346 : vector<1x1x128xf32> to vector<1x128xf32>
    %c1_93 = arith.constant 1 : index
    %c0_94 = arith.constant 0 : index
    %c128_95 = arith.constant 128 : index
    %348 = vector.load %arg7[%c1_93, %c0_94, %c128_95] : memref<2x1x2432xf32, #tpu.memory_space<vmem>>, vector<1x1x128xf32>
    %349 = vector.shape_cast %348 : vector<1x1x128xf32> to vector<1x128xf32>
    %cst_96 = arith.constant dense<0.000000e+00> : vector<16xf32>
    %350 = vector.multi_reduction <add>, %345, %cst_96 [1] : vector<16x128xf32> to vector<16xf32>
    %351 = vector.shape_cast %350 : vector<16xf32> to vector<16x1xf32>
    %cst_97 = arith.constant 1.280000e+02 : f32
    %352 = vector.broadcast %cst_97 : f32 to vector<16x1xf32>
    %353 = arith.divf %351, %352 : vector<16x1xf32>
    %354 = vector.broadcast %353 : vector<16x1xf32> to vector<16x128xf32>
    %355 = arith.subf %345, %354 : vector<16x128xf32>
    %356 = arith.mulf %355, %355 : vector<16x128xf32>
    %cst_98 = arith.constant dense<0.000000e+00> : vector<16xf32>
    %357 = vector.multi_reduction <add>, %356, %cst_98 [1] : vector<16x128xf32> to vector<16xf32>
    %358 = vector.shape_cast %357 : vector<16xf32> to vector<16x1xf32>
    %cst_99 = arith.constant 1.280000e+02 : f32
    %359 = vector.broadcast %cst_99 : f32 to vector<16x1xf32>
    %360 = arith.divf %358, %359 : vector<16x1xf32>
    %361 = vector.broadcast %353 : vector<16x1xf32> to vector<16x128xf32>
    %362 = arith.subf %345, %361 : vector<16x128xf32>
    %cst_100 = arith.constant 9.99999974E-6 : f32
    %363 = vector.broadcast %cst_100 : f32 to vector<16x1xf32>
    %364 = arith.addf %360, %363 : vector<16x1xf32>
    %365 = math.rsqrt %364 : vector<16x1xf32>
    %366 = vector.broadcast %365 : vector<16x1xf32> to vector<16x128xf32>
    %367 = arith.mulf %362, %366 : vector<16x128xf32>
    %368 = vector.broadcast %347 : vector<1x128xf32> to vector<16x128xf32>
    %369 = arith.mulf %367, %368 : vector<16x128xf32>
    %370 = vector.broadcast %349 : vector<1x128xf32> to vector<16x128xf32>
    %371 = arith.addf %369, %370 : vector<16x128xf32>
    %372 = arith.truncf %371 : vector<16x128xf32> to vector<16x128xbf16>
    %c1_101 = arith.constant 1 : index
    %c0_102 = arith.constant 0 : index
    %c0_103 = arith.constant 0 : index
    %373 = vector.load %arg5[%c1_101, %c0_102, %c0_103] : memref<2x128x1536xbf16, #tpu.memory_space<vmem>>, vector<1x128x384xbf16>
    %374 = vector.shape_cast %373 : vector<1x128x384xbf16> to vector<128x384xbf16>
    %cst_104 = arith.constant dense<0.000000e+00> : vector<16x384xf32>
    %375 = tpu.matmul %372, %374, %cst_104 {dimension_numbers = #tpu.dot_dimension_numbers<[1], [0], [0], [1], [0, 0, 1, 1], [], []>} : vector<16x128xbf16>, vector<128x384xbf16>, vector<16x384xf32> -> vector<16x384xf32>
    %c1_105 = arith.constant 1 : index
    %c0_106 = arith.constant 0 : index
    %c256_107 = arith.constant 256 : index
    %376 = vector.load %arg7[%c1_105, %c0_106, %c256_107] : memref<2x1x2432xf32, #tpu.memory_space<vmem>>, vector<1x1x384xf32>
    %377 = vector.shape_cast %376 : vector<1x1x384xf32> to vector<1x384xf32>
    %378 = vector.broadcast %377 : vector<1x384xf32> to vector<16x384xf32>
    %379 = arith.addf %375, %378 : vector<16x384xf32>
    %380 = vector.extract_strided_slice %379 {offsets = [0, 0], sizes = [16, 128], strides = [1, 1]} : vector<16x384xf32> to vector<16x128xf32>
    %381 = vector.extract_strided_slice %380 {offsets = [0, 0], sizes = [8, 32], strides = [1, 1]} : vector<16x128xf32> to vector<8x32xf32>
    %382 = vector.extract_strided_slice %380 {offsets = [0, 32], sizes = [8, 32], strides = [1, 1]} : vector<16x128xf32> to vector<8x32xf32>
    %383 = vector.extract_strided_slice %380 {offsets = [0, 64], sizes = [8, 32], strides = [1, 1]} : vector<16x128xf32> to vector<8x32xf32>
    %384 = vector.extract_strided_slice %380 {offsets = [0, 96], sizes = [8, 32], strides = [1, 1]} : vector<16x128xf32> to vector<8x32xf32>
    %385 = vector.extract_strided_slice %380 {offsets = [8, 0], sizes = [8, 32], strides = [1, 1]} : vector<16x128xf32> to vector<8x32xf32>
    %386 = vector.extract_strided_slice %380 {offsets = [8, 32], sizes = [8, 32], strides = [1, 1]} : vector<16x128xf32> to vector<8x32xf32>
    %387 = vector.extract_strided_slice %380 {offsets = [8, 64], sizes = [8, 32], strides = [1, 1]} : vector<16x128xf32> to vector<8x32xf32>
    %388 = vector.extract_strided_slice %380 {offsets = [8, 96], sizes = [8, 32], strides = [1, 1]} : vector<16x128xf32> to vector<8x32xf32>
    %389 = vector.shape_cast %381 : vector<8x32xf32> to vector<1x8x32xf32>
    %390 = vector.shape_cast %382 : vector<8x32xf32> to vector<1x8x32xf32>
    %391 = vector.shape_cast %383 : vector<8x32xf32> to vector<1x8x32xf32>
    %392 = vector.shape_cast %384 : vector<8x32xf32> to vector<1x8x32xf32>
    %393 = vector.shape_cast %385 : vector<8x32xf32> to vector<1x8x32xf32>
    %394 = vector.shape_cast %386 : vector<8x32xf32> to vector<1x8x32xf32>
    %395 = vector.shape_cast %387 : vector<8x32xf32> to vector<1x8x32xf32>
    %396 = vector.shape_cast %388 : vector<8x32xf32> to vector<1x8x32xf32>
    %397 = tpu.concatenate %389, %390, %391, %392, %393, %394, %395, %396 in 0 : vector<1x8x32xf32>, vector<1x8x32xf32>, vector<1x8x32xf32>, vector<1x8x32xf32>, vector<1x8x32xf32>, vector<1x8x32xf32>, vector<1x8x32xf32>, vector<1x8x32xf32> -> vector<8x8x32xf32>
    %398 = vector.extract_strided_slice %379 {offsets = [0, 128], sizes = [16, 128], strides = [1, 1]} : vector<16x384xf32> to vector<16x128xf32>
    %399 = vector.extract_strided_slice %398 {offsets = [0, 0], sizes = [8, 32], strides = [1, 1]} : vector<16x128xf32> to vector<8x32xf32>
    %400 = vector.extract_strided_slice %398 {offsets = [0, 32], sizes = [8, 32], strides = [1, 1]} : vector<16x128xf32> to vector<8x32xf32>
    %401 = vector.extract_strided_slice %398 {offsets = [0, 64], sizes = [8, 32], strides = [1, 1]} : vector<16x128xf32> to vector<8x32xf32>
    %402 = vector.extract_strided_slice %398 {offsets = [0, 96], sizes = [8, 32], strides = [1, 1]} : vector<16x128xf32> to vector<8x32xf32>
    %403 = vector.extract_strided_slice %398 {offsets = [8, 0], sizes = [8, 32], strides = [1, 1]} : vector<16x128xf32> to vector<8x32xf32>
    %404 = vector.extract_strided_slice %398 {offsets = [8, 32], sizes = [8, 32], strides = [1, 1]} : vector<16x128xf32> to vector<8x32xf32>
    %405 = vector.extract_strided_slice %398 {offsets = [8, 64], sizes = [8, 32], strides = [1, 1]} : vector<16x128xf32> to vector<8x32xf32>
    %406 = vector.extract_strided_slice %398 {offsets = [8, 96], sizes = [8, 32], strides = [1, 1]} : vector<16x128xf32> to vector<8x32xf32>
    %407 = vector.shape_cast %399 : vector<8x32xf32> to vector<1x8x32xf32>
    %408 = vector.shape_cast %400 : vector<8x32xf32> to vector<1x8x32xf32>
    %409 = vector.shape_cast %401 : vector<8x32xf32> to vector<1x8x32xf32>
    %410 = vector.shape_cast %402 : vector<8x32xf32> to vector<1x8x32xf32>
    %411 = vector.shape_cast %403 : vector<8x32xf32> to vector<1x8x32xf32>
    %412 = vector.shape_cast %404 : vector<8x32xf32> to vector<1x8x32xf32>
    %413 = vector.shape_cast %405 : vector<8x32xf32> to vector<1x8x32xf32>
    %414 = vector.shape_cast %406 : vector<8x32xf32> to vector<1x8x32xf32>
    %415 = tpu.concatenate %407, %408, %409, %410, %411, %412, %413, %414 in 0 : vector<1x8x32xf32>, vector<1x8x32xf32>, vector<1x8x32xf32>, vector<1x8x32xf32>, vector<1x8x32xf32>, vector<1x8x32xf32>, vector<1x8x32xf32>, vector<1x8x32xf32> -> vector<8x8x32xf32>
    %416 = vector.extract_strided_slice %379 {offsets = [0, 256], sizes = [16, 128], strides = [1, 1]} : vector<16x384xf32> to vector<16x128xf32>
    %417 = vector.extract_strided_slice %416 {offsets = [0, 0], sizes = [8, 32], strides = [1, 1]} : vector<16x128xf32> to vector<8x32xf32>
    %418 = vector.extract_strided_slice %416 {offsets = [0, 32], sizes = [8, 32], strides = [1, 1]} : vector<16x128xf32> to vector<8x32xf32>
    %419 = vector.extract_strided_slice %416 {offsets = [0, 64], sizes = [8, 32], strides = [1, 1]} : vector<16x128xf32> to vector<8x32xf32>
    %420 = vector.extract_strided_slice %416 {offsets = [0, 96], sizes = [8, 32], strides = [1, 1]} : vector<16x128xf32> to vector<8x32xf32>
    %421 = vector.extract_strided_slice %416 {offsets = [8, 0], sizes = [8, 32], strides = [1, 1]} : vector<16x128xf32> to vector<8x32xf32>
    %422 = vector.extract_strided_slice %416 {offsets = [8, 32], sizes = [8, 32], strides = [1, 1]} : vector<16x128xf32> to vector<8x32xf32>
    %423 = vector.extract_strided_slice %416 {offsets = [8, 64], sizes = [8, 32], strides = [1, 1]} : vector<16x128xf32> to vector<8x32xf32>
    %424 = vector.extract_strided_slice %416 {offsets = [8, 96], sizes = [8, 32], strides = [1, 1]} : vector<16x128xf32> to vector<8x32xf32>
    %425 = vector.shape_cast %417 : vector<8x32xf32> to vector<1x8x32xf32>
    %426 = vector.shape_cast %418 : vector<8x32xf32> to vector<1x8x32xf32>
    %427 = vector.shape_cast %419 : vector<8x32xf32> to vector<1x8x32xf32>
    %428 = vector.shape_cast %420 : vector<8x32xf32> to vector<1x8x32xf32>
    %429 = vector.shape_cast %421 : vector<8x32xf32> to vector<1x8x32xf32>
    %430 = vector.shape_cast %422 : vector<8x32xf32> to vector<1x8x32xf32>
    %431 = vector.shape_cast %423 : vector<8x32xf32> to vector<1x8x32xf32>
    %432 = vector.shape_cast %424 : vector<8x32xf32> to vector<1x8x32xf32>
    %433 = tpu.concatenate %425, %426, %427, %428, %429, %430, %431, %432 in 0 : vector<1x8x32xf32>, vector<1x8x32xf32>, vector<1x8x32xf32>, vector<1x8x32xf32>, vector<1x8x32xf32>, vector<1x8x32xf32>, vector<1x8x32xf32>, vector<1x8x32xf32> -> vector<8x8x32xf32>
    %434 = arith.truncf %397 : vector<8x8x32xf32> to vector<8x8x32xbf16>
    %435 = arith.truncf %415 : vector<8x8x32xf32> to vector<8x8x32xbf16>
    "tpu.trace_start"() <{level = 10 : i32, message = "bqf,bkf->bqk"}> : () -> ()
    %cst_108 = arith.constant dense<0.000000e+00> : vector<8x8x8xf32>
    %436 = tpu.matmul %434, %435, %cst_108 {dimension_numbers = #tpu.dot_dimension_numbers<[2], [2], [1], [1], [0, 0, 0, 1, 1, 1], [0], [0]>} : vector<8x8x32xbf16>, vector<8x8x32xbf16>, vector<8x8x8xf32> -> vector<8x8x8xf32>
    "tpu.trace_stop"() : () -> ()
    %cst_109 = arith.constant 0.176776692 : f32
    %437 = vector.broadcast %cst_109 : f32 to vector<8x8x8xf32>
    %438 = arith.mulf %436, %437 : vector<8x8x8xf32>
    %439 = vector.broadcast %12 : vector<1x8x8xf32> to vector<8x8x8xf32>
    %440 = arith.addf %438, %439 : vector<8x8x8xf32>
    %cst_110 = arith.constant dense<0xFF800000> : vector<8x8xf32>
    %441 = vector.multi_reduction <maximumf>, %440, %cst_110 [2] : vector<8x8x8xf32> to vector<8x8xf32>
    %442 = vector.shape_cast %441 : vector<8x8xf32> to vector<8x8x1xf32>
    %443 = vector.broadcast %442 : vector<8x8x1xf32> to vector<8x8x8xf32>
    %444 = arith.subf %440, %443 : vector<8x8x8xf32>
    %445 = math.exp %444 : vector<8x8x8xf32>
    %cst_111 = arith.constant dense<0.000000e+00> : vector<8x8xf32>
    %446 = vector.multi_reduction <add>, %445, %cst_111 [2] : vector<8x8x8xf32> to vector<8x8xf32>
    %447 = vector.shape_cast %446 : vector<8x8xf32> to vector<8x8x1xf32>
    %448 = tpu.reciprocal %447 {approx = true} : vector<8x8x1xf32> -> vector<8x8x1xf32>
    %449 = vector.broadcast %448 : vector<8x8x1xf32> to vector<8x8x8xf32>
    %450 = arith.mulf %445, %449 : vector<8x8x8xf32>
    %451 = arith.truncf %450 : vector<8x8x8xf32> to vector<8x8x8xbf16>
    %452 = arith.truncf %433 : vector<8x8x32xf32> to vector<8x8x32xbf16>
    "tpu.trace_start"() <{level = 10 : i32, message = "bqk,bkf->bqf"}> : () -> ()
    %cst_112 = arith.constant dense<0.000000e+00> : vector<8x8x32xf32>
    %453 = tpu.matmul %451, %452, %cst_112 {dimension_numbers = #tpu.dot_dimension_numbers<[2], [1], [1], [2], [0, 0, 0, 1, 1, 2], [0], [0]>} : vector<8x8x8xbf16>, vector<8x8x32xbf16>, vector<8x8x32xf32> -> vector<8x8x32xf32>
    "tpu.trace_stop"() : () -> ()
    %454 = vector.extract_strided_slice %453 {offsets = [0, 0, 0], sizes = [1, 8, 32], strides = [1, 1, 1]} : vector<8x8x32xf32> to vector<1x8x32xf32>
    %455 = vector.shape_cast %454 : vector<1x8x32xf32> to vector<8x32xf32>
    %456 = vector.extract_strided_slice %453 {offsets = [1, 0, 0], sizes = [1, 8, 32], strides = [1, 1, 1]} : vector<8x8x32xf32> to vector<1x8x32xf32>
    %457 = vector.shape_cast %456 : vector<1x8x32xf32> to vector<8x32xf32>
    %458 = vector.extract_strided_slice %453 {offsets = [2, 0, 0], sizes = [1, 8, 32], strides = [1, 1, 1]} : vector<8x8x32xf32> to vector<1x8x32xf32>
    %459 = vector.shape_cast %458 : vector<1x8x32xf32> to vector<8x32xf32>
    %460 = vector.extract_strided_slice %453 {offsets = [3, 0, 0], sizes = [1, 8, 32], strides = [1, 1, 1]} : vector<8x8x32xf32> to vector<1x8x32xf32>
    %461 = vector.shape_cast %460 : vector<1x8x32xf32> to vector<8x32xf32>
    %462 = tpu.concatenate %455, %457, %459, %461 in 1 : vector<8x32xf32>, vector<8x32xf32>, vector<8x32xf32>, vector<8x32xf32> -> vector<8x128xf32>
    %463 = vector.extract_strided_slice %453 {offsets = [4, 0, 0], sizes = [1, 8, 32], strides = [1, 1, 1]} : vector<8x8x32xf32> to vector<1x8x32xf32>
    %464 = vector.shape_cast %463 : vector<1x8x32xf32> to vector<8x32xf32>
    %465 = vector.extract_strided_slice %453 {offsets = [5, 0, 0], sizes = [1, 8, 32], strides = [1, 1, 1]} : vector<8x8x32xf32> to vector<1x8x32xf32>
    %466 = vector.shape_cast %465 : vector<1x8x32xf32> to vector<8x32xf32>
    %467 = vector.extract_strided_slice %453 {offsets = [6, 0, 0], sizes = [1, 8, 32], strides = [1, 1, 1]} : vector<8x8x32xf32> to vector<1x8x32xf32>
    %468 = vector.shape_cast %467 : vector<1x8x32xf32> to vector<8x32xf32>
    %469 = vector.extract_strided_slice %453 {offsets = [7, 0, 0], sizes = [1, 8, 32], strides = [1, 1, 1]} : vector<8x8x32xf32> to vector<1x8x32xf32>
    %470 = vector.shape_cast %469 : vector<1x8x32xf32> to vector<8x32xf32>
    %471 = tpu.concatenate %464, %466, %468, %470 in 1 : vector<8x32xf32>, vector<8x32xf32>, vector<8x32xf32>, vector<8x32xf32> -> vector<8x128xf32>
    %472 = tpu.concatenate %462, %471 in 0 : vector<8x128xf32>, vector<8x128xf32> -> vector<16x128xf32>
    %473 = arith.truncf %472 : vector<16x128xf32> to vector<16x128xbf16>
    %c1_113 = arith.constant 1 : index
    %c0_114 = arith.constant 0 : index
    %c384_115 = arith.constant 384 : index
    %474 = vector.load %arg5[%c1_113, %c0_114, %c384_115] : memref<2x128x1536xbf16, #tpu.memory_space<vmem>>, vector<1x128x128xbf16>
    %475 = vector.shape_cast %474 : vector<1x128x128xbf16> to vector<128x128xbf16>
    %cst_116 = arith.constant dense<0.000000e+00> : vector<16x128xf32>
    %476 = tpu.matmul %473, %475, %cst_116 {dimension_numbers = #tpu.dot_dimension_numbers<[1], [0], [0], [1], [0, 0, 1, 1], [], []>} : vector<16x128xbf16>, vector<128x128xbf16>, vector<16x128xf32> -> vector<16x128xf32>
    %c1_117 = arith.constant 1 : index
    %c0_118 = arith.constant 0 : index
    %c640_119 = arith.constant 640 : index
    %477 = vector.load %arg7[%c1_117, %c0_118, %c640_119] : memref<2x1x2432xf32, #tpu.memory_space<vmem>>, vector<1x1x128xf32>
    %478 = vector.shape_cast %477 : vector<1x1x128xf32> to vector<1x128xf32>
    %479 = vector.broadcast %478 : vector<1x128xf32> to vector<16x128xf32>
    %480 = arith.addf %476, %479 : vector<16x128xf32>
    %481 = arith.addf %480, %345 : vector<16x128xf32>
    %c1_120 = arith.constant 1 : index
    %c0_121 = arith.constant 0 : index
    %c768_122 = arith.constant 768 : index
    %482 = vector.load %arg7[%c1_120, %c0_121, %c768_122] : memref<2x1x2432xf32, #tpu.memory_space<vmem>>, vector<1x1x128xf32>
    %483 = vector.shape_cast %482 : vector<1x1x128xf32> to vector<1x128xf32>
    %c1_123 = arith.constant 1 : index
    %c0_124 = arith.constant 0 : index
    %c896_125 = arith.constant 896 : index
    %484 = vector.load %arg7[%c1_123, %c0_124, %c896_125] : memref<2x1x2432xf32, #tpu.memory_space<vmem>>, vector<1x1x128xf32>
    %485 = vector.shape_cast %484 : vector<1x1x128xf32> to vector<1x128xf32>
    %cst_126 = arith.constant dense<0.000000e+00> : vector<16xf32>
    %486 = vector.multi_reduction <add>, %481, %cst_126 [1] : vector<16x128xf32> to vector<16xf32>
    %487 = vector.shape_cast %486 : vector<16xf32> to vector<16x1xf32>
    %cst_127 = arith.constant 1.280000e+02 : f32
    %488 = vector.broadcast %cst_127 : f32 to vector<16x1xf32>
    %489 = arith.divf %487, %488 : vector<16x1xf32>
    %490 = vector.broadcast %489 : vector<16x1xf32> to vector<16x128xf32>
    %491 = arith.subf %481, %490 : vector<16x128xf32>
    %492 = arith.mulf %491, %491 : vector<16x128xf32>
    %cst_128 = arith.constant dense<0.000000e+00> : vector<16xf32>
    %493 = vector.multi_reduction <add>, %492, %cst_128 [1] : vector<16x128xf32> to vector<16xf32>
    %494 = vector.shape_cast %493 : vector<16xf32> to vector<16x1xf32>
    %cst_129 = arith.constant 1.280000e+02 : f32
    %495 = vector.broadcast %cst_129 : f32 to vector<16x1xf32>
    %496 = arith.divf %494, %495 : vector<16x1xf32>
    %497 = vector.broadcast %489 : vector<16x1xf32> to vector<16x128xf32>
    %498 = arith.subf %481, %497 : vector<16x128xf32>
    %cst_130 = arith.constant 9.99999974E-6 : f32
    %499 = vector.broadcast %cst_130 : f32 to vector<16x1xf32>
    %500 = arith.addf %496, %499 : vector<16x1xf32>
    %501 = math.rsqrt %500 : vector<16x1xf32>
    %502 = vector.broadcast %501 : vector<16x1xf32> to vector<16x128xf32>
    %503 = arith.mulf %498, %502 : vector<16x128xf32>
    %504 = vector.broadcast %483 : vector<1x128xf32> to vector<16x128xf32>
    %505 = arith.mulf %503, %504 : vector<16x128xf32>
    %506 = vector.broadcast %485 : vector<1x128xf32> to vector<16x128xf32>
    %507 = arith.addf %505, %506 : vector<16x128xf32>
    %508 = arith.truncf %507 : vector<16x128xf32> to vector<16x128xbf16>
    %c1_131 = arith.constant 1 : index
    %c0_132 = arith.constant 0 : index
    %c512_133 = arith.constant 512 : index
    %509 = vector.load %arg5[%c1_131, %c0_132, %c512_133] : memref<2x128x1536xbf16, #tpu.memory_space<vmem>>, vector<1x128x128xbf16>
    %510 = vector.shape_cast %509 : vector<1x128x128xbf16> to vector<128x128xbf16>
    %cst_134 = arith.constant dense<0.000000e+00> : vector<16x128xf32>
    %511 = tpu.matmul %508, %510, %cst_134 {dimension_numbers = #tpu.dot_dimension_numbers<[1], [0], [0], [1], [0, 0, 1, 1], [], []>} : vector<16x128xbf16>, vector<128x128xbf16>, vector<16x128xf32> -> vector<16x128xf32>
    %c1_135 = arith.constant 1 : index
    %c0_136 = arith.constant 0 : index
    %c1024_137 = arith.constant 1024 : index
    %512 = vector.load %arg7[%c1_135, %c0_136, %c1024_137] : memref<2x1x2432xf32, #tpu.memory_space<vmem>>, vector<1x1x128xf32>
    %513 = vector.shape_cast %512 : vector<1x1x128xf32> to vector<1x128xf32>
    %514 = vector.broadcast %513 : vector<1x128xf32> to vector<16x128xf32>
    %515 = arith.addf %511, %514 : vector<16x128xf32>
    %c1_138 = arith.constant 1 : index
    %c0_139 = arith.constant 0 : index
    %c640_140 = arith.constant 640 : index
    %516 = vector.load %arg5[%c1_138, %c0_139, %c640_140] : memref<2x128x1536xbf16, #tpu.memory_space<vmem>>, vector<1x128x256xbf16>
    %517 = vector.shape_cast %516 : vector<1x128x256xbf16> to vector<128x256xbf16>
    %cst_141 = arith.constant dense<0.000000e+00> : vector<32x256xf32>
    %518 = tpu.matmul %6, %517, %cst_141 {dimension_numbers = #tpu.dot_dimension_numbers<[1], [0], [0], [1], [0, 0, 1, 1], [], []>} : vector<32x128xbf16>, vector<128x256xbf16>, vector<32x256xf32> -> vector<32x256xf32>
    %c1_142 = arith.constant 1 : index
    %c0_143 = arith.constant 0 : index
    %c1152_144 = arith.constant 1152 : index
    %519 = vector.load %arg7[%c1_142, %c0_143, %c1152_144] : memref<2x1x2432xf32, #tpu.memory_space<vmem>>, vector<1x1x256xf32>
    %520 = vector.shape_cast %519 : vector<1x1x256xf32> to vector<1x256xf32>
    %521 = vector.broadcast %520 : vector<1x256xf32> to vector<32x256xf32>
    %522 = arith.addf %518, %521 : vector<32x256xf32>
    %523 = vector.extract_strided_slice %515 {offsets = [0, 0], sizes = [8, 32], strides = [1, 1]} : vector<16x128xf32> to vector<8x32xf32>
    %524 = vector.extract_strided_slice %515 {offsets = [0, 32], sizes = [8, 32], strides = [1, 1]} : vector<16x128xf32> to vector<8x32xf32>
    %525 = vector.extract_strided_slice %515 {offsets = [0, 64], sizes = [8, 32], strides = [1, 1]} : vector<16x128xf32> to vector<8x32xf32>
    %526 = vector.extract_strided_slice %515 {offsets = [0, 96], sizes = [8, 32], strides = [1, 1]} : vector<16x128xf32> to vector<8x32xf32>
    %527 = vector.extract_strided_slice %515 {offsets = [8, 0], sizes = [8, 32], strides = [1, 1]} : vector<16x128xf32> to vector<8x32xf32>
    %528 = vector.extract_strided_slice %515 {offsets = [8, 32], sizes = [8, 32], strides = [1, 1]} : vector<16x128xf32> to vector<8x32xf32>
    %529 = vector.extract_strided_slice %515 {offsets = [8, 64], sizes = [8, 32], strides = [1, 1]} : vector<16x128xf32> to vector<8x32xf32>
    %530 = vector.extract_strided_slice %515 {offsets = [8, 96], sizes = [8, 32], strides = [1, 1]} : vector<16x128xf32> to vector<8x32xf32>
    %531 = vector.shape_cast %523 : vector<8x32xf32> to vector<1x8x32xf32>
    %532 = vector.shape_cast %524 : vector<8x32xf32> to vector<1x8x32xf32>
    %533 = vector.shape_cast %525 : vector<8x32xf32> to vector<1x8x32xf32>
    %534 = vector.shape_cast %526 : vector<8x32xf32> to vector<1x8x32xf32>
    %535 = vector.shape_cast %527 : vector<8x32xf32> to vector<1x8x32xf32>
    %536 = vector.shape_cast %528 : vector<8x32xf32> to vector<1x8x32xf32>
    %537 = vector.shape_cast %529 : vector<8x32xf32> to vector<1x8x32xf32>
    %538 = vector.shape_cast %530 : vector<8x32xf32> to vector<1x8x32xf32>
    %539 = tpu.concatenate %531, %532, %533, %534, %535, %536, %537, %538 in 0 : vector<1x8x32xf32>, vector<1x8x32xf32>, vector<1x8x32xf32>, vector<1x8x32xf32>, vector<1x8x32xf32>, vector<1x8x32xf32>, vector<1x8x32xf32>, vector<1x8x32xf32> -> vector<8x8x32xf32>
    %540 = vector.extract_strided_slice %522 {offsets = [0, 0], sizes = [32, 128], strides = [1, 1]} : vector<32x256xf32> to vector<32x128xf32>
    %541 = vector.extract_strided_slice %540 {offsets = [0, 0], sizes = [16, 32], strides = [1, 1]} : vector<32x128xf32> to vector<16x32xf32>
    %542 = vector.extract_strided_slice %540 {offsets = [0, 32], sizes = [16, 32], strides = [1, 1]} : vector<32x128xf32> to vector<16x32xf32>
    %543 = vector.extract_strided_slice %540 {offsets = [0, 64], sizes = [16, 32], strides = [1, 1]} : vector<32x128xf32> to vector<16x32xf32>
    %544 = vector.extract_strided_slice %540 {offsets = [0, 96], sizes = [16, 32], strides = [1, 1]} : vector<32x128xf32> to vector<16x32xf32>
    %545 = vector.extract_strided_slice %540 {offsets = [16, 0], sizes = [16, 32], strides = [1, 1]} : vector<32x128xf32> to vector<16x32xf32>
    %546 = vector.extract_strided_slice %540 {offsets = [16, 32], sizes = [16, 32], strides = [1, 1]} : vector<32x128xf32> to vector<16x32xf32>
    %547 = vector.extract_strided_slice %540 {offsets = [16, 64], sizes = [16, 32], strides = [1, 1]} : vector<32x128xf32> to vector<16x32xf32>
    %548 = vector.extract_strided_slice %540 {offsets = [16, 96], sizes = [16, 32], strides = [1, 1]} : vector<32x128xf32> to vector<16x32xf32>
    %549 = vector.shape_cast %541 : vector<16x32xf32> to vector<1x16x32xf32>
    %550 = vector.shape_cast %542 : vector<16x32xf32> to vector<1x16x32xf32>
    %551 = vector.shape_cast %543 : vector<16x32xf32> to vector<1x16x32xf32>
    %552 = vector.shape_cast %544 : vector<16x32xf32> to vector<1x16x32xf32>
    %553 = vector.shape_cast %545 : vector<16x32xf32> to vector<1x16x32xf32>
    %554 = vector.shape_cast %546 : vector<16x32xf32> to vector<1x16x32xf32>
    %555 = vector.shape_cast %547 : vector<16x32xf32> to vector<1x16x32xf32>
    %556 = vector.shape_cast %548 : vector<16x32xf32> to vector<1x16x32xf32>
    %557 = tpu.concatenate %549, %550, %551, %552, %553, %554, %555, %556 in 0 : vector<1x16x32xf32>, vector<1x16x32xf32>, vector<1x16x32xf32>, vector<1x16x32xf32>, vector<1x16x32xf32>, vector<1x16x32xf32>, vector<1x16x32xf32>, vector<1x16x32xf32> -> vector<8x16x32xf32>
    %558 = vector.extract_strided_slice %522 {offsets = [0, 128], sizes = [32, 128], strides = [1, 1]} : vector<32x256xf32> to vector<32x128xf32>
    %559 = vector.extract_strided_slice %558 {offsets = [0, 0], sizes = [16, 32], strides = [1, 1]} : vector<32x128xf32> to vector<16x32xf32>
    %560 = vector.extract_strided_slice %558 {offsets = [0, 32], sizes = [16, 32], strides = [1, 1]} : vector<32x128xf32> to vector<16x32xf32>
    %561 = vector.extract_strided_slice %558 {offsets = [0, 64], sizes = [16, 32], strides = [1, 1]} : vector<32x128xf32> to vector<16x32xf32>
    %562 = vector.extract_strided_slice %558 {offsets = [0, 96], sizes = [16, 32], strides = [1, 1]} : vector<32x128xf32> to vector<16x32xf32>
    %563 = vector.extract_strided_slice %558 {offsets = [16, 0], sizes = [16, 32], strides = [1, 1]} : vector<32x128xf32> to vector<16x32xf32>
    %564 = vector.extract_strided_slice %558 {offsets = [16, 32], sizes = [16, 32], strides = [1, 1]} : vector<32x128xf32> to vector<16x32xf32>
    %565 = vector.extract_strided_slice %558 {offsets = [16, 64], sizes = [16, 32], strides = [1, 1]} : vector<32x128xf32> to vector<16x32xf32>
    %566 = vector.extract_strided_slice %558 {offsets = [16, 96], sizes = [16, 32], strides = [1, 1]} : vector<32x128xf32> to vector<16x32xf32>
    %567 = vector.shape_cast %559 : vector<16x32xf32> to vector<1x16x32xf32>
    %568 = vector.shape_cast %560 : vector<16x32xf32> to vector<1x16x32xf32>
    %569 = vector.shape_cast %561 : vector<16x32xf32> to vector<1x16x32xf32>
    %570 = vector.shape_cast %562 : vector<16x32xf32> to vector<1x16x32xf32>
    %571 = vector.shape_cast %563 : vector<16x32xf32> to vector<1x16x32xf32>
    %572 = vector.shape_cast %564 : vector<16x32xf32> to vector<1x16x32xf32>
    %573 = vector.shape_cast %565 : vector<16x32xf32> to vector<1x16x32xf32>
    %574 = vector.shape_cast %566 : vector<16x32xf32> to vector<1x16x32xf32>
    %575 = tpu.concatenate %567, %568, %569, %570, %571, %572, %573, %574 in 0 : vector<1x16x32xf32>, vector<1x16x32xf32>, vector<1x16x32xf32>, vector<1x16x32xf32>, vector<1x16x32xf32>, vector<1x16x32xf32>, vector<1x16x32xf32>, vector<1x16x32xf32> -> vector<8x16x32xf32>
    %576 = arith.truncf %539 : vector<8x8x32xf32> to vector<8x8x32xbf16>
    %577 = arith.truncf %557 : vector<8x16x32xf32> to vector<8x16x32xbf16>
    "tpu.trace_start"() <{level = 10 : i32, message = "bqf,bkf->bqk"}> : () -> ()
    %cst_145 = arith.constant dense<0.000000e+00> : vector<8x8x16xf32>
    %578 = tpu.matmul %576, %577, %cst_145 {dimension_numbers = #tpu.dot_dimension_numbers<[2], [2], [1], [1], [0, 0, 0, 1, 1, 1], [0], [0]>} : vector<8x8x32xbf16>, vector<8x16x32xbf16>, vector<8x8x16xf32> -> vector<8x8x16xf32>
    "tpu.trace_stop"() : () -> ()
    %cst_146 = arith.constant 0.176776692 : f32
    %579 = vector.broadcast %cst_146 : f32 to vector<8x8x16xf32>
    %580 = arith.mulf %578, %579 : vector<8x8x16xf32>
    %cst_147 = arith.constant dense<0xFF800000> : vector<8x8xf32>
    %581 = vector.multi_reduction <maximumf>, %580, %cst_147 [2] : vector<8x8x16xf32> to vector<8x8xf32>
    %582 = vector.shape_cast %581 : vector<8x8xf32> to vector<8x8x1xf32>
    %583 = vector.broadcast %582 : vector<8x8x1xf32> to vector<8x8x16xf32>
    %584 = arith.subf %580, %583 : vector<8x8x16xf32>
    %585 = math.exp %584 : vector<8x8x16xf32>
    %cst_148 = arith.constant dense<0.000000e+00> : vector<8x8xf32>
    %586 = vector.multi_reduction <add>, %585, %cst_148 [2] : vector<8x8x16xf32> to vector<8x8xf32>
    %587 = vector.shape_cast %586 : vector<8x8xf32> to vector<8x8x1xf32>
    %588 = tpu.reciprocal %587 {approx = true} : vector<8x8x1xf32> -> vector<8x8x1xf32>
    %589 = vector.broadcast %588 : vector<8x8x1xf32> to vector<8x8x16xf32>
    %590 = arith.mulf %585, %589 : vector<8x8x16xf32>
    %591 = arith.truncf %590 : vector<8x8x16xf32> to vector<8x8x16xbf16>
    %592 = arith.truncf %575 : vector<8x16x32xf32> to vector<8x16x32xbf16>
    "tpu.trace_start"() <{level = 10 : i32, message = "bqk,bkf->bqf"}> : () -> ()
    %cst_149 = arith.constant dense<0.000000e+00> : vector<8x8x32xf32>
    %593 = tpu.matmul %591, %592, %cst_149 {dimension_numbers = #tpu.dot_dimension_numbers<[2], [1], [1], [2], [0, 0, 0, 1, 1, 2], [0], [0]>} : vector<8x8x16xbf16>, vector<8x16x32xbf16>, vector<8x8x32xf32> -> vector<8x8x32xf32>
    "tpu.trace_stop"() : () -> ()
    %594 = vector.extract_strided_slice %593 {offsets = [0, 0, 0], sizes = [1, 8, 32], strides = [1, 1, 1]} : vector<8x8x32xf32> to vector<1x8x32xf32>
    %595 = vector.shape_cast %594 : vector<1x8x32xf32> to vector<8x32xf32>
    %596 = vector.extract_strided_slice %593 {offsets = [1, 0, 0], sizes = [1, 8, 32], strides = [1, 1, 1]} : vector<8x8x32xf32> to vector<1x8x32xf32>
    %597 = vector.shape_cast %596 : vector<1x8x32xf32> to vector<8x32xf32>
    %598 = vector.extract_strided_slice %593 {offsets = [2, 0, 0], sizes = [1, 8, 32], strides = [1, 1, 1]} : vector<8x8x32xf32> to vector<1x8x32xf32>
    %599 = vector.shape_cast %598 : vector<1x8x32xf32> to vector<8x32xf32>
    %600 = vector.extract_strided_slice %593 {offsets = [3, 0, 0], sizes = [1, 8, 32], strides = [1, 1, 1]} : vector<8x8x32xf32> to vector<1x8x32xf32>
    %601 = vector.shape_cast %600 : vector<1x8x32xf32> to vector<8x32xf32>
    %602 = tpu.concatenate %595, %597, %599, %601 in 1 : vector<8x32xf32>, vector<8x32xf32>, vector<8x32xf32>, vector<8x32xf32> -> vector<8x128xf32>
    %603 = vector.extract_strided_slice %593 {offsets = [4, 0, 0], sizes = [1, 8, 32], strides = [1, 1, 1]} : vector<8x8x32xf32> to vector<1x8x32xf32>
    %604 = vector.shape_cast %603 : vector<1x8x32xf32> to vector<8x32xf32>
    %605 = vector.extract_strided_slice %593 {offsets = [5, 0, 0], sizes = [1, 8, 32], strides = [1, 1, 1]} : vector<8x8x32xf32> to vector<1x8x32xf32>
    %606 = vector.shape_cast %605 : vector<1x8x32xf32> to vector<8x32xf32>
    %607 = vector.extract_strided_slice %593 {offsets = [6, 0, 0], sizes = [1, 8, 32], strides = [1, 1, 1]} : vector<8x8x32xf32> to vector<1x8x32xf32>
    %608 = vector.shape_cast %607 : vector<1x8x32xf32> to vector<8x32xf32>
    %609 = vector.extract_strided_slice %593 {offsets = [7, 0, 0], sizes = [1, 8, 32], strides = [1, 1, 1]} : vector<8x8x32xf32> to vector<1x8x32xf32>
    %610 = vector.shape_cast %609 : vector<1x8x32xf32> to vector<8x32xf32>
    %611 = tpu.concatenate %604, %606, %608, %610 in 1 : vector<8x32xf32>, vector<8x32xf32>, vector<8x32xf32>, vector<8x32xf32> -> vector<8x128xf32>
    %612 = tpu.concatenate %602, %611 in 0 : vector<8x128xf32>, vector<8x128xf32> -> vector<16x128xf32>
    %613 = arith.truncf %612 : vector<16x128xf32> to vector<16x128xbf16>
    %c1_150 = arith.constant 1 : index
    %c0_151 = arith.constant 0 : index
    %c896_152 = arith.constant 896 : index
    %614 = vector.load %arg5[%c1_150, %c0_151, %c896_152] : memref<2x128x1536xbf16, #tpu.memory_space<vmem>>, vector<1x128x128xbf16>
    %615 = vector.shape_cast %614 : vector<1x128x128xbf16> to vector<128x128xbf16>
    %cst_153 = arith.constant dense<0.000000e+00> : vector<16x128xf32>
    %616 = tpu.matmul %613, %615, %cst_153 {dimension_numbers = #tpu.dot_dimension_numbers<[1], [0], [0], [1], [0, 0, 1, 1], [], []>} : vector<16x128xbf16>, vector<128x128xbf16>, vector<16x128xf32> -> vector<16x128xf32>
    %c1_154 = arith.constant 1 : index
    %c0_155 = arith.constant 0 : index
    %c1408_156 = arith.constant 1408 : index
    %617 = vector.load %arg7[%c1_154, %c0_155, %c1408_156] : memref<2x1x2432xf32, #tpu.memory_space<vmem>>, vector<1x1x128xf32>
    %618 = vector.shape_cast %617 : vector<1x1x128xf32> to vector<1x128xf32>
    %619 = vector.broadcast %618 : vector<1x128xf32> to vector<16x128xf32>
    %620 = arith.addf %616, %619 : vector<16x128xf32>
    %621 = arith.addf %481, %620 : vector<16x128xf32>
    %c1_157 = arith.constant 1 : index
    %c0_158 = arith.constant 0 : index
    %c1536_159 = arith.constant 1536 : index
    %622 = vector.load %arg7[%c1_157, %c0_158, %c1536_159] : memref<2x1x2432xf32, #tpu.memory_space<vmem>>, vector<1x1x128xf32>
    %623 = vector.shape_cast %622 : vector<1x1x128xf32> to vector<1x128xf32>
    %c1_160 = arith.constant 1 : index
    %c0_161 = arith.constant 0 : index
    %c1664_162 = arith.constant 1664 : index
    %624 = vector.load %arg7[%c1_160, %c0_161, %c1664_162] : memref<2x1x2432xf32, #tpu.memory_space<vmem>>, vector<1x1x128xf32>
    %625 = vector.shape_cast %624 : vector<1x1x128xf32> to vector<1x128xf32>
    %cst_163 = arith.constant dense<0.000000e+00> : vector<16xf32>
    %626 = vector.multi_reduction <add>, %621, %cst_163 [1] : vector<16x128xf32> to vector<16xf32>
    %627 = vector.shape_cast %626 : vector<16xf32> to vector<16x1xf32>
    %cst_164 = arith.constant 1.280000e+02 : f32
    %628 = vector.broadcast %cst_164 : f32 to vector<16x1xf32>
    %629 = arith.divf %627, %628 : vector<16x1xf32>
    %630 = vector.broadcast %629 : vector<16x1xf32> to vector<16x128xf32>
    %631 = arith.subf %621, %630 : vector<16x128xf32>
    %632 = arith.mulf %631, %631 : vector<16x128xf32>
    %cst_165 = arith.constant dense<0.000000e+00> : vector<16xf32>
    %633 = vector.multi_reduction <add>, %632, %cst_165 [1] : vector<16x128xf32> to vector<16xf32>
    %634 = vector.shape_cast %633 : vector<16xf32> to vector<16x1xf32>
    %cst_166 = arith.constant 1.280000e+02 : f32
    %635 = vector.broadcast %cst_166 : f32 to vector<16x1xf32>
    %636 = arith.divf %634, %635 : vector<16x1xf32>
    %637 = vector.broadcast %629 : vector<16x1xf32> to vector<16x128xf32>
    %638 = arith.subf %621, %637 : vector<16x128xf32>
    %cst_167 = arith.constant 9.99999974E-6 : f32
    %639 = vector.broadcast %cst_167 : f32 to vector<16x1xf32>
    %640 = arith.addf %636, %639 : vector<16x1xf32>
    %641 = math.rsqrt %640 : vector<16x1xf32>
    %642 = vector.broadcast %641 : vector<16x1xf32> to vector<16x128xf32>
    %643 = arith.mulf %638, %642 : vector<16x128xf32>
    %644 = vector.broadcast %623 : vector<1x128xf32> to vector<16x128xf32>
    %645 = arith.mulf %643, %644 : vector<16x128xf32>
    %646 = vector.broadcast %625 : vector<1x128xf32> to vector<16x128xf32>
    %647 = arith.addf %645, %646 : vector<16x128xf32>
    %648 = arith.truncf %647 : vector<16x128xf32> to vector<16x128xbf16>
    %c1_168 = arith.constant 1 : index
    %c0_169 = arith.constant 0 : index
    %c1024_170 = arith.constant 1024 : index
    %649 = vector.load %arg5[%c1_168, %c0_169, %c1024_170] : memref<2x128x1536xbf16, #tpu.memory_space<vmem>>, vector<1x128x512xbf16>
    %650 = vector.shape_cast %649 : vector<1x128x512xbf16> to vector<128x512xbf16>
    %cst_171 = arith.constant dense<0.000000e+00> : vector<16x512xf32>
    %651 = tpu.matmul %648, %650, %cst_171 {dimension_numbers = #tpu.dot_dimension_numbers<[1], [0], [0], [1], [0, 0, 1, 1], [], []>} : vector<16x128xbf16>, vector<128x512xbf16>, vector<16x512xf32> -> vector<16x512xf32>
    %c1_172 = arith.constant 1 : index
    %c0_173 = arith.constant 0 : index
    %c1792_174 = arith.constant 1792 : index
    %652 = vector.load %arg7[%c1_172, %c0_173, %c1792_174] : memref<2x1x2432xf32, #tpu.memory_space<vmem>>, vector<1x1x512xf32>
    %653 = vector.shape_cast %652 : vector<1x1x512xf32> to vector<1x512xf32>
    %654 = vector.broadcast %653 : vector<1x512xf32> to vector<16x512xf32>
    %655 = arith.addf %651, %654 : vector<16x512xf32>
    %cst_175 = arith.constant 5.000000e-01 : f32
    %656 = vector.broadcast %cst_175 : f32 to vector<16x512xf32>
    %657 = arith.mulf %656, %655 : vector<16x512xf32>
    %cst_176 = arith.constant 4.471500e-02 : f32
    %658 = vector.broadcast %cst_176 : f32 to vector<16x512xf32>
    %659 = arith.mulf %658, %655 : vector<16x512xf32>
    %660 = arith.mulf %659, %655 : vector<16x512xf32>
    %661 = arith.mulf %660, %655 : vector<16x512xf32>
    %662 = arith.addf %655, %661 : vector<16x512xf32>
    %cst_177 = arith.constant 0.797884583 : f32
    %663 = vector.broadcast %cst_177 : f32 to vector<16x512xf32>
    %664 = arith.mulf %663, %662 : vector<16x512xf32>
    %665 = math.tanh %664 : vector<16x512xf32>
    %cst_178 = arith.constant 1.000000e+00 : f32
    %666 = vector.broadcast %cst_178 : f32 to vector<16x512xf32>
    %667 = arith.addf %666, %665 : vector<16x512xf32>
    %668 = arith.mulf %657, %667 : vector<16x512xf32>
    %669 = arith.truncf %668 : vector<16x512xf32> to vector<16x512xbf16>
    %c1_179 = arith.constant 1 : index
    %c0_180 = arith.constant 0 : index
    %c0_181 = arith.constant 0 : index
    %670 = vector.load %arg6[%c1_179, %c0_180, %c0_181] : memref<2x512x128xbf16, #tpu.memory_space<vmem>>, vector<1x512x128xbf16>
    %671 = vector.shape_cast %670 : vector<1x512x128xbf16> to vector<512x128xbf16>
    %cst_182 = arith.constant dense<0.000000e+00> : vector<16x128xf32>
    %672 = tpu.matmul %669, %671, %cst_182 {dimension_numbers = #tpu.dot_dimension_numbers<[1], [0], [0], [1], [0, 0, 1, 1], [], []>} : vector<16x512xbf16>, vector<512x128xbf16>, vector<16x128xf32> -> vector<16x128xf32>
    %c1_183 = arith.constant 1 : index
    %c0_184 = arith.constant 0 : index
    %c2304_185 = arith.constant 2304 : index
    %673 = vector.load %arg7[%c1_183, %c0_184, %c2304_185] : memref<2x1x2432xf32, #tpu.memory_space<vmem>>, vector<1x1x128xf32>
    %674 = vector.shape_cast %673 : vector<1x1x128xf32> to vector<1x128xf32>
    %675 = vector.broadcast %674 : vector<1x128xf32> to vector<16x128xf32>
    %676 = arith.addf %672, %675 : vector<16x128xf32>
    %677 = arith.addf %676, %621 : vector<16x128xf32>
    %678 = arith.truncf %677 : vector<16x128xf32> to vector<16x128xbf16>
    %c0_186 = arith.constant 0 : index
    %c0_187 = arith.constant 0 : index
    %679 = vector.load %arg8[%c0_186, %c0_187] : memref<128x128xbf16, #tpu.memory_space<vmem>>, vector<128x128xbf16>
    %cst_188 = arith.constant dense<0.000000e+00> : vector<16x128xf32>
    %680 = tpu.matmul %678, %679, %cst_188 {dimension_numbers = #tpu.dot_dimension_numbers<[1], [0], [0], [1], [0, 0, 1, 1], [], []>} : vector<16x128xbf16>, vector<128x128xbf16>, vector<16x128xf32> -> vector<16x128xf32>
    %c0_189 = arith.constant 0 : index
    %c0_190 = arith.constant 0 : index
    %681 = vector.load %arg9[%c0_189, %c0_190] : memref<1x128xf32, #tpu.memory_space<vmem>>, vector<1x128xf32>
    %682 = vector.broadcast %681 : vector<1x128xf32> to vector<16x128xf32>
    %683 = arith.addf %680, %682 : vector<16x128xf32>
    %c0_191 = arith.constant 0 : index
    %c0_192 = arith.constant 0 : index
    %684 = vector.load %arg10[%c0_191, %c0_192] : memref<16x128xf32, #tpu.memory_space<vmem>>, vector<16x128xf32>
    tpu.vector_store %arg10[%c0_191, %c0_192], %683 {strides = array<i32>} : memref<16x128xf32, #tpu.memory_space<vmem>>, vector<16x128xf32>,
    return
  }
  func.func @transform_0(%arg0: i32) -> (i32, i32) {
    %c0_i32 = arith.constant 0 : i32
    %c0_i32_0 = arith.constant 0 : i32
    %c0_i32_1 = arith.constant 0 : i32
    return %c0_i32, %c0_i32_0 : i32, i32
  }
  func.func @transform_1(%arg0: i32) -> (i32, i32) {
    %c0_i32 = arith.constant 0 : i32
    %c0_i32_0 = arith.constant 0 : i32
    %c0_i32_1 = arith.constant 0 : i32
    return %c0_i32, %c0_i32_0 : i32, i32
  }
  func.func @transform_2(%arg0: i32) -> (i32, i32) {
    %c0_i32 = arith.constant 0 : i32
    %c0_i32_0 = arith.constant 0 : i32
    %c0_i32_1 = arith.constant 0 : i32
    return %c0_i32, %c0_i32_0 : i32, i32
  }
  func.func @transform_3(%arg0: i32) -> (i32, i32) {
    %c0_i32 = arith.constant 0 : i32
    %c0_i32_0 = arith.constant 0 : i32
    %c0_i32_1 = arith.constant 0 : i32
    return %c0_i32, %c0_i32_0 : i32, i32
  }
  func.func @transform_4(%arg0: i32) -> (i32, i32, i32) {
    %c0_i32 = arith.constant 0 : i32
    %c0_i32_0 = arith.constant 0 : i32
    %c0_i32_1 = arith.constant 0 : i32
    %c0_i32_2 = arith.constant 0 : i32
    return %c0_i32, %c0_i32_0, %c0_i32_1 : i32, i32, i32
  }
  func.func @transform_5(%arg0: i32) -> (i32, i32, i32) {
    %c0_i32 = arith.constant 0 : i32
    %c0_i32_0 = arith.constant 0 : i32
    %c0_i32_1 = arith.constant 0 : i32
    %c0_i32_2 = arith.constant 0 : i32
    return %c0_i32, %c0_i32_0, %c0_i32_1 : i32, i32, i32
  }
  func.func @transform_6(%arg0: i32) -> (i32, i32, i32) {
    %c0_i32 = arith.constant 0 : i32
    %c0_i32_0 = arith.constant 0 : i32
    %c0_i32_1 = arith.constant 0 : i32
    %c0_i32_2 = arith.constant 0 : i32
    return %c0_i32, %c0_i32_0, %c0_i32_1 : i32, i32, i32
  }
  func.func @transform_7(%arg0: i32) -> (i32, i32) {
    %c0_i32 = arith.constant 0 : i32
    %c0_i32_0 = arith.constant 0 : i32
    %c0_i32_1 = arith.constant 0 : i32
    return %c0_i32, %c0_i32_0 : i32, i32
  }
  func.func @transform_8(%arg0: i32) -> (i32, i32) {
    %c0_i32 = arith.constant 0 : i32
    %c0_i32_0 = arith.constant 0 : i32
    %c0_i32_1 = arith.constant 0 : i32
    return %c0_i32, %c0_i32_0 : i32, i32
  }
  func.func @transform_9(%arg0: i32) -> (i32, i32) {
    %c0_i32 = arith.constant 0 : i32
    %c0_i32_0 = arith.constant 0 : i32
    %c0_i32_1 = arith.constant 0 : i32
    return %c0_i32, %c0_i32_0 : i32, i32
  }
}

</mosaic_0001>

<bundles_post_ra>
// kernel: image_captions_forward.1
= control target key start
LH: loop header
LB: loop body
LE: loop exit
PB: predicated region body
PF: predicated region fallthrough
CT: control target
= control target key end

     0   :  { %14 = vsyncpa [#allocation3], 0  ;;  %s8588_s0 = inlined_call_operand.vmem [shape: f32[16,128], index: 0, kind: input, shape index: {}]   ;;  %s8589_s1 = inlined_call_operand.vmem [shape: bf16[32,64], index: 1, kind: input, shape index: {}]   ;;  %s8590_s2 = inlined_call_operand.vmem [shape: bf16[64,128], index: 2, kind: input, shape index: {}]   ;;  %s8591_s3 = inlined_call_operand.vmem [shape: f32[1,128], index: 3, kind: input, shape index: {}]   ;;  %s8592_s4 = inlined_call_operand.hbm [shape: bf16[2,128,1536], index: 4, kind: input, shape index: {}]   ;;  %s8593_s5 = inlined_call_operand.vmem [shape: bf16[2,512,128], index: 5, kind: input, shape index: {}]   ;;  %s8594_s6 = inlined_call_operand.vmem [shape: f32[2,1,2432], index: 6, kind: input, shape index: {}]   ;;  %s8595_s7 = inlined_call_operand.vmem [shape: bf16[128,128], index: 7, kind: input, shape index: {}]   ;;  %s8596_s8 = inlined_call_operand.vmem [shape: f32[1,128], index: 8, kind: input, shape index: {}]   ;;  %s8597_s9 = inlined_call_operand.hbm [shape: f32[16,128], index: 9, kind: output, shape index: {}]  }
   0x1   :  { %15 = vsyncpa [#allocation4], 0  ;;  %s28_s11 = sshll.u32 %s8592_s4, 4  ;;  %s7381_s12 = smov [#allocation2]   ;;  %s29_s11 = int_to_ptr.hbm [resolvable:$true] %s28_s11 }
   0x2   :  { %s30_s13 = sshll.u32 %s7381_s12, 4  ;;  %s7382_s14 = smov 768   ;;  %s31_s13 = int_to_ptr.vmem [resolvable:$true] %s30_s13 }
   0x3   :  { %s7383_s15 = smov 48  }
   0x4   :  { %36 = dma.hbm_to_vmem [thread:$0]  %s29_s11, 24576, %s31_s13, [#allocation3], %s7382_s14, %s7382_s14, %s7383_s15  }
   0x5   :  { %7377 = dma.done.wait [#allocation3], 24576  }
   0x6   :  { %7378 = vsyncadd [#allocation3], 4294942720  ;;  %v134_v0 = vld [vmem:[%s8588_s0] sm:$0xff]  ;;  %v135_v1 = vld [vmem:[%s8588_s0 + $0x8] sm:$0xff]  ;;  %v7384_v2 = vmov 128.0   ;;  %vm100_vm1 = vcmask 523264  }
   0x7   :  { %138 = vadd.xlane.f32.xlu0 %v134_v0  ;;  %7141 = vrcp.f32 %v7384_v2  ;;  %v6653_v5 = vld [vmem:[%s8590_s2 + $0x18] sm:$0xff]  ;;  %v6652_v6 = vld [vmem:[%s8590_s2 + $0x10] sm:$0xff]  ;;  %v6651_v8 = vld [vmem:[%s8590_s2 + $0x8] sm:$0xff]  ;;  %s7385_s14 = smov 32   ;;  %s7386_s15 = smov 64   ;;  %vm482_vm8 = vcmask 261120  }
   0x8   :  { %111 = vmatpush.bf16.msra.mxu2 %v6653_v5  ;;  %v6650_v10 = vld [vmem:[%s8590_s2] sm:$0xff]  ;;  %v6676_v23 = vld [vmem:[#allocation2 + $0x2cc] sm:$0xf0]  ;;  %v5545_v24 = vld [vmem:[#allocation2 + $0x2a8] sm:$0xf]  ;;  %s7387_s16 = smov 96  }
   0x9   :  { %v6648_v21 = vld [vmem:[%s8589_s1] sm:$0xff]  ;;  %v6677_v26 = vld [vmem:[#allocation2 + $0x2d4] sm:$0xf0]  ;;  %v5539_v28 = vld [vmem:[#allocation2 + $0x2d0] sm:$0xf0]  ;;  %vm759_vm9 = vcmask 1043456  }
   0xa   :  { %v5537_v22 = vld [vmem:[#allocation2 + $0x2a0] sm:$0xf]  ;;  %v6675_v27 = vld [vmem:[#allocation2 + $0x2a4] sm:$0xf]  ;;  %v5546_v29 = vor.u32 %v6677_v26, %v5545_v24  ;;  %v6673_v32 = vld [vmem:[#allocation2 + $0x26c] sm:$0xf0] }
   0xb   :  { %v5538_v25 = vor.u32 %v6676_v23, %v5537_v22  ;;  %v5542_v30 = vor.u32 %v6675_v27, %v5539_v28  ;;  %v5525_v31 = vld [vmem:[#allocation2 + $0x240] sm:$0xf]  ;;  %v6672_v33 = vld [vmem:[#allocation2 + $0x244] sm:$0xf]  ;;  %v5527_v35 = vld [vmem:[#allocation2 + $0x270] sm:$0xf0] }
   0xc   :  { %112 = vmatpush.bf16.msra.mxu2 %v6652_v6  ;;  %392 = vmatpush.bf16.msra.mxu3 %v5546_v29  ;;  %v5526_v34 = vor.u32 %v6673_v32, %v5525_v31  ;;  %v5533_v36 = vld [vmem:[#allocation2 + $0x248] sm:$0xf]  ;;  %v6674_v37 = vld [vmem:[#allocation2 + $0x274] sm:$0xf0]  ;;  %v5530_v38 = vor.u32 %v6672_v33, %v5527_v35  ;;  %v5513_v40 = vld [vmem:[#allocation2 + $0x1e0] sm:$0xf] }
   0xd   :  { %v7142_v3 = vpop.eup %7141  ;;  %364 = vmatpush.bf16.msra.mxu1 %v5538_v25  ;;  %v5534_v39 = vor.u32 %v6674_v37, %v5533_v36  ;;  %v6670_v41 = vld [vmem:[#allocation2 + $0x20c] sm:$0xf0]  ;;  %v6669_v42 = vld [vmem:[#allocation2 + $0x1e4] sm:$0xf]  ;;  %v5515_v44 = vld [vmem:[#allocation2 + $0x210] sm:$0xf0] }
   0xe   :  { %v143_v4 = vmul.f32 128.0, %v7142_v3  ;;  %vm147_vm0 = vweird.f32 %v7142_v3  ;;  %v5514_v43 = vor.u32 %v6670_v41, %v5513_v40  ;;  %v5521_v45 = vld [vmem:[#allocation2 + $0x1e8] sm:$0xf]  ;;  %v6671_v46 = vld [vmem:[#allocation2 + $0x214] sm:$0xf0]  ;;  %v5518_v47 = vor.u32 %v6669_v42, %v5515_v44  ;;  %s7389_s13 = smov [#allocation5]  }
   0xf   :  { %140 = vadd.xlane.f32.xlu0 %v135_v1  ;;  %v5522_v48 = vor.u32 %v6671_v46, %v5521_v45  ;;  %v6649_v49 = vld [vmem:[%s8589_s1 + $0x8] sm:$0xff]  ;;  %v5501_v50 = vld [vmem:[#allocation2 + $0x180] sm:$0xf]  ;;  %v6667_v51 = vld [vmem:[#allocation2 + $0x1ac] sm:$0xf0]  ;;  %vm651_vm11 = vcmask 64512  }
  0x10   :  { %v144_v7 = vsub.f32 1.0, %v143_v4  ;;  %113 = vmatpush.bf16.msra.mxu2 %v6651_v8  ;;  %393 = vmatpush.bf16.msra.mxu3 %v5534_v39  ;;  %v6666_v52 = vld [vmem:[#allocation2 + $0x184] sm:$0xf]  ;;  %v5502_v53 = vor.u32 %v6667_v51, %v5501_v50  ;;  %v5503_v54 = vld [vmem:[#allocation2 + $0x1b0] sm:$0xf0]  ;;  %vm923_vm12 = vcmask 785408  }
  0x11   :  { %365 = vmatpush.bf16.msra.mxu1 %v5526_v34  ;;  %v5509_v55 = vld [vmem:[#allocation2 + $0x188] sm:$0xf]  ;;  %v6668_v56 = vld [vmem:[#allocation2 + $0x1b4] sm:$0xf0]  ;;  %v5506_v57 = vor.u32 %v6666_v52, %v5503_v54  ;;  %v5489_v59 = vld [vmem:[#allocation2 + $0x120] sm:$0xf] }
  0x12   :  { %v145_v9 = vmul.f32 %v7142_v3, %v144_v7  ;;  %v5510_v58 = vor.u32 %v6668_v56, %v5509_v55  ;;  %v6664_v60 = vld [vmem:[#allocation2 + $0x14c] sm:$0xf0]  ;;  %v6663_v61 = vld [vmem:[#allocation2 + $0x124] sm:$0xf]  ;;  %v5491_v63 = vld [vmem:[#allocation2 + $0x150] sm:$0xf0] }
  0x13   :  { %v5490_v62 = vor.u32 %v6664_v60, %v5489_v59  ;;  %v5494_v2 = vor.u32 %v6663_v61, %v5491_v63  ;;  %v5477_v4 = vld [vmem:[#allocation2 + $0xc0] sm:$0xf]  ;;  %v6661_v5 = vld [vmem:[#allocation2 + $0xec] sm:$0xf0]  ;;  %v6660_v6 = vld [vmem:[#allocation2 + $0xc4] sm:$0xf] }
  0x14   :  { %v146_v11 = vadd.f32 %v7142_v3, %v145_v9  ;;  %114 = vmatpush.bf16.msra.mxu2 %v6650_v10  ;;  %394 = vmatpush.bf16.msra.mxu3 %v5522_v48  ;;  %v5478_v7 = vor.u32 %v6661_v5, %v5477_v4  ;;  %v5479_v8 = vld [vmem:[#allocation2 + $0xf0] sm:$0xf0]  ;;  %v5485_v9 = vld [vmem:[#allocation2 + $0xc8] sm:$0xf]  ;;  %v6662_v10 = vld [vmem:[#allocation2 + $0xf4] sm:$0xf0] }
  0x15   :  { %366 = vmatpush.bf16.msra.mxu1 %v5514_v43  ;;  %v6659_v22 = vld [vmem:[#allocation2 + $0x94] sm:$0xf0]  ;;  %v5453_v25 = vld [vmem:[#allocation2] sm:$0xf]  ;;  %v6655_v26 = vld [vmem:[#allocation2 + $0x2c] sm:$0xf0] }
  0x16   :  { %v7463_v12 = vsel %vm147_vm0, %v7142_v3, %v146_v11  ;;  %v5482_v11 = vor.u32 %v6660_v6, %v5479_v8  ;;  %v6654_v27 = vld [vmem:[#allocation2 + $0x4] sm:$0xf]  ;;  %v5454_v29 = vor.u32 %v6655_v26, %v5453_v25  ;;  %v5461_v31 = vld [vmem:[#allocation2 + $0x8] sm:$0xf]  ;;  %v6656_v32 = vld [vmem:[#allocation2 + $0x34] sm:$0xf0] }
  0x17   :  { %5449 = vmatmul.msk.bf16.vlgmr.msra.gmra.mxu2 %vm100_vm1, %v6648_v21  ;;  %v5473_v21 = vld [vmem:[#allocation2 + $0x68] sm:$0xf]  ;;  %v5462_v35 = vor.u32 %v6656_v32, %v5461_v31  ;;  %s5410_s17 = sshll.u32 %s7389_s13, 4  ;;  %s5412_s19 = sshll.u32 %s8597_s9, 4  ;;  %s5411_s17 = int_to_ptr.vmem [resolvable:$true] %s5410_s17  ;;  %s5413_s19 = int_to_ptr.hbm [resolvable:$true] %s5412_s19 }
  0x18   :  { %378 = vmatpush.bf16.msrb.mxu2 %v5542_v30  ;;  %395 = vmatpush.bf16.msra.mxu3 %v5510_v58  ;;  %v5474_v24 = vor.u32 %v6659_v22, %v5473_v21  ;;  %v5455_v30 = vld [vmem:[#allocation2 + $0x30] sm:$0xf0]  ;;  %v7120_v58 = vld [vmem:[%s8594_s6 + $0x1] ss:$0 sm:$0xff]  ;;  %s7390_s4 = smov 128   ;;  %s7391_s20 = smov 8  }
  0x19   :  { %367 = vmatpush.bf16.msra.mxu1 %v5502_v53  ;;  %v5458_v34 = vor.u32 %v6654_v27, %v5455_v30  ;;  %v7119_v53 = vld [vmem:[%s8594_s6] ss:$0 sm:$0xff] }
  0x1c   :  { %379 = vmatpush.bf16.msrb.mxu2 %v5530_v38 }
  0x1d   :  { %368 = vmatpush.bf16.msra.mxu1 %v5490_v62 }
  0x20   :  { %380 = vmatpush.bf16.msrb.mxu2 %v5518_v47 }
  0x21   :  { %369 = vmatpush.bf16.msra.mxu1 %v5478_v7 }
  0x24   :  { %381 = vmatpush.bf16.msrb.mxu2 %v5506_v57 }
  0x27   :  { %5450 = vmatmul.msk.bf16.gmra.mxu2 %vm100_vm1, %v6649_v49 }
  0x28   :  { %382 = vmatpush.bf16.msrb.mxu2 %v5494_v2 }
  0x2c   :  { %383 = vmatpush.bf16.msrb.mxu2 %v5482_v11 }
  0x7a   :  { %v139_v13 = vpop.xlane.xlu0 %138 }
  0x7b   :  { %v149_v14 = vmul.f32 %v7463_v12, %v139_v13  ;;  %v5486_v13 = vor.u32 %v6662_v10, %v5485_v9 }
  0x7d   :  { %v7466_v15 = vsub.f32 %v134_v0, %v149_v14  ;;  %v5497_v0 = vld [vmem:[#allocation2 + $0x128] sm:$0xf]  ;;  %v5465_v14 = vld [vmem:[#allocation2 + $0x60] sm:$0xf] }
  0x7f   :  { %v153_v16 = vmul.f32 %v7466_v15, %v7466_v15 }
  0x81   :  { %155 = vadd.xlane.f32.xlu1 %v153_v16  ;;  %v6658_v16 = vld [vmem:[#allocation2 + $0x8c] sm:$0xf0] }
  0x82   :  { %v141_v17 = vpop.xlane.xlu0 %140 }
  0x83   :  { %v150_v18 = vmul.f32 %v7463_v12, %v141_v17  ;;  %v6657_v17 = vld [vmem:[#allocation2 + $0x64] sm:$0xf] }
  0x85   :  { %v7471_v19 = vsub.f32 %v135_v1, %v150_v18  ;;  %v6665_v1 = vld [vmem:[#allocation2 + $0x154] sm:$0xf0]  ;;  %v5466_v18 = vor.u32 %v6658_v16, %v5465_v14 }
  0x86   :  { %v5498_v3 = vor.u32 %v6665_v1, %v5497_v0 }
  0x87   :  { %v154_v20 = vmul.f32 %v7471_v19, %v7471_v19  ;;  %370 = vmatpush.bf16.msra.mxu1 %v5466_v18 }
  0x88   :  { %396 = vmatpush.bf16.msra.mxu3 %v5498_v3 }
  0x89   :  { %157 = vadd.xlane.f32.xlu1 %v154_v20  ;;  %v5467_v20 = vld [vmem:[#allocation2 + $0x90] sm:$0xf0] }
  0x8a   :  { %v5470_v23 = vor.u32 %v6657_v17, %v5467_v20 }
  0x8b   :  { %371 = vmatpush.bf16.msra.mxu1 %v5454_v29 }
  0x8c   :  { %397 = vmatpush.bf16.msra.mxu3 %v5486_v13  ;;  %384 = vmatpush.bf16.msrb.mxu2 %v5470_v23 }
  0x90   :  { %398 = vmatpush.bf16.msra.mxu3 %v5474_v24  ;;  %385 = vmatpush.bf16.msrb.mxu2 %v5458_v34 }
  0x94   :  { %399 = vmatpush.bf16.msra.mxu3 %v5462_v35 }
  0xf4   :  { %v156_v28 = vpop.xlane.xlu1 %155 }
  0xf5   :  { %v159_v33 = vmul.f32 %v156_v28, %v7463_v12 }
  0xf7   :  { %v161_v36 = vadd.f32 1e-05, %v159_v33 }
  0xf9   :  { %7143 = vrsqrt.f32 %v161_v36  ;;  %vm169_vm3 = vweird.f32 %v161_v36 }
  0xfc   :  { %v158_v37 = vpop.xlane.xlu1 %157 }
  0xfd   :  { %v160_v38 = vmul.f32 %v158_v37, %v7463_v12 }
  0xff   :  { %v7144_v39 = vpop.eup %7143  ;;  %v162_v40 = vadd.f32 1e-05, %v160_v38 }
 0x100   :  { %v164_v41 = vmul.f32 %v7144_v39, %v161_v36  ;;  %vm170_vm2 = vweird.f32 %v7144_v39 }
 0x101   :  { %7145 = vrsqrt.f32 %v162_v40  ;;  %vm171_vm4 = vmor %vm169_vm3, %vm170_vm2  ;;  %vm179_vm6 = vweird.f32 %v162_v40 }
 0x102   :  { %v165_v42 = vmul.f32 %v7144_v39, %v164_v41 }
 0x104   :  { %v166_v43 = vmul.f32 0.5, %v165_v42 }
 0x106   :  { %v167_v44 = vsub.f32 1.5, %v166_v43 }
 0x107   :  { %v7146_v45 = vpop.eup %7145 }
 0x108   :  { %v168_v46 = vmul.f32 %v7144_v39, %v167_v44  ;;  %v174_v47 = vmul.f32 %v7146_v45, %v162_v40  ;;  %vm180_vm5 = vweird.f32 %v7146_v45 }
 0x109   :  { %vm181_vm7 = vmor %vm179_vm6, %vm180_vm5 }
 0x10a   :  { %v175_v48 = vmul.f32 %v7146_v45, %v174_v47  ;;  %v172_v49 = vsel %vm171_vm4, %v7144_v39, %v168_v46  ;;  %v128_v47 = vlaneseq  ;;  %vm1624_vm4 = vcmask 130048  }
 0x10b   :  { %v183_v52 = vmul.f32 %v172_v49, %v7466_v15  ;;  %v7493_v15 = vpop.f32.mrf.mxu2 }
 0x10c   :  { %v176_v50 = vmul.f32 0.5, %v175_v48 }
 0x10d   :  { %v188_v57 = vmul.f32 %v7119_v53, %v183_v52 }
 0x10e   :  { %v177_v51 = vsub.f32 1.5, %v176_v50 }
 0x10f   :  { %v193_v60 = vadd.f32 %v7120_v58, %v188_v57 }
 0x110   :  { %v178_v54 = vmul.f32 %v7146_v45, %v177_v51 }
 0x112   :  { %v182_v55 = vsel %vm181_vm7, %v7146_v45, %v178_v54  ;;  %v131_v54 = vand.u32 127, %v128_v47 }
 0x113   :  { %v184_v56 = vmul.f32 %v182_v55, %v7471_v19  ;;  %v7495_v63 = vpop.f32.mrf.mxu2  ;;  %v7502_v19 = vld [vmem:[%s8594_s6 + $0x2] sm:$0x7] }
 0x114   :  { %v230_v1 = vperm.slane %v7502_v19, 0  ;;  %v231_v5 = vperm.slane %v7502_v19, 1  ;;  %v232_v25 = vperm.slane %v7502_v19, 2 }
 0x115   :  { %v189_v59 = vmul.f32 %v7119_v53, %v184_v56  ;;  %v129_v53 = vshrl.u32 %v128_v47, 7 }
 0x117   :  { %v194_v61 = vadd.f32 %v7120_v58, %v189_v59  ;;  %vm132_vm10 = vcmp.ge.s32.totalorder %v129_v53, %v131_v54 }
 0x119   :  { %v195_v62 = vpack.c.bf16 %v194_v61, %v193_v60 }
 0x11b   :  { %372 = vmatmul.bf16.vlgmr.msra.gmra.mxu1 %v195_v62  ;;  %386 = vmatmul.bf16.vlgmr.msrb.gmra.mxu2 %v195_v62  ;;  %v7497_v0 = vpop.f32.mrf.mxu2 }
 0x11c   :  { %400 = vmatmul.bf16.vlgmr.msra.gmra.mxu3 %v195_v62  ;;  %v7388_v62 = vmov -1e+09  }
 0x11d   :  { %v7553_v19 = vsel %vm132_vm10, 0.0, %v7388_v62 }
 0x123   :  { %v7505_v2 = vpop.f32.mrf.mxu2 }
 0x198   :  { %v373_v3 = vpop.f32.mrf.mxu1 }
 0x199   :  { %v374_v4 = vadd.f32 %v373_v3, %v230_v1 }
 0x19b   :  { %413 = vrot.lane.b32.xlu1 %v374_v4, %s7385_s14  ;;  %410 = vrot.lane.b32.xlu0 %v374_v4, %s7386_s15  ;;  %v466_v16 = vpack.c.bf16 %v374_v4, %v374_v4 }
 0x19e   :  { %v387_v6 = vpop.f32.mrf.mxu2 }
 0x19f   :  { %v388_v7 = vadd.f32 %v387_v6, %v231_v5  ;;  %v401_v26 = vpop.f32.mrf.mxu3 }
 0x1a0   :  { %v375_v8 = vpop.f32.mrf.mxu1  ;;  %v7531_v34 = vadd.f32 %v401_v26, %v232_v25 }
 0x1a1   :  { %v7510_v9 = vadd.f32 %v375_v8, %v230_v1  ;;  %430 = vrot.lane.b32.xlu2 %v388_v7, %s7386_s15  ;;  %v474_v10 = vpack.c.bf16 %v388_v7, %v388_v7 }
 0x1a2   :  { %v748_v38 = vpack.c.bf16 %v7531_v34, %v7531_v34 }
 0x1a3   :  { %423 = vrot.lane.b32.xlu1 %v7510_v9, %s7385_s14  ;;  %407 = vrot.lane.b32.xlu0 %v374_v4, %s7387_s16  ;;  %v487_v11 = vsel %vm482_vm8, %v474_v10, 0  ;;  %v470_v59 = vpack.c.bf16 %v7510_v9, %v7510_v9 }
 0x1a4   :  { %496 = vmatpush.bf16.xpose.msra.mxu0 %v487_v11  ;;  %v761_v42 = vsel %vm759_vm9, %v748_v38, 0 }
 0x1a6   :  { %v389_v13 = vpop.f32.mrf.mxu2 }
 0x1a7   :  { %v390_v14 = vadd.f32 %v389_v13, %v231_v5  ;;  %v403_v45 = vpop.f32.mrf.mxu3 }
 0x1a8   :  { %v7542_v50 = vadd.f32 %v403_v45, %v232_v25 }
 0x1a9   :  { %433 = vrot.lane.b32.xlu2 %v388_v7, %s7385_s14  ;;  %v478_v28 = vpack.c.bf16 %v390_v14, %v390_v14 }
 0x1aa   :  { %v752_v58 = vpack.c.bf16 %v7542_v50, %v7542_v50 }
 0x1ab   :  { %437 = vrot.lane.b32.xlu0 %v390_v14, %s7387_s16  ;;  %5547 = vmatmul.msk.bf16.vlgmr.msra.gmra.mxu0 %vm482_vm8, %v466_v16  ;;  %v563_v35 = vsel %vm482_vm8, %v478_v28, 0 }
 0x1ac   :  { %v837_v61 = vsel %vm759_vm9, %v752_v58, 0 }
 0x1b1   :  { %427 = vrot.lane.b32.xlu2 %v388_v7, %s7387_s16 }
 0x1b9   :  { %440 = vrot.lane.b32.xlu2 %v390_v14, %s7386_s15 }
 0x1c1   :  { %443 = vrot.lane.b32.xlu2 %v390_v14, %s7385_s14 }
 0x1c9   :  { %420 = vrot.lane.b32.xlu2 %v7510_v9, %s7386_s15 }
 0x1d1   :  { %417 = vrot.lane.b32.xlu2 %v7510_v9, %s7387_s16 }
 0x1fb   :  { %v431_v17 = vpop.permute.xlu2 %430 }
 0x1fc   :  { %v476_v18 = vpack.c.bf16 %v431_v17, %v431_v17 }
 0x1fe   :  { %v525_v20 = vsel %vm482_vm8, %v476_v18, 0 }
 0x1ff   :  { %534 = vmatpush.bf16.xpose.msra.mxu2 %v525_v20 }
 0x203   :  { %v434_v21 = vpop.permute.xlu2 %433 }
 0x204   :  { %v477_v22 = vpack.c.bf16 %v434_v21, %v434_v21 }
 0x206   :  { %v544_v23 = vsel %vm482_vm8, %v477_v22, 0 }
 0x207   :  { %553 = vmatpush.bf16.xpose.msrb.mxu3 %v544_v23 }
 0x20b   :  { %v428_v24 = vpop.permute.xlu2 %427 }
 0x20c   :  { %v475_v27 = vpack.c.bf16 %v428_v24, %v428_v24 }
 0x20d   :  { %v414_v29 = vpop.permute.xlu1 %413  ;;  %v411_v30 = vpop.permute.xlu0 %410 }
 0x20e   :  { %v469_v31 = vpack.c.bf16 %v414_v29, %v414_v29  ;;  %v468_v32 = vpack.c.bf16 %v411_v30, %v411_v30  ;;  %v506_v33 = vsel %vm482_vm8, %v475_v27, 0 }
 0x20f   :  { %515 = vmatpush.bf16.xpose.msrb.mxu0 %v506_v33 }
 0x210   :  { %5549 = vmatmul.msk.bf16.vlgmr.msra.gmra.mxu2 %vm482_vm8, %v468_v32  ;;  %5550 = vmatmul.msk.bf16.vlgmr.msrb.gmra.mxu3 %vm482_vm8, %v469_v31 }
 0x213   :  { %v441_v36 = vpop.permute.xlu2 %440 }
 0x214   :  { %v480_v37 = vpack.c.bf16 %v441_v36, %v441_v36 }
 0x215   :  { %v408_v39 = vpop.permute.xlu0 %407  ;;  %v424_v52 = vpop.permute.xlu1 %423 }
 0x216   :  { %v467_v40 = vpack.c.bf16 %v408_v39, %v408_v39  ;;  %v601_v41 = vsel %vm482_vm8, %v480_v37, 0  ;;  %v473_v56 = vpack.c.bf16 %v424_v52, %v424_v52 }
 0x217   :  { %572 = vmatpush.bf16.xpose.msra.mxu0 %v563_v35  ;;  %610 = vmatpush.bf16.xpose.msrb.mxu2 %v601_v41 }
 0x218   :  { %5548 = vmatmul.msk.bf16.vlgmr.msrb.gmra.mxu0 %vm482_vm8, %v467_v40 }
 0x21b   :  { %v444_v43 = vpop.permute.xlu2 %443 }
 0x21c   :  { %v481_v44 = vpack.c.bf16 %v444_v43, %v444_v43 }
 0x21d   :  { %v438_v46 = vpop.permute.xlu0 %437 }
 0x21e   :  { %v479_v48 = vpack.c.bf16 %v438_v46, %v438_v46  ;;  %v620_v49 = vsel %vm482_vm8, %v481_v44, 0 }
 0x21f   :  { %770 = vmatpush.bf16.msrb.mxu0 %v761_v42  ;;  %629 = vmatpush.bf16.xpose.msra.mxu3 %v620_v49 }
 0x220   :  { %v582_v51 = vsel %vm482_vm8, %v479_v48, 0 }
 0x221   :  { %591 = vmatpush.bf16.xpose.msrb.mxu1 %v582_v51 }
 0x223   :  { %v421_v55 = vpop.permute.xlu2 %420 }
 0x224   :  { %v472_v57 = vpack.c.bf16 %v421_v55, %v421_v55 }
 0x226   :  { %5553 = vmatmul.msk.bf16.vlgmr.msrb.gmra.mxu2 %vm482_vm8, %v472_v57  ;;  %5554 = vmatmul.msk.bf16.vlgmr.msra.gmra.mxu3 %vm482_vm8, %v473_v56 }
 0x228   :  { %v498_v60 = vpop.f32.mrf.mxu0  ;;  %5551 = vmatmul.msk.bf16.vlgmr.msra.gmra.mxu0 %vm482_vm8, %v470_v59 }
 0x229   :  { %v635_v1 = vmul.f32 0.17677669, %v498_v60  ;;  %846 = vmatpush.bf16.msra.mxu0 %v837_v61 }
 0x22b   :  { %v418_v3 = vpop.permute.xlu2 %417  ;;  %v7556_v4 = vadd.f32 %v635_v1, %v7553_v19 }
 0x22c   :  { %v471_v5 = vpack.c.bf16 %v418_v3, %v418_v3 }
 0x22d   :  { %v652_v6 = vsel %vm651_vm11, %v7556_v4, -inf }
 0x22e   :  { %5552 = vmatmul.msk.bf16.vlgmr.msrb.gmra.mxu1 %vm482_vm8, %v471_v5  ;;  %653 = vmax.xlane.f32.xlu1 %v652_v6 }
 0x230   :  { %v500_v7 = vpop.f32.mrf.mxu0 }
 0x293   :  { %v536_v8 = vpop.f32.mrf.mxu2  ;;  %v555_v9 = vpop.f32.mrf.mxu3 }
 0x294   :  { %v637_v10 = vmul.f32 0.17677669, %v536_v8  ;;  %v638_v11 = vmul.f32 0.17677669, %v555_v9 }
 0x295   :  { %v517_v13 = vpop.f32.mrf.mxu0 }
 0x296   :  { %v636_v14 = vmul.f32 0.17677669, %v517_v13  ;;  %v646_v16 = vadd.f32 %v638_v11, %v7553_v19  ;;  %v645_v17 = vadd.f32 %v637_v10, %v7553_v19 }
 0x298   :  { %v661_v18 = vsel %vm651_vm11, %v646_v16, -inf  ;;  %v658_v20 = vsel %vm651_vm11, %v645_v17, -inf  ;;  %v644_v21 = vadd.f32 %v636_v14, %v7553_v19 }
 0x299   :  { %662 = vmax.xlane.f32.xlu0 %v661_v18  ;;  %659 = vmax.xlane.f32.xlu1 %v658_v20 }
 0x29a   :  { %v655_v22 = vsel %vm651_vm11, %v644_v21, -inf }
 0x29b   :  { %v538_v23 = vpop.f32.mrf.mxu2  ;;  %v557_v24 = vpop.f32.mrf.mxu3  ;;  %656 = vmax.xlane.f32.xlu2 %v655_v22 }
 0x29d   :  { %v519_v25 = vpop.f32.mrf.mxu0 }
 0x2a1   :  { %v654_v47 = vpop.xlane.xlu1 %653 }
 0x2a5   :  { %v574_v26 = vpop.f32.mrf.mxu0 }
 0x2a6   :  { %v639_v27 = vmul.f32 0.17677669, %v574_v26 }
 0x2a8   :  { %v7568_v28 = vadd.f32 %v639_v27, %v7553_v19 }
 0x2a9   :  { %v612_v29 = vpop.f32.mrf.mxu2  ;;  %v631_v30 = vpop.f32.mrf.mxu3 }
 0x2aa   :  { %v641_v31 = vmul.f32 0.17677669, %v612_v29  ;;  %v664_v32 = vsel %vm651_vm11, %v7568_v28, -inf  ;;  %v642_v41 = vmul.f32 0.17677669, %v631_v30 }
 0x2ab   :  { %v593_v33 = vpop.f32.mrf.mxu1  ;;  %665 = vmax.xlane.f32.xlu1 %v664_v32  ;;  %v676_v32 = vsub.f32 %v7556_v4, %v654_v47 }
 0x2ac   :  { %v649_v36 = vadd.f32 %v641_v31, %v7553_v19  ;;  %v650_v42 = vadd.f32 %v642_v41, %v7553_v19  ;;  %v640_v43 = vmul.f32 0.17677669, %v593_v33 }
 0x2ad   :  { %450 = vrot.lane.b32.xlu0 %v7531_v34, %s7386_s15  ;;  %v576_v35 = vpop.f32.mrf.mxu0  ;;  %v684_v33 = vmul.f32 1.442695, %v676_v32 }
 0x2ae   :  { %v670_v39 = vsel %vm651_vm11, %v649_v36, -inf  ;;  %v673_v44 = vsel %vm651_vm11, %v650_v42, -inf  ;;  %v648_v45 = vadd.f32 %v640_v43, %v7553_v19 }
 0x2b0   :  { %v667_v46 = vsel %vm651_vm11, %v648_v45, -inf }
 0x2b1   :  { %v614_v37 = vpop.f32.mrf.mxu2  ;;  %v633_v38 = vpop.f32.mrf.mxu3 }
 0x2b3   :  { %v595_v40 = vpop.f32.mrf.mxu1  ;;  %453 = vrot.lane.b32.xlu2 %v7531_v34, %s7385_s14  ;;  %671 = vmax.xlane.f32.xlu1 %v670_v39 }
 0x2cc   :  { %447 = vrot.lane.b32.xlu1 %v7531_v34, %s7387_s16 }
 0x2d7   :  { %674 = vmax.xlane.f32.xlu0 %v673_v44 }
 0x2dc   :  { %668 = vmax.xlane.f32.xlu2 %v667_v46 }
 0x30c   :  { %v663_v48 = vpop.xlane.xlu0 %662  ;;  %v660_v49 = vpop.xlane.xlu1 %659 }
 0x30d   :  { %v679_v51 = vsub.f32 %v646_v16, %v663_v48  ;;  %v678_v52 = vsub.f32 %v645_v17, %v660_v49 }
 0x30e   :  { %v657_v53 = vpop.xlane.xlu2 %656 }
 0x30f   :  { %v690_v54 = vmul.f32 1.442695, %v679_v51  ;;  %v688_v34 = vmul.f32 1.442695, %v678_v52  ;;  %v677_v55 = vsub.f32 %v644_v21, %v657_v53  ;;  %v5685_v53 = vld [vmem:[#allocation2 + $0x2b4] sm:$0xf] }
 0x311   :  { %7147 = vpow2.f32 %v690_v54  ;;  %v686_v56 = vmul.f32 1.442695, %v677_v55  ;;  %v6709_v54 = vld [vmem:[#allocation2 + $0x2e0] sm:$0xf0] }
 0x312   :  { %7149 = vpow2.f32 %v688_v34 }
 0x313   :  { %7151 = vpow2.f32 %v686_v56 }
 0x316   :  { %v454_v57 = vpop.permute.xlu2 %453 }
 0x317   :  { %v7584_v58 = vpop.eup %7147  ;;  %v751_v59 = vpack.c.bf16 %v454_v57, %v454_v57  ;;  %v5686_v57 = vor.u32 %v6709_v54, %v5685_v53  ;;  %v6698_v53 = vld [vmem:[#allocation2 + $0xd8] sm:$0xf]  ;;  %v5647_v54 = vld [vmem:[#allocation2 + $0x104] sm:$0xf0] }
 0x318   :  { %v7586_v60 = vpop.eup %7149  ;;  %v709_v61 = vsel %vm651_vm11, %v7584_v58, 0.0 }
 0x319   :  { %v7590_v62 = vpop.eup %7151  ;;  %v818_v1 = vsel %vm759_vm9, %v751_v59, 0  ;;  %v706_v3 = vsel %vm651_vm11, %v7586_v60, 0.0  ;;  %710 = vadd.xlane.f32.xlu2 %v709_v61  ;;  %v6707_v59 = vld [vmem:[#allocation2 + $0x280] sm:$0xf0] }
 0x31a   :  { %707 = vadd.xlane.f32.xlu0 %v706_v3  ;;  %827 = vmatpush.bf16.msrb.mxu3 %v818_v1  ;;  %v703_v5 = vsel %vm651_vm11, %v7590_v62, 0.0  ;;  %v5669_v1 = vld [vmem:[#allocation2 + $0x1f4] sm:$0xf]  ;;  %v6705_v3 = vld [vmem:[#allocation2 + $0x220] sm:$0xf0] }
 0x31b   :  { %704 = vadd.xlane.f32.xlu1 %v703_v5  ;;  %v5670_v5 = vor.u32 %v6705_v3, %v5669_v1 }
 0x31e   :  { %v666_v6 = vpop.xlane.xlu1 %665 }
 0x31f   :  { %v451_v7 = vpop.permute.xlu0 %450  ;;  %v680_v37 = vsub.f32 %v7568_v28, %v666_v6  ;;  %v5661_v6 = vld [vmem:[#allocation2 + $0x194] sm:$0xf] }
 0x320   :  { %v750_v8 = vpack.c.bf16 %v451_v7, %v451_v7  ;;  %v6703_v7 = vld [vmem:[#allocation2 + $0x1c0] sm:$0xf0] }
 0x321   :  { %v692_v38 = vmul.f32 1.442695, %v680_v37  ;;  %v6706_v37 = vld [vmem:[#allocation2 + $0x258] sm:$0xf] }
 0x322   :  { %v799_v9 = vsel %vm759_vm9, %v750_v8, 0  ;;  %v5662_v8 = vor.u32 %v6703_v7, %v5661_v6 }
 0x323   :  { %808 = vmatpush.bf16.msra.mxu2 %v799_v9  ;;  %v5653_v9 = vld [vmem:[#allocation2 + $0x134] sm:$0xf] }
 0x326   :  { %v672_v10 = vpop.xlane.xlu1 %671 }
 0x327   :  { %v682_v11 = vsub.f32 %v649_v36, %v672_v10  ;;  %v6701_v10 = vld [vmem:[#allocation2 + $0x160] sm:$0xf0] }
 0x329   :  { %v696_v13 = vmul.f32 1.442695, %v682_v11 }
 0x32b   :  { %7153 = vpow2.f32 %v696_v13  ;;  %v5654_v13 = vor.u32 %v6701_v10, %v5653_v9 }
 0x331   :  { %v7154_v14 = vpop.eup %7153 }
 0x332   :  { %v718_v16 = vsel %vm651_vm11, %v7154_v14, 0.0 }
 0x333   :  { %719 = vadd.xlane.f32.xlu0 %v718_v16  ;;  %v6699_v16 = vld [vmem:[#allocation2 + $0x100] sm:$0xf0] }
 0x33e   :  { %v448_v17 = vpop.permute.xlu1 %447 }
 0x33f   :  { %v749_v18 = vpack.c.bf16 %v448_v17, %v448_v17 }
 0x341   :  { %v780_v20 = vsel %vm759_vm9, %v749_v18, 0  ;;  %v5637_v18 = vld [vmem:[#allocation2 + $0x74] sm:$0xf] }
 0x342   :  { %789 = vmatpush.bf16.msra.mxu1 %v780_v20  ;;  %v6697_v20 = vld [vmem:[#allocation2 + $0xa0] sm:$0xf0] }
 0x347   :  { %460 = vrot.lane.b32.xlu0 %v7542_v50, %s7386_s15 }
 0x34a   :  { %v675_v21 = vpop.xlane.xlu0 %674 }
 0x34b   :  { %v683_v22 = vsub.f32 %v650_v42, %v675_v21  ;;  %v6708_v21 = vld [vmem:[#allocation2 + $0x2b8] sm:$0xf] }
 0x34d   :  { %v698_v23 = vmul.f32 1.442695, %v683_v22  ;;  %v5687_v22 = vld [vmem:[#allocation2 + $0x2e4] sm:$0xf0] }
 0x34e   :  { %v5690_v32 = vor.u32 %v6708_v21, %v5687_v22  ;;  %v5593_v22 = vld [vmem:[#allocation2 + $0x2ac] sm:$0xf] }
 0x34f   :  { %7155 = vpow2.f32 %v698_v23  ;;  %v669_v24 = vpop.xlane.xlu2 %668 }
 0x350   :  { %v681_v25 = vsub.f32 %v648_v45, %v669_v24 }
 0x352   :  { %v694_v26 = vmul.f32 1.442695, %v681_v25  ;;  %v5638_v25 = vor.u32 %v6697_v20, %v5637_v18 }
 0x354   :  { %7157 = vpow2.f32 %v694_v26  ;;  %v7121_v26 = vld [vmem:[%s8591_s3] ss:$0 sm:$0xff] }
 0x355   :  { %v7602_v27 = vpop.eup %7155  ;;  %7159 = vpow2.f32 %v684_v33  ;;  %v5629_v33 = vld [vmem:[#allocation2 + $0x14] sm:$0xf] }
 0x356   :  { %v721_v29 = vsel %vm651_vm11, %v7602_v27, 0.0  ;;  %7161 = vpow2.f32 %v692_v38  ;;  %v5679_v38 = vld [vmem:[#allocation2 + $0x284] sm:$0xf0] }
 0x357   :  { %722 = vadd.xlane.f32.xlu2 %v721_v29 }
 0x35a   :  { %v7606_v30 = vpop.eup %7157 }
 0x35b   :  { %v715_v31 = vsel %vm651_vm11, %v7606_v30, 0.0  ;;  %v7611_v35 = vpop.eup %7159 }
 0x35c   :  { %716 = vadd.xlane.f32.xlu1 %v715_v31  ;;  %v700_v36 = vsel %vm651_vm11, %v7611_v35, 0.0  ;;  %v7620_v41 = vpop.eup %7161 }
 0x35d   :  { %v712_v48 = vsel %vm651_vm11, %v7620_v41, 0.0 }
 0x36f   :  { %463 = vrot.lane.b32.xlu2 %v7542_v50, %s7385_s14 }
 0x371   :  { %701 = vadd.xlane.f32.xlu0 %v700_v36  ;;  %v6695_v36 = vld [vmem:[#allocation2 + $0x40] sm:$0xf0] }
 0x375   :  { %457 = vrot.lane.b32.xlu1 %v7542_v50, %s7387_s16 }
 0x38c   :  { %v711_v39 = vpop.xlane.xlu2 %710 }
 0x38d   :  { %v708_v4 = vpop.xlane.xlu0 %707  ;;  %7163 = vrcp.f32 %v711_v39 }
 0x38e   :  { %7165 = vrcp.f32 %v708_v4  ;;  %v705_v40 = vpop.xlane.xlu1 %704  ;;  %v5630_v4 = vor.u32 %v6695_v36, %v5629_v33  ;;  %v5581_v33 = vld [vmem:[#allocation2 + $0x18c] sm:$0xf]  ;;  %v6682_v36 = vld [vmem:[#allocation2 + $0x1b8] sm:$0xf0] }
 0x38f   :  { %7167 = vrcp.f32 %v705_v40  ;;  %v117_v40 = vadd.f32 %v7121_v26, %v7493_v15 }
 0x393   :  { %v7164_v42 = vpop.eup %7163 }
 0x394   :  { %v7166_v43 = vpop.eup %7165  ;;  %v735_v44 = vmul.f32 %v7164_v42, %v7584_v58  ;;  %v5677_v58 = vld [vmem:[#allocation2 + $0x254] sm:$0xf]  ;;  %v119_v42 = vadd.f32 %v7121_v26, %v7495_v63  ;;  %v6700_v63 = vld [vmem:[#allocation2 + $0x138] sm:$0xf] }
 0x395   :  { %v7168_v45 = vpop.eup %7167  ;;  %v734_v46 = vmul.f32 %v7166_v43, %v7586_v60 }
 0x396   :  { %v743_v50 = vpack.c.bf16 %v735_v44, %v735_v44  ;;  %v733_v28 = vmul.f32 %v7168_v45, %v7590_v62  ;;  %v5678_v62 = vor.u32 %v6707_v59, %v5677_v58  ;;  %v5682_v44 = vor.u32 %v6706_v37, %v5679_v38  ;;  %v6704_v45 = vld [vmem:[#allocation2 + $0x1f8] sm:$0xf] }
 0x397   :  { %v742_v47 = vpack.c.bf16 %v734_v46, %v734_v46  ;;  %v7640_v46 = vpack.c.bf16 %v119_v42, %v117_v40  ;;  %v5650_v58 = vor.u32 %v6698_v53, %v5647_v54  ;;  %v5582_v37 = vor.u32 %v6682_v36, %v5581_v33  ;;  %v5573_v42 = vld [vmem:[#allocation2 + $0xcc] sm:$0xf] }
 0x398   :  { %v741_v49 = vpack.c.bf16 %v733_v28, %v733_v28  ;;  %5558 = vmatmul.msk.bf16.vlgmr.msrb.gmra.mxu3 %vm651_vm11, %v743_v50  ;;  %713 = vadd.xlane.f32.xlu2 %v712_v48  ;;  %v5663_v48 = vld [vmem:[#allocation2 + $0x1c4] sm:$0xf0] }
 0x399   :  { %5557 = vmatmul.msk.bf16.vlgmr.msra.gmra.mxu2 %vm651_vm11, %v742_v47  ;;  %v6702_v47 = vld [vmem:[#allocation2 + $0x198] sm:$0xf] }
 0x39a   :  { %5556 = vmatmul.msk.bf16.vlgmr.msra.gmra.mxu1 %vm651_vm11, %v741_v49  ;;  %v5666_v15 = vor.u32 %v6702_v47, %v5663_v48  ;;  %v5655_v49 = vld [vmem:[#allocation2 + $0x164] sm:$0xf0]  ;;  %v5565_v47 = vld [vmem:[#allocation2 + $0xc] sm:$0xf]  ;;  %v6678_v48 = vld [vmem:[#allocation2 + $0x38] sm:$0xf0] }
 0x3a6   :  { %v720_v51 = vpop.xlane.xlu0 %719 }
 0x3a7   :  { %7169 = vrcp.f32 %v720_v51  ;;  %v5658_v51 = vor.u32 %v6700_v63, %v5655_v49  ;;  %v1176_v49 = vld [vmem:[%s8594_s6 + $0x9] sm:$0x3] }
 0x3ad   :  { %v7170_v52 = vpop.eup %7169 }
 0x3ae   :  { %v738_v55 = vmul.f32 %v7170_v52, %v7154_v14  ;;  %v5645_v14 = vld [vmem:[#allocation2 + $0xd4] sm:$0xf] }
 0x3af   :  { %v5646_v17 = vor.u32 %v6699_v16, %v5645_v14 }
 0x3b0   :  { %v746_v61 = vpack.c.bf16 %v738_v55, %v738_v55  ;;  %v122_v55 = vadd.f32 %v7121_v26, %v7497_v0 }
 0x3b9   :  { %v461_v34 = vpop.permute.xlu0 %460 }
 0x3ba   :  { %v754_v56 = vpack.c.bf16 %v461_v34, %v461_v34 }
 0x3bc   :  { %v875_v60 = vsel %vm759_vm9, %v754_v56, 0  ;;  %v124_v56 = vadd.f32 %v7121_v26, %v7505_v2  ;;  %v6694_v2 = vld [vmem:[#allocation2 + $0x18] sm:$0xf]  ;;  %v6684_v26 = vld [vmem:[#allocation2 + $0x278] sm:$0xf0] }
 0x3bd   :  { %884 = vmatpush.bf16.msrb.mxu2 %v875_v60 }
 0x3c0   :  { %5561 = vmatmul.msk.bf16.vlgmr.msrb.gmra.mxu2 %vm651_vm11, %v746_v61  ;;  %v6696_v61 = vld [vmem:[#allocation2 + $0x78] sm:$0xf] }
 0x3c1   :  { %1262 = vmatpush.bf16.msra.mxu2 %v5686_v57 }
 0x3c5   :  { %1263 = vmatpush.bf16.msra.mxu2 %v5678_v62  ;;  %v5639_v62 = vld [vmem:[#allocation2 + $0xa4] sm:$0xf0] }
 0x3c6   :  { %v5642_v6 = vor.u32 %v6696_v61, %v5639_v62 }
 0x3c9   :  { %1264 = vmatpush.bf16.msra.mxu2 %v5670_v5  ;;  %v7647_v5 = vpack.c.bf16 %v124_v56, %v122_v55 }
 0x3ca   :  { %v723_v11 = vpop.xlane.xlu2 %722 }
 0x3cb   :  { %7171 = vrcp.f32 %v723_v11 }
 0x3cd   :  { %1265 = vmatpush.bf16.msra.mxu2 %v5662_v8  ;;  %v5631_v8 = vld [vmem:[#allocation2 + $0x44] sm:$0xf0] }
 0x3cf   :  { %v717_v28 = vpop.xlane.xlu1 %716 }
 0x3d0   :  { %7173 = vrcp.f32 %v717_v28 }
 0x3d1   :  { %1266 = vmatpush.bf16.msra.mxu2 %v5654_v13  ;;  %v7172_v23 = vpop.eup %7171 }
 0x3d2   :  { %v464_v24 = vpop.permute.xlu2 %463  ;;  %v739_v29 = vmul.f32 %v7172_v23, %v7602_v27  ;;  %v5671_v27 = vld [vmem:[#allocation2 + $0x224] sm:$0xf0]  ;;  %v6685_v23 = vld [vmem:[#allocation2 + $0x2d8] sm:$0xf0] }
 0x3d3   :  { %v755_v31 = vpack.c.bf16 %v464_v24, %v464_v24  ;;  %v5674_v50 = vor.u32 %v6704_v45, %v5671_v27  ;;  %v5589_v24 = vld [vmem:[#allocation2 + $0x24c] sm:$0xf] }
 0x3d4   :  { %v747_v43 = vpack.c.bf16 %v739_v29, %v739_v29  ;;  %v5590_v29 = vor.u32 %v6684_v26, %v5589_v24  ;;  %v5569_v27 = vld [vmem:[#allocation2 + $0x6c] sm:$0xf] }
 0x3d5   :  { %1267 = vmatpush.bf16.msra.mxu2 %v5646_v17  ;;  %v894_v39 = vsel %vm759_vm9, %v755_v31, 0  ;;  %v6683_v31 = vld [vmem:[#allocation2 + $0x218] sm:$0xf0] }
 0x3d6   :  { %903 = vmatpush.bf16.msra.mxu3 %v894_v39  ;;  %v7174_v34 = vpop.eup %7173  ;;  %v5577_v39 = vld [vmem:[#allocation2 + $0x12c] sm:$0xf] }
 0x3d7   :  { %v737_v59 = vmul.f32 %v7174_v34, %v7606_v30  ;;  %v5634_v30 = vor.u32 %v6694_v2, %v5631_v8 }
 0x3d9   :  { %1268 = vmatpush.bf16.msra.mxu2 %v5638_v25  ;;  %5562 = vmatmul.msk.bf16.vlgmr.msra.gmra.mxu3 %vm651_vm11, %v747_v43  ;;  %v745_v7 = vpack.c.bf16 %v737_v59, %v737_v59  ;;  %v5594_v25 = vor.u32 %v6685_v23, %v5593_v22  ;;  %v6680_v43 = vld [vmem:[#allocation2 + $0xf8] sm:$0xf0] }
 0x3da   :  { %1281 = vmatpush.bf16.msrb.mxu3 %v5690_v32 }
 0x3dd   :  { %1269 = vmatpush.bf16.msra.mxu2 %v5630_v4  ;;  %v6681_v4 = vld [vmem:[#allocation2 + $0x158] sm:$0xf0] }
 0x3de   :  { %1282 = vmatpush.bf16.msrb.mxu3 %v5682_v44  ;;  %v5578_v40 = vor.u32 %v6681_v4, %v5577_v39  ;;  %v5574_v44 = vor.u32 %v6680_v43, %v5573_v42 }
 0x3e0   :  { %1270 = vmatmul.bf16.vlgmr.msra.gmra.mxu2 %v7640_v46 }
 0x3e2   :  { %1283 = vmatpush.bf16.msrb.mxu3 %v5674_v50  ;;  %v6679_v50 = vld [vmem:[#allocation2 + $0x98] sm:$0xf0] }
 0x3e3   :  { %v5570_v28 = vor.u32 %v6679_v50, %v5569_v27 }
 0x3e4   :  { %v702_v52 = vpop.xlane.xlu0 %701 }
 0x3e5   :  { %7175 = vrcp.f32 %v702_v52  ;;  %v1178_v52 = vperm.slane %v1176_v49, 0 }
 0x3e6   :  { %1284 = vmatpush.bf16.msrb.mxu3 %v5666_v15  ;;  %v5566_v15 = vor.u32 %v6678_v48, %v5565_v47 }
 0x3e7   :  { %v458_v57 = vpop.permute.xlu1 %457 }
 0x3e8   :  { %v753_v60 = vpack.c.bf16 %v458_v57, %v458_v57 }
 0x3ea   :  { %1285 = vmatpush.bf16.msrb.mxu3 %v5658_v51  ;;  %v856_v1 = vsel %vm759_vm9, %v753_v60, 0 }
 0x3eb   :  { %v7176_v3 = vpop.eup %7175  ;;  %865 = vmatpush.bf16.msrb.mxu1 %v856_v1 }
 0x3ec   :  { %v732_v0 = vmul.f32 %v7176_v3, %v7611_v35 }
 0x3ee   :  { %1286 = vmatpush.bf16.msrb.mxu3 %v5650_v58  ;;  %v740_v9 = vpack.c.bf16 %v732_v0, %v732_v0  ;;  %5560 = vmatmul.msk.bf16.vlgmr.msrb.gmra.mxu1 %vm651_vm11, %v745_v7 }
 0x3f0   :  { %1275 = vmatmul.bf16.gmra.mxu2 %v7647_v5  ;;  %5555 = vmatmul.msk.bf16.vlgmr.msrb.gmra.mxu0 %vm651_vm11, %v740_v9 }
 0x3f1   :  { %1009 = vmatpush.bf16.msrb.mxu0 %v5594_v25 }
 0x3f2   :  { %1287 = vmatpush.bf16.msrb.mxu3 %v5642_v6 }
 0x3f5   :  { %1010 = vmatpush.bf16.msrb.mxu0 %v5590_v29 }
 0x3f6   :  { %1288 = vmatpush.bf16.msrb.mxu3 %v5634_v30 }
 0x3f9   :  { %1289 = vmatmul.bf16.vlgmr.msrb.gmra.mxu3 %v7640_v46 }
 0x409   :  { %1294 = vmatmul.bf16.gmra.mxu3 %v7647_v5 }
 0x40b   :  { %v714_v10 = vpop.xlane.xlu2 %713 }
 0x40c   :  { %7177 = vrcp.f32 %v714_v10 }
 0x412   :  { %v7178_v11 = vpop.eup %7177 }
 0x413   :  { %v736_v35 = vmul.f32 %v7178_v11, %v7620_v41  ;;  %v5585_v41 = vld [vmem:[#allocation2 + $0x1ec] sm:$0xf] }
 0x414   :  { %v5586_v32 = vor.u32 %v6683_v31, %v5585_v41 }
 0x415   :  { %v744_v13 = vpack.c.bf16 %v736_v35, %v736_v35 }
 0x416   :  { %1011 = vmatpush.bf16.msrb.mxu0 %v5586_v32 }
 0x417   :  { %v791_v14 = vpop.f32.mrf.mxu1  ;;  %5559 = vmatmul.msk.bf16.vlgmr.msra.gmra.mxu0 %vm651_vm11, %v744_v13  ;;  %v1179_v13 = vperm.slane %v1176_v49, 1 }
 0x41a   :  { %1012 = vmatpush.bf16.msrb.mxu0 %v5582_v37 }
 0x41b   :  { %v7657_v16 = vpop.f32.mrf.mxu3 }
 0x41c   :  { %v7659_v17 = vpop.f32.mrf.mxu2 }
 0x41e   :  { %1013 = vmatpush.bf16.msrb.mxu0 %v5578_v40 }
 0x41f   :  { %v793_v18 = vpop.f32.mrf.mxu1 }
 0x422   :  { %1014 = vmatpush.bf16.msrb.mxu0 %v5574_v44 }
 0x423   :  { %v831_v20 = vpop.f32.mrf.mxu3 }
 0x424   :  { %v812_v21 = vpop.f32.mrf.mxu2 }
 0x426   :  { %1015 = vmatpush.bf16.msrb.mxu0 %v5570_v28 }
 0x42a   :  { %1016 = vmatpush.bf16.msrb.mxu0 %v5566_v15 }
 0x443   :  { %v886_v38 = vpop.f32.mrf.mxu2 }
 0x444   :  { %v6934_v2 = vpack.i.bf16 %v886_v38, %v7659_v17 }
 0x44b   :  { %v888_v45 = vpop.f32.mrf.mxu2 }
 0x45c   :  { %v905_v63 = vpop.f32.mrf.mxu3 }
 0x45d   :  { %v6939_v18 = vpack.i.bf16 %v905_v63, %v7657_v16 }
 0x463   :  { %v1271_v51 = vpop.f32.mrf.mxu2 }
 0x464   :  { %v907_v53 = vpop.f32.mrf.mxu3  ;;  %v1272_v54 = vadd.f32 %v1271_v51, %v1178_v52 }
 0x466   :  { %v1408_v56 = vpack.c.bf16 %v1272_v54, %v1272_v54 }
 0x468   :  { %v1426_v62 = vunpack.c.l.b16 %v1408_v56 }
 0x46b   :  { %v1273_v34 = vpop.f32.mrf.mxu2  ;;  %v867_v57 = vpop.f32.mrf.mxu1 }
 0x46c   :  { %v1274_v55 = vadd.f32 %v1273_v34, %v1178_v52  ;;  %v6929_v60 = vpack.i.bf16 %v867_v57, %v791_v14  ;;  %v7122_v34 = vld [vmem:[%s8594_s6 + $0x5] ss:$0 sm:$0xff] }
 0x46d   :  { %v772_v61 = vpop.f32.mrf.mxu0  ;;  %v7327_v57 = vld [vmem:[%s8588_s0] sm:$0xff] }
 0x46e   :  { %v1409_v58 = vpack.c.bf16 %v1274_v55, %v1274_v55  ;;  %v7664_v59 = vpack.i.bf16 %v1274_v55, %v1272_v54  ;;  %6930 = vrot.lane.b32.xlu1 %v6929_v60, %s7385_s14 }
 0x470   :  { %v1427_v1 = vunpack.c.l.b16 %v1409_v58 }
 0x472   :  { %v1428_v3 = vpack.c.b16 %v1427_v1, %v1426_v62  ;;  %v7328_v62 = vld [vmem:[%s8588_s0 + $0x8] sm:$0xff] }
 0x473   :  { %v1276_v6 = vpop.f32.mrf.mxu2  ;;  %v869_v0 = vpop.f32.mrf.mxu1 }
 0x474   :  { %v1433_v7 = vsel %vm482_vm8, %v1428_v3, 0  ;;  %v7669_v8 = vadd.f32 %v1276_v6, %v1178_v52  ;;  %v5625_v0 = vld [vmem:[#allocation2 + $0x2b0] sm:$0xf] }
 0x475   :  { %1442 = vmatpush.bf16.xpose.msra.mxu0 %v1433_v7  ;;  %v774_v9 = vpop.f32.mrf.mxu0 }
 0x476   :  { %6935 = vrot.lane.b32.xlu1 %v6934_v2, %s7386_s15  ;;  %v1416_v35 = vpack.c.bf16 %v7669_v8, %v7669_v8  ;;  %v6693_v2 = vld [vmem:[#allocation2 + $0x2dc] sm:$0xf0] }
 0x477   :  { %v5626_v9 = vor.u32 %v6693_v2, %v5625_v0 }
 0x478   :  { %v1522_v20 = vunpack.c.l.b16 %v1416_v35 }
 0x479   :  { %1146 = vmatpush.bf16.msra.mxu1 %v5626_v9 }
 0x47b   :  { %v1278_v30 = vpop.f32.mrf.mxu2 }
 0x47c   :  { %v7672_v10 = vadd.f32 %v1278_v30, %v1178_v52  ;;  %v1290_v11 = vpop.f32.mrf.mxu3 }
 0x47d   :  { %v1291_v21 = vadd.f32 %v1290_v11, %v1179_v13 }
 0x47e   :  { %v1417_v14 = vpack.c.bf16 %v7672_v10, %v7672_v10  ;;  %6940 = vrot.lane.b32.xlu1 %v6939_v18, %s7387_s16  ;;  %v5621_v18 = vld [vmem:[#allocation2 + $0x250] sm:$0xf] }
 0x47f   :  { %v1721_v25 = vpack.c.bf16 %v1291_v21, %v1291_v21 }
 0x480   :  { %v1523_v17 = vunpack.c.l.b16 %v1417_v14 }
 0x481   :  { %v1739_v31 = vunpack.c.l.b16 %v1721_v25  ;;  %v6690_v25 = vld [vmem:[#allocation2 + $0x1bc] sm:$0xf0] }
 0x482   :  { %v1524_v22 = vpack.c.b16 %v1523_v17, %v1522_v20  ;;  %v6692_v20 = vld [vmem:[#allocation2 + $0x27c] sm:$0xf0] }
 0x483   :  { %v5622_v17 = vor.u32 %v6692_v20, %v5621_v18  ;;  %v7123_v18 = vld [vmem:[%s8594_s6 + $0x6] ss:$0 sm:$0xff] }
 0x484   :  { %v1292_v23 = vpop.f32.mrf.mxu3  ;;  %v1529_v24 = vsel %vm482_vm8, %v1524_v22, 0  ;;  %v6691_v22 = vld [vmem:[#allocation2 + $0x21c] sm:$0xf0] }
 0x485   :  { %v1293_v26 = vadd.f32 %v1292_v23, %v1179_v13  ;;  %1538 = vmatpush.bf16.xpose.msrb.mxu2 %v1529_v24  ;;  %1147 = vmatpush.bf16.msra.mxu1 %v5622_v17  ;;  %v5613_v24 = vld [vmem:[#allocation2 + $0x190] sm:$0xf] }
 0x487   :  { %v1722_v29 = vpack.c.bf16 %v1293_v26, %v1293_v26  ;;  %v7681_v41 = vpack.i.bf16 %v1293_v26, %v1291_v21  ;;  %v5617_v21 = vld [vmem:[#allocation2 + $0x1f0] sm:$0xf]  ;;  %v5614_v26 = vor.u32 %v6690_v25, %v5613_v24 }
 0x488   :  { %v5618_v23 = vor.u32 %v6691_v22, %v5617_v21 }
 0x489   :  { %v1740_v32 = vunpack.c.l.b16 %v1722_v29  ;;  %v5609_v29 = vld [vmem:[#allocation2 + $0x130] sm:$0xf] }
 0x48a   :  { %1148 = vmatpush.bf16.msra.mxu1 %v5618_v23 }
 0x48b   :  { %v1741_v33 = vpack.c.b16 %v1740_v32, %v1739_v31  ;;  %v6689_v31 = vld [vmem:[#allocation2 + $0x15c] sm:$0xf0] }
 0x48c   :  { %v1295_v36 = vpop.f32.mrf.mxu3  ;;  %v5610_v32 = vor.u32 %v6689_v31, %v5609_v29  ;;  %v7124_v29 = vld [vmem:[%s8594_s6 + $0x7] ss:$0 sm:$0xff] }
 0x48d   :  { %1753 = vmatpush.bf16.msra.mxu2 %v1741_v33  ;;  %v7683_v37 = vadd.f32 %v1295_v36, %v1179_v13  ;;  %v5605_v33 = vld [vmem:[#allocation2 + $0xd0] sm:$0xf]  ;;  %v6688_v36 = vld [vmem:[#allocation2 + $0xfc] sm:$0xf0] }
 0x48e   :  { %1149 = vmatpush.bf16.msra.mxu1 %v5614_v26 }
 0x492   :  { %1150 = vmatpush.bf16.msra.mxu1 %v5610_v32 }
 0x494   :  { %v1297_v16 = vpop.f32.mrf.mxu3  ;;  %v848_v39 = vpop.f32.mrf.mxu0 }
 0x495   :  { %v7685_v38 = vadd.f32 %v1297_v16, %v1179_v13  ;;  %v5606_v16 = vor.u32 %v6688_v36, %v5605_v33 }
 0x497   :  { %v7689_v4 = vpack.i.bf16 %v7685_v38, %v7683_v37  ;;  %1151 = vmatpush.bf16.msra.mxu1 %v5606_v16 }
 0x49c   :  { %v850_v40 = vpop.f32.mrf.mxu0 }
 0x49d   :  { %v6687_v40 = vld [vmem:[#allocation2 + $0x9c] sm:$0xf0] }
 0x4e0   :  { %v6931_v42 = vpop.permute.xlu1 %6930 }
 0x4e1   :  { %v6933_v44 = vunpack.i.h.bf16 %v6931_v42  ;;  %v6932_v45 = vunpack.i.l.bf16 %v6931_v42 }
 0x4e3   :  { %v921_v47 = vsel %vm482_vm8, %v772_v61, %v6932_v45  ;;  %v937_v48 = vsel %vm482_vm8, %v848_v39, %v6933_v44  ;;  %v5601_v39 = vld [vmem:[#allocation2 + $0x70] sm:$0xf]  ;;  %v6686_v44 = vld [vmem:[#allocation2 + $0x3c] sm:$0xf0] }
 0x4e4   :  { %v5602_v42 = vor.u32 %v6687_v40, %v5601_v39 }
 0x4e6   :  { %1152 = vmatpush.bf16.msra.mxu1 %v5602_v42 }
 0x4e8   :  { %v6936_v43 = vpop.permute.xlu1 %6935 }
 0x4e9   :  { %v6938_v27 = vunpack.i.h.bf16 %v6936_v43  ;;  %v6937_v50 = vunpack.i.l.bf16 %v6936_v43  ;;  %v5597_v43 = vld [vmem:[#allocation2 + $0x10] sm:$0xf] }
 0x4ea   :  { %v5598_v45 = vor.u32 %v6686_v44, %v5597_v43 }
 0x4eb   :  { %v922_v49 = vsel %vm100_vm1, %v921_v47, %v6937_v50  ;;  %v938_v51 = vsel %vm100_vm1, %v937_v48, %v6938_v27 }
 0x4ec   :  { %1153 = vmatpush.bf16.msra.mxu1 %v5598_v45 }
 0x4f0   :  { %v6941_v28 = vpop.permute.xlu1 %6940 }
 0x4f1   :  { %v6943_v15 = vunpack.i.h.bf16 %v6941_v28  ;;  %v6942_v63 = vunpack.i.l.bf16 %v6941_v28 }
 0x4f3   :  { %v924_v52 = vsel %vm923_vm12, %v922_v49, %v6942_v63  ;;  %v939_v53 = vsel %vm923_vm12, %v938_v51, %v6943_v15 }
 0x4f4   :  { %v940_v54 = vpack.c.bf16 %v939_v53, %v924_v52 }
 0x4f6   :  { %1017 = vmatmul.bf16.vlgmr.msrb.gmra.mxu0 %v940_v54 }
 0x573   :  { %v1018_v55 = vpop.f32.mrf.mxu0 }
 0x574   :  { %v1019_v56 = vadd.f32 %v7122_v34, %v1018_v55 }
 0x576   :  { %v7703_v58 = vadd.f32 %v7327_v57, %v1019_v56 }
 0x578   :  { %1027 = vadd.xlane.f32.xlu0 %v7703_v58 }
 0x57b   :  { %v1020_v60 = vpop.f32.mrf.mxu0 }
 0x57c   :  { %v1021_v61 = vadd.f32 %v7122_v34, %v1020_v60 }
 0x57e   :  { %v7709_v1 = vadd.f32 %v7328_v62, %v1021_v61 }
 0x580   :  { %1029 = vadd.xlane.f32.xlu1 %v7709_v1 }
 0x5eb   :  { %v1028_v3 = vpop.xlane.xlu0 %1027 }
 0x5ec   :  { %v1031_v6 = vmul.f32 %v1028_v3, %v7463_v12 }
 0x5ee   :  { %v7714_v7 = vsub.f32 %v7703_v58, %v1031_v6 }
 0x5f0   :  { %v1035_v30 = vmul.f32 %v7714_v7, %v7714_v7 }
 0x5f2   :  { %1037 = vadd.xlane.f32.xlu0 %v1035_v30 }
 0x5f3   :  { %v1030_v11 = vpop.xlane.xlu1 %1029 }
 0x5f4   :  { %v1032_v35 = vmul.f32 %v1030_v11, %v7463_v12 }
 0x5f6   :  { %v7720_v13 = vsub.f32 %v7709_v1, %v1032_v35 }
 0x5f8   :  { %v1036_v14 = vmul.f32 %v7720_v13, %v7720_v13 }
 0x5fa   :  { %1039 = vadd.xlane.f32.xlu2 %v1036_v14 }
 0x606   :  { %6945 = vrot.lane.b32.xlu0 %v7664_v59, %s7387_s16 }
 0x60e   :  { %6950 = vrot.lane.b32.xlu0 %v7664_v59, %s7386_s15 }
 0x665   :  { %v1038_v27 = vpop.xlane.xlu0 %1037 }
 0x666   :  { %v1041_v50 = vmul.f32 %v1038_v27, %v7463_v12 }
 0x668   :  { %v1043_v28 = vadd.f32 1e-05, %v1041_v50  ;;  %v1730_v50 = vpack.c.bf16 %v7685_v38, %v7685_v38 }
 0x66a   :  { %7179 = vrsqrt.f32 %v1043_v28  ;;  %vm1051_vm14 = vweird.f32 %v1043_v28 }
 0x66d   :  { %v1040_v47 = vpop.xlane.xlu2 %1039 }
 0x66e   :  { %v1042_v48 = vmul.f32 %v1040_v47, %v7463_v12 }
 0x670   :  { %v7180_v15 = vpop.eup %7179  ;;  %v1044_v63 = vadd.f32 1e-05, %v1042_v48  ;;  %v1828_v48 = vunpack.c.l.b16 %v1730_v50 }
 0x671   :  { %v1046_v49 = vmul.f32 %v7180_v15, %v1043_v28  ;;  %vm1052_vm13 = vweird.f32 %v7180_v15  ;;  %v1729_v28 = vpack.c.bf16 %v7683_v37, %v7683_v37 }
 0x672   :  { %7181 = vrsqrt.f32 %v1044_v63  ;;  %vm1053_vm15 = vmor %vm1051_vm14, %vm1052_vm13  ;;  %vm1061_vm2 = vweird.f32 %v1044_v63 }
 0x673   :  { %v1047_v51 = vmul.f32 %v7180_v15, %v1046_v49 }
 0x675   :  { %v1048_v52 = vmul.f32 0.5, %v1047_v51 }
 0x677   :  { %v1049_v53 = vsub.f32 1.5, %v1048_v52 }
 0x678   :  { %v7182_v54 = vpop.eup %7181  ;;  %v6946_v34 = vpop.permute.xlu0 %6945 }
 0x679   :  { %v1050_v55 = vmul.f32 %v7180_v15, %v1049_v53  ;;  %v1056_v56 = vmul.f32 %v7182_v54, %v1044_v63  ;;  %v6948_v57 = vunpack.i.h.bf16 %v6946_v34  ;;  %v6947_v60 = vunpack.i.l.bf16 %v6946_v34 }
 0x67a   :  { %vm1062_vm0 = vweird.f32 %v7182_v54  ;;  %v1827_v63 = vunpack.c.l.b16 %v1729_v28 }
 0x67b   :  { %v1057_v61 = vmul.f32 %v7182_v54, %v1056_v56  ;;  %v1411_v62 = vpack.c.bf16 %v6948_v57, %v6948_v57  ;;  %v1410_v3 = vpack.c.bf16 %v6947_v60, %v6947_v60  ;;  %v1054_v6 = vsel %vm1053_vm15, %v7180_v15, %v1050_v55  ;;  %vm1063_vm3 = vmor %vm1061_vm2, %vm1062_vm0 }
 0x67c   :  { %v1065_v11 = vmul.f32 %v1054_v6, %v7714_v7 }
 0x67d   :  { %v1058_v0 = vmul.f32 0.5, %v1057_v61  ;;  %v1451_v2 = vunpack.c.l.b16 %v1411_v62  ;;  %v1450_v9 = vunpack.c.l.b16 %v1410_v3 }
 0x67e   :  { %v1070_v7 = vmul.f32 %v7123_v18, %v1065_v11 }
 0x67f   :  { %v1059_v30 = vsub.f32 1.5, %v1058_v0  ;;  %v1452_v35 = vpack.c.b16 %v1451_v2, %v1450_v9 }
 0x680   :  { %v6951_v14 = vpop.permute.xlu0 %6950  ;;  %v1075_v16 = vadd.f32 %v7124_v29, %v1070_v7 }
 0x681   :  { %v1060_v20 = vmul.f32 %v7182_v54, %v1059_v30  ;;  %v6953_v17 = vunpack.i.h.bf16 %v6951_v14  ;;  %v6952_v21 = vunpack.i.l.bf16 %v6951_v14  ;;  %v1457_v22 = vsel %vm482_vm8, %v1452_v35, 0 }
 0x682   :  { %1466 = vmatpush.bf16.xpose.msrb.mxu1 %v1457_v22 }
 0x683   :  { %v1064_v23 = vsel %vm1063_vm3, %v7182_v54, %v1060_v20  ;;  %v1413_v24 = vpack.c.bf16 %v6953_v17, %v6953_v17  ;;  %v1412_v25 = vpack.c.bf16 %v6952_v21, %v6952_v21 }
 0x684   :  { %v1066_v26 = vmul.f32 %v1064_v23, %v7720_v13  ;;  %v7125_v13 = vld [vmem:[%s8594_s6 + $0x8] ss:$0 sm:$0xff] }
 0x685   :  { %v1475_v31 = vunpack.c.l.b16 %v1413_v24  ;;  %v1474_v32 = vunpack.c.l.b16 %v1412_v25 }
 0x686   :  { %v1071_v33 = vmul.f32 %v7123_v18, %v1066_v26 }
 0x687   :  { %v1476_v36 = vpack.c.b16 %v1475_v31, %v1474_v32 }
 0x688   :  { %v1076_v39 = vadd.f32 %v7124_v29, %v1071_v33 }
 0x689   :  { %v1481_v40 = vsel %vm482_vm8, %v1476_v36, 0 }
 0x68a   :  { %1490 = vmatpush.bf16.xpose.msrb.mxu0 %v1481_v40  ;;  %v1077_v42 = vpack.c.bf16 %v1076_v39, %v1075_v16 }
 0x68c   :  { %1154 = vmatmul.bf16.vlgmr.msra.gmra.mxu1 %v1077_v42 }
 0x709   :  { %v1155_v43 = vpop.f32.mrf.mxu1 }
 0x70a   :  { %v1156_v44 = vadd.f32 %v7125_v13, %v1155_v43 }
 0x70c   :  { %v1400_v45 = vpack.c.bf16 %v1156_v44, %v1156_v44  ;;  %v6969_v27 = vpack.i.bf16 %v7669_v8, %v1156_v44  ;;  %v1829_v8 = vpack.c.b16 %v1828_v48, %v1827_v63 }
 0x70e   :  { %6970 = vrot.lane.b32.xlu1 %v6969_v27, %s7386_s15  ;;  %6955 = vrot.lane.b32.xlu2 %v6969_v27, %s7387_s16 }
 0x70f   :  { %5691 = vmatmul.msk.bf16.vlgmr.msra.gmra.mxu0 %vm482_vm8, %v1400_v45 }
 0x711   :  { %v1157_v47 = vpop.f32.mrf.mxu1 }
 0x712   :  { %v1158_v15 = vadd.f32 %v7125_v13, %v1157_v47 }
 0x714   :  { %v1404_v49 = vpack.c.bf16 %v1158_v15, %v1158_v15  ;;  %v6964_v51 = vpack.i.bf16 %v1158_v15, %v7672_v10 }
 0x716   :  { %5695 = vmatmul.msk.bf16.vlgmr.msrb.gmra.mxu2 %vm482_vm8, %v1404_v49  ;;  %6960 = vrot.lane.b32.xlu2 %v7664_v59, %s7385_s14 }
 0x717   :  { %1841 = vmatpush.bf16.msrb.mxu2 %v1829_v8  ;;  %6965 = vrot.lane.b32.xlu0 %v6964_v51, %s7387_s16 }
 0x71e   :  { %6975 = vrot.lane.b32.xlu2 %v6969_v27, %s7385_s14 }
 0x71f   :  { %1350 = vrot.lane.b32.xlu0 %v7672_v10, %s7386_s15 }
 0x726   :  { %1356 = vrot.lane.b32.xlu2 %v7672_v10, %s7385_s14 }
 0x727   :  { %1314 = vrot.lane.b32.xlu0 %v1158_v15, %s7386_s15 }
 0x72e   :  { %1317 = vrot.lane.b32.xlu2 %v1158_v15, %s7385_s14 }
 0x768   :  { %v6956_v37 = vpop.permute.xlu2 %6955 }
 0x769   :  { %v6957_v38 = vunpack.i.l.bf16 %v6956_v37  ;;  %v6958_v17 = vunpack.i.h.bf16 %v6956_v37 }
 0x76b   :  { %v1401_v52 = vpack.c.bf16 %v6957_v38, %v6957_v38  ;;  %v1418_v23 = vpack.c.bf16 %v6958_v17, %v6958_v17 }
 0x76d   :  { %5692 = vmatmul.msk.bf16.vlgmr.msrb.gmra.mxu1 %vm482_vm8, %v1401_v52  ;;  %v1546_v32 = vunpack.c.l.b16 %v1418_v23 }
 0x770   :  { %v6961_v59 = vpop.permute.xlu2 %6960 }
 0x771   :  { %v6963_v53 = vunpack.i.h.bf16 %v6961_v59  ;;  %v6962_v54 = vunpack.i.l.bf16 %v6961_v59 }
 0x773   :  { %v1415_v34 = vpack.c.bf16 %v6963_v53, %v6963_v53  ;;  %v1414_v55 = vpack.c.bf16 %v6962_v54, %v6962_v54 }
 0x775   :  { %v1499_v56 = vunpack.c.l.b16 %v1415_v34  ;;  %v1498_v57 = vunpack.c.l.b16 %v1414_v55 }
 0x777   :  { %v1500_v60 = vpack.c.b16 %v1499_v56, %v1498_v57 }
 0x778   :  { %v6976_v61 = vpop.permute.xlu2 %6975 }
 0x779   :  { %v1505_v10 = vsel %vm482_vm8, %v1500_v60, 0  ;;  %v6978_v62 = vunpack.i.h.bf16 %v6976_v61  ;;  %v6977_v3 = vunpack.i.l.bf16 %v6976_v61 }
 0x77a   :  { %1514 = vmatpush.bf16.xpose.msra.mxu1 %v1505_v10 }
 0x77b   :  { %v1422_v6 = vpack.c.bf16 %v6978_v62, %v6978_v62  ;;  %v1403_v0 = vpack.c.bf16 %v6977_v3, %v6977_v3 }
 0x77d   :  { %v1594_v35 = vunpack.c.l.b16 %v1422_v6 }
 0x780   :  { %v6971_v2 = vpop.permute.xlu1 %6970  ;;  %v1357_v9 = vpop.permute.xlu2 %1356 }
 0x781   :  { %v6972_v30 = vunpack.i.l.bf16 %v6971_v2  ;;  %v1423_v11 = vpack.c.bf16 %v1357_v9, %v1357_v9  ;;  %5694 = vmatmul.msk.bf16.vlgmr.msra.gmra.mxu1 %vm482_vm8, %v1403_v0  ;;  %v6973_v25 = vunpack.i.h.bf16 %v6971_v2 }
 0x783   :  { %v1402_v14 = vpack.c.bf16 %v6972_v30, %v6972_v30  ;;  %v1595_v18 = vunpack.c.l.b16 %v1423_v11  ;;  %v1420_v39 = vpack.c.bf16 %v6973_v25, %v6973_v25 }
 0x785   :  { %v1596_v20 = vpack.c.b16 %v1595_v18, %v1594_v35  ;;  %5693 = vmatmul.msk.bf16.vlgmr.msrb.gmra.mxu0 %vm482_vm8, %v1402_v14  ;;  %v1570_v44 = vunpack.c.l.b16 %v1420_v39 }
 0x787   :  { %v1601_v21 = vsel %vm482_vm8, %v1596_v20, 0 }
 0x788   :  { %1610 = vmatpush.bf16.xpose.msrb.mxu1 %v1601_v21  ;;  %v1318_v26 = vpop.permute.xlu2 %1317 }
 0x789   :  { %v6966_v22 = vpop.permute.xlu0 %6965  ;;  %v1407_v36 = vpack.c.bf16 %v1318_v26, %v1318_v26 }
 0x78a   :  { %v6967_v24 = vunpack.i.l.bf16 %v6966_v22  ;;  %v6968_v45 = vunpack.i.h.bf16 %v6966_v22 }
 0x78c   :  { %v1419_v7 = vpack.c.bf16 %v6967_v24, %v6967_v24  ;;  %v1444_v29 = vpop.f32.mrf.mxu0  ;;  %v1405_v47 = vpack.c.bf16 %v6968_v45, %v6968_v45 }
 0x78d   :  { %v7768_v31 = vmul.f32 0.17677669, %v1444_v29 }
 0x78e   :  { %v1547_v33 = vunpack.c.l.b16 %v1419_v7 }
 0x78f   :  { %v1625_v16 = vsel %vm1624_vm4, %v7768_v31, -inf }
 0x790   :  { %v1548_v40 = vpack.c.b16 %v1547_v33, %v1546_v32  ;;  %1626 = vmax.xlane.f32.xlu0 %v1625_v16 }
 0x791   :  { %v1351_v42 = vpop.permute.xlu0 %1350  ;;  %5698 = vmatmul.msk.bf16.vlgmr.msrb.gmra.mxu1 %vm482_vm8, %v1407_v36 }
 0x792   :  { %v1421_v13 = vpack.c.bf16 %v1351_v42, %v1351_v42  ;;  %v1553_v43 = vsel %vm482_vm8, %v1548_v40, 0 }
 0x793   :  { %1562 = vmatpush.bf16.xpose.msra.mxu3 %v1553_v43 }
 0x794   :  { %v1571_v27 = vunpack.c.l.b16 %v1421_v13  ;;  %v1446_v50 = vpop.f32.mrf.mxu0 }
 0x796   :  { %v1572_v28 = vpack.c.b16 %v1571_v27, %v1570_v44 }
 0x798   :  { %v1577_v48 = vsel %vm482_vm8, %v1572_v28, 0 }
 0x799   :  { %1586 = vmatpush.bf16.xpose.msra.mxu0 %v1577_v48  ;;  %v1540_v15 = vpop.f32.mrf.mxu2  ;;  %v1315_v63 = vpop.permute.xlu0 %1314 }
 0x79a   :  { %5696 = vmatmul.msk.bf16.vlgmr.msra.gmra.mxu3 %vm482_vm8, %v1405_v47  ;;  %v1406_v49 = vpack.c.bf16 %v1315_v63, %v1315_v63  ;;  %v7785_v2 = vmul.f32 0.17677669, %v1540_v15 }
 0x79c   :  { %v1637_v11 = vsel %vm1624_vm4, %v7785_v2, -inf }
 0x7a0   :  { %5697 = vmatmul.msk.bf16.vlgmr.msra.gmra.mxu0 %vm482_vm8, %v1406_v49 }
 0x7a1   :  { %v1542_v51 = vpop.f32.mrf.mxu2 }
 0x7ea   :  { %v1468_v8 = vpop.f32.mrf.mxu1 }
 0x7eb   :  { %v1617_v37 = vmul.f32 0.17677669, %v1468_v8 }
 0x7ed   :  { %v1628_v38 = vsel %vm1624_vm4, %v1617_v37, -inf }
 0x7ee   :  { %1629 = vmax.xlane.f32.xlu0 %v1628_v38 }
 0x7f2   :  { %v1470_v52 = vpop.f32.mrf.mxu1 }
 0x7fe   :  { %v1516_v59 = vpop.f32.mrf.mxu1 }
 0x7ff   :  { %v1619_v53 = vmul.f32 0.17677669, %v1516_v59 }
 0x801   :  { %v1634_v54 = vsel %vm1624_vm4, %v1619_v53, -inf }
 0x802   :  { %1635 = vmax.xlane.f32.xlu2 %v1634_v54  ;;  %v1492_v34 = vpop.f32.mrf.mxu0 }
 0x803   :  { %v1618_v55 = vmul.f32 0.17677669, %v1492_v34  ;;  %v7799_v17 = vpop.xlane.xlu0 %1626 }
 0x805   :  { %v1631_v56 = vsel %vm1624_vm4, %v1618_v55, -inf }
 0x806   :  { %v1518_v57 = vpop.f32.mrf.mxu1  ;;  %1632 = vmax.xlane.f32.xlu1 %v1631_v56 }
 0x80a   :  { %v1494_v60 = vpop.f32.mrf.mxu0 }
 0x80e   :  { %v1612_v61 = vpop.f32.mrf.mxu1 }
 0x80f   :  { %v7791_v35 = vmul.f32 0.17677669, %v1612_v61 }
 0x811   :  { %v1646_v14 = vsel %vm1624_vm4, %v7791_v35, -inf }
 0x816   :  { %v1614_v10 = vpop.f32.mrf.mxu1 }
 0x81a   :  { %6980 = vrot.lane.b32.xlu2 %v7681_v41, %s7387_s16 }
 0x81d   :  { %v1564_v62 = vpop.f32.mrf.mxu3  ;;  %v1588_v3 = vpop.f32.mrf.mxu0 }
 0x81e   :  { %v1621_v6 = vmul.f32 0.17677669, %v1564_v62  ;;  %v7795_v18 = vmul.f32 0.17677669, %v1588_v3 }
 0x81f   :  { %6985 = vrot.lane.b32.xlu1 %v7681_v41, %s7386_s15 }
 0x820   :  { %v1640_v0 = vsel %vm1624_vm4, %v1621_v6, -inf  ;;  %v1643_v20 = vsel %vm1624_vm4, %v7795_v18, -inf }
 0x821   :  { %1641 = vmax.xlane.f32.xlu0 %v1640_v0 }
 0x825   :  { %v1566_v9 = vpop.f32.mrf.mxu3  ;;  %v1590_v30 = vpop.f32.mrf.mxu0 }
 0x829   :  { %1638 = vmax.xlane.f32.xlu0 %v1637_v11 }
 0x83d   :  { %6990 = vrot.lane.b32.xlu0 %v7681_v41, %s7385_s14 }
 0x843   :  { %1647 = vmax.xlane.f32.xlu2 %v1646_v14 }
 0x849   :  { %1644 = vmax.xlane.f32.xlu1 %v1643_v20 }
 0x861   :  { %v1630_v21 = vpop.xlane.xlu0 %1629 }
 0x862   :  { %v1650_v22 = vsub.f32 %v1617_v37, %v1630_v21 }
 0x864   :  { %v1659_v23 = vmul.f32 1.442695, %v1650_v22 }
 0x866   :  { %7183 = vpow2.f32 %v1659_v23 }
 0x86c   :  { %v7801_v24 = vpop.eup %7183 }
 0x86d   :  { %v1676_v41 = vsel %vm1624_vm4, %v7801_v24, 0.0 }
 0x86e   :  { %1677 = vadd.xlane.f32.xlu1 %v1676_v41 }
 0x875   :  { %v1636_v25 = vpop.xlane.xlu2 %1635 }
 0x876   :  { %v1652_v26 = vsub.f32 %v1619_v53, %v1636_v25 }
 0x878   :  { %v1663_v7 = vmul.f32 1.442695, %v1652_v26 }
 0x879   :  { %v1633_v29 = vpop.xlane.xlu1 %1632 }
 0x87a   :  { %7185 = vpow2.f32 %v1663_v7  ;;  %v1651_v32 = vsub.f32 %v1618_v55, %v1633_v29 }
 0x87c   :  { %v1661_v33 = vmul.f32 1.442695, %v1651_v32 }
 0x87d   :  { %v6981_v36 = vpop.permute.xlu2 %6980 }
 0x87e   :  { %7187 = vpow2.f32 %v1661_v33  ;;  %v6983_v16 = vunpack.i.h.bf16 %v6981_v36  ;;  %v6982_v39 = vunpack.i.l.bf16 %v6981_v36 }
 0x880   :  { %v7805_v40 = vpop.eup %7185  ;;  %v1724_v42 = vpack.c.bf16 %v6983_v16, %v6983_v16  ;;  %v1723_v13 = vpack.c.bf16 %v6982_v39, %v6982_v39 }
 0x881   :  { %v1682_v43 = vsel %vm1624_vm4, %v7805_v40, 0.0 }
 0x882   :  { %v1762_v44 = vunpack.c.l.b16 %v1724_v42  ;;  %v1761_v45 = vunpack.c.l.b16 %v1723_v13  ;;  %1683 = vadd.xlane.f32.xlu0 %v1682_v43 }
 0x884   :  { %v7809_v27 = vpop.eup %7187  ;;  %v1763_v50 = vpack.c.b16 %v1762_v44, %v1761_v45 }
 0x885   :  { %v1679_v28 = vsel %vm1624_vm4, %v7809_v27, 0.0 }
 0x886   :  { %1775 = vmatpush.bf16.msrb.mxu3 %v1763_v50  ;;  %1680 = vadd.xlane.f32.xlu1 %v1679_v28 }
 0x891   :  { %v6986_v47 = vpop.permute.xlu1 %6985 }
 0x892   :  { %v6988_v48 = vunpack.i.h.bf16 %v6986_v47  ;;  %v6987_v15 = vunpack.i.l.bf16 %v6986_v47 }
 0x894   :  { %v1726_v63 = vpack.c.bf16 %v6988_v48, %v6988_v48  ;;  %v1725_v49 = vpack.c.bf16 %v6987_v15, %v6987_v15  ;;  %v1642_v51 = vpop.xlane.xlu0 %1641 }
 0x895   :  { %v1654_v8 = vsub.f32 %v1621_v6, %v1642_v51 }
 0x896   :  { %v1784_v37 = vunpack.c.l.b16 %v1726_v63  ;;  %v1783_v38 = vunpack.c.l.b16 %v1725_v49  ;;  %6995 = vrot.lane.b32.xlu0 %v7689_v4, %s7387_s16 }
 0x897   :  { %v1667_v52 = vmul.f32 1.442695, %v1654_v8 }
 0x898   :  { %v1785_v59 = vpack.c.b16 %v1784_v37, %v1783_v38 }
 0x899   :  { %7189 = vpow2.f32 %v1667_v52 }
 0x89a   :  { %1797 = vmatpush.bf16.msrb.mxu0 %v1785_v59 }
 0x89c   :  { %v1639_v34 = vpop.xlane.xlu0 %1638 }
 0x89d   :  { %v1653_v9 = vsub.f32 %v7785_v2, %v1639_v34 }
 0x89f   :  { %v7815_v53 = vpop.eup %7189  ;;  %v1665_v11 = vmul.f32 1.442695, %v1653_v9 }
 0x8a0   :  { %v1688_v54 = vsel %vm1624_vm4, %v7815_v53, 0.0 }
 0x8a1   :  { %1689 = vadd.xlane.f32.xlu2 %v1688_v54 }
 0x8af   :  { %v6991_v55 = vpop.permute.xlu0 %6990 }
 0x8b0   :  { %v6993_v56 = vunpack.i.h.bf16 %v6991_v55  ;;  %v6992_v57 = vunpack.i.l.bf16 %v6991_v55 }
 0x8b2   :  { %v1728_v60 = vpack.c.bf16 %v6993_v56, %v6993_v56  ;;  %v1727_v61 = vpack.c.bf16 %v6992_v57, %v6992_v57 }
 0x8b4   :  { %v1806_v10 = vunpack.c.l.b16 %v1728_v60  ;;  %v1805_v62 = vunpack.c.l.b16 %v1727_v61 }
 0x8b6   :  { %v1807_v3 = vpack.c.b16 %v1806_v10, %v1805_v62  ;;  %v1648_v6 = vpop.xlane.xlu2 %1647 }
 0x8b7   :  { %v1656_v0 = vsub.f32 %v7791_v35, %v1648_v6 }
 0x8b8   :  { %1819 = vmatpush.bf16.msra.mxu1 %v1807_v3 }
 0x8b9   :  { %v1671_v30 = vmul.f32 1.442695, %v1656_v0  ;;  %7000 = vrot.lane.b32.xlu2 %v7689_v4, %s7386_s15 }
 0x8bb   :  { %7191 = vpow2.f32 %v1671_v30 }
 0x8bc   :  { %v1645_v14 = vpop.xlane.xlu1 %1644  ;;  %7193 = vpow2.f32 %v1665_v11 }
 0x8bd   :  { %v1655_v20 = vsub.f32 %v7795_v18, %v1645_v14  ;;  %v1649_v18 = vsub.f32 %v7768_v31, %v7799_v17 }
 0x8bf   :  { %v1669_v21 = vmul.f32 1.442695, %v1655_v20  ;;  %v1657_v26 = vmul.f32 1.442695, %v1649_v18 }
 0x8c1   :  { %v7824_v22 = vpop.eup %7191  ;;  %7195 = vpow2.f32 %v1669_v21 }
 0x8c2   :  { %v1694_v35 = vsel %vm1624_vm4, %v7824_v22, 0.0  ;;  %v7828_v2 = vpop.eup %7193  ;;  %7197 = vpow2.f32 %v1657_v26 }
 0x8c3   :  { %1695 = vadd.xlane.f32.xlu0 %v1694_v35  ;;  %v1685_v25 = vsel %vm1624_vm4, %v7828_v2, 0.0 }
 0x8c7   :  { %v7196_v23 = vpop.eup %7195 }
 0x8c8   :  { %v1691_v41 = vsel %vm1624_vm4, %v7196_v23, 0.0  ;;  %v7835_v7 = vpop.eup %7197 }
 0x8c9   :  { %1692 = vadd.xlane.f32.xlu1 %v1691_v41  ;;  %v1673_v29 = vsel %vm1624_vm4, %v7835_v7, 0.0 }
 0x8cb   :  { %1686 = vadd.xlane.f32.xlu0 %v1685_v25 }
 0x8e1   :  { %v1678_v32 = vpop.xlane.xlu1 %1677 }
 0x8e2   :  { %1674 = vadd.xlane.f32.xlu2 %v1673_v29  ;;  %7199 = vrcp.f32 %v1678_v32  ;;  %7005 = vrot.lane.b32.xlu1 %v7689_v4, %s7385_s14 }
 0x8e8   :  { %v7200_v33 = vpop.eup %7199 }
 0x8e9   :  { %v1706_v36 = vmul.f32 %v7200_v33, %v7801_v24 }
 0x8eb   :  { %v1714_v16 = vpack.c.bf16 %v1706_v36, %v1706_v36 }
 0x8ed   :  { %5700 = vmatmul.msk.bf16.vlgmr.msrb.gmra.mxu3 %vm1624_vm4, %v1714_v16 }
 0x8f5   :  { %v1684_v31 = vpop.xlane.xlu0 %1683 }
 0x8f6   :  { %7201 = vrcp.f32 %v1684_v31 }
 0x8f9   :  { %v1681_v17 = vpop.xlane.xlu1 %1680 }
 0x8fa   :  { %7203 = vrcp.f32 %v1681_v17 }
 0x8fc   :  { %v7202_v39 = vpop.eup %7201 }
 0x8fd   :  { %v1708_v42 = vmul.f32 %v7202_v39, %v7805_v40 }
 0x8ff   :  { %v1716_v13 = vpack.c.bf16 %v1708_v42, %v1708_v42 }
 0x900   :  { %v7204_v43 = vpop.eup %7203 }
 0x901   :  { %v1707_v44 = vmul.f32 %v7204_v43, %v7809_v27  ;;  %5702 = vmatmul.msk.bf16.vlgmr.msra.gmra.mxu1 %vm1624_vm4, %v1716_v13 }
 0x903   :  { %v1715_v4 = vpack.c.bf16 %v1707_v44, %v1707_v44 }
 0x905   :  { %5701 = vmatmul.msk.bf16.vlgmr.msrb.gmra.mxu0 %vm1624_vm4, %v1715_v4 }
 0x908   :  { %v6996_v24 = vpop.permute.xlu0 %6995 }
 0x909   :  { %v6998_v45 = vunpack.i.h.bf16 %v6996_v24  ;;  %v6997_v50 = vunpack.i.l.bf16 %v6996_v24 }
 0x90b   :  { %v1732_v28 = vpack.c.bf16 %v6998_v45, %v6998_v45  ;;  %v1731_v47 = vpack.c.bf16 %v6997_v50, %v6997_v50 }
 0x90d   :  { %v1850_v48 = vunpack.c.l.b16 %v1732_v28  ;;  %v1849_v15 = vunpack.c.l.b16 %v1731_v47  ;;  %v5737_v47 = vld [vmem:[#allocation2 + $0x2bc] sm:$0xf] }
 0x90f   :  { %v1851_v63 = vpack.c.b16 %v1850_v48, %v1849_v15  ;;  %v6717_v48 = vld [vmem:[#allocation2 + $0x2e8] sm:$0xf0] }
 0x911   :  { %1863 = vmatpush.bf16.msra.mxu3 %v1851_v63  ;;  %v5738_v63 = vor.u32 %v6717_v48, %v5737_v47  ;;  %v5855_v47 = vld [vmem:[#allocation2 + $0x2f0] sm:$0xf0]  ;;  %v5861_v48 = vld [vmem:[#allocation2 + $0x2c8] sm:$0xf] }
 0x914   :  { %v1690_v49 = vpop.xlane.xlu2 %1689 }
 0x915   :  { %7205 = vrcp.f32 %v1690_v49  ;;  %v5733_v49 = vld [vmem:[#allocation2 + $0x25c] sm:$0xf] }
 0x91b   :  { %v7206_v40 = vpop.eup %7205 }
 0x91c   :  { %v1710_v51 = vmul.f32 %v7206_v40, %v7815_v53  ;;  %v7001_v27 = vpop.permute.xlu2 %7000  ;;  %v6716_v40 = vld [vmem:[#allocation2 + $0x288] sm:$0xf0] }
 0x91d   :  { %v7003_v8 = vunpack.i.h.bf16 %v7001_v27  ;;  %v7002_v37 = vunpack.i.l.bf16 %v7001_v27  ;;  %v5729_v27 = vld [vmem:[#allocation2 + $0x1fc] sm:$0xf] }
 0x91e   :  { %v1718_v38 = vpack.c.bf16 %v1710_v51, %v1710_v51  ;;  %v5734_v51 = vor.u32 %v6716_v40, %v5733_v49  ;;  %v6747_v40 = vld [vmem:[#allocation2 + $0x2cc] sm:$0xf] }
 0x91f   :  { %v1734_v52 = vpack.c.bf16 %v7003_v8, %v7003_v8  ;;  %v1733_v59 = vpack.c.bf16 %v7002_v37, %v7002_v37  ;;  %v6715_v8 = vld [vmem:[#allocation2 + $0x228] sm:$0xf0] }
 0x920   :  { %5704 = vmatmul.msk.bf16.vlgmr.msra.gmra.mxu3 %vm1624_vm4, %v1718_v38  ;;  %v5730_v37 = vor.u32 %v6715_v8, %v5729_v27  ;;  %v5725_v38 = vld [vmem:[#allocation2 + $0x19c] sm:$0xf]  ;;  %v5837_v8 = vld [vmem:[#allocation2 + $0x260] sm:$0xf] }
 0x921   :  { %v1872_v54 = vunpack.c.l.b16 %v1734_v52  ;;  %v1871_v34 = vunpack.c.l.b16 %v1733_v59  ;;  %v6714_v52 = vld [vmem:[#allocation2 + $0x1c8] sm:$0xf0] }
 0x922   :  { %v5726_v59 = vor.u32 %v6714_v52, %v5725_v38  ;;  %v6742_v38 = vld [vmem:[#allocation2 + $0x264] sm:$0xf] }
 0x923   :  { %v1873_v55 = vpack.c.b16 %v1872_v54, %v1871_v34  ;;  %v5721_v54 = vld [vmem:[#allocation2 + $0x13c] sm:$0xf]  ;;  %v6713_v34 = vld [vmem:[#allocation2 + $0x168] sm:$0xf0] }
 0x925   :  { %1885 = vmatpush.bf16.msra.mxu0 %v1873_v55  ;;  %v5722_v55 = vor.u32 %v6713_v34, %v5721_v54  ;;  %v5845_v54 = vld [vmem:[#allocation2 + $0x268] sm:$0xf]  ;;  %v6745_v34 = vld [vmem:[#allocation2 + $0x294] sm:$0xf0] }
 0x936   :  { %v1696_v53 = vpop.xlane.xlu0 %1695 }
 0x93c   :  { %v1693_v56 = vpop.xlane.xlu1 %1692 }
 0x93d   :  { %7207 = vrcp.f32 %v1693_v56  ;;  %v5717_v56 = vld [vmem:[#allocation2 + $0xdc] sm:$0xf] }
 0x93e   :  { %7209 = vrcp.f32 %v1696_v53  ;;  %v1687_v25 = vpop.xlane.xlu0 %1686  ;;  %v6711_v53 = vld [vmem:[#allocation2 + $0xa8] sm:$0xf0] }
 0x943   :  { %v7208_v57 = vpop.eup %7207 }
 0x944   :  { %v1711_v60 = vmul.f32 %v7208_v57, %v7196_v23  ;;  %v7210_v0 = vpop.eup %7209  ;;  %v6712_v57 = vld [vmem:[#allocation2 + $0x108] sm:$0xf0] }
 0x945   :  { %v1712_v20 = vmul.f32 %v7210_v0, %v7824_v22 }
 0x946   :  { %v1719_v61 = vpack.c.bf16 %v1711_v60, %v1711_v60  ;;  %v5718_v60 = vor.u32 %v6712_v57, %v5717_v56  ;;  %v5846_v56 = vor.u32 %v6745_v34, %v5845_v54  ;;  %v6743_v57 = vld [vmem:[#allocation2 + $0x26c] sm:$0xf]  ;;  %v6724_v54 = vld [vmem:[#allocation2 + $0xac] sm:$0xf0]  ;;  %v6722_v34 = vld [vmem:[#allocation2 + $0x84] sm:$0xf] }
 0x947   :  { %v1720_v41 = vpack.c.bf16 %v1712_v20, %v1712_v20 }
 0x948   :  { %5705 = vmatmul.msk.bf16.vlgmr.msra.gmra.mxu0 %vm1624_vm4, %v1719_v61  ;;  %v5713_v61 = vld [vmem:[#allocation2 + $0x7c] sm:$0xf] }
 0x954   :  { %v7006_v10 = vpop.permute.xlu1 %7005 }
 0x955   :  { %v1675_v62 = vpop.xlane.xlu2 %1674  ;;  %v7008_v3 = vunpack.i.h.bf16 %v7006_v10  ;;  %v7007_v6 = vunpack.i.l.bf16 %v7006_v10  ;;  %v5714_v10 = vor.u32 %v6711_v53, %v5713_v61  ;;  %v5821_v53 = vld [vmem:[#allocation2 + $0x200] sm:$0xf] }
 0x956   :  { %7211 = vrcp.f32 %v1675_v62  ;;  %v5709_v62 = vld [vmem:[#allocation2 + $0x1c] sm:$0xf] }
 0x957   :  { %v1736_v9 = vpack.c.bf16 %v7008_v3, %v7008_v3  ;;  %v1735_v30 = vpack.c.bf16 %v7007_v6, %v7007_v6  ;;  %7213 = vrcp.f32 %v1687_v25  ;;  %v6710_v3 = vld [vmem:[#allocation2 + $0x48] sm:$0xf0] }
 0x958   :  { %v5710_v6 = vor.u32 %v6710_v3, %v5709_v62  ;;  %v6738_v62 = vld [vmem:[#allocation2 + $0x204] sm:$0xf] }
 0x959   :  { %v1894_v11 = vunpack.c.l.b16 %v1736_v9  ;;  %v1893_v14 = vunpack.c.l.b16 %v1735_v30 }
 0x95b   :  { %v1895_v21 = vpack.c.b16 %v1894_v11, %v1893_v14 }
 0x95c   :  { %v7212_v35 = vpop.eup %7211 }
 0x95d   :  { %v1705_v23 = vmul.f32 %v7212_v35, %v7835_v7  ;;  %1907 = vmatpush.bf16.msrb.mxu1 %v1895_v21  ;;  %v7214_v26 = vpop.eup %7213 }
 0x95e   :  { %v1709_v29 = vmul.f32 %v7214_v26, %v7828_v2 }
 0x95f   :  { %v1713_v18 = vpack.c.bf16 %v1705_v23, %v1705_v23 }
 0x960   :  { %5706 = vmatmul.msk.bf16.vlgmr.msrb.gmra.mxu1 %vm1624_vm4, %v1720_v41  ;;  %v1717_v32 = vpack.c.bf16 %v1709_v29, %v1709_v29 }
 0x961   :  { %5699 = vmatmul.msk.bf16.vlgmr.msra.gmra.mxu2 %vm1624_vm4, %v1713_v18 }
 0x962   :  { %2012 = vmatpush.bf16.msra.mxu2 %v5738_v63 }
 0x966   :  { %2013 = vmatpush.bf16.msra.mxu2 %v5734_v51  ;;  %v5863_v51 = vld [vmem:[#allocation2 + $0x2f8] sm:$0xf0] }
 0x967   :  { %v5866_v27 = vor.u32 %v6747_v40, %v5863_v51  ;;  %v5781_v40 = vld [vmem:[#allocation2 + $0xe8] sm:$0xf]  ;;  %v6729_v51 = vld [vmem:[#allocation2 + $0x114] sm:$0xf0] }
 0x96a   :  { %2014 = vmatpush.bf16.msra.mxu2 %v5730_v37  ;;  %v6744_v37 = vld [vmem:[#allocation2 + $0x28c] sm:$0xf0] }
 0x96b   :  { %v5838_v52 = vor.u32 %v6744_v37, %v5837_v8  ;;  %v5782_v8 = vor.u32 %v6729_v51, %v5781_v40  ;;  %v6727_v37 = vld [vmem:[#allocation2 + $0xec] sm:$0xf] }
 0x96e   :  { %2015 = vmatpush.bf16.msra.mxu2 %v5726_v59  ;;  %v5839_v59 = vld [vmem:[#allocation2 + $0x290] sm:$0xf0] }
 0x970   :  { %v1777_v33 = vpop.f32.mrf.mxu3 }
 0x971   :  { %5703 = vmatmul.msk.bf16.vlgmr.msrb.gmra.mxu2 %vm1624_vm4, %v1717_v32 }
 0x972   :  { %2016 = vmatpush.bf16.msra.mxu2 %v5722_v55  ;;  %v5842_v55 = vor.u32 %v6742_v38, %v5839_v59  ;;  %v5783_v38 = vld [vmem:[#allocation2 + $0x118] sm:$0xf0]  ;;  %v5757_v59 = vld [vmem:[#allocation2 + $0x80] sm:$0xf] }
 0x976   :  { %2017 = vmatpush.bf16.msra.mxu2 %v5718_v60  ;;  %v5847_v60 = vld [vmem:[#allocation2 + $0x298] sm:$0xf0] }
 0x977   :  { %v5850_v61 = vor.u32 %v6743_v57, %v5847_v60  ;;  %v5765_v57 = vld [vmem:[#allocation2 + $0x88] sm:$0xf]  ;;  %v6725_v60 = vld [vmem:[#allocation2 + $0xb4] sm:$0xf0] }
 0x978   :  { %v1779_v22 = vpop.f32.mrf.mxu3 }
 0x979   :  { %v7126_v22 = vld [vmem:[%s8594_s6 + $0xb] ss:$0 sm:$0xff] }
 0x97a   :  { %2018 = vmatpush.bf16.msra.mxu2 %v5714_v10  ;;  %v6740_v10 = vld [vmem:[#allocation2 + $0x22c] sm:$0xf0] }
 0x97b   :  { %v5822_v3 = vor.u32 %v6740_v10, %v5821_v53  ;;  %v5766_v10 = vor.u32 %v6725_v60, %v5765_v57  ;;  %v6762_v57 = vld [vmem:[%s8593_s5 + $0x60] sm:$0xff] }
 0x97c   :  { %v6770_v60 = vld [vmem:[%s8593_s5 + $0xa0] sm:$0xff] }
 0x97e   :  { %v1821_v36 = vpop.f32.mrf.mxu1  ;;  %2019 = vmatpush.bf16.msra.mxu2 %v5710_v6  ;;  %v5823_v6 = vld [vmem:[#allocation2 + $0x230] sm:$0xf0] }
 0x982   :  { %v1799_v16 = vpop.f32.mrf.mxu0  ;;  %2325 = vmatpush.bf16.msrb.mxu2 %v5866_v27 }
 0x986   :  { %v1823_v7 = vpop.f32.mrf.mxu1  ;;  %2326 = vmatpush.bf16.msrb.mxu2 %v5850_v61 }
 0x98a   :  { %v1801_v31 = vpop.f32.mrf.mxu0 }
 0x9a3   :  { %v1865_v17 = vpop.f32.mrf.mxu3 }
 0x9a4   :  { %v7009_v39 = vpack.i.bf16 %v1865_v17, %v1777_v33 }
 0x9a6   :  { %7010 = vrot.lane.b32.xlu0 %v7009_v39, %s7385_s14 }
 0x9ab   :  { %v1867_v42 = vpop.f32.mrf.mxu3 }
 0x9c5   :  { %v1887_v13 = vpop.f32.mrf.mxu0 }
 0x9c6   :  { %v7014_v43 = vpack.i.bf16 %v1887_v13, %v1799_v16 }
 0x9c8   :  { %7015 = vrot.lane.b32.xlu1 %v7014_v43, %s7386_s15 }
 0x9cd   :  { %v1889_v44 = vpop.f32.mrf.mxu0 }
 0x9dd   :  { %v1909_v2 = vpop.f32.mrf.mxu1 }
 0x9de   :  { %v7019_v4 = vpack.i.bf16 %v1909_v2, %v1821_v36 }
 0x9e0   :  { %7020 = vrot.lane.b32.xlu1 %v7019_v4, %s7387_s16 }
 0x9e4   :  { %v1755_v24 = vpop.f32.mrf.mxu2 }
 0x9e5   :  { %v1911_v45 = vpop.f32.mrf.mxu1 }
 0x9e6   :  { %v6748_v45 = vld [vmem:[#allocation2 + $0x2ec] sm:$0xf0] }
 0x9ec   :  { %v1757_v50 = vpop.f32.mrf.mxu2 }
 0x9ed   :  { %v6746_v50 = vld [vmem:[#allocation2 + $0x2c4] sm:$0xf] }
 0x9ee   :  { %v5858_v63 = vor.u32 %v6746_v50, %v5855_v47  ;;  %v5799_v50 = vld [vmem:[#allocation2 + $0x178] sm:$0xf0]  ;;  %v5773_v47 = vld [vmem:[#allocation2 + $0xe0] sm:$0xf] }
 0x9f0   :  { %2297 = vmatpush.bf16.msrb.mxu0 %v5858_v63 }
 0x9f4   :  { %v1843_v28 = vpop.f32.mrf.mxu2  ;;  %2298 = vmatpush.bf16.msrb.mxu0 %v5842_v55  ;;  %v5758_v55 = vor.u32 %v6724_v54, %v5757_v59  ;;  %v6781_v59 = vld [vmem:[%s8593_s5 + $0xf8] sm:$0xff]  ;;  %v6763_v54 = vld [vmem:[%s8593_s5 + $0x68] sm:$0xff] }
 0x9fc   :  { %v1845_v15 = vpop.f32.mrf.mxu2 }
 0x9fd   :  { %v6749_v15 = vld [vmem:[#allocation2 + $0x2f4] sm:$0xf0] }
 0x9fe   :  { %v5862_v49 = vor.u32 %v6749_v15, %v5861_v48  ;;  %v6728_v48 = vld [vmem:[#allocation2 + $0x10c] sm:$0xf0]  ;;  %v6726_v15 = vld [vmem:[#allocation2 + $0xe4] sm:$0xf] }
 0x9ff   :  { %v5774_v63 = vor.u32 %v6728_v48, %v5773_v47 }
 0xa00   :  { %2311 = vmatpush.bf16.msra.mxu1 %v5862_v49  ;;  %v5775_v49 = vld [vmem:[#allocation2 + $0x110] sm:$0xf0] }
 0xa01   :  { %v5778_v27 = vor.u32 %v6726_v15, %v5775_v49  ;;  %v7128_v49 = vld [vmem:[%s8594_s6 + $0xd] ss:$0 sm:$0xff] }
 0xa04   :  { %2312 = vmatpush.bf16.msra.mxu1 %v5846_v56  ;;  %v5759_v56 = vld [vmem:[#allocation2 + $0xb0] sm:$0xf0] }
 0xa05   :  { %v5762_v53 = vor.u32 %v6722_v34, %v5759_v56  ;;  %v6771_v34 = vld [vmem:[%s8593_s5 + $0xa8] sm:$0xff]  ;;  %v6780_v56 = vld [vmem:[%s8593_s5 + $0xf0] sm:$0xff] }
 0xa18   :  { %v7011_v9 = vpop.permute.xlu0 %7010 }
 0xa19   :  { %v7013_v30 = vunpack.i.h.bf16 %v7011_v9  ;;  %v7012_v11 = vunpack.i.l.bf16 %v7011_v9  ;;  %v6741_v9 = vld [vmem:[#allocation2 + $0x234] sm:$0xf0] }
 0xa1b   :  { %v1940_v35 = vsel %vm482_vm8, %v1843_v28, %v7013_v30  ;;  %v1925_v23 = vsel %vm482_vm8, %v1755_v24, %v7012_v11  ;;  %v5853_v24 = vld [vmem:[#allocation2 + $0x2c0] sm:$0xf]  ;;  %v5826_v30 = vor.u32 %v6738_v62, %v5823_v6  ;;  %v6723_v62 = vld [vmem:[#allocation2 + $0x8c] sm:$0xf] }
 0xa1c   :  { %v5854_v28 = vor.u32 %v6748_v45, %v5853_v24  ;;  %v6731_v45 = vld [vmem:[#allocation2 + $0x14c] sm:$0xf]  ;;  %v5741_v6 = vld [vmem:[#allocation2 + $0x20] sm:$0xf] }
 0xa1d   :  { %2299 = vmatpush.bf16.msrb.mxu0 %v5826_v30  ;;  %v6720_v30 = vld [vmem:[#allocation2 + $0x4c] sm:$0xf0] }
 0xa1e   :  { %2283 = vmatpush.bf16.msrb.mxu3 %v5854_v28  ;;  %v5802_v28 = vor.u32 %v6731_v45, %v5799_v50 }
 0xa22   :  { %2284 = vmatpush.bf16.msrb.mxu3 %v5838_v52  ;;  %v5786_v52 = vor.u32 %v6727_v37, %v5783_v38  ;;  %v6764_v37 = vld [vmem:[%s8593_s5 + $0x70] sm:$0xff] }
 0xa23   :  { %v6772_v38 = vld [vmem:[%s8593_s5 + $0xb0] sm:$0xff] }
 0xa26   :  { %2285 = vmatpush.bf16.msrb.mxu3 %v5822_v3  ;;  %v5767_v3 = vld [vmem:[#allocation2 + $0xb8] sm:$0xf0] }
 0xa3a   :  { %v7016_v0 = vpop.permute.xlu1 %7015 }
 0xa3b   :  { %v7018_v14 = vunpack.i.h.bf16 %v7016_v0  ;;  %v7017_v20 = vunpack.i.l.bf16 %v7016_v0  ;;  %v5829_v0 = vld [vmem:[#allocation2 + $0x208] sm:$0xf] }
 0xa3c   :  { %v5830_v11 = vor.u32 %v6741_v9, %v5829_v0  ;;  %v5770_v9 = vor.u32 %v6723_v62, %v5767_v3  ;;  %v6769_v62 = vld [vmem:[%s8593_s5 + $0x98] sm:$0xff]  ;;  %v6754_v3 = vld [vmem:[%s8593_s5 + $0x20] sm:$0xff] }
 0xa3d   :  { %v1941_v18 = vsel %vm100_vm1, %v1940_v35, %v7018_v14  ;;  %v1926_v26 = vsel %vm100_vm1, %v1925_v23, %v7017_v20  ;;  %v6739_v14 = vld [vmem:[#allocation2 + $0x20c] sm:$0xf]  ;;  %v5831_v20 = vld [vmem:[#allocation2 + $0x238] sm:$0xf0]  ;;  %v5805_v35 = vld [vmem:[#allocation2 + $0x1a0] sm:$0xf] }
 0xa3e   :  { %2313 = vmatpush.bf16.msra.mxu1 %v5830_v11  ;;  %v6736_v23 = vld [vmem:[#allocation2 + $0x1cc] sm:$0xf0]  ;;  %v6718_v11 = vld [vmem:[#allocation2 + $0x24] sm:$0xf] }
 0xa52   :  { %v7021_v21 = vpop.permute.xlu1 %7020 }
 0xa53   :  { %v7023_v41 = vunpack.i.h.bf16 %v7021_v21  ;;  %v7022_v25 = vunpack.i.l.bf16 %v7021_v21  ;;  %v5834_v21 = vor.u32 %v6739_v14, %v5831_v20  ;;  %v5743_v14 = vld [vmem:[#allocation2 + $0x50] sm:$0xf0]  ;;  %v5742_v20 = vor.u32 %v6720_v30, %v5741_v6  ;;  %v6778_v6 = vld [vmem:[%s8593_s5 + $0xe0] sm:$0xff]  ;;  %v6753_v30 = vld [vmem:[%s8593_s5 + $0x18] sm:$0xff] }
 0xa55   :  { %v1927_v29 = vsel %vm923_vm12, %v1926_v26, %v7022_v25  ;;  %v1942_v32 = vsel %vm923_vm12, %v1941_v18, %v7023_v41  ;;  %v6734_v41 = vld [vmem:[#allocation2 + $0x1a4] sm:$0xf]  ;;  %2327 = vmatpush.bf16.msrb.mxu2 %v5834_v21  ;;  %v5806_v25 = vor.u32 %v6736_v23, %v5805_v35  ;;  %v5807_v18 = vld [vmem:[#allocation2 + $0x1d0] sm:$0xf0]  ;;  %v5813_v26 = vld [vmem:[#allocation2 + $0x1a8] sm:$0xf]  ;;  %v5746_v21 = vor.u32 %v6718_v11, %v5743_v14 }
 0xa56   :  { %v1943_v33 = vpack.c.bf16 %v1942_v32, %v1927_v29  ;;  %v6737_v29 = vld [vmem:[#allocation2 + $0x1d4] sm:$0xf0]  ;;  %v5810_v32 = vor.u32 %v6734_v41, %v5807_v18  ;;  %v5749_v35 = vld [vmem:[#allocation2 + $0x28] sm:$0xf]  ;;  %v6719_v41 = vld [vmem:[#allocation2 + $0x2c] sm:$0xf] }
 0xa57   :  { %2286 = vmatpush.bf16.msrb.mxu3 %v5806_v25  ;;  %v6721_v23 = vld [vmem:[#allocation2 + $0x54] sm:$0xf0]  ;;  %v7967_v14 = vld [vmem:[%s8594_s6 + $0xe] sm:$0xf] }
 0xa58   :  { %2020 = vmatmul.bf16.vlgmr.msra.gmra.mxu2 %v1943_v33  ;;  %v5814_v33 = vor.u32 %v6737_v29, %v5813_v26  ;;  %2300 = vmatpush.bf16.msrb.mxu0 %v5810_v32  ;;  %v5750_v18 = vor.u32 %v6721_v23, %v5749_v35  ;;  %v5751_v26 = vld [vmem:[#allocation2 + $0x58] sm:$0xf0]  ;;  %v6752_v35 = vld [vmem:[%s8593_s5 + $0x10] sm:$0xff] }
 0xa59   :  { %v5754_v29 = vor.u32 %v6719_v41, %v5751_v26  ;;  %v6777_v11 = vld [vmem:[%s8593_s5 + $0xd8] sm:$0xff]  ;;  %v6776_v23 = vld [vmem:[%s8593_s5 + $0xd0] sm:$0xff]  ;;  %v6758_v41 = vld [vmem:[%s8593_s5 + $0x40] sm:$0xff]  ;;  %v2117_v26 = vperm.slane %v7967_v14, 2 }
 0xa5a   :  { %2314 = vmatpush.bf16.msra.mxu1 %v5814_v33 }
 0xadb   :  { %v2021_v36 = vpop.f32.mrf.mxu2 }
 0xadc   :  { %v2022_v16 = vadd.f32 %v7126_v22, %v2021_v36  ;;  %v5815_v36 = vld [vmem:[#allocation2 + $0x1d8] sm:$0xf0] }
 0xade   :  { %v7869_v7 = vadd.f32 %v2022_v16, %v7703_v58 }
 0xae0   :  { %2030 = vadd.xlane.f32.xlu0 %v7869_v7 }
 0xae3   :  { %v2023_v31 = vpop.f32.mrf.mxu2 }
 0xae4   :  { %v2024_v17 = vadd.f32 %v7126_v22, %v2023_v31  ;;  %v6735_v22 = vld [vmem:[#allocation2 + $0x1ac] sm:$0xf]  ;;  %v5789_v31 = vld [vmem:[#allocation2 + $0x140] sm:$0xf] }
 0xae5   :  { %v5818_v16 = vor.u32 %v6735_v22, %v5815_v36 }
 0xae6   :  { %v7873_v39 = vadd.f32 %v2024_v17, %v7709_v1  ;;  %v6732_v17 = vld [vmem:[#allocation2 + $0x16c] sm:$0xf0] }
 0xae7   :  { %2328 = vmatpush.bf16.msrb.mxu2 %v5818_v16 }
 0xae8   :  { %2032 = vadd.xlane.f32.xlu1 %v7873_v39 }
 0xaeb   :  { %2329 = vmatpush.bf16.msrb.mxu2 %v5802_v28  ;;  %v7127_v28 = vld [vmem:[%s8594_s6 + $0xc] ss:$0 sm:$0xff] }
 0xaef   :  { %2330 = vmatpush.bf16.msrb.mxu2 %v5786_v52  ;;  %v6757_v52 = vld [vmem:[%s8593_s5 + $0x38] sm:$0xff] }
 0xaf3   :  { %2331 = vmatpush.bf16.msrb.mxu2 %v5770_v9  ;;  %v6768_v9 = vld [vmem:[%s8593_s5 + $0x90] sm:$0xff] }
 0xaf7   :  { %2332 = vmatpush.bf16.msrb.mxu2 %v5754_v29  ;;  %v6751_v29 = vld [vmem:[%s8593_s5 + $0x8] sm:$0xff] }
 0xafb   :  { %2717 = vmatpush.bf16.msra.mxu2 %v6781_v59 }
 0xaff   :  { %2718 = vmatpush.bf16.msra.mxu2 %v6780_v56 }
 0xb53   :  { %v2031_v42 = vpop.xlane.xlu0 %2030 }
 0xb54   :  { %v2034_v13 = vmul.f32 %v2031_v42, %v7463_v12  ;;  %v6730_v42 = vld [vmem:[#allocation2 + $0x144] sm:$0xf] }
 0xb56   :  { %v7878_v43 = vsub.f32 %v7869_v7, %v2034_v13  ;;  %v5790_v13 = vor.u32 %v6732_v17, %v5789_v31 }
 0xb58   :  { %v2038_v44 = vmul.f32 %v7878_v43, %v7878_v43  ;;  %2287 = vmatpush.bf16.msrb.mxu3 %v5790_v13 }
 0xb5a   :  { %2040 = vadd.xlane.f32.xlu2 %v2038_v44  ;;  %v5791_v44 = vld [vmem:[#allocation2 + $0x170] sm:$0xf0] }
 0xb5b   :  { %v2033_v58 = vpop.xlane.xlu1 %2032 }
 0xb5c   :  { %v2035_v2 = vmul.f32 %v2033_v58, %v7463_v12  ;;  %v5797_v58 = vld [vmem:[#allocation2 + $0x148] sm:$0xf]  ;;  %2288 = vmatpush.bf16.msrb.mxu3 %v5774_v63 }
 0xb5e   :  { %v7884_v4 = vsub.f32 %v7873_v39, %v2035_v2  ;;  %v6733_v2 = vld [vmem:[#allocation2 + $0x174] sm:$0xf0] }
 0xb5f   :  { %v5798_v24 = vor.u32 %v6733_v2, %v5797_v58 }
 0xb60   :  { %v2039_v1 = vmul.f32 %v7884_v4, %v7884_v4  ;;  %2289 = vmatpush.bf16.msrb.mxu3 %v5758_v55  ;;  %v6756_v55 = vld [vmem:[%s8593_s5 + $0x30] sm:$0xff] }
 0xb61   :  { %2315 = vmatpush.bf16.msra.mxu1 %v5798_v24 }
 0xb62   :  { %2042 = vadd.xlane.f32.xlu2 %v2039_v1  ;;  %v5794_v1 = vor.u32 %v6730_v42, %v5791_v44 }
 0xb64   :  { %2301 = vmatpush.bf16.msrb.mxu0 %v5794_v1  ;;  %2290 = vmatpush.bf16.msrb.mxu3 %v5742_v20  ;;  %v6759_v20 = vld [vmem:[%s8593_s5 + $0x48] sm:$0xff] }
 0xb65   :  { %2316 = vmatpush.bf16.msra.mxu1 %v5782_v8 }
 0xb68   :  { %2302 = vmatpush.bf16.msrb.mxu0 %v5778_v27  ;;  %2675 = vmatpush.bf16.msra.mxu3 %v6757_v52 }
 0xb69   :  { %2317 = vmatpush.bf16.msra.mxu1 %v5766_v10  ;;  %v6761_v10 = vld [vmem:[%s8593_s5 + $0x58] sm:$0xff] }
 0xb6c   :  { %2303 = vmatpush.bf16.msrb.mxu0 %v5762_v53  ;;  %2676 = vmatpush.bf16.msra.mxu3 %v6756_v55  ;;  %v6779_v53 = vld [vmem:[%s8593_s5 + $0xe8] sm:$0xff] }
 0xb6d   :  { %2318 = vmatpush.bf16.msra.mxu1 %v5750_v18  ;;  %2719 = vmatpush.bf16.msra.mxu2 %v6779_v53  ;;  %v6766_v18 = vld [vmem:[%s8593_s5 + $0x80] sm:$0xff] }
 0xb70   :  { %2304 = vmatpush.bf16.msrb.mxu0 %v5746_v21  ;;  %v6767_v21 = vld [vmem:[%s8593_s5 + $0x88] sm:$0xff] }
 0xb71   :  { %2720 = vmatpush.bf16.msra.mxu2 %v6778_v6 }
 0xb75   :  { %2721 = vmatpush.bf16.msra.mxu2 %v6777_v11 }
 0xb79   :  { %2722 = vmatpush.bf16.msra.mxu2 %v6776_v23 }
 0xbcd   :  { %v2041_v61 = vpop.xlane.xlu2 %2040 }
 0xbce   :  { %v2044_v0 = vmul.f32 %v2041_v61, %v7463_v12  ;;  %v6755_v61 = vld [vmem:[%s8593_s5 + $0x28] sm:$0xff] }
 0xbcf   :  { %2677 = vmatpush.bf16.msra.mxu3 %v6755_v61 }
 0xbd0   :  { %v2046_v25 = vadd.f32 1e-05, %v2044_v0  ;;  %v6760_v0 = vld [vmem:[%s8593_s5 + $0x50] sm:$0xff] }
 0xbd2   :  { %7215 = vrsqrt.f32 %v2046_v25  ;;  %vm2054_vm6 = vweird.f32 %v2046_v25 }
 0xbd3   :  { %2678 = vmatpush.bf16.msra.mxu3 %v6754_v3 }
 0xbd5   :  { %v2043_v32 = vpop.xlane.xlu2 %2042 }
 0xbd6   :  { %v2045_v33 = vmul.f32 %v2043_v32, %v7463_v12  ;;  %v6775_v32 = vld [vmem:[%s8593_s5 + $0xc8] sm:$0xff] }
 0xbd7   :  { %2679 = vmatpush.bf16.msra.mxu3 %v6753_v30  ;;  %2723 = vmatpush.bf16.msra.mxu2 %v6775_v32 }
 0xbd8   :  { %v7216_v22 = vpop.eup %7215  ;;  %v2047_v36 = vadd.f32 1e-05, %v2045_v33 }
 0xbd9   :  { %v2049_v16 = vmul.f32 %v7216_v22, %v2046_v25  ;;  %vm2055_vm5 = vweird.f32 %v7216_v22  ;;  %v2116_v25 = vperm.slane %v7967_v14, 1 }
 0xbda   :  { %7217 = vrsqrt.f32 %v2047_v36  ;;  %vm2056_vm7 = vmor %vm2054_vm6, %vm2055_vm5  ;;  %vm2064_vm13 = vweird.f32 %v2047_v36 }
 0xbdb   :  { %v2050_v31 = vmul.f32 %v7216_v22, %v2049_v16  ;;  %2680 = vmatpush.bf16.msra.mxu3 %v6752_v35 }
 0xbdd   :  { %v2051_v17 = vmul.f32 0.5, %v2050_v31 }
 0xbdf   :  { %v2052_v42 = vsub.f32 1.5, %v2051_v17  ;;  %2681 = vmatpush.bf16.msra.mxu3 %v6751_v29  ;;  %v2115_v17 = vperm.slane %v7967_v14, 0 }
 0xbe0   :  { %v7218_v13 = vpop.eup %7217 }
 0xbe1   :  { %v2053_v44 = vmul.f32 %v7216_v22, %v2052_v42  ;;  %v2059_v58 = vmul.f32 %v7218_v13, %v2047_v36  ;;  %vm2065_vm10 = vweird.f32 %v7218_v13  ;;  %v6750_v42 = vld [vmem:[%s8593_s5] sm:$0xff] }
 0xbe2   :  { %vm2066_vm14 = vmor %vm2064_vm13, %vm2065_vm10 }
 0xbe3   :  { %v2060_v2 = vmul.f32 %v7218_v13, %v2059_v58  ;;  %v2057_v1 = vsel %vm2056_vm7, %v7216_v22, %v2053_v44  ;;  %v2118_v58 = vperm.slane %v7967_v14, 3  ;;  %2682 = vmatpush.bf16.msra.mxu3 %v6750_v42 }
 0xbe4   :  { %v2068_v50 = vmul.f32 %v2057_v1, %v7878_v43  ;;  %v6765_v43 = vld [vmem:[%s8593_s5 + $0x78] sm:$0xff] }
 0xbe5   :  { %v2061_v24 = vmul.f32 0.5, %v2060_v2  ;;  %2689 = vmatpush.bf16.msra.mxu0 %v6765_v43 }
 0xbe6   :  { %v2073_v63 = vmul.f32 %v7127_v28, %v2068_v50 }
 0xbe7   :  { %v2062_v45 = vsub.f32 1.5, %v2061_v24 }
 0xbe8   :  { %v2078_v51 = vadd.f32 %v7128_v49, %v2073_v63 }
 0xbe9   :  { %v2063_v47 = vmul.f32 %v7218_v13, %v2062_v45  ;;  %2690 = vmatpush.bf16.msra.mxu0 %v6764_v37 }
 0xbeb   :  { %v2067_v48 = vsel %vm2066_vm14, %v7218_v13, %v2063_v47  ;;  %v6774_v13 = vld [vmem:[%s8593_s5 + $0xc0] sm:$0xff] }
 0xbec   :  { %v2069_v15 = vmul.f32 %v2067_v48, %v7884_v4  ;;  %v6773_v4 = vld [vmem:[%s8593_s5 + $0xb8] sm:$0xff]  ;;  %2724 = vmatpush.bf16.msra.mxu2 %v6774_v13 }
 0xbed   :  { %2703 = vmatpush.bf16.msrb.mxu1 %v6773_v4  ;;  %2691 = vmatpush.bf16.msra.mxu0 %v6763_v54 }
 0xbee   :  { %v2074_v40 = vmul.f32 %v7127_v28, %v2069_v15 }
 0xbf0   :  { %v2079_v27 = vadd.f32 %v7128_v49, %v2074_v40 }
 0xbf1   :  { %2704 = vmatpush.bf16.msrb.mxu1 %v6772_v38  ;;  %2692 = vmatpush.bf16.msra.mxu0 %v6762_v57 }
 0xbf2   :  { %v2080_v8 = vpack.c.bf16 %v2079_v27, %v2078_v51 }
 0xbf4   :  { %2291 = vmatmul.bf16.vlgmr.msrb.gmra.mxu3 %v2080_v8  ;;  %2305 = vmatmul.bf16.vlgmr.msrb.gmra.mxu0 %v2080_v8 }
 0xbf5   :  { %2319 = vmatmul.bf16.vlgmr.msra.gmra.mxu1 %v2080_v8  ;;  %2333 = vmatmul.bf16.vlgmr.msrb.gmra.mxu2 %v2080_v8 }
 0xbf6   :  { %2705 = vmatpush.bf16.msrb.mxu1 %v6771_v34  ;;  %2693 = vmatpush.bf16.msra.mxu0 %v6761_v10 }
 0xbfa   :  { %2706 = vmatpush.bf16.msrb.mxu1 %v6770_v60  ;;  %2694 = vmatpush.bf16.msra.mxu0 %v6760_v0 }
 0xbfe   :  { %2707 = vmatpush.bf16.msrb.mxu1 %v6769_v62  ;;  %2695 = vmatpush.bf16.msra.mxu0 %v6759_v20 }
 0xc02   :  { %2708 = vmatpush.bf16.msrb.mxu1 %v6768_v9  ;;  %2696 = vmatpush.bf16.msra.mxu0 %v6758_v41 }
 0xc06   :  { %2709 = vmatpush.bf16.msrb.mxu1 %v6767_v21 }
 0xc0a   :  { %2710 = vmatpush.bf16.msrb.mxu1 %v6766_v18 }
 0xc71   :  { %v2306_v33 = vpop.f32.mrf.mxu0 }
 0xc72   :  { %v7995_v22 = vadd.f32 %v2306_v33, %v2116_v25  ;;  %v2320_v36 = vpop.f32.mrf.mxu1 }
 0xc73   :  { %v7997_v16 = vadd.f32 %v2320_v36, %v2117_v26 }
 0xc74   :  { %v2348_v31 = vmul.f32 0.044715, %v7995_v22 }
 0xc75   :  { %v2349_v44 = vmul.f32 0.044715, %v7997_v16 }
 0xc76   :  { %v2356_v2 = vmul.f32 %v2348_v31, %v7995_v22 }
 0xc77   :  { %v2357_v1 = vmul.f32 %v2349_v44, %v7997_v16  ;;  %v2292_v24 = vpop.f32.mrf.mxu3 }
 0xc78   :  { %v2364_v45 = vmul.f32 %v2356_v2, %v7995_v22  ;;  %v8012_v50 = vadd.f32 %v2292_v24, %v2115_v17  ;;  %v2334_v28 = vpop.f32.mrf.mxu2  ;;  %v2340_v2 = vmul.f32 0.5, %v7995_v22 }
 0xc79   :  { %v2365_v47 = vmul.f32 %v2357_v1, %v7997_v16  ;;  %v8015_v48 = vadd.f32 %v2334_v28, %v2118_v58  ;;  %v2308_v15 = vpop.f32.mrf.mxu0  ;;  %v2341_v28 = vmul.f32 0.5, %v7997_v16 }
 0xc7a   :  { %v2372_v63 = vadd.f32 %v2364_v45, %v7995_v22  ;;  %v2347_v49 = vmul.f32 0.044715, %v8012_v50  ;;  %v2309_v40 = vadd.f32 %v2308_v15, %v2116_v25  ;;  %v2322_v51 = vpop.f32.mrf.mxu1  ;;  %v2339_v22 = vmul.f32 0.5, %v8012_v50 }
 0xc7b   :  { %v2373_v27 = vadd.f32 %v2365_v47, %v7997_v16  ;;  %v2350_v8 = vmul.f32 0.044715, %v8015_v48  ;;  %v2323_v43 = vadd.f32 %v2322_v51, %v2117_v26  ;;  %v2342_v16 = vmul.f32 0.5, %v8015_v48 }
 0xc7c   :  { %v2355_v4 = vmul.f32 %v2347_v49, %v8012_v50  ;;  %v2352_v37 = vmul.f32 0.044715, %v2309_v40  ;;  %v2380_v59 = vmul.f32 0.7978846, %v2372_v63  ;;  %v2344_v1 = vmul.f32 0.5, %v2309_v40 }
 0xc7d   :  { %v2358_v38 = vmul.f32 %v2350_v8, %v8015_v48  ;;  %v2353_v52 = vmul.f32 0.044715, %v2323_v43  ;;  %v2381_v55 = vmul.f32 0.7978846, %v2373_v27  ;;  %v2345_v47 = vmul.f32 0.5, %v2323_v43 }
 0xc7e   :  { %v2363_v54 = vmul.f32 %v2355_v4, %v8012_v50  ;;  %v2360_v34 = vmul.f32 %v2352_v37, %v2309_v40  ;;  %7219 = vtanh.f32 %v2380_v59 }
 0xc7f   :  { %v2366_v56 = vmul.f32 %v2358_v38, %v8015_v48  ;;  %v2361_v57 = vmul.f32 %v2353_v52, %v2323_v43  ;;  %v2294_v60 = vpop.f32.mrf.mxu3  ;;  %7221 = vtanh.f32 %v2381_v55 }
 0xc80   :  { %v2371_v61 = vadd.f32 %v2363_v54, %v8012_v50  ;;  %v2368_v53 = vmul.f32 %v2360_v34, %v2309_v40  ;;  %v2295_v10 = vadd.f32 %v2294_v60, %v2115_v17  ;;  %v2336_v62 = vpop.f32.mrf.mxu2 }
 0xc81   :  { %v2374_v3 = vadd.f32 %v2366_v56, %v8015_v48  ;;  %v2369_v6 = vmul.f32 %v2361_v57, %v2323_v43  ;;  %v2337_v0 = vadd.f32 %v2336_v62, %v2118_v58 }
 0xc82   :  { %v2376_v9 = vadd.f32 %v2368_v53, %v2309_v40  ;;  %v2351_v30 = vmul.f32 0.044715, %v2295_v10  ;;  %v2379_v20 = vmul.f32 0.7978846, %v2371_v61  ;;  %v2343_v40 = vmul.f32 0.5, %v2295_v10 }
 0xc83   :  { %v2354_v11 = vmul.f32 0.044715, %v2337_v0  ;;  %v2377_v14 = vadd.f32 %v2369_v6, %v2323_v43  ;;  %v2382_v23 = vmul.f32 0.7978846, %v2374_v3  ;;  %v2346_v43 = vmul.f32 0.5, %v2337_v0 }
 0xc84   :  { %v2384_v21 = vmul.f32 0.7978846, %v2376_v9  ;;  %v2359_v35 = vmul.f32 %v2351_v30, %v2295_v10  ;;  %v7220_v29 = vpop.eup %7219  ;;  %v7129_v3 = vld [vmem:[%s8594_s6 + $0x12] ss:$0 sm:$0xff] }
 0xc85   :  { %v2362_v41 = vmul.f32 %v2354_v11, %v2337_v0  ;;  %v2385_v25 = vmul.f32 0.7978846, %v2377_v14  ;;  %v7222_v33 = vpop.eup %7221  ;;  %v2396_v17 = vadd.f32 1.0, %v7220_v29 }
 0xc86   :  { %7223 = vtanh.f32 %v2384_v21  ;;  %v2367_v18 = vmul.f32 %v2359_v35, %v2295_v10  ;;  %v2397_v44 = vadd.f32 1.0, %v7222_v33 }
 0xc87   :  { %v2370_v26 = vmul.f32 %v2362_v41, %v2337_v0  ;;  %7225 = vtanh.f32 %v2385_v25  ;;  %v2404_v49 = vmul.f32 %v2396_v17, %v2340_v2 }
 0xc88   :  { %v2375_v32 = vadd.f32 %v2367_v18, %v2295_v10  ;;  %7227 = vtanh.f32 %v2379_v20  ;;  %v2405_v27 = vmul.f32 %v2397_v44, %v2341_v28  ;;  %v6804_v44 = vld [vmem:[#allocation2 + $0x5cc] sm:$0xf0] }
 0xc89   :  { %7229 = vtanh.f32 %v2382_v23  ;;  %v2378_v36 = vadd.f32 %v2370_v26, %v2337_v0 }
 0xc8a   :  { %v2383_v31 = vmul.f32 0.7978846, %v2375_v32 }
 0xc8b   :  { %v2386_v42 = vmul.f32 0.7978846, %v2378_v36 }
 0xc8c   :  { %v7224_v13 = vpop.eup %7223  ;;  %7231 = vtanh.f32 %v2383_v31 }
 0xc8d   :  { %v7226_v58 = vpop.eup %7225  ;;  %7233 = vtanh.f32 %v2386_v42  ;;  %v2400_v24 = vadd.f32 1.0, %v7224_v13  ;;  %v6084_v13 = vld [vmem:[#allocation2 + $0x5a0] sm:$0xf] }
 0xc8e   :  { %v7228_v45 = vpop.eup %7227  ;;  %v2401_v15 = vadd.f32 1.0, %v7226_v58  ;;  %v6803_v58 = vld [vmem:[#allocation2 + $0x5a4] sm:$0xf]  ;;  %v6085_v2 = vor.u32 %v6804_v44, %v6084_v13 }
 0xc8f   :  { %v7230_v63 = vpop.eup %7229  ;;  %v2408_v51 = vmul.f32 %v2400_v24, %v2344_v1  ;;  %v2395_v37 = vadd.f32 1.0, %v7228_v45  ;;  %v6086_v1 = vld [vmem:[#allocation2 + $0x5d0] sm:$0xf0]  ;;  %v6092_v24 = vld [vmem:[#allocation2 + $0x5a8] sm:$0xf] }
 0xc90   :  { %v2409_v8 = vmul.f32 %v2401_v15, %v2345_v47  ;;  %v2398_v52 = vadd.f32 1.0, %v7230_v63  ;;  %v6805_v45 = vld [vmem:[#allocation2 + $0x5d4] sm:$0xf0]  ;;  %v6089_v28 = vor.u32 %v6803_v58, %v6086_v1  ;;  %2956 = vmatpush.bf16.msrb.mxu3 %v6085_v2  ;;  %v6072_v15 = vld [vmem:[#allocation2 + $0x540] sm:$0xf] }
 0xc91   :  { %v2412_v4 = vpack.c.bf16 %v2408_v51, %v2404_v49  ;;  %v2403_v56 = vmul.f32 %v2395_v37, %v2339_v22  ;;  %v6093_v47 = vor.u32 %v6805_v45, %v6092_v24  ;;  %v6801_v63 = vld [vmem:[#allocation2 + $0x56c] sm:$0xf0]  ;;  %v6800_v49 = vld [vmem:[#allocation2 + $0x544] sm:$0xf]  ;;  %v6014_v58 = vld [vmem:[#allocation2 + $0x390] sm:$0xf0] }
 0xc92   :  { %v7232_v38 = vpop.eup %7231  ;;  %v2413_v59 = vpack.c.bf16 %v2409_v8, %v2405_v27  ;;  %v2406_v60 = vmul.f32 %v2398_v52, %v2342_v16  ;;  %2970 = vmatpush.bf16.msrb.mxu0 %v6089_v28  ;;  %v6073_v51 = vor.u32 %v6801_v63, %v6072_v15  ;;  %v6074_v27 = vld [vmem:[#allocation2 + $0x570] sm:$0xf0]  ;;  %v6080_v8 = vld [vmem:[#allocation2 + $0x548] sm:$0xf]  ;;  %v6060_v52 = vld [vmem:[#allocation2 + $0x4e0] sm:$0xf] }
 0xc93   :  { %v7234_v54 = vpop.eup %7233  ;;  %2697 = vmatmul.bf16.vlgmr.msra.gmra.mxu0 %v2412_v4  ;;  %v2399_v34 = vadd.f32 1.0, %v7232_v38  ;;  %2984 = vmatpush.bf16.msra.mxu1 %v6093_v47  ;;  %v6802_v4 = vld [vmem:[#allocation2 + $0x574] sm:$0xf0]  ;;  %v6077_v37 = vor.u32 %v6800_v49, %v6074_v27  ;;  %v6785_v13 = vld [vmem:[#allocation2 + $0x364] sm:$0xf] }
 0xc94   :  { %2711 = vmatmul.bf16.vlgmr.msrb.gmra.mxu1 %v2413_v59  ;;  %v2402_v55 = vadd.f32 1.0, %v7234_v54  ;;  %v6081_v38 = vor.u32 %v6802_v4, %v6080_v8  ;;  %2957 = vmatpush.bf16.msrb.mxu3 %v6073_v51  ;;  %v6798_v59 = vld [vmem:[#allocation2 + $0x50c] sm:$0xf0]  ;;  %v6797_v54 = vld [vmem:[#allocation2 + $0x4e4] sm:$0xf]  ;;  %v6017_v45 = vor.u32 %v6785_v13, %v6014_v58 }
 0xc95   :  { %v2407_v57 = vmul.f32 %v2399_v34, %v2343_v40  ;;  %v6061_v22 = vor.u32 %v6798_v59, %v6060_v52  ;;  %v6062_v40 = vld [vmem:[#allocation2 + $0x510] sm:$0xf0]  ;;  %v6068_v34 = vld [vmem:[#allocation2 + $0x4e8] sm:$0xf]  ;;  %v6799_v16 = vld [vmem:[#allocation2 + $0x514] sm:$0xf0] }
 0xc96   :  { %v2410_v61 = vmul.f32 %v2402_v55, %v2346_v43  ;;  %2971 = vmatpush.bf16.msrb.mxu0 %v6077_v37  ;;  %v6065_v43 = vor.u32 %v6797_v54, %v6062_v40  ;;  %v6069_v55 = vor.u32 %v6799_v16, %v6068_v34  ;;  %v6020_v2 = vld [vmem:[#allocation2 + $0x368] sm:$0xf]  ;;  %v6787_v1 = vld [vmem:[#allocation2 + $0x394] sm:$0xf0]  ;;  %v6000_v15 = vld [vmem:[#allocation2 + $0x300] sm:$0xf] }
 0xc97   :  { %v2411_v53 = vpack.c.bf16 %v2407_v57, %v2403_v56  ;;  %2985 = vmatpush.bf16.msra.mxu1 %v6081_v38  ;;  %v6048_v56 = vld [vmem:[#allocation2 + $0x480] sm:$0xf]  ;;  %v6795_v57 = vld [vmem:[#allocation2 + $0x4ac] sm:$0xf0]  ;;  %v6021_v28 = vor.u32 %v6787_v1, %v6020_v2  ;;  %v6782_v49 = vld [vmem:[#allocation2 + $0x304] sm:$0xf] }
 0xc98   :  { %v2414_v62 = vpack.c.bf16 %v2410_v61, %v2406_v60  ;;  %2958 = vmatpush.bf16.msrb.mxu3 %v6061_v22  ;;  %v6794_v60 = vld [vmem:[#allocation2 + $0x484] sm:$0xf]  ;;  %v6049_v61 = vor.u32 %v6795_v57, %v6048_v56  ;;  %v6783_v63 = vld [vmem:[#allocation2 + $0x32c] sm:$0xf0]  ;;  %v6002_v8 = vld [vmem:[#allocation2 + $0x330] sm:$0xf0] }
 0xc99   :  { %2683 = vmatmul.bf16.vlgmr.msra.gmra.mxu3 %v2411_v53  ;;  %v6050_v53 = vld [vmem:[#allocation2 + $0x4b0] sm:$0xf0]  ;;  %v6001_v27 = vor.u32 %v6783_v63, %v6000_v15  ;;  %v6008_v4 = vld [vmem:[#allocation2 + $0x308] sm:$0xf]  ;;  %v6005_v37 = vor.u32 %v6782_v49, %v6002_v8  ;;  %v6784_v38 = vld [vmem:[#allocation2 + $0x334] sm:$0xf0] }
 0xc9a   :  { %2725 = vmatmul.bf16.vlgmr.msra.gmra.mxu2 %v2414_v62  ;;  %2972 = vmatpush.bf16.msrb.mxu0 %v6065_v43  ;;  %v6056_v62 = vld [vmem:[#allocation2 + $0x488] sm:$0xf]  ;;  %v6009_v52 = vor.u32 %v6784_v38, %v6008_v4 }
 0xc9b   :  { %2986 = vmatpush.bf16.msra.mxu1 %v6069_v55 }
 0xc9c   :  { %2959 = vmatpush.bf16.msrb.mxu3 %v6049_v61 }
 0xd10   :  { %v2698_v50 = vpop.f32.mrf.mxu0 }
 0xd11   :  { %v2712_v9 = vpop.f32.mrf.mxu1 }
 0xd18   :  { %v2700_v35 = vpop.f32.mrf.mxu0 }
 0xd19   :  { %v2714_v41 = vpop.f32.mrf.mxu1 }
 0xd1c   :  { %v2684_v10 = vpop.f32.mrf.mxu3 }
 0xd1d   :  { %v2685_v6 = vadd.f32 %v7129_v3, %v2684_v10  ;;  %v2726_v0 = vpop.f32.mrf.mxu2 }
 0xd1f   :  { %v2699_v48 = vadd.f32 %v2698_v50, %v2685_v6  ;;  %v6053_v50 = vor.u32 %v6794_v60, %v6050_v53  ;;  %v6036_v6 = vld [vmem:[#allocation2 + $0x420] sm:$0xf] }
 0xd21   :  { %v2713_v30 = vadd.f32 %v2712_v9, %v2699_v48  ;;  %2973 = vmatpush.bf16.msrb.mxu0 %v6053_v50  ;;  %v6792_v9 = vld [vmem:[#allocation2 + $0x44c] sm:$0xf0]  ;;  %v6791_v48 = vld [vmem:[#allocation2 + $0x424] sm:$0xf] }
 0xd22   :  { %v7130_v50 = vld [vmem:[%s8594_s6 + $0x13] ss:$0 sm:$0xff] }
 0xd23   :  { %v2727_v11 = vadd.f32 %v2726_v0, %v2713_v30  ;;  %v6037_v0 = vor.u32 %v6792_v9, %v6036_v6  ;;  %v6038_v30 = vld [vmem:[#allocation2 + $0x450] sm:$0xf0] }
 0xd24   :  { %v2686_v14 = vpop.f32.mrf.mxu3 }
 0xd25   :  { %v8035_v20 = vadd.f32 %v2727_v11, %v7869_v7  ;;  %v2687_v21 = vadd.f32 %v7129_v3, %v2686_v14  ;;  %v2728_v18 = vpop.f32.mrf.mxu2  ;;  %v6796_v3 = vld [vmem:[#allocation2 + $0x4b4] sm:$0xf0]  ;;  %v6044_v11 = vld [vmem:[#allocation2 + $0x428] sm:$0xf]  ;;  %2960 = vmatpush.bf16.msrb.mxu3 %v6037_v0 }
 0xd26   :  { %v6057_v10 = vor.u32 %v6796_v3, %v6056_v62  ;;  %v6793_v14 = vld [vmem:[#allocation2 + $0x454] sm:$0xf0] }
 0xd27   :  { %v2701_v23 = vadd.f32 %v2700_v35, %v2687_v21  ;;  %2736 = vadd.xlane.f32.xlu2 %v8035_v20  ;;  %v6041_v21 = vor.u32 %v6791_v48, %v6038_v30  ;;  %v6045_v35 = vor.u32 %v6793_v14, %v6044_v11  ;;  %v7131_v48 = vld [vmem:[%s8594_s6 + $0x14] ss:$0 sm:$0xff] }
 0xd28   :  { %2987 = vmatpush.bf16.msra.mxu1 %v6057_v10 }
 0xd29   :  { %v2715_v25 = vadd.f32 %v2714_v41, %v2701_v23  ;;  %2974 = vmatpush.bf16.msrb.mxu0 %v6041_v21  ;;  %v6024_v23 = vld [vmem:[#allocation2 + $0x3c0] sm:$0xf]  ;;  %v6789_v41 = vld [vmem:[#allocation2 + $0x3ec] sm:$0xf0] }
 0xd2b   :  { %v2729_v26 = vadd.f32 %v2728_v18, %v2715_v25  ;;  %v6788_v25 = vld [vmem:[#allocation2 + $0x3c4] sm:$0xf]  ;;  %v6025_v18 = vor.u32 %v6789_v41, %v6024_v23 }
 0xd2c   :  { %2988 = vmatpush.bf16.msra.mxu1 %v6045_v35 }
 0xd2d   :  { %v8039_v29 = vadd.f32 %v2729_v26, %v7873_v39  ;;  %v6026_v26 = vld [vmem:[#allocation2 + $0x3f0] sm:$0xf0]  ;;  %2961 = vmatpush.bf16.msrb.mxu3 %v6025_v18 }
 0xd2f   :  { %2738 = vadd.xlane.f32.xlu2 %v8039_v29 }
 0xd9a   :  { %v2737_v32 = vpop.xlane.xlu2 %2736 }
 0xd9b   :  { %v2740_v33 = vmul.f32 %v2737_v32, %v7463_v12  ;;  %v6032_v32 = vld [vmem:[#allocation2 + $0x3c8] sm:$0xf] }
 0xd9d   :  { %v8044_v7 = vsub.f32 %v8035_v20, %v2740_v33  ;;  %v6790_v33 = vld [vmem:[#allocation2 + $0x3f4] sm:$0xf0] }
 0xd9f   :  { %v2744_v36 = vmul.f32 %v8044_v7, %v8044_v7 }
 0xda1   :  { %2746 = vadd.xlane.f32.xlu0 %v2744_v36  ;;  %v6029_v36 = vor.u32 %v6788_v25, %v6026_v26 }
 0xda2   :  { %v2739_v31 = vpop.xlane.xlu2 %2738 }
 0xda3   :  { %v2741_v17 = vmul.f32 %v2739_v31, %v7463_v12  ;;  %v6033_v31 = vor.u32 %v6790_v33, %v6032_v32  ;;  %2975 = vmatpush.bf16.msrb.mxu0 %v6029_v36 }
 0xda5   :  { %v8050_v42 = vsub.f32 %v8039_v29, %v2741_v17  ;;  %2989 = vmatpush.bf16.msra.mxu1 %v6033_v31  ;;  %v6012_v17 = vld [vmem:[#allocation2 + $0x360] sm:$0xf] }
 0xda7   :  { %v2745_v39 = vmul.f32 %v8050_v42, %v8050_v42  ;;  %2976 = vmatpush.bf16.msrb.mxu0 %v6017_v45 }
 0xda9   :  { %2748 = vadd.xlane.f32.xlu2 %v2745_v39  ;;  %v6786_v39 = vld [vmem:[#allocation2 + $0x38c] sm:$0xf0]  ;;  %2990 = vmatpush.bf16.msra.mxu1 %v6021_v28 }
 0xdaa   :  { %v6013_v44 = vor.u32 %v6786_v39, %v6012_v17 }
 0xdab   :  { %2977 = vmatpush.bf16.msrb.mxu0 %v6005_v37 }
 0xdac   :  { %2962 = vmatpush.bf16.msrb.mxu3 %v6013_v44 }
 0xdad   :  { %2991 = vmatpush.bf16.msra.mxu1 %v6009_v52 }
 0xdb0   :  { %2963 = vmatpush.bf16.msrb.mxu3 %v6001_v27 }
 0xe14   :  { %v2747_v24 = vpop.xlane.xlu0 %2746 }
 0xe15   :  { %v2750_v47 = vmul.f32 %v2747_v24, %v7463_v12 }
 0xe17   :  { %v2752_v51 = vadd.f32 1e-05, %v2750_v47 }
 0xe19   :  { %7235 = vrsqrt.f32 %v2752_v51  ;;  %vm2760_vm0 = vweird.f32 %v2752_v51 }
 0xe1c   :  { %v2749_v59 = vpop.xlane.xlu2 %2748 }
 0xe1d   :  { %v2751_v54 = vmul.f32 %v2749_v59, %v7463_v12 }
 0xe1f   :  { %v7236_v22 = vpop.eup %7235  ;;  %v2753_v40 = vadd.f32 1e-05, %v2751_v54 }
 0xe20   :  { %v2755_v34 = vmul.f32 %v7236_v22, %v2752_v51  ;;  %vm2761_vm15 = vweird.f32 %v7236_v22 }
 0xe21   :  { %7237 = vrsqrt.f32 %v2753_v40  ;;  %vm2762_vm2 = vmor %vm2760_vm0, %vm2761_vm15  ;;  %vm2770_vm5 = vweird.f32 %v2753_v40 }
 0xe22   :  { %v2756_v16 = vmul.f32 %v7236_v22, %v2755_v34 }
 0xe24   :  { %v2757_v43 = vmul.f32 0.5, %v2756_v16 }
 0xe26   :  { %v2758_v55 = vsub.f32 1.5, %v2757_v43 }
 0xe27   :  { %v7238_v56 = vpop.eup %7237 }
 0xe28   :  { %v2759_v57 = vmul.f32 %v7236_v22, %v2758_v55  ;;  %v2765_v60 = vmul.f32 %v7238_v56, %v2753_v40  ;;  %vm2771_vm3 = vweird.f32 %v7238_v56 }
 0xe29   :  { %vm2772_vm6 = vmor %vm2770_vm5, %vm2771_vm3 }
 0xe2a   :  { %v2766_v61 = vmul.f32 %v7238_v56, %v2765_v60  ;;  %v2763_v53 = vsel %vm2762_vm2, %v7236_v22, %v2759_v57 }
 0xe2b   :  { %v2774_v10 = vmul.f32 %v2763_v53, %v8044_v7  ;;  %v5997_v7 = vld [vmem:[%s8594_s6 + $0x15] sm:$0x7] }
 0xe2c   :  { %v2767_v62 = vmul.f32 0.5, %v2766_v61  ;;  %v2823_v23 = vperm.slane %v5997_v7, 1  ;;  %v2824_v18 = vperm.slane %v5997_v7, 2 }
 0xe2d   :  { %v2779_v0 = vmul.f32 %v7130_v50, %v2774_v10 }
 0xe2e   :  { %v2768_v3 = vsub.f32 1.5, %v2767_v62 }
 0xe2f   :  { %v2784_v14 = vadd.f32 %v7131_v48, %v2779_v0 }
 0xe30   :  { %v2769_v6 = vmul.f32 %v7238_v56, %v2768_v3 }
 0xe32   :  { %v2773_v9 = vsel %vm2772_vm6, %v7238_v56, %v2769_v6 }
 0xe33   :  { %v2775_v30 = vmul.f32 %v2773_v9, %v8050_v42  ;;  %v2822_v42 = vperm.slane %v5997_v7, 0 }
 0xe35   :  { %v2780_v11 = vmul.f32 %v7130_v50, %v2775_v30 }
 0xe37   :  { %v2785_v21 = vadd.f32 %v7131_v48, %v2780_v11 }
 0xe39   :  { %v2786_v35 = vpack.c.bf16 %v2785_v21, %v2784_v14 }
 0xe3b   :  { %2964 = vmatmul.bf16.vlgmr.msrb.gmra.mxu3 %v2786_v35  ;;  %2978 = vmatmul.bf16.vlgmr.msrb.gmra.mxu0 %v2786_v35 }
 0xe3c   :  { %2992 = vmatmul.bf16.vlgmr.msra.gmra.mxu1 %v2786_v35 }
 0xeb8   :  { %v2979_v41 = vpop.f32.mrf.mxu0 }
 0xeb9   :  { %v2980_v25 = vadd.f32 %v2979_v41, %v2823_v23  ;;  %v2993_v26 = vpop.f32.mrf.mxu1 }
 0xeba   :  { %v8070_v36 = vadd.f32 %v2993_v26, %v2824_v18 }
 0xebb   :  { %3022 = vrot.lane.b32.xlu2 %v2980_v25, %s7386_s15  ;;  %3019 = vrot.lane.b32.xlu1 %v2980_v25, %s7387_s16  ;;  %v3066_v32 = vpack.c.bf16 %v2980_v25, %v2980_v25 }
 0xebc   :  { %v3338_v44 = vpack.c.bf16 %v8070_v36, %v8070_v36 }
 0xebd   :  { %v3078_v33 = vsel %vm482_vm8, %v3066_v32, 0 }
 0xebe   :  { %v2965_v31 = vpop.f32.mrf.mxu3  ;;  %3087 = vmatpush.bf16.xpose.msrb.mxu2 %v3078_v33  ;;  %v3350_v45 = vsel %vm759_vm9, %v3338_v44, 0 }
 0xebf   :  { %v2966_v17 = vadd.f32 %v2965_v31, %v2822_v42 }
 0xec0   :  { %v2981_v39 = vpop.f32.mrf.mxu0 }
 0xec1   :  { %v2982_v13 = vadd.f32 %v2981_v39, %v2823_v23  ;;  %2999 = vrot.lane.b32.xlu0 %v2966_v17, %s7387_s16  ;;  %v3058_v58 = vpack.c.bf16 %v2966_v17, %v2966_v17  ;;  %v2995_v47 = vpop.f32.mrf.mxu1 }
 0xec2   :  { %v8083_v15 = vadd.f32 %v2995_v47, %v2824_v18 }
 0xec3   :  { %3029 = vrot.lane.b32.xlu1 %v2982_v13, %s7387_s16  ;;  %3002 = vrot.lane.b32.xlu2 %v2966_v17, %s7386_s15  ;;  %v3070_v2 = vpack.c.bf16 %v2982_v13, %v2982_v13 }
 0xec4   :  { %v3342_v63 = vpack.c.bf16 %v8083_v15, %v8083_v15 }
 0xec5   :  { %6094 = vmatmul.msk.bf16.vlgmr.msrb.gmra.mxu2 %vm482_vm8, %v3058_v58  ;;  %v3154_v1 = vsel %vm482_vm8, %v3070_v2, 0 }
 0xec6   :  { %v2967_v24 = vpop.f32.mrf.mxu3  ;;  %3163 = vmatpush.bf16.xpose.msra.mxu2 %v3154_v1  ;;  %v3426_v51 = vsel %vm759_vm9, %v3342_v63, 0 }
 0xec7   :  { %v2968_v28 = vadd.f32 %v2967_v24, %v2822_v42 }
 0xec9   :  { %3025 = vrot.lane.b32.xlu0 %v2980_v25, %s7385_s14  ;;  %v3062_v49 = vpack.c.bf16 %v2968_v28, %v2968_v28 }
 0xecb   :  { %3009 = vrot.lane.b32.xlu1 %v2968_v28, %s7387_s16  ;;  %3032 = vrot.lane.b32.xlu2 %v2982_v13, %s7386_s15 }
 0xece   :  { %3359 = vmatpush.bf16.msrb.mxu2 %v3350_v45 }
 0xed1   :  { %3005 = vrot.lane.b32.xlu0 %v2966_v17, %s7385_s14 }
 0xed3   :  { %3012 = vrot.lane.b32.xlu1 %v2968_v28, %s7386_s15  ;;  %3015 = vrot.lane.b32.xlu2 %v2968_v28, %s7385_s14 }
 0xed5   :  { %6098 = vmatmul.msk.bf16.vlgmr.msra.gmra.mxu2 %vm482_vm8, %v3062_v49 }
 0xed6   :  { %3435 = vmatpush.bf16.msra.mxu2 %v3426_v51 }
 0xed9   :  { %3035 = vrot.lane.b32.xlu0 %v2982_v13, %s7385_s14 }
 0xf15   :  { %v3023_v27 = vpop.permute.xlu2 %3022 }
 0xf16   :  { %v3068_v8 = vpack.c.bf16 %v3023_v27, %v3023_v27 }
 0xf18   :  { %v3116_v4 = vsel %vm482_vm8, %v3068_v8, 0 }
 0xf19   :  { %3125 = vmatpush.bf16.xpose.msra.mxu0 %v3116_v4 }
 0xf1d   :  { %v3003_v37 = vpop.permute.xlu2 %3002 }
 0xf1e   :  { %v3060_v38 = vpack.c.bf16 %v3003_v37, %v3003_v37 }
 0xf20   :  { %6096 = vmatmul.msk.bf16.vlgmr.msra.gmra.mxu0 %vm482_vm8, %v3060_v38 }
 0xf25   :  { %v3033_v52 = vpop.permute.xlu2 %3032 }
 0xf26   :  { %v3072_v59 = vpack.c.bf16 %v3033_v52, %v3033_v52 }
 0xf28   :  { %v3192_v54 = vsel %vm482_vm8, %v3072_v59, 0 }
 0xf29   :  { %3201 = vmatpush.bf16.xpose.msrb.mxu0 %v3192_v54 }
 0xf2d   :  { %v3020_v22 = vpop.permute.xlu1 %3019  ;;  %v3016_v23 = vpop.permute.xlu2 %3015 }
 0xf2e   :  { %v3067_v40 = vpack.c.bf16 %v3020_v22, %v3020_v22  ;;  %v3065_v41 = vpack.c.bf16 %v3016_v23, %v3016_v23 }
 0xf30   :  { %v3097_v34 = vsel %vm482_vm8, %v3067_v40, 0 }
 0xf31   :  { %3106 = vmatpush.bf16.xpose.msra.mxu3 %v3097_v34 }
 0xf33   :  { %v3000_v16 = vpop.permute.xlu0 %2999 }
 0xf34   :  { %v3059_v55 = vpack.c.bf16 %v3000_v16, %v3000_v16 }
 0xf35   :  { %v3030_v43 = vpop.permute.xlu1 %3029 }
 0xf36   :  { %v3071_v56 = vpack.c.bf16 %v3030_v43, %v3030_v43 }
 0xf38   :  { %v3173_v57 = vsel %vm482_vm8, %v3071_v56, 0  ;;  %6095 = vmatmul.msk.bf16.vlgmr.msra.gmra.mxu3 %vm482_vm8, %v3059_v55  ;;  %v7024_v56 = vpack.i.bf16 %v8083_v15, %v8070_v36 }
 0xf39   :  { %3182 = vmatpush.bf16.xpose.msrb.mxu3 %v3173_v57 }
 0xf3b   :  { %v3026_v60 = vpop.permute.xlu0 %3025 }
 0xf3c   :  { %v3069_v61 = vpack.c.bf16 %v3026_v60, %v3026_v60 }
 0xf3d   :  { %v3010_v53 = vpop.permute.xlu1 %3009 }
 0xf3e   :  { %v3135_v62 = vsel %vm482_vm8, %v3069_v61, 0  ;;  %v3063_v6 = vpack.c.bf16 %v3010_v53, %v3010_v53 }
 0xf3f   :  { %3144 = vmatpush.bf16.xpose.msrb.mxu1 %v3135_v62 }
 0xf43   :  { %v3006_v3 = vpop.permute.xlu0 %3005 }
 0xf44   :  { %v3061_v50 = vpack.c.bf16 %v3006_v3, %v3006_v3 }
 0xf45   :  { %v3013_v10 = vpop.permute.xlu1 %3012 }
 0xf46   :  { %v3064_v9 = vpack.c.bf16 %v3013_v10, %v3013_v10  ;;  %6097 = vmatmul.msk.bf16.vlgmr.msrb.gmra.mxu1 %vm482_vm8, %v3061_v50 }
 0xf48   :  { %v3089_v48 = vpop.f32.mrf.mxu2  ;;  %6099 = vmatmul.msk.bf16.vlgmr.msrb.gmra.mxu3 %vm482_vm8, %v3063_v6  ;;  %6100 = vmatmul.msk.bf16.vlgmr.msrb.gmra.mxu0 %vm482_vm8, %v3064_v9 }
 0xf49   :  { %v3226_v0 = vmul.f32 0.17677669, %v3089_v48 }
 0xf4b   :  { %v3036_v30 = vpop.permute.xlu0 %3035  ;;  %v8104_v11 = vadd.f32 %v3226_v0, %v7553_v19 }
 0xf4c   :  { %v3073_v14 = vpack.c.bf16 %v3036_v30, %v3036_v30 }
 0xf4d   :  { %v3242_v21 = vsel %vm651_vm11, %v8104_v11, -inf }
 0xf4e   :  { %v3211_v35 = vsel %vm482_vm8, %v3073_v14, 0  ;;  %3243 = vmax.xlane.f32.xlu0 %v3242_v21 }
 0xf4f   :  { %3220 = vmatpush.bf16.xpose.msra.mxu1 %v3211_v35 }
 0xf50   :  { %v3091_v7 = vpop.f32.mrf.mxu2 }
 0xf56   :  { %6101 = vmatmul.msk.bf16.vlgmr.msra.gmra.mxu1 %vm482_vm8, %v3065_v41 }
 0xf58   :  { %v3165_v25 = vpop.f32.mrf.mxu2 }
 0xf59   :  { %v3230_v18 = vmul.f32 0.17677669, %v3165_v25 }
 0xf5b   :  { %v8111_v26 = vadd.f32 %v3230_v18, %v7553_v19 }
 0xf5d   :  { %v3254_v42 = vsel %vm651_vm11, %v8111_v26, -inf }
 0xf5e   :  { %3255 = vmax.xlane.f32.xlu2 %v3254_v42 }
 0xf60   :  { %v3167_v32 = vpop.f32.mrf.mxu2 }
 0xf9d   :  { %v3127_v33 = vpop.f32.mrf.mxu0 }
 0xf9e   :  { %v3228_v31 = vmul.f32 0.17677669, %v3127_v33 }
 0xfa0   :  { %v3236_v17 = vadd.f32 %v3228_v31, %v7553_v19 }
 0xfa2   :  { %v3248_v39 = vsel %vm651_vm11, %v3236_v17, -inf }
 0xfa3   :  { %3249 = vmax.xlane.f32.xlu1 %v3248_v39 }
 0xfa5   :  { %v3129_v13 = vpop.f32.mrf.mxu0 }
 0xfbb   :  { %v3108_v44 = vpop.f32.mrf.mxu3 }
 0xfbc   :  { %v3227_v58 = vmul.f32 0.17677669, %v3108_v44 }
 0xfbe   :  { %v3235_v2 = vadd.f32 %v3227_v58, %v7553_v19 }
 0xfc0   :  { %v3245_v1 = vsel %vm651_vm11, %v3235_v2, -inf }
 0xfc1   :  { %3246 = vmax.xlane.f32.xlu0 %v3245_v1  ;;  %v3244_v62 = vpop.xlane.xlu0 %3243 }
 0xfc3   :  { %v3110_v24 = vpop.f32.mrf.mxu3  ;;  %v3146_v45 = vpop.f32.mrf.mxu1 }
 0xfc4   :  { %v3229_v28 = vmul.f32 0.17677669, %v3146_v45 }
 0xfc5   :  { %v3203_v47 = vpop.f32.mrf.mxu0 }
 0xfc6   :  { %v3232_v63 = vmul.f32 0.17677669, %v3203_v47  ;;  %v3237_v49 = vadd.f32 %v3229_v28, %v7553_v19 }
 0xfc8   :  { %v3251_v51 = vsel %vm651_vm11, %v3237_v49, -inf  ;;  %v3240_v27 = vadd.f32 %v3232_v63, %v7553_v19 }
 0xfc9   :  { %3252 = vmax.xlane.f32.xlu2 %v3251_v51 }
 0xfca   :  { %v3260_v8 = vsel %vm651_vm11, %v3240_v27, -inf }
 0xfcb   :  { %3261 = vmax.xlane.f32.xlu1 %v3260_v8  ;;  %v3148_v4 = vpop.f32.mrf.mxu1  ;;  %v3184_v37 = vpop.f32.mrf.mxu3  ;;  %v3266_v8 = vsub.f32 %v8104_v11, %v3244_v62 }
 0xfcc   :  { %v3231_v38 = vmul.f32 0.17677669, %v3184_v37 }
 0xfcd   :  { %v3205_v52 = vpop.f32.mrf.mxu0  ;;  %v3274_v37 = vmul.f32 1.442695, %v3266_v8  ;;  %v6830_v8 = vld [vmem:[#allocation2 + $0x498] sm:$0xf] }
 0xfce   :  { %v3239_v59 = vadd.f32 %v3231_v38, %v7553_v19 }
 0xfd0   :  { %v3257_v54 = vsel %vm651_vm11, %v3239_v59, -inf }
 0xfd1   :  { %3258 = vmax.xlane.f32.xlu0 %v3257_v54  ;;  %v3256_v3 = vpop.xlane.xlu2 %3255 }
 0xfd3   :  { %v3186_v22 = vpop.f32.mrf.mxu3  ;;  %v3222_v40 = vpop.f32.mrf.mxu1 }
 0xfd4   :  { %v3233_v34 = vmul.f32 0.17677669, %v3222_v40 }
 0xfd6   :  { %v3241_v16 = vadd.f32 %v3233_v34, %v7553_v19 }
 0xfd8   :  { %v3263_v43 = vsel %vm651_vm11, %v3241_v16, -inf }
 0xfd9   :  { %3264 = vmax.xlane.f32.xlu2 %v3263_v43 }
 0xfdb   :  { %v3224_v55 = vpop.f32.mrf.mxu1 }
 0xfe4   :  { %3042 = vrot.lane.b32.xlu1 %v8070_v36, %s7386_s15 }
 0xfe5   :  { %7025 = vrot.lane.b32.xlu0 %v7024_v56, %s7387_s16 }
0x1016   :  { %v3250_v57 = vpop.xlane.xlu1 %3249 }
0x1017   :  { %v3268_v60 = vsub.f32 %v3236_v17, %v3250_v57 }
0x1019   :  { %v3278_v61 = vmul.f32 1.442695, %v3268_v60 }
0x101b   :  { %7239 = vpow2.f32 %v3278_v61 }
0x1021   :  { %v8132_v53 = vpop.eup %7239 }
0x1022   :  { %v3296_v19 = vsel %vm651_vm11, %v8132_v53, 0.0 }
0x1023   :  { %3297 = vadd.xlane.f32.xlu1 %v3296_v19 }
0x1034   :  { %v3247_v50 = vpop.xlane.xlu0 %3246 }
0x1035   :  { %v3267_v10 = vsub.f32 %v3235_v2, %v3247_v50 }
0x1037   :  { %v3276_v6 = vmul.f32 1.442695, %v3267_v10 }
0x1039   :  { %7241 = vpow2.f32 %v3276_v6 }
0x103c   :  { %v3253_v9 = vpop.xlane.xlu2 %3252 }
0x103d   :  { %v3269_v48 = vsub.f32 %v3237_v49, %v3253_v9 }
0x103e   :  { %v3262_v0 = vpop.xlane.xlu1 %3261 }
0x103f   :  { %v8136_v30 = vpop.eup %7241  ;;  %v3280_v14 = vmul.f32 1.442695, %v3269_v48  ;;  %v3272_v21 = vsub.f32 %v3240_v27, %v3262_v0  ;;  %v3270_v27 = vsub.f32 %v8111_v26, %v3256_v3  ;;  %v6237_v0 = vld [vmem:[#allocation2 + $0x5b4] sm:$0xf] }
0x1040   :  { %v3293_v35 = vsel %vm651_vm11, %v8136_v30, 0.0 }
0x1041   :  { %7243 = vpow2.f32 %v3280_v14  ;;  %v3286_v7 = vmul.f32 1.442695, %v3272_v21  ;;  %3294 = vadd.xlane.f32.xlu1 %v3293_v35  ;;  %v3282_v4 = vmul.f32 1.442695, %v3270_v27 }
0x1043   :  { %7245 = vpow2.f32 %v3286_v7 }
0x1044   :  { %v3259_v23 = vpop.xlane.xlu0 %3258 }
0x1045   :  { %v3271_v41 = vsub.f32 %v3239_v59, %v3259_v23 }
0x1047   :  { %v8140_v25 = vpop.eup %7243  ;;  %v3284_v18 = vmul.f32 1.442695, %v3271_v41 }
0x1048   :  { %v3299_v42 = vsel %vm651_vm11, %v8140_v25, 0.0 }
0x1049   :  { %v8144_v32 = vpop.eup %7245  ;;  %7247 = vpow2.f32 %v3284_v18  ;;  %3300 = vadd.xlane.f32.xlu2 %v3299_v42  ;;  %v6239_v18 = vld [vmem:[#allocation2 + $0x5e4] sm:$0xf0] }
0x104a   :  { %v3308_v33 = vsel %vm651_vm11, %v8144_v32, 0.0 }
0x104b   :  { %3309 = vadd.xlane.f32.xlu1 %v3308_v33  ;;  %v6229_v33 = vld [vmem:[#allocation2 + $0x554] sm:$0xf] }
0x104c   :  { %v3265_v63 = vpop.xlane.xlu2 %3264 }
0x104d   :  { %v3273_v49 = vsub.f32 %v3241_v16, %v3265_v63  ;;  %v6213_v63 = vld [vmem:[#allocation2 + $0x494] sm:$0xf] }
0x104f   :  { %v8148_v31 = vpop.eup %7247  ;;  %v3288_v51 = vmul.f32 1.442695, %v3273_v49  ;;  %v6831_v49 = vld [vmem:[#allocation2 + $0x4c0] sm:$0xf0] }
0x1050   :  { %v3305_v17 = vsel %vm651_vm11, %v8148_v31, 0.0  ;;  %v6214_v27 = vor.u32 %v6831_v49, %v6213_v63  ;;  %v6810_v63 = vld [vmem:[#allocation2 + $0x4b8] sm:$0xf0] }
0x1051   :  { %3306 = vadd.xlane.f32.xlu0 %v3305_v17  ;;  %7249 = vpow2.f32 %v3288_v51 }
0x1052   :  { %7251 = vpow2.f32 %v3282_v4  ;;  %v6215_v4 = vld [vmem:[#allocation2 + $0x4c4] sm:$0xf0] }
0x1053   :  { %7253 = vpow2.f32 %v3274_v37  ;;  %v6205_v37 = vld [vmem:[#allocation2 + $0x434] sm:$0xf] }
0x1056   :  { %v3043_v39 = vpop.permute.xlu1 %3042 }
0x1057   :  { %v3340_v13 = vpack.c.bf16 %v3043_v39, %v3043_v39  ;;  %v7026_v44 = vpop.permute.xlu0 %7025  ;;  %v8163_v38 = vpop.eup %7249 }
0x1058   :  { %v7028_v58 = vunpack.i.h.bf16 %v7026_v44  ;;  %v7027_v2 = vunpack.i.l.bf16 %v7026_v44  ;;  %v8167_v52 = vpop.eup %7251 }
0x1059   :  { %v3388_v1 = vsel %vm759_vm9, %v3340_v13, 0  ;;  %v3302_v26 = vsel %vm651_vm11, %v8167_v52, 0.0 }
0x105a   :  { %v3343_v24 = vpack.c.bf16 %v7028_v58, %v7028_v58  ;;  %v3339_v45 = vpack.c.bf16 %v7027_v2, %v7027_v2  ;;  %3397 = vmatpush.bf16.msra.mxu0 %v3388_v1  ;;  %v6834_v58 = vld [vmem:[#allocation2 + $0x558] sm:$0xf]  ;;  %v6231_v2 = vld [vmem:[#allocation2 + $0x584] sm:$0xf0]  ;;  %v6833_v1 = vld [vmem:[#allocation2 + $0x520] sm:$0xf0] }
0x105c   :  { %v3369_v28 = vsel %vm759_vm9, %v3339_v45, 0  ;;  %v3445_v47 = vsel %vm759_vm9, %v3343_v24, 0  ;;  %v6234_v24 = vor.u32 %v6834_v58, %v6231_v2  ;;  %v6812_v58 = vld [vmem:[#allocation2 + $0x578] sm:$0xf0] }
0x105d   :  { %3378 = vmatpush.bf16.msra.mxu3 %v3369_v28  ;;  %v6832_v28 = vld [vmem:[#allocation2 + $0x4f8] sm:$0xf] }
0x1061   :  { %3454 = vmatpush.bf16.msrb.mxu3 %v3445_v47  ;;  %3045 = vrot.lane.b32.xlu2 %v8070_v36, %s7385_s14  ;;  %v3311_v36 = vsel %vm651_vm11, %v8163_v38, 0.0  ;;  %v6223_v47 = vld [vmem:[#allocation2 + $0x524] sm:$0xf0] }
0x1062   :  { %v6226_v51 = vor.u32 %v6832_v28, %v6223_v47 }
0x1064   :  { %3055 = vrot.lane.b32.xlu1 %v8083_v15, %s7385_s14 }
0x1065   :  { %3052 = vrot.lane.b32.xlu0 %v8083_v15, %s7386_s15  ;;  %v8169_v15 = vpop.eup %7253 }
0x1066   :  { %v3290_v11 = vsel %vm651_vm11, %v8169_v15, 0.0 }
0x108a   :  { %3312 = vadd.xlane.f32.xlu2 %v3311_v36  ;;  %v6829_v36 = vld [vmem:[#allocation2 + $0x460] sm:$0xf0] }
0x108f   :  { %3303 = vadd.xlane.f32.xlu0 %v3302_v26  ;;  %v6218_v26 = vor.u32 %v6830_v8, %v6215_v4 }
0x1092   :  { %3291 = vadd.xlane.f32.xlu2 %v3290_v11  ;;  %v6206_v11 = vor.u32 %v6829_v36, %v6205_v37 }
0x1096   :  { %v3298_v59 = vpop.xlane.xlu1 %3297 }
0x1097   :  { %7255 = vrcp.f32 %v3298_v59  ;;  %v6828_v59 = vld [vmem:[#allocation2 + $0x438] sm:$0xf] }
0x109d   :  { %v7256_v54 = vpop.eup %7255 }
0x109e   :  { %v3324_v22 = vmul.f32 %v7256_v54, %v8132_v53  ;;  %v6207_v54 = vld [vmem:[#allocation2 + $0x464] sm:$0xf0] }
0x10a0   :  { %v3332_v40 = vpack.c.bf16 %v3324_v22, %v3324_v22  ;;  %v6197_v22 = vld [vmem:[#allocation2 + $0x3d4] sm:$0xf] }
0x10a2   :  { %6104 = vmatmul.msk.bf16.vlgmr.msra.gmra.mxu0 %vm651_vm11, %v3332_v40  ;;  %v6827_v40 = vld [vmem:[#allocation2 + $0x400] sm:$0xf0] }
0x10b4   :  { %v3295_v34 = vpop.xlane.xlu1 %3294 }
0x10b5   :  { %7257 = vrcp.f32 %v3295_v34  ;;  %v6210_v34 = vor.u32 %v6828_v59, %v6207_v54  ;;  %v6117_v54 = vld [vmem:[#allocation2 + $0x36c] sm:$0xf] }
0x10bb   :  { %v7258_v16 = vpop.eup %7257 }
0x10bc   :  { %v3323_v43 = vmul.f32 %v7258_v16, %v8136_v30  ;;  %v3301_v55 = vpop.xlane.xlu2 %3300  ;;  %v6837_v30 = vld [vmem:[#allocation2 + $0x5e0] sm:$0xf0]  ;;  %v6198_v16 = vor.u32 %v6827_v40, %v6197_v22  ;;  %v6807_v22 = vld [vmem:[#allocation2 + $0x398] sm:$0xf0] }
0x10bd   :  { %7259 = vrcp.f32 %v3301_v55  ;;  %v6238_v41 = vor.u32 %v6837_v30, %v6237_v0  ;;  %v6199_v55 = vld [vmem:[#allocation2 + $0x404] sm:$0xf0]  ;;  %v6118_v40 = vor.u32 %v6807_v22, %v6117_v54 }
0x10be   :  { %v3331_v56 = vpack.c.bf16 %v3323_v43, %v3323_v43  ;;  %v3310_v10 = vpop.xlane.xlu1 %3309  ;;  %v6826_v43 = vld [vmem:[#allocation2 + $0x3d8] sm:$0xf] }
0x10c0   :  { %6103 = vmatmul.msk.bf16.vlgmr.msra.gmra.mxu3 %vm651_vm11, %v3331_v56  ;;  %v6189_v56 = vld [vmem:[#allocation2 + $0x374] sm:$0xf] }
0x10c3   :  { %v7260_v57 = vpop.eup %7259 }
0x10c4   :  { %v3307_v60 = vpop.xlane.xlu0 %3306  ;;  %v3046_v61 = vpop.permute.xlu2 %3045  ;;  %v3325_v19 = vmul.f32 %v7260_v57, %v8140_v25  ;;  %v6836_v25 = vld [vmem:[#allocation2 + $0x5b8] sm:$0xf]  ;;  %v6825_v57 = vld [vmem:[#allocation2 + $0x3a0] sm:$0xf0] }
0x10c5   :  { %7261 = vrcp.f32 %v3307_v60  ;;  %v3341_v53 = vpack.c.bf16 %v3046_v61, %v3046_v61  ;;  %v6242_v17 = vor.u32 %v6836_v25, %v6239_v18  ;;  %v6202_v60 = vor.u32 %v6826_v43, %v6199_v55  ;;  %v6806_v43 = vld [vmem:[#allocation2 + $0x338] sm:$0xf0] }
0x10c6   :  { %v3333_v3 = vpack.c.bf16 %v3325_v19, %v3325_v19  ;;  %7263 = vrcp.f32 %v3310_v10  ;;  %v6190_v61 = vor.u32 %v6825_v57, %v6189_v56  ;;  %v6181_v19 = vld [vmem:[#allocation2 + $0x314] sm:$0xf]  ;;  %v6822_v10 = vld [vmem:[#allocation2 + $0x318] sm:$0xf]  ;;  %v6178_v56 = vld [vmem:[%s8594_s6 + $0x1c] sm:$0x3] }
0x10c7   :  { %v3407_v62 = vsel %vm759_vm9, %v3341_v53, 0  ;;  %v6824_v53 = vld [vmem:[#allocation2 + $0x378] sm:$0xf] }
0x10c8   :  { %3416 = vmatpush.bf16.msrb.mxu1 %v3407_v62  ;;  %v6191_v62 = vld [vmem:[#allocation2 + $0x3a4] sm:$0xf0] }
0x10cb   :  { %v7262_v50 = vpop.eup %7261  ;;  %6105 = vmatmul.msk.bf16.vlgmr.msrb.gmra.mxu1 %vm651_vm11, %v3333_v3  ;;  %v6823_v3 = vld [vmem:[#allocation2 + $0x340] sm:$0xf0] }
0x10cc   :  { %v3327_v6 = vmul.f32 %v7262_v50, %v8148_v31  ;;  %v7264_v48 = vpop.eup %7263  ;;  %v6835_v31 = vld [vmem:[#allocation2 + $0x580] sm:$0xf0]  ;;  %v6194_v50 = vor.u32 %v6824_v53, %v6191_v62 }
0x10cd   :  { %v3328_v7 = vmul.f32 %v7264_v48, %v8144_v32  ;;  %v6230_v44 = vor.u32 %v6835_v31, %v6229_v33  ;;  %v6221_v32 = vld [vmem:[#allocation2 + $0x4f4] sm:$0xf]  ;;  %v6182_v48 = vor.u32 %v6823_v3, %v6181_v19 }
0x10ce   :  { %v3335_v9 = vpack.c.bf16 %v3327_v6, %v3327_v6  ;;  %v6222_v45 = vor.u32 %v6833_v1, %v6221_v32  ;;  %v6183_v6 = vld [vmem:[#allocation2 + $0x344] sm:$0xf0]  ;;  %v6133_v32 = vld [vmem:[#allocation2 + $0x4ec] sm:$0xf]  ;;  %v6811_v1 = vld [vmem:[#allocation2 + $0x518] sm:$0xf0] }
0x10cf   :  { %v3336_v13 = vpack.c.bf16 %v3328_v7, %v3328_v7 }
0x10d0   :  { %6107 = vmatmul.msk.bf16.vlgmr.msrb.gmra.mxu3 %vm651_vm11, %v3335_v9  ;;  %v6186_v9 = vor.u32 %v6822_v10, %v6183_v6 }
0x10d6   :  { %v3056_v14 = vpop.permute.xlu1 %3055 }
0x10d7   :  { %v3345_v21 = vpack.c.bf16 %v3056_v14, %v3056_v14  ;;  %v3053_v35 = vpop.permute.xlu0 %3052 }
0x10d8   :  { %v3344_v23 = vpack.c.bf16 %v3053_v35, %v3053_v35 }
0x10d9   :  { %v3483_v42 = vsel %vm759_vm9, %v3345_v21, 0 }
0x10da   :  { %v3464_v39 = vsel %vm759_vm9, %v3344_v23, 0  ;;  %3492 = vmatpush.bf16.msra.mxu1 %v3483_v42 }
0x10db   :  { %3473 = vmatpush.bf16.msrb.mxu0 %v3464_v39  ;;  %v6141_v39 = vld [vmem:[#allocation2 + $0x5ac] sm:$0xf] }
0x10de   :  { %3869 = vmatpush.bf16.msrb.mxu1 %v6242_v17  ;;  %6108 = vmatmul.msk.bf16.vlgmr.msrb.gmra.mxu0 %vm651_vm11, %v3336_v13  ;;  %v6137_v13 = vld [vmem:[#allocation2 + $0x54c] sm:$0xf] }
0x10df   :  { %3850 = vmatpush.bf16.msra.mxu0 %v6238_v41  ;;  %v6138_v2 = vor.u32 %v6812_v58, %v6137_v13 }
0x10e2   :  { %3870 = vmatpush.bf16.msrb.mxu1 %v6234_v24 }
0x10e3   :  { %3851 = vmatpush.bf16.msra.mxu0 %v6230_v44 }
0x10e6   :  { %3871 = vmatpush.bf16.msrb.mxu1 %v6226_v51  ;;  %v6125_v51 = vld [vmem:[#allocation2 + $0x42c] sm:$0xf] }
0x10e7   :  { %3852 = vmatpush.bf16.msra.mxu0 %v6222_v45 }
0x10ea   :  { %3872 = vmatpush.bf16.msrb.mxu1 %v6218_v26  ;;  %v6121_v26 = vld [vmem:[#allocation2 + $0x3cc] sm:$0xf] }
0x10eb   :  { %3853 = vmatpush.bf16.msra.mxu0 %v6214_v27  ;;  %v6809_v27 = vld [vmem:[#allocation2 + $0x458] sm:$0xf0] }
0x10ec   :  { %v6126_v8 = vor.u32 %v6809_v27, %v6125_v51 }
0x10ee   :  { %3873 = vmatpush.bf16.msrb.mxu1 %v6210_v34 }
0x10ef   :  { %3854 = vmatpush.bf16.msra.mxu0 %v6206_v11  ;;  %v6808_v11 = vld [vmem:[#allocation2 + $0x3f8] sm:$0xf0] }
0x10f0   :  { %v6122_v59 = vor.u32 %v6808_v11, %v6121_v26 }
0x10f2   :  { %3874 = vmatpush.bf16.msrb.mxu1 %v6202_v60  ;;  %v3766_v60 = vperm.slane %v6178_v56, 0 }
0x10f3   :  { %3855 = vmatpush.bf16.msra.mxu0 %v6198_v16  ;;  %v6113_v16 = vld [vmem:[#allocation2 + $0x30c] sm:$0xf] }
0x10f4   :  { %v6114_v55 = vor.u32 %v6806_v43, %v6113_v16 }
0x10f6   :  { %3875 = vmatpush.bf16.msrb.mxu1 %v6194_v50 }
0x10f7   :  { %3856 = vmatpush.bf16.msra.mxu0 %v6190_v61 }
0x10fa   :  { %3876 = vmatpush.bf16.msrb.mxu1 %v6186_v9 }
0x10fb   :  { %3857 = vmatpush.bf16.msra.mxu0 %v6182_v48 }
0x10fd   :  { %v3313_v0 = vpop.xlane.xlu2 %3312 }
0x10fe   :  { %3858 = vmatmul.bf16.vlgmr.msra.gmra.mxu0 %v7640_v46  ;;  %7265 = vrcp.f32 %v3313_v0 }
0x1102   :  { %v3304_v41 = vpop.xlane.xlu0 %3303 }
0x1104   :  { %v7266_v30 = vpop.eup %7265 }
0x1105   :  { %v3329_v14 = vmul.f32 %v7266_v30, %v8163_v38  ;;  %v3292_v21 = vpop.xlane.xlu2 %3291 }
0x1106   :  { %7267 = vrcp.f32 %v3292_v21 }
0x1107   :  { %v3337_v35 = vpack.c.bf16 %v3329_v14, %v3329_v14  ;;  %7269 = vrcp.f32 %v3304_v41 }
0x1109   :  { %6109 = vmatmul.msk.bf16.vlgmr.msra.gmra.mxu1 %vm651_vm11, %v3337_v35 }
0x110c   :  { %v7268_v7 = vpop.eup %7267 }
0x110d   :  { %v3322_v23 = vmul.f32 %v7268_v7, %v8169_v15  ;;  %v7270_v18 = vpop.eup %7269  ;;  %v6813_v15 = vld [vmem:[#allocation2 + $0x5d8] sm:$0xf0] }
0x110e   :  { %3863 = vmatmul.bf16.gmra.mxu0 %v7647_v5  ;;  %v3326_v38 = vmul.f32 %v7270_v18, %v8167_v52  ;;  %v6142_v44 = vor.u32 %v6813_v15, %v6141_v39  ;;  %v6134_v52 = vor.u32 %v6811_v1, %v6133_v32 }
0x110f   :  { %v3330_v25 = vpack.c.bf16 %v3322_v23, %v3322_v23 }
0x1110   :  { %v3334_v42 = vpack.c.bf16 %v3326_v38, %v3326_v38 }
0x1111   :  { %6102 = vmatmul.msk.bf16.vlgmr.msrb.gmra.mxu2 %vm651_vm11, %v3330_v25 }
0x1112   :  { %3597 = vmatpush.bf16.msrb.mxu2 %v6142_v44 }
0x1116   :  { %3598 = vmatpush.bf16.msrb.mxu2 %v6138_v2 }
0x1119   :  { %3877 = vmatmul.bf16.vlgmr.msrb.gmra.mxu1 %v7640_v46 }
0x111a   :  { %3599 = vmatpush.bf16.msrb.mxu2 %v6134_v52 }
0x111f   :  { %v3399_v33 = vpop.f32.mrf.mxu0 }
0x1121   :  { %6106 = vmatmul.msk.bf16.vlgmr.msra.gmra.mxu2 %vm651_vm11, %v3334_v42 }
0x1127   :  { %v3401_v31 = vpop.f32.mrf.mxu0 }
0x1128   :  { %v3767_v31 = vperm.slane %v6178_v56, 1 }
0x1129   :  { %3882 = vmatmul.bf16.gmra.mxu1 %v7647_v5  ;;  %v6129_v5 = vld [vmem:[#allocation2 + $0x48c] sm:$0xf] }
0x112a   :  { %v6130_v49 = vor.u32 %v6810_v63, %v6129_v5 }
0x112c   :  { %3600 = vmatpush.bf16.msrb.mxu2 %v6130_v49 }
0x1130   :  { %3601 = vmatpush.bf16.msrb.mxu2 %v6126_v8 }
0x1134   :  { %3602 = vmatpush.bf16.msrb.mxu2 %v6122_v59 }
0x1138   :  { %3603 = vmatpush.bf16.msrb.mxu2 %v6118_v40 }
0x113c   :  { %3604 = vmatpush.bf16.msrb.mxu2 %v6114_v55 }
0x1143   :  { %v3380_v17 = vpop.f32.mrf.mxu3 }
0x1148   :  { %v3418_v46 = vpop.f32.mrf.mxu1 }
0x114b   :  { %v3382_v24 = vpop.f32.mrf.mxu3 }
0x1150   :  { %v3420_v45 = vpop.f32.mrf.mxu1 }
0x1153   :  { %v3456_v28 = vpop.f32.mrf.mxu3 }
0x1154   :  { %v7034_v47 = vpack.i.bf16 %v3456_v28, %v3380_v17 }
0x1156   :  { %7035 = vrot.lane.b32.xlu2 %v7034_v47, %s7385_s14 }
0x115b   :  { %v3458_v4 = vpop.f32.mrf.mxu3  ;;  %v3475_v37 = vpop.f32.mrf.mxu0 }
0x115c   :  { %v7029_v36 = vpack.i.bf16 %v3475_v37, %v3399_v33 }
0x115e   :  { %7030 = vrot.lane.b32.xlu1 %v7029_v36, %s7386_s15 }
0x1163   :  { %v3477_v34 = vpop.f32.mrf.mxu0 }
0x117b   :  { %v3859_v57 = vpop.f32.mrf.mxu0 }
0x117c   :  { %v3860_v61 = vadd.f32 %v3859_v57, %v3766_v60  ;;  %v7132_v57 = vld [vmem:[%s8594_s6 + $0x18] ss:$0 sm:$0xff] }
0x117e   :  { %v3996_v62 = vpack.c.bf16 %v3860_v61, %v3860_v61 }
0x1180   :  { %v4014_v10 = vunpack.c.l.b16 %v3996_v62 }
0x1183   :  { %v3861_v19 = vpop.f32.mrf.mxu0 }
0x1184   :  { %v3862_v53 = vadd.f32 %v3861_v19, %v3766_v60 }
0x1186   :  { %v3997_v3 = vpack.c.bf16 %v3862_v53, %v3862_v53  ;;  %v8203_v50 = vpack.i.bf16 %v3862_v53, %v3860_v61  ;;  %v3494_v9 = vpop.f32.mrf.mxu1 }
0x1187   :  { %v7039_v48 = vpack.i.bf16 %v3494_v9, %v3418_v46 }
0x1188   :  { %v4015_v6 = vunpack.c.l.b16 %v3997_v3 }
0x1189   :  { %7040 = vrot.lane.b32.xlu2 %v7039_v48, %s7387_s16 }
0x118a   :  { %v4016_v0 = vpack.c.b16 %v4015_v6, %v4014_v10 }
0x118b   :  { %v3864_v30 = vpop.f32.mrf.mxu0 }
0x118c   :  { %v4021_v14 = vsel %vm482_vm8, %v4016_v0, 0  ;;  %v8207_v21 = vadd.f32 %v3864_v30, %v3766_v60 }
0x118d   :  { %4030 = vmatpush.bf16.xpose.msra.mxu2 %v4021_v14 }
0x118e   :  { %v3496_v35 = vpop.f32.mrf.mxu1  ;;  %v4004_v41 = vpack.c.bf16 %v8207_v21, %v8207_v21 }
0x1190   :  { %v4110_v38 = vunpack.c.l.b16 %v4004_v41 }
0x1193   :  { %v3866_v7 = vpop.f32.mrf.mxu0 }
0x1194   :  { %v8209_v23 = vadd.f32 %v3866_v7, %v3766_v60  ;;  %v3361_v18 = vpop.f32.mrf.mxu2 }
0x1196   :  { %v4005_v25 = vpack.c.bf16 %v8209_v23, %v8209_v23  ;;  %v3878_v33 = vpop.f32.mrf.mxu1 }
0x1197   :  { %v3879_v15 = vadd.f32 %v3878_v33, %v3767_v31 }
0x1198   :  { %v4111_v42 = vunpack.c.l.b16 %v4005_v25 }
0x1199   :  { %v4308_v58 = vpack.c.bf16 %v3879_v15, %v3879_v15 }
0x119a   :  { %v4112_v17 = vpack.c.b16 %v4111_v42, %v4110_v38 }
0x119b   :  { %v4326_v46 = vunpack.c.l.b16 %v4308_v58  ;;  %v6168_v58 = vld [vmem:[#allocation2 + $0x4f0] sm:$0xf] }
0x119c   :  { %v4117_v39 = vsel %vm482_vm8, %v4112_v17, 0  ;;  %v3363_v13 = vpop.f32.mrf.mxu2  ;;  %v6821_v17 = vld [vmem:[#allocation2 + $0x5dc] sm:$0xf0] }
0x119d   :  { %4126 = vmatpush.bf16.xpose.msrb.mxu0 %v4117_v39  ;;  %v6820_v13 = vld [vmem:[#allocation2 + $0x57c] sm:$0xf0] }
0x119e   :  { %v3880_v44 = vpop.f32.mrf.mxu1 }
0x119f   :  { %v3881_v2 = vadd.f32 %v3880_v44, %v3767_v31 }
0x11a1   :  { %v4309_v32 = vpack.c.bf16 %v3881_v2, %v3881_v2  ;;  %v8216_v1 = vpack.i.bf16 %v3881_v2, %v3879_v15  ;;  %v6172_v15 = vld [vmem:[#allocation2 + $0x550] sm:$0xf]  ;;  %v6819_v2 = vld [vmem:[#allocation2 + $0x51c] sm:$0xf0] }
0x11a2   :  { %v6173_v44 = vor.u32 %v6820_v13, %v6172_v15 }
0x11a3   :  { %v4327_v52 = vunpack.c.l.b16 %v4309_v32  ;;  %v6169_v32 = vor.u32 %v6819_v2, %v6168_v58 }
0x11a4   :  { %v3437_v24 = vpop.f32.mrf.mxu2 }
0x11a5   :  { %v4328_v45 = vpack.c.b16 %v4327_v52, %v4326_v46  ;;  %v6164_v46 = vld [vmem:[#allocation2 + $0x490] sm:$0xf]  ;;  %v6818_v52 = vld [vmem:[#allocation2 + $0x4bc] sm:$0xf0] }
0x11a6   :  { %v3883_v28 = vpop.f32.mrf.mxu1 }
0x11a7   :  { %4340 = vmatpush.bf16.msra.mxu0 %v4328_v45  ;;  %v8218_v63 = vadd.f32 %v3883_v28, %v3767_v31  ;;  %v6160_v45 = vld [vmem:[#allocation2 + $0x430] sm:$0xf]  ;;  %v6817_v28 = vld [vmem:[#allocation2 + $0x45c] sm:$0xf0] }
0x11ac   :  { %v3439_v47 = vpop.f32.mrf.mxu2 }
0x11ad   :  { %v6161_v47 = vor.u32 %v6817_v28, %v6160_v45 }
0x11ae   :  { %v3885_v5 = vpop.f32.mrf.mxu1 }
0x11af   :  { %v8220_v49 = vadd.f32 %v3885_v5, %v3767_v31  ;;  %v6176_v31 = vld [vmem:[#allocation2 + $0x5b0] sm:$0xf]  ;;  %v6816_v5 = vld [vmem:[#allocation2 + $0x3fc] sm:$0xf0] }
0x11b0   :  { %v7036_v27 = vpop.permute.xlu2 %7035  ;;  %v6177_v39 = vor.u32 %v6821_v17, %v6176_v31 }
0x11b1   :  { %v8224_v51 = vpack.i.bf16 %v8220_v49, %v8218_v63  ;;  %v7038_v4 = vunpack.i.h.bf16 %v7036_v27  ;;  %v7037_v37 = vunpack.i.l.bf16 %v7036_v27 }
0x11b2   :  { %3734 = vmatpush.bf16.msra.mxu3 %v6177_v39 }
0x11b3   :  { %v3510_v59 = vsel %vm482_vm8, %v3361_v18, %v7037_v37  ;;  %v3525_v54 = vsel %vm482_vm8, %v3437_v24, %v7038_v4  ;;  %v6165_v24 = vor.u32 %v6818_v52, %v6164_v46  ;;  %v6815_v4 = vld [vmem:[#allocation2 + $0x39c] sm:$0xf0] }
0x11b6   :  { %3735 = vmatpush.bf16.msra.mxu3 %v6173_v44 }
0x11ba   :  { %3736 = vmatpush.bf16.msra.mxu3 %v6169_v32 }
0x11be   :  { %3737 = vmatpush.bf16.msra.mxu3 %v6165_v24 }
0x11c2   :  { %3738 = vmatpush.bf16.msra.mxu3 %v6161_v47 }
0x11d0   :  { %v7031_v8 = vpop.permute.xlu1 %7030 }
0x11d1   :  { %v7033_v36 = vunpack.i.h.bf16 %v7031_v8  ;;  %v7032_v26 = vunpack.i.l.bf16 %v7031_v8  ;;  %v6152_v8 = vld [vmem:[#allocation2 + $0x370] sm:$0xf] }
0x11d2   :  { %v6153_v37 = vor.u32 %v6815_v4, %v6152_v8 }
0x11d3   :  { %v3511_v34 = vsel %vm100_vm1, %v3510_v59, %v7032_v26  ;;  %v3526_v16 = vsel %vm100_vm1, %v3525_v54, %v7033_v36  ;;  %v6814_v59 = vld [vmem:[#allocation2 + $0x33c] sm:$0xf0] }
0x11e3   :  { %v7041_v11 = vpop.permute.xlu2 %7040 }
0x11e4   :  { %v7043_v22 = vunpack.i.h.bf16 %v7041_v11  ;;  %v7042_v40 = vunpack.i.l.bf16 %v7041_v11  ;;  %v6148_v11 = vld [vmem:[#allocation2 + $0x310] sm:$0xf] }
0x11e6   :  { %v3512_v43 = vsel %vm923_vm12, %v3511_v34, %v7042_v40  ;;  %v3527_v55 = vsel %vm923_vm12, %v3526_v16, %v7043_v22  ;;  %v6149_v22 = vor.u32 %v6814_v59, %v6148_v11 }
0x11e7   :  { %v3528_v56 = vpack.c.bf16 %v3527_v55, %v3512_v43 }
0x11e9   :  { %3605 = vmatmul.bf16.vlgmr.msrb.gmra.mxu2 %v3528_v56 }
0x126c   :  { %v3606_v60 = vpop.f32.mrf.mxu2 }
0x126d   :  { %v3607_v61 = vadd.f32 %v7132_v57, %v3606_v60 }
0x126f   :  { %v8236_v19 = vadd.f32 %v3607_v61, %v8035_v20 }
0x1271   :  { %3615 = vadd.xlane.f32.xlu1 %v8236_v19 }
0x1274   :  { %v3608_v53 = vpop.f32.mrf.mxu2 }
0x1275   :  { %v3609_v62 = vadd.f32 %v7132_v57, %v3608_v53 }
0x1277   :  { %v8240_v3 = vadd.f32 %v3609_v62, %v8039_v29 }
0x1279   :  { %3617 = vadd.xlane.f32.xlu2 %v8240_v3 }
0x1291   :  { %7050 = vrot.lane.b32.xlu2 %v8203_v50, %s7386_s15 }
0x1299   :  { %3944 = vrot.lane.b32.xlu2 %v8209_v23, %s7385_s14 }
0x12e4   :  { %v3616_v10 = vpop.xlane.xlu1 %3615 }
0x12e5   :  { %v3619_v6 = vmul.f32 %v3616_v10, %v7463_v12 }
0x12e7   :  { %v8249_v20 = vsub.f32 %v8236_v19, %v3619_v6 }
0x12e9   :  { %v3623_v9 = vmul.f32 %v8249_v20, %v8249_v20 }
0x12eb   :  { %3625 = vadd.xlane.f32.xlu0 %v3623_v9 }
0x12ec   :  { %v3618_v29 = vpop.xlane.xlu2 %3617 }
0x12ed   :  { %v3620_v48 = vmul.f32 %v3618_v29, %v7463_v12 }
0x12ef   :  { %v8255_v0 = vsub.f32 %v8240_v3, %v3620_v48  ;;  %v7133_v48 = vld [vmem:[%s8594_s6 + $0x19] ss:$0 sm:$0xff] }
0x12f1   :  { %v3624_v30 = vmul.f32 %v8255_v0, %v8255_v0 }
0x12f3   :  { %3627 = vadd.xlane.f32.xlu0 %v3624_v30 }
0x12f4   :  { %v7051_v14 = vpop.permute.xlu2 %7050 }
0x12f5   :  { %v7053_v35 = vunpack.i.h.bf16 %v7051_v14  ;;  %v7052_v7 = vunpack.i.l.bf16 %v7051_v14 }
0x12f7   :  { %v4001_v41 = vpack.c.bf16 %v7053_v35, %v7053_v35  ;;  %v4000_v25 = vpack.c.bf16 %v7052_v7, %v7052_v7 }
0x12f9   :  { %v4063_v18 = vunpack.c.l.b16 %v4001_v41  ;;  %v4062_v38 = vunpack.c.l.b16 %v4000_v25 }
0x12fb   :  { %v4064_v42 = vpack.c.b16 %v4063_v18, %v4062_v38 }
0x12fd   :  { %v4069_v33 = vsel %vm482_vm8, %v4064_v42, 0  ;;  %v7134_v42 = vld [vmem:[%s8594_s6 + $0x1a] ss:$0 sm:$0xff] }
0x12fe   :  { %4078 = vmatpush.bf16.xpose.msrb.mxu2 %v4069_v33 }
0x1307   :  { %7045 = vrot.lane.b32.xlu0 %v8203_v50, %s7387_s16 }
0x130f   :  { %7055 = vrot.lane.b32.xlu0 %v8203_v50, %s7385_s14  ;;  %v6156_v50 = vld [vmem:[#allocation2 + $0x3d0] sm:$0xf] }
0x1310   :  { %v6157_v27 = vor.u32 %v6816_v5, %v6156_v50  ;;  %v7135_v5 = vld [vmem:[%s8594_s6 + $0x1b] ss:$0 sm:$0xff] }
0x1312   :  { %3739 = vmatpush.bf16.msra.mxu3 %v6157_v27 }
0x1316   :  { %3740 = vmatpush.bf16.msra.mxu3 %v6153_v37 }
0x131a   :  { %3741 = vmatpush.bf16.msra.mxu3 %v6149_v22 }
0x135e   :  { %v3626_v36 = vpop.xlane.xlu0 %3625 }
0x135f   :  { %v3629_v26 = vmul.f32 %v3626_v36, %v7463_v12  ;;  %v4317_v36 = vpack.c.bf16 %v8220_v49, %v8220_v49 }
0x1361   :  { %v3631_v54 = vadd.f32 1e-05, %v3629_v26  ;;  %v4316_v26 = vpack.c.bf16 %v8218_v63, %v8218_v63  ;;  %v4415_v11 = vunpack.c.l.b16 %v4317_v36  ;;  %v7069_v63 = vpack.i.bf16 %v8209_v23, %v8207_v21 }
0x1363   :  { %7271 = vrsqrt.f32 %v3631_v54  ;;  %vm3639_vm11 = vweird.f32 %v3631_v54  ;;  %v4414_v22 = vunpack.c.l.b16 %v4316_v26 }
0x1366   :  { %v3628_v40 = vpop.xlane.xlu0 %3627 }
0x1367   :  { %v3630_v34 = vmul.f32 %v3628_v40, %v7463_v12 }
0x1369   :  { %v7272_v16 = vpop.eup %7271  ;;  %v3632_v43 = vadd.f32 1e-05, %v3630_v34  ;;  %v4416_v34 = vpack.c.b16 %v4415_v11, %v4414_v22 }
0x136a   :  { %v3634_v55 = vmul.f32 %v7272_v16, %v3631_v54  ;;  %vm3640_vm9 = vweird.f32 %v7272_v16 }
0x136b   :  { %7273 = vrsqrt.f32 %v3632_v43  ;;  %vm3641_vm7 = vmor %vm3639_vm11, %vm3640_vm9  ;;  %vm3649_vm13 = vweird.f32 %v3632_v43 }
0x136c   :  { %v3635_v56 = vmul.f32 %v7272_v16, %v3634_v55 }
0x136e   :  { %v3636_v57 = vmul.f32 0.5, %v3635_v56 }
0x1370   :  { %v3637_v60 = vsub.f32 1.5, %v3636_v57 }
0x1371   :  { %v7274_v61 = vpop.eup %7273 }
0x1372   :  { %v3638_v53 = vmul.f32 %v7272_v16, %v3637_v60  ;;  %v3644_v62 = vmul.f32 %v7274_v61, %v3632_v43  ;;  %vm3650_vm10 = vweird.f32 %v7274_v61 }
0x1373   :  { %vm3651_vm14 = vmor %vm3649_vm13, %vm3650_vm10 }
0x1374   :  { %v3645_v10 = vmul.f32 %v7274_v61, %v3644_v62  ;;  %v3642_v6 = vsel %vm3641_vm7, %v7272_v16, %v3638_v53 }
0x1375   :  { %v3653_v30 = vmul.f32 %v3642_v6, %v8249_v20 }
0x1376   :  { %v3646_v9 = vmul.f32 0.5, %v3645_v10 }
0x1377   :  { %v3658_v33 = vmul.f32 %v7133_v48, %v3653_v30 }
0x1378   :  { %v3647_v29 = vsub.f32 1.5, %v3646_v9 }
0x1379   :  { %v7046_v14 = vpop.permute.xlu0 %7045  ;;  %v3663_v13 = vadd.f32 %v7134_v42, %v3658_v33 }
0x137a   :  { %v3648_v35 = vmul.f32 %v7274_v61, %v3647_v29  ;;  %v7048_v7 = vunpack.i.h.bf16 %v7046_v14  ;;  %v7047_v41 = vunpack.i.l.bf16 %v7046_v14 }
0x137c   :  { %v3652_v25 = vsel %vm3651_vm14, %v7274_v61, %v3648_v35  ;;  %v3999_v18 = vpack.c.bf16 %v7048_v7, %v7048_v7  ;;  %v3998_v38 = vpack.c.bf16 %v7047_v41, %v7047_v41  ;;  %v3945_v61 = vpop.permute.xlu2 %3944 }
0x137d   :  { %v3654_v31 = vmul.f32 %v3652_v25, %v8255_v0 }
0x137e   :  { %v4039_v17 = vunpack.c.l.b16 %v3999_v18  ;;  %v4038_v39 = vunpack.c.l.b16 %v3998_v38 }
0x137f   :  { %v3659_v15 = vmul.f32 %v7133_v48, %v3654_v31 }
0x1380   :  { %v4040_v20 = vpack.c.b16 %v4039_v17, %v4038_v39 }
0x1381   :  { %v3664_v44 = vadd.f32 %v7134_v42, %v3659_v15  ;;  %v7056_v58 = vpop.permute.xlu0 %7055 }
0x1382   :  { %v7058_v2 = vunpack.i.h.bf16 %v7056_v58  ;;  %v7057_v32 = vunpack.i.l.bf16 %v7056_v58  ;;  %v4045_v46 = vsel %vm482_vm8, %v4040_v20, 0 }
0x1383   :  { %4054 = vmatpush.bf16.xpose.msrb.mxu3 %v4045_v46  ;;  %v3665_v52 = vpack.c.bf16 %v3664_v44, %v3663_v13 }
0x1384   :  { %v4003_v24 = vpack.c.bf16 %v7058_v2, %v7058_v2  ;;  %v4002_v45 = vpack.c.bf16 %v7057_v32, %v7057_v32 }
0x1385   :  { %3742 = vmatmul.bf16.vlgmr.msra.gmra.mxu3 %v3665_v52 }
0x1386   :  { %v4087_v28 = vunpack.c.l.b16 %v4003_v24  ;;  %v4086_v47 = vunpack.c.l.b16 %v4002_v45 }
0x1388   :  { %v4088_v50 = vpack.c.b16 %v4087_v28, %v4086_v47 }
0x138a   :  { %v4093_v0 = vsel %vm482_vm8, %v4088_v50, 0 }
0x138b   :  { %4102 = vmatpush.bf16.xpose.msra.mxu3 %v4093_v0 }
0x1408   :  { %v3743_v27 = vpop.f32.mrf.mxu3 }
0x1409   :  { %v3744_v8 = vadd.f32 %v7135_v5, %v3743_v27 }
0x140b   :  { %v3988_v4 = vpack.c.bf16 %v3744_v8, %v3744_v8  ;;  %3889 = vrot.lane.b32.xlu1 %v3744_v8, %s7387_s16  ;;  %v7059_v37 = vpack.i.bf16 %v8207_v21, %v3744_v8  ;;  %v4011_v21 = vpack.c.bf16 %v3945_v61, %v3945_v61 }
0x140d   :  { %7060 = vrot.lane.b32.xlu0 %v7059_v37, %s7386_s15  ;;  %6243 = vmatmul.msk.bf16.vlgmr.msra.gmra.mxu2 %vm482_vm8, %v3988_v4  ;;  %v4183_v14 = vunpack.c.l.b16 %v4011_v21 }
0x1410   :  { %v3745_v59 = vpop.f32.mrf.mxu3 }
0x1411   :  { %v3746_v54 = vadd.f32 %v7135_v5, %v3745_v59 }
0x1413   :  { %v3992_v40 = vpack.c.bf16 %v3746_v54, %v3746_v54  ;;  %3905 = vrot.lane.b32.xlu2 %v3746_v54, %s7385_s14  ;;  %3938 = vrot.lane.b32.xlu1 %v8209_v23, %s7386_s15 }
0x1415   :  { %6247 = vmatmul.msk.bf16.vlgmr.msrb.gmra.mxu0 %vm482_vm8, %v3992_v40  ;;  %7065 = vrot.lane.b32.xlu0 %v7059_v37, %s7385_s14 }
0x1416   :  { %4428 = vmatpush.bf16.msrb.mxu0 %v4416_v34 }
0x141b   :  { %3902 = vrot.lane.b32.xlu1 %v3746_v54, %s7386_s15 }
0x141d   :  { %7070 = vrot.lane.b32.xlu0 %v7069_v63, %s7387_s16 }
0x1425   :  { %3899 = vrot.lane.b32.xlu0 %v3746_v54, %s7387_s16 }
0x146d   :  { %v3906_v28 = vpop.permute.xlu2 %3905 }
0x146e   :  { %v3995_v50 = vpack.c.bf16 %v3906_v28, %v3906_v28 }
0x147d   :  { %v3890_v49 = vpop.permute.xlu1 %3889 }
0x147e   :  { %v3989_v16 = vpack.c.bf16 %v3890_v49, %v3890_v49 }
0x147f   :  { %v7061_v43 = vpop.permute.xlu0 %7060 }
0x1480   :  { %v7063_v55 = vunpack.i.h.bf16 %v7061_v43  ;;  %v7062_v56 = vunpack.i.l.bf16 %v7061_v43  ;;  %6244 = vmatmul.msk.bf16.vlgmr.msrb.gmra.mxu3 %vm482_vm8, %v3989_v16 }
0x1482   :  { %v3990_v57 = vpack.c.bf16 %v7062_v56, %v7062_v56  ;;  %v4008_v60 = vpack.c.bf16 %v7063_v55, %v7063_v55 }
0x1484   :  { %6245 = vmatmul.msk.bf16.vlgmr.msrb.gmra.mxu2 %vm482_vm8, %v3990_v57  ;;  %v4158_v23 = vunpack.c.l.b16 %v4008_v60 }
0x1485   :  { %v3939_v53 = vpop.permute.xlu1 %3938 }
0x1486   :  { %v4009_v62 = vpack.c.bf16 %v3939_v53, %v3939_v53 }
0x1487   :  { %v7066_v10 = vpop.permute.xlu0 %7065 }
0x1488   :  { %v4159_v6 = vunpack.c.l.b16 %v4009_v62  ;;  %v7068_v9 = vunpack.i.h.bf16 %v7066_v10  ;;  %v7067_v30 = vunpack.i.l.bf16 %v7066_v10 }
0x148a   :  { %v4160_v29 = vpack.c.b16 %v4159_v6, %v4158_v23  ;;  %v4010_v48 = vpack.c.bf16 %v7068_v9, %v7068_v9  ;;  %v3991_v25 = vpack.c.bf16 %v7067_v30, %v7067_v30 }
0x148c   :  { %v4182_v35 = vunpack.c.l.b16 %v4010_v48  ;;  %v4165_v7 = vsel %vm482_vm8, %v4160_v29, 0 }
0x148d   :  { %4174 = vmatpush.bf16.xpose.msra.mxu2 %v4165_v7  ;;  %v3903_v18 = vpop.permute.xlu1 %3902 }
0x148e   :  { %v4184_v41 = vpack.c.b16 %v4183_v14, %v4182_v35  ;;  %v3994_v15 = vpack.c.bf16 %v3903_v18, %v3903_v18 }
0x148f   :  { %v7071_v38 = vpop.permute.xlu0 %7070 }
0x1490   :  { %v7073_v42 = vunpack.i.h.bf16 %v7071_v38  ;;  %v7072_v33 = vunpack.i.l.bf16 %v7071_v38  ;;  %v4032_v31 = vpop.f32.mrf.mxu2  ;;  %6246 = vmatmul.msk.bf16.vlgmr.msra.gmra.mxu3 %vm482_vm8, %v3991_v25  ;;  %v4189_v17 = vsel %vm482_vm8, %v4184_v41, 0 }
0x1491   :  { %v8302_v39 = vmul.f32 0.17677669, %v4032_v31  ;;  %4198 = vmatpush.bf16.xpose.msrb.mxu3 %v4189_v17 }
0x1492   :  { %v4007_v20 = vpack.c.bf16 %v7073_v42, %v7073_v42  ;;  %v4006_v13 = vpack.c.bf16 %v7072_v33, %v7072_v33  ;;  %v4128_v44 = vpop.f32.mrf.mxu0 }
0x1493   :  { %v4212_v58 = vsel %vm1624_vm4, %v8302_v39, -inf  ;;  %v8325_v10 = vmul.f32 0.17677669, %v4128_v44 }
0x1494   :  { %v4135_v2 = vunpack.c.l.b16 %v4007_v20  ;;  %v4134_v32 = vunpack.c.l.b16 %v4006_v13  ;;  %4213 = vmax.xlane.f32.xlu1 %v4212_v58  ;;  %6249 = vmatmul.msk.bf16.vlgmr.msra.gmra.mxu2 %vm482_vm8, %v3994_v15 }
0x1495   :  { %v4224_v21 = vsel %vm1624_vm4, %v8325_v10, -inf }
0x1496   :  { %v4136_v46 = vpack.c.b16 %v4135_v2, %v4134_v32 }
0x1497   :  { %v3900_v47 = vpop.permute.xlu0 %3899 }
0x1498   :  { %v4034_v52 = vpop.f32.mrf.mxu2  ;;  %v4141_v24 = vsel %vm482_vm8, %v4136_v46, 0  ;;  %v3993_v0 = vpack.c.bf16 %v3900_v47, %v3900_v47 }
0x1499   :  { %4150 = vmatpush.bf16.xpose.msra.mxu1 %v4141_v24 }
0x149a   :  { %v4130_v45 = vpop.f32.mrf.mxu0 }
0x14a0   :  { %6248 = vmatmul.msk.bf16.vlgmr.msra.gmra.mxu1 %vm482_vm8, %v3993_v0  ;;  %6250 = vmatmul.msk.bf16.vlgmr.msrb.gmra.mxu3 %vm482_vm8, %v3995_v50 }
0x1503   :  { %v4056_v5 = vpop.f32.mrf.mxu3 }
0x1504   :  { %v4205_v27 = vmul.f32 0.17677669, %v4056_v5 }
0x1506   :  { %v4215_v8 = vsel %vm1624_vm4, %v4205_v27, -inf }
0x1507   :  { %v4080_v4 = vpop.f32.mrf.mxu2  ;;  %4216 = vmax.xlane.f32.xlu0 %v4215_v8  ;;  %v4214_v23 = vpop.xlane.xlu1 %4213 }
0x1508   :  { %v4206_v37 = vmul.f32 0.17677669, %v4080_v4  ;;  %v4236_v33 = vsub.f32 %v8302_v39, %v4214_v23 }
0x150a   :  { %v4218_v36 = vsel %vm1624_vm4, %v4206_v37, -inf  ;;  %v4244_v20 = vmul.f32 1.442695, %v4236_v33 }
0x150b   :  { %4219 = vmax.xlane.f32.xlu1 %v4218_v36  ;;  %v4058_v26 = vpop.f32.mrf.mxu3 }
0x150f   :  { %v4082_v11 = vpop.f32.mrf.mxu2 }
0x1513   :  { %v4104_v59 = vpop.f32.mrf.mxu3 }
0x1514   :  { %v4207_v54 = vmul.f32 0.17677669, %v4104_v59 }
0x1516   :  { %v4221_v22 = vsel %vm1624_vm4, %v4207_v54, -inf }
0x1517   :  { %v4176_v40 = vpop.f32.mrf.mxu2  ;;  %4222 = vmax.xlane.f32.xlu2 %v4221_v22 }
0x1518   :  { %v4210_v34 = vmul.f32 0.17677669, %v4176_v40 }
0x151a   :  { %v4230_v63 = vsel %vm1624_vm4, %v4210_v34, -inf }
0x151b   :  { %4231 = vmax.xlane.f32.xlu1 %v4230_v63  ;;  %v4106_v49 = vpop.f32.mrf.mxu3 }
0x151d   :  { %v4152_v16 = vpop.f32.mrf.mxu1 }
0x151e   :  { %v4209_v43 = vmul.f32 0.17677669, %v4152_v16 }
0x151f   :  { %v4178_v55 = vpop.f32.mrf.mxu2 }
0x1520   :  { %v4227_v56 = vsel %vm1624_vm4, %v4209_v43, -inf }
0x1521   :  { %4228 = vmax.xlane.f32.xlu0 %v4227_v56 }
0x1523   :  { %v4200_v57 = vpop.f32.mrf.mxu3 }
0x1524   :  { %v8321_v53 = vmul.f32 0.17677669, %v4200_v57 }
0x1525   :  { %v4154_v60 = vpop.f32.mrf.mxu1 }
0x1526   :  { %v4233_v62 = vsel %vm1624_vm4, %v8321_v53, -inf }
0x152b   :  { %v4202_v61 = vpop.f32.mrf.mxu3 }
0x152f   :  { %7080 = vrot.lane.b32.xlu2 %v8216_v1, %s7385_s14 }
0x1534   :  { %7075 = vrot.lane.b32.xlu1 %v8216_v1, %s7386_s15 }
0x1535   :  { %7085 = vrot.lane.b32.xlu0 %v8216_v1, %s7387_s16 }
0x1558   :  { %4234 = vmax.xlane.f32.xlu2 %v4233_v62 }
0x155e   :  { %4225 = vmax.xlane.f32.xlu1 %v4224_v21 }
0x1577   :  { %7090 = vrot.lane.b32.xlu1 %v8224_v51, %s7386_s15 }
0x157a   :  { %v4217_v6 = vpop.xlane.xlu0 %4216 }
0x157b   :  { %v4237_v9 = vsub.f32 %v4205_v27, %v4217_v6 }
0x157d   :  { %v4246_v29 = vmul.f32 1.442695, %v4237_v9 }
0x157e   :  { %v4220_v1 = vpop.xlane.xlu1 %4219 }
0x157f   :  { %7275 = vpow2.f32 %v4246_v29  ;;  %v4238_v48 = vsub.f32 %v4206_v37, %v4220_v1 }
0x1581   :  { %v4248_v30 = vmul.f32 1.442695, %v4238_v48 }
0x1583   :  { %7277 = vpow2.f32 %v4248_v30 }
0x1585   :  { %v8331_v14 = vpop.eup %7275 }
0x1586   :  { %v4263_v35 = vsel %vm1624_vm4, %v8331_v14, 0.0 }
0x1587   :  { %4264 = vadd.xlane.f32.xlu0 %v4263_v35 }
0x1589   :  { %v8335_v7 = vpop.eup %7277 }
0x158a   :  { %v4223_v41 = vpop.xlane.xlu2 %4222  ;;  %v4266_v25 = vsel %vm1624_vm4, %v8335_v7, 0.0 }
0x158b   :  { %v4239_v18 = vsub.f32 %v4207_v54, %v4223_v41  ;;  %4267 = vadd.xlane.f32.xlu2 %v4266_v25 }
0x158d   :  { %v4250_v38 = vmul.f32 1.442695, %v4239_v18 }
0x158e   :  { %v4232_v42 = vpop.xlane.xlu1 %4231 }
0x158f   :  { %7279 = vpow2.f32 %v4250_v38  ;;  %v4242_v31 = vsub.f32 %v4210_v34, %v4232_v42 }
0x1591   :  { %v4256_v17 = vmul.f32 1.442695, %v4242_v31 }
0x1592   :  { %v7081_v15 = vpop.permute.xlu2 %7080 }
0x1593   :  { %7281 = vpow2.f32 %v4256_v17  ;;  %v7083_v13 = vunpack.i.h.bf16 %v7081_v15  ;;  %v7082_v44 = vunpack.i.l.bf16 %v7081_v15 }
0x1594   :  { %v4229_v58 = vpop.xlane.xlu0 %4228  ;;  %7283 = vpow2.f32 %v4244_v20 }
0x1595   :  { %v8340_v2 = vpop.eup %7279  ;;  %v4315_v32 = vpack.c.bf16 %v7083_v13, %v7083_v13  ;;  %v4314_v46 = vpack.c.bf16 %v7082_v44, %v7082_v44  ;;  %v4241_v52 = vsub.f32 %v4209_v43, %v4229_v58 }
0x1596   :  { %v4269_v24 = vsel %vm1624_vm4, %v8340_v2, 0.0 }
0x1597   :  { %v4393_v45 = vunpack.c.l.b16 %v4315_v32  ;;  %v4392_v39 = vunpack.c.l.b16 %v4314_v46  ;;  %v4254_v28 = vmul.f32 1.442695, %v4241_v52  ;;  %4270 = vadd.xlane.f32.xlu0 %v4269_v24 }
0x1599   :  { %v8344_v47 = vpop.eup %7281  ;;  %v4394_v50 = vpack.c.b16 %v4393_v45, %v4392_v39  ;;  %7285 = vpow2.f32 %v4254_v28 }
0x159a   :  { %v4278_v0 = vsel %vm1624_vm4, %v8344_v47, 0.0  ;;  %v8348_v5 = vpop.eup %7283 }
0x159b   :  { %4406 = vmatpush.bf16.msra.mxu3 %v4394_v50  ;;  %4279 = vadd.xlane.f32.xlu2 %v4278_v0  ;;  %v4260_v8 = vsel %vm1624_vm4, %v8348_v5, 0.0 }
0x159f   :  { %v8350_v27 = vpop.eup %7285 }
0x15a0   :  { %v4275_v4 = vsel %vm1624_vm4, %v8350_v27, 0.0 }
0x15a1   :  { %4261 = vadd.xlane.f32.xlu1 %v4260_v8  ;;  %4276 = vadd.xlane.f32.xlu0 %v4275_v4 }
0x15a6   :  { %v7076_v37 = vpop.permute.xlu1 %7075 }
0x15a7   :  { %v7078_v36 = vunpack.i.h.bf16 %v7076_v37  ;;  %v7077_v26 = vunpack.i.l.bf16 %v7076_v37  ;;  %v7086_v11 = vpop.permute.xlu0 %7085 }
0x15a8   :  { %v7088_v59 = vunpack.i.h.bf16 %v7086_v11  ;;  %v7087_v54 = vunpack.i.l.bf16 %v7086_v11 }
0x15a9   :  { %v4313_v22 = vpack.c.bf16 %v7078_v36, %v7078_v36  ;;  %v4312_v40 = vpack.c.bf16 %v7077_v26, %v7077_v26 }
0x15aa   :  { %v4311_v34 = vpack.c.bf16 %v7088_v59, %v7088_v59  ;;  %v4310_v63 = vpack.c.bf16 %v7087_v54, %v7087_v54 }
0x15ab   :  { %v4371_v49 = vunpack.c.l.b16 %v4313_v22  ;;  %v4370_v16 = vunpack.c.l.b16 %v4312_v40 }
0x15ac   :  { %v4349_v43 = vunpack.c.l.b16 %v4311_v34  ;;  %v4348_v55 = vunpack.c.l.b16 %v4310_v63 }
0x15ad   :  { %v4372_v56 = vpack.c.b16 %v4371_v49, %v4370_v16 }
0x15ae   :  { %v4350_v57 = vpack.c.b16 %v4349_v43, %v4348_v55 }
0x15af   :  { %4384 = vmatpush.bf16.msrb.mxu2 %v4372_v56 }
0x15b0   :  { %4362 = vmatpush.bf16.msrb.mxu1 %v4350_v57 }
0x15b3   :  { %7095 = vrot.lane.b32.xlu2 %v8224_v51, %s7385_s14 }
0x15cb   :  { %v4235_v60 = vpop.xlane.xlu2 %4234 }
0x15cc   :  { %v4243_v61 = vsub.f32 %v8321_v53, %v4235_v60 }
0x15ce   :  { %v4258_v62 = vmul.f32 1.442695, %v4243_v61 }
0x15d0   :  { %7287 = vpow2.f32 %v4258_v62 }
0x15d1   :  { %v4226_v21 = vpop.xlane.xlu1 %4225 }
0x15d2   :  { %v4240_v23 = vsub.f32 %v8325_v10, %v4226_v21 }
0x15d4   :  { %v4252_v6 = vmul.f32 1.442695, %v4240_v23 }
0x15d6   :  { %v7288_v9 = vpop.eup %7287  ;;  %7289 = vpow2.f32 %v4252_v6 }
0x15d7   :  { %v4281_v29 = vsel %vm1624_vm4, %v7288_v9, 0.0 }
0x15d8   :  { %4282 = vadd.xlane.f32.xlu0 %v4281_v29 }
0x15dc   :  { %v7290_v1 = vpop.eup %7289 }
0x15dd   :  { %v4272_v48 = vsel %vm1624_vm4, %v7290_v1, 0.0 }
0x15de   :  { %4273 = vadd.xlane.f32.xlu2 %v4272_v48 }
0x15e9   :  { %v7091_v30 = vpop.permute.xlu1 %7090 }
0x15ea   :  { %v7093_v35 = vunpack.i.h.bf16 %v7091_v30  ;;  %v7092_v41 = vunpack.i.l.bf16 %v7091_v30 }
0x15ec   :  { %v4321_v25 = vpack.c.bf16 %v7093_v35, %v7093_v35  ;;  %v4320_v53 = vpack.c.bf16 %v7092_v41, %v7092_v41  ;;  %7100 = vrot.lane.b32.xlu0 %v8224_v51, %s7387_s16 }
0x15ee   :  { %v4459_v18 = vunpack.c.l.b16 %v4321_v25  ;;  %v4458_v10 = vunpack.c.l.b16 %v4320_v53 }
0x15f0   :  { %v4460_v38 = vpack.c.b16 %v4459_v18, %v4458_v10 }
0x15f2   :  { %4472 = vmatpush.bf16.msra.mxu2 %v4460_v38 }
0x15fa   :  { %v4265_v42 = vpop.xlane.xlu0 %4264 }
0x15fb   :  { %7291 = vrcp.f32 %v4265_v42 }
0x15fe   :  { %v4268_v33 = vpop.xlane.xlu2 %4267 }
0x15ff   :  { %7293 = vrcp.f32 %v4268_v33  ;;  %v6290_v33 = vld [vmem:[#allocation2 + $0x5bc] sm:$0xf] }
0x1601   :  { %v7292_v31 = vpop.eup %7291 }
0x1602   :  { %v4293_v17 = vmul.f32 %v7292_v31, %v8331_v14  ;;  %v6286_v31 = vld [vmem:[#allocation2 + $0x55c] sm:$0xf] }
0x1604   :  { %v4301_v15 = vpack.c.bf16 %v4293_v17, %v4293_v17 }
0x1605   :  { %v7294_v20 = vpop.eup %7293 }
0x1606   :  { %v4294_v13 = vmul.f32 %v7294_v20, %v8335_v7  ;;  %6252 = vmatmul.msk.bf16.vlgmr.msrb.gmra.mxu1 %vm1624_vm4, %v4301_v15  ;;  %v6844_v15 = vld [vmem:[#allocation2 + $0x588] sm:$0xf0] }
0x1607   :  { %v6287_v20 = vor.u32 %v6844_v15, %v6286_v31  ;;  %v6411_v31 = vld [vmem:[#allocation2 + $0x5f0] sm:$0xf0]  ;;  %v6877_v15 = vld [vmem:[#allocation2 + $0x5f4] sm:$0xf0] }
0x1608   :  { %v4302_v44 = vpack.c.bf16 %v4294_v13, %v4294_v13  ;;  %v6282_v13 = vld [vmem:[#allocation2 + $0x4fc] sm:$0xf] }
0x160a   :  { %v4271_v58 = vpop.xlane.xlu0 %4270  ;;  %6253 = vmatmul.msk.bf16.vlgmr.msrb.gmra.mxu2 %vm1624_vm4, %v4302_v44  ;;  %v6843_v44 = vld [vmem:[#allocation2 + $0x528] sm:$0xf0] }
0x160b   :  { %7295 = vrcp.f32 %v4271_v58  ;;  %v6283_v58 = vor.u32 %v6843_v44, %v6282_v13  ;;  %v6875_v44 = vld [vmem:[#allocation2 + $0x5cc] sm:$0xf] }
0x160e   :  { %v4280_v51 = vpop.xlane.xlu2 %4279 }
0x160f   :  { %7297 = vrcp.f32 %v4280_v51 }
0x1611   :  { %v7296_v32 = vpop.eup %7295 }
0x1612   :  { %v4295_v46 = vmul.f32 %v7296_v32, %v8340_v2 }
0x1614   :  { %v4303_v52 = vpack.c.bf16 %v4295_v46, %v4295_v46  ;;  %v4262_v24 = vpop.xlane.xlu1 %4261 }
0x1615   :  { %v7298_v45 = vpop.eup %7297  ;;  %7299 = vrcp.f32 %v4262_v24 }
0x1616   :  { %v4298_v14 = vmul.f32 %v7298_v45, %v8344_v47  ;;  %6254 = vmatmul.msk.bf16.vlgmr.msra.gmra.mxu3 %vm1624_vm4, %v4303_v52  ;;  %v7096_v7 = vpop.permute.xlu2 %7095  ;;  %v4277_v47 = vpop.xlane.xlu0 %4276 }
0x1617   :  { %v7098_v39 = vunpack.i.h.bf16 %v7096_v7  ;;  %v7097_v28 = vunpack.i.l.bf16 %v7096_v7  ;;  %v6842_v7 = vld [vmem:[#allocation2 + $0x4c8] sm:$0xf0] }
0x1618   :  { %v4306_v50 = vpack.c.bf16 %v4298_v14, %v4298_v14  ;;  %v6278_v14 = vld [vmem:[#allocation2 + $0x49c] sm:$0xf] }
0x1619   :  { %v4323_v0 = vpack.c.bf16 %v7098_v39, %v7098_v39  ;;  %v4322_v8 = vpack.c.bf16 %v7097_v28, %v7097_v28  ;;  %v6279_v39 = vor.u32 %v6842_v7, %v6278_v14  ;;  %v6274_v28 = vld [vmem:[#allocation2 + $0x43c] sm:$0xf]  ;;  %v6401_v14 = vld [vmem:[#allocation2 + $0x568] sm:$0xf]  ;;  %v6873_v7 = vld [vmem:[#allocation2 + $0x594] sm:$0xf0] }
0x161a   :  { %6257 = vmatmul.msk.bf16.vlgmr.msra.gmra.mxu2 %vm1624_vm4, %v4306_v50  ;;  %v6841_v50 = vld [vmem:[#allocation2 + $0x468] sm:$0xf0] }
0x161b   :  { %v7300_v4 = vpop.eup %7299  ;;  %v4481_v37 = vunpack.c.l.b16 %v4323_v0  ;;  %v4480_v36 = vunpack.c.l.b16 %v4322_v8  ;;  %v6275_v0 = vor.u32 %v6841_v50, %v6274_v28  ;;  %v6270_v8 = vld [vmem:[#allocation2 + $0x3dc] sm:$0xf]  ;;  %v6402_v28 = vor.u32 %v6873_v7, %v6401_v14  ;;  %v6871_v50 = vld [vmem:[#allocation2 + $0x56c] sm:$0xf]  ;;  %v6315_v14 = vld [vmem:[#allocation2 + $0x3b0] sm:$0xf0] }
0x161c   :  { %v4292_v2 = vmul.f32 %v7300_v4, %v8348_v5  ;;  %v6840_v4 = vld [vmem:[#allocation2 + $0x408] sm:$0xf0]  ;;  %v6321_v7 = vld [vmem:[#allocation2 + $0x388] sm:$0xf] }
0x161d   :  { %v4482_v26 = vpack.c.b16 %v4481_v37, %v4480_v36  ;;  %v6271_v37 = vor.u32 %v6840_v4, %v6270_v8  ;;  %v6266_v36 = vld [vmem:[#allocation2 + $0x37c] sm:$0xf]  ;;  %v6377_v4 = vld [vmem:[#allocation2 + $0x500] sm:$0xf] }
0x161e   :  { %v4300_v11 = vpack.c.bf16 %v4292_v2, %v4292_v2  ;;  %v6839_v2 = vld [vmem:[#allocation2 + $0x3a8] sm:$0xf0] }
0x161f   :  { %4494 = vmatpush.bf16.msrb.mxu3 %v4482_v26  ;;  %v6267_v26 = vor.u32 %v6839_v2, %v6266_v36  ;;  %v6866_v36 = vld [vmem:[#allocation2 + $0x504] sm:$0xf] }
0x1620   :  { %6251 = vmatmul.msk.bf16.vlgmr.msra.gmra.mxu0 %vm1624_vm4, %v4300_v11  ;;  %v6262_v11 = vld [vmem:[#allocation2 + $0x31c] sm:$0xf] }
0x164b   :  { %v4283_v59 = vpop.xlane.xlu0 %4282 }
0x164c   :  { %7301 = vrcp.f32 %v4283_v59 }
0x1651   :  { %v4274_v54 = vpop.xlane.xlu2 %4273 }
0x1652   :  { %v7302_v22 = vpop.eup %7301  ;;  %7303 = vrcp.f32 %v4274_v54 }
0x1653   :  { %v4299_v40 = vmul.f32 %v7302_v22, %v7288_v9  ;;  %7305 = vrcp.f32 %v4277_v47  ;;  %v6838_v47 = vld [vmem:[#allocation2 + $0x348] sm:$0xf0] }
0x1654   :  { %v6263_v59 = vor.u32 %v6838_v47, %v6262_v11  ;;  %v6385_v11 = vld [vmem:[#allocation2 + $0x508] sm:$0xf]  ;;  %v6869_v47 = vld [vmem:[#allocation2 + $0x534] sm:$0xf0] }
0x1655   :  { %v4307_v34 = vpack.c.bf16 %v4299_v40, %v4299_v40 }
0x1657   :  { %6258 = vmatmul.msk.bf16.vlgmr.msrb.gmra.mxu3 %vm1624_vm4, %v4307_v34 }
0x1658   :  { %v7304_v63 = vpop.eup %7303 }
0x1659   :  { %v4296_v49 = vmul.f32 %v7304_v63, %v7290_v1  ;;  %v7306_v56 = vpop.eup %7305 }
0x165a   :  { %v4297_v21 = vmul.f32 %v7306_v56, %v8350_v27  ;;  %v6845_v27 = vld [vmem:[#allocation2 + $0x5e8] sm:$0xf0] }
0x165b   :  { %v4304_v16 = vpack.c.bf16 %v4296_v49, %v4296_v49  ;;  %v6291_v17 = vor.u32 %v6845_v27, %v6290_v33  ;;  %v6874_v33 = vld [vmem:[#allocation2 + $0x5c4] sm:$0xf] }
0x165c   :  { %v4305_v6 = vpack.c.bf16 %v4297_v21, %v4297_v21 }
0x165d   :  { %6255 = vmatmul.msk.bf16.vlgmr.msrb.gmra.mxu0 %vm1624_vm4, %v4304_v16 }
0x165e   :  { %v7101_v5 = vpop.permute.xlu0 %7100  ;;  %4599 = vmatpush.bf16.msra.mxu0 %v6291_v17  ;;  %v6417_v17 = vld [vmem:[#allocation2 + $0x5c8] sm:$0xf] }
0x165f   :  { %v7103_v43 = vunpack.i.h.bf16 %v7101_v5  ;;  %v7102_v55 = vunpack.i.l.bf16 %v7101_v5  ;;  %v6418_v13 = vor.u32 %v6877_v15, %v6417_v17  ;;  %v6331_v17 = vld [vmem:[#allocation2 + $0x410] sm:$0xf0]  ;;  %v6337_v15 = vld [vmem:[#allocation2 + $0x3e8] sm:$0xf] }
0x1661   :  { %v4319_v57 = vpack.c.bf16 %v7103_v43, %v7103_v43  ;;  %v4318_v60 = vpack.c.bf16 %v7102_v55, %v7102_v55  ;;  %4898 = vmatpush.bf16.msra.mxu3 %v6418_v13 }
0x1662   :  { %4600 = vmatpush.bf16.msra.mxu0 %v6287_v20  ;;  %v6414_v20 = vor.u32 %v6874_v33, %v6411_v31  ;;  %v6856_v33 = vld [vmem:[#allocation2 + $0x40c] sm:$0xf0] }
0x1663   :  { %v4437_v61 = vunpack.c.l.b16 %v4319_v57  ;;  %v4436_v62 = vunpack.c.l.b16 %v4318_v60 }
0x1664   :  { %4884 = vmatpush.bf16.msrb.mxu2 %v6414_v20  ;;  %v6857_v20 = vld [vmem:[#allocation2 + $0x414] sm:$0xf0] }
0x1665   :  { %v4438_v23 = vpack.c.b16 %v4437_v61, %v4436_v62  ;;  %4899 = vmatpush.bf16.msra.mxu3 %v6402_v28 }
0x1666   :  { %4601 = vmatpush.bf16.msra.mxu0 %v6283_v58  ;;  %v6419_v58 = vld [vmem:[#allocation2 + $0x5f8] sm:$0xf0] }
0x1667   :  { %4450 = vmatpush.bf16.msra.mxu1 %v4438_v23  ;;  %v7136_v23 = vld [vmem:[%s8594_s6 + $0x1e] ss:$0 sm:$0xff] }
0x166a   :  { %6256 = vmatmul.msk.bf16.vlgmr.msra.gmra.mxu1 %vm1624_vm4, %v4305_v6  ;;  %4602 = vmatpush.bf16.msra.mxu0 %v6279_v39 }
0x166e   :  { %4603 = vmatpush.bf16.msra.mxu0 %v6275_v0  ;;  %v6403_v0 = vld [vmem:[#allocation2 + $0x598] sm:$0xf0] }
0x166f   :  { %v6406_v8 = vor.u32 %v6871_v50, %v6403_v0 }
0x1672   :  { %4604 = vmatpush.bf16.msra.mxu0 %v6271_v37  ;;  %v6868_v37 = vld [vmem:[#allocation2 + $0x52c] sm:$0xf0] }
0x1673   :  { %v6378_v2 = vor.u32 %v6868_v37, %v6377_v4  ;;  %v6323_v4 = vld [vmem:[#allocation2 + $0x3b8] sm:$0xf0] }
0x1676   :  { %4605 = vmatpush.bf16.msra.mxu0 %v6267_v26  ;;  %v6379_v26 = vld [vmem:[#allocation2 + $0x530] sm:$0xf0] }
0x167a   :  { %4606 = vmatpush.bf16.msra.mxu0 %v6263_v59  ;;  %v6382_v59 = vor.u32 %v6866_v36, %v6379_v26  ;;  %v6848_v26 = vld [vmem:[#allocation2 + $0x34c] sm:$0xf0] }
0x1683   :  { %v4364_v9 = vpop.f32.mrf.mxu1 }
0x168b   :  { %v4366_v29 = vpop.f32.mrf.mxu1 }
0x168d   :  { %v4386_v1 = vpop.f32.mrf.mxu2 }
0x1695   :  { %v4388_v48 = vpop.f32.mrf.mxu2 }
0x1699   :  { %v4408_v30 = vpop.f32.mrf.mxu3 }
0x169d   :  { %v4342_v35 = vpop.f32.mrf.mxu0  ;;  %v4474_v41 = vpop.f32.mrf.mxu2 }
0x169e   :  { %v7109_v25 = vpack.i.bf16 %v4474_v41, %v4386_v1 }
0x16a1   :  { %v4410_v53 = vpop.f32.mrf.mxu3 }
0x16a5   :  { %v4344_v18 = vpop.f32.mrf.mxu0  ;;  %v4476_v10 = vpop.f32.mrf.mxu2 }
0x16da   :  { %v4430_v38 = vpop.f32.mrf.mxu0  ;;  %v4496_v42 = vpop.f32.mrf.mxu3 }
0x16db   :  { %v7114_v45 = vpack.i.bf16 %v4496_v42, %v4408_v30  ;;  %v6876_v42 = vld [vmem:[#allocation2 + $0x5ec] sm:$0xf0] }
0x16e2   :  { %v4432_v51 = vpop.f32.mrf.mxu0  ;;  %v4498_v32 = vpop.f32.mrf.mxu3 }
0x16e3   :  { %v6422_v51 = vor.u32 %v6875_v44, %v6419_v58  ;;  %v6393_v32 = vld [vmem:[#allocation2 + $0x560] sm:$0xf]  ;;  %v6338_v44 = vor.u32 %v6857_v20, %v6337_v15  ;;  %v6855_v58 = vld [vmem:[#allocation2 + $0x3ec] sm:$0xf]  ;;  %v6909_v15 = vld [vmem:[%s8593_s5 + $0x1f8] sm:$0xff] }
0x16e4   :  { %v6908_v20 = vld [vmem:[%s8593_s5 + $0x1f0] sm:$0xff] }
0x16e5   :  { %4912 = vmatpush.bf16.msrb.mxu0 %v6422_v51  ;;  %v6339_v51 = vld [vmem:[#allocation2 + $0x418] sm:$0xf0] }
0x16e7   :  { %v4452_v46 = vpop.f32.mrf.mxu1 }
0x16e8   :  { %v7104_v52 = vpack.i.bf16 %v4452_v46, %v4364_v9  ;;  %v6872_v46 = vld [vmem:[#allocation2 + $0x58c] sm:$0xf0] }
0x16e9   :  { %4913 = vmatpush.bf16.msrb.mxu0 %v6406_v8  ;;  %v6851_v8 = vld [vmem:[#allocation2 + $0x38c] sm:$0xf] }
0x16ea   :  { %7105 = vrot.lane.b32.xlu0 %v7104_v52, %s7385_s14  ;;  %v6870_v52 = vld [vmem:[#allocation2 + $0x564] sm:$0xf]  ;;  %v6326_v36 = vor.u32 %v6851_v8, %v6323_v4  ;;  %v6904_v8 = vld [vmem:[%s8593_s5 + $0x1d0] sm:$0xff]  ;;  %v6889_v4 = vld [vmem:[%s8593_s5 + $0x158] sm:$0xff] }
0x16ef   :  { %v4454_v24 = vpop.f32.mrf.mxu1 }
0x16f0   :  { %v6394_v24 = vor.u32 %v6872_v46, %v6393_v32  ;;  %v6342_v32 = vor.u32 %v6855_v58, %v6339_v51  ;;  %v6313_v46 = vld [vmem:[#allocation2 + $0x380] sm:$0xf]  ;;  %v6883_v58 = vld [vmem:[%s8593_s5 + $0x128] sm:$0xff] }
0x16f1   :  { %v6907_v51 = vld [vmem:[%s8593_s5 + $0x1e8] sm:$0xff] }
0x16f2   :  { %7110 = vrot.lane.b32.xlu0 %v7109_v25, %s7386_s15 }
0x16fa   :  { %7115 = vrot.lane.b32.xlu0 %v7114_v45, %s7387_s16  ;;  %v6395_v45 = vld [vmem:[#allocation2 + $0x590] sm:$0xf0] }
0x16fb   :  { %v6398_v39 = vor.u32 %v6870_v52, %v6395_v45  ;;  %v6852_v52 = vld [vmem:[#allocation2 + $0x3ac] sm:$0xf0] }
0x16fc   :  { %v6314_v45 = vor.u32 %v6852_v52, %v6313_v46  ;;  %v6900_v46 = vld [vmem:[%s8593_s5 + $0x1b0] sm:$0xff]  ;;  %v6882_v52 = vld [vmem:[%s8593_s5 + $0x120] sm:$0xff] }
0x16fd   :  { %4885 = vmatpush.bf16.msrb.mxu2 %v6398_v39  ;;  %v6853_v39 = vld [vmem:[#allocation2 + $0x3b4] sm:$0xf0] }
0x16fe   :  { %v6322_v0 = vor.u32 %v6853_v39, %v6321_v7  ;;  %v6881_v7 = vld [vmem:[%s8593_s5 + $0x118] sm:$0xff] }
0x16ff   :  { %v6905_v39 = vld [vmem:[%s8593_s5 + $0x1d8] sm:$0xff] }
0x1701   :  { %4886 = vmatpush.bf16.msrb.mxu2 %v6382_v59 }
0x175c   :  { %v7106_v54 = vpop.permute.xlu0 %7105 }
0x175d   :  { %v7108_v40 = vunpack.i.h.bf16 %v7106_v54  ;;  %v7107_v34 = vunpack.i.l.bf16 %v7106_v54  ;;  %v6386_v54 = vor.u32 %v6869_v47, %v6385_v11  ;;  %v6846_v11 = vld [vmem:[#allocation2 + $0x324] sm:$0xf] }
0x175f   :  { %v4512_v5 = vsel %vm482_vm8, %v4342_v35, %v7107_v34  ;;  %v4527_v43 = vsel %vm482_vm8, %v4430_v38, %v7108_v40  ;;  %v6409_v38 = vld [vmem:[#allocation2 + $0x5c0] sm:$0xf]  ;;  %v6387_v40 = vld [vmem:[#allocation2 + $0x538] sm:$0xf0]  ;;  %4900 = vmatpush.bf16.msra.mxu3 %v6386_v54  ;;  %v6299_v54 = vld [vmem:[#allocation2 + $0x350] sm:$0xf0] }
0x1760   :  { %v6410_v27 = vor.u32 %v6876_v42, %v6409_v38  ;;  %v6329_v42 = vld [vmem:[#allocation2 + $0x3e0] sm:$0xf] }
0x1761   :  { %v6330_v31 = vor.u32 %v6856_v33, %v6329_v42 }
0x1762   :  { %4870 = vmatpush.bf16.msrb.mxu1 %v6410_v27  ;;  %v6854_v27 = vld [vmem:[#allocation2 + $0x3e4] sm:$0xf] }
0x1763   :  { %v6334_v13 = vor.u32 %v6854_v27, %v6331_v17 }
0x1764   :  { %v7111_v22 = vpop.permute.xlu0 %7110 }
0x1765   :  { %v7113_v63 = vunpack.i.h.bf16 %v7111_v22  ;;  %v7112_v49 = vunpack.i.l.bf16 %v7111_v22  ;;  %v6867_v22 = vld [vmem:[#allocation2 + $0x50c] sm:$0xf] }
0x1766   :  { %4871 = vmatpush.bf16.msrb.mxu1 %v6394_v24  ;;  %v6390_v34 = vor.u32 %v6867_v22, %v6387_v40  ;;  %v6850_v24 = vld [vmem:[#allocation2 + $0x384] sm:$0xf]  ;;  %v6305_v22 = vld [vmem:[#allocation2 + $0x328] sm:$0xf]  ;;  %v6302_v40 = vor.u32 %v6846_v11, %v6299_v54  ;;  %v6888_v11 = vld [vmem:[%s8593_s5 + $0x150] sm:$0xff] }
0x1767   :  { %v4513_v57 = vsel %vm100_vm1, %v4512_v5, %v7112_v49  ;;  %v4528_v60 = vsel %vm100_vm1, %v4527_v43, %v7113_v63  ;;  %v6361_v63 = vld [vmem:[#allocation2 + $0x4a0] sm:$0xf]  ;;  %v6864_v49 = vld [vmem:[#allocation2 + $0x4cc] sm:$0xf0]  ;;  %v6363_v43 = vld [vmem:[#allocation2 + $0x4d0] sm:$0xf0]  ;;  %v6318_v50 = vor.u32 %v6850_v24, %v6315_v14 }
0x1768   :  { %4914 = vmatpush.bf16.msrb.mxu0 %v6390_v34  ;;  %v6362_v5 = vor.u32 %v6864_v49, %v6361_v63  ;;  %v6849_v34 = vld [vmem:[#allocation2 + $0x354] sm:$0xf0]  ;;  %v6847_v63 = vld [vmem:[#allocation2 + $0x32c] sm:$0xf]  ;;  %v6307_v49 = vld [vmem:[#allocation2 + $0x358] sm:$0xf0] }
0x1769   :  { %v6906_v24 = vld [vmem:[%s8593_s5 + $0x1e0] sm:$0xff]  ;;  %v6899_v14 = vld [vmem:[%s8593_s5 + $0x1a8] sm:$0xff] }
0x176a   :  { %4872 = vmatpush.bf16.msrb.mxu1 %v6378_v2  ;;  %v6297_v2 = vld [vmem:[#allocation2 + $0x320] sm:$0xf] }
0x176b   :  { %v6298_v59 = vor.u32 %v6848_v26, %v6297_v2  ;;  %v6879_v2 = vld [vmem:[%s8593_s5 + $0x108] sm:$0xff] }
0x176c   :  { %v7116_v16 = vpop.permute.xlu0 %7115  ;;  %v6903_v26 = vld [vmem:[%s8593_s5 + $0x1c8] sm:$0xff] }
0x176d   :  { %v7118_v55 = vunpack.i.h.bf16 %v7116_v16  ;;  %v7117_v56 = vunpack.i.l.bf16 %v7116_v16  ;;  %v6862_v16 = vld [vmem:[#allocation2 + $0x4a4] sm:$0xf] }
0x176e   :  { %4873 = vmatpush.bf16.msrb.mxu1 %v6362_v5  ;;  %v6310_v5 = vor.u32 %v6847_v63, %v6307_v49  ;;  %v6887_v63 = vld [vmem:[%s8593_s5 + $0x148] sm:$0xff] }
0x176f   :  { %v4529_v61 = vsel %vm923_vm12, %v4528_v60, %v7118_v55  ;;  %v4514_v62 = vsel %vm923_vm12, %v4513_v57, %v7117_v56  ;;  %v6369_v55 = vld [vmem:[#allocation2 + $0x4a8] sm:$0xf]  ;;  %v6865_v56 = vld [vmem:[#allocation2 + $0x4d4] sm:$0xf0]  ;;  %v6366_v57 = vor.u32 %v6862_v16, %v6363_v43  ;;  %v6306_v16 = vor.u32 %v6849_v34, %v6305_v22  ;;  %v6878_v22 = vld [vmem:[%s8593_s5 + $0x100] sm:$0xff] }
0x1770   :  { %v4530_v21 = vpack.c.bf16 %v4529_v61, %v4514_v62  ;;  %v6370_v60 = vor.u32 %v6865_v56, %v6369_v55  ;;  %v6863_v61 = vld [vmem:[#allocation2 + $0x4ac] sm:$0xf]  ;;  %v6371_v62 = vld [vmem:[#allocation2 + $0x4d8] sm:$0xf0] }
0x1771   :  { %4887 = vmatpush.bf16.msrb.mxu2 %v6366_v57  ;;  %v6895_v49 = vld [vmem:[%s8593_s5 + $0x188] sm:$0xff] }
0x1772   :  { %4607 = vmatmul.bf16.vlgmr.msra.gmra.mxu0 %v4530_v21  ;;  %v6374_v21 = vor.u32 %v6863_v61, %v6371_v62  ;;  %4901 = vmatpush.bf16.msra.mxu3 %v6370_v60 }
0x1774   :  { %4915 = vmatpush.bf16.msrb.mxu0 %v6374_v21 }
0x17ef   :  { %v4608_v6 = vpop.f32.mrf.mxu0 }
0x17f0   :  { %v4609_v9 = vadd.f32 %v7136_v23, %v4608_v6  ;;  %v6860_v6 = vld [vmem:[#allocation2 + $0x46c] sm:$0xf0] }
0x17f2   :  { %v8391_v29 = vadd.f32 %v4609_v9, %v8236_v19  ;;  %v6858_v9 = vld [vmem:[#allocation2 + $0x444] sm:$0xf] }
0x17f4   :  { %4617 = vadd.xlane.f32.xlu0 %v8391_v29 }
0x17f7   :  { %v4610_v1 = vpop.f32.mrf.mxu0 }
0x17f8   :  { %v4611_v48 = vadd.f32 %v7136_v23, %v4610_v1  ;;  %v6345_v23 = vld [vmem:[#allocation2 + $0x440] sm:$0xf] }
0x17f9   :  { %v6346_v1 = vor.u32 %v6860_v6, %v6345_v23 }
0x17fa   :  { %v8395_v30 = vadd.f32 %v4611_v48, %v8240_v3  ;;  %v6347_v48 = vld [vmem:[#allocation2 + $0x470] sm:$0xf0] }
0x17fb   :  { %4874 = vmatpush.bf16.msrb.mxu1 %v6346_v1 }
0x17fc   :  { %4619 = vadd.xlane.f32.xlu1 %v8395_v30 }
0x17ff   :  { %4875 = vmatpush.bf16.msrb.mxu1 %v6330_v31 }
0x1803   :  { %4876 = vmatpush.bf16.msrb.mxu1 %v6314_v45  ;;  %v6891_v45 = vld [vmem:[%s8593_s5 + $0x168] sm:$0xff] }
0x1807   :  { %4877 = vmatpush.bf16.msrb.mxu1 %v6298_v59 }
0x1867   :  { %v4618_v35 = vpop.xlane.xlu0 %4617 }
0x1868   :  { %v4621_v41 = vmul.f32 %v4618_v35, %v7463_v12  ;;  %v6353_v35 = vld [vmem:[#allocation2 + $0x448] sm:$0xf] }
0x186a   :  { %v8400_v25 = vsub.f32 %v8391_v29, %v4621_v41  ;;  %v6861_v41 = vld [vmem:[#allocation2 + $0x474] sm:$0xf0] }
0x186c   :  { %v4625_v53 = vmul.f32 %v8400_v25, %v8400_v25 }
0x186e   :  { %4627 = vadd.xlane.f32.xlu2 %v4625_v53  ;;  %v6350_v53 = vor.u32 %v6858_v9, %v6347_v48 }
0x186f   :  { %v4620_v19 = vpop.xlane.xlu1 %4619 }
0x1870   :  { %v4622_v18 = vmul.f32 %v4620_v19, %v7463_v12  ;;  %v6354_v19 = vor.u32 %v6861_v41, %v6353_v35  ;;  %4888 = vmatpush.bf16.msrb.mxu2 %v6350_v53 }
0x1872   :  { %v8406_v10 = vsub.f32 %v8395_v30, %v4622_v18  ;;  %v6859_v18 = vld [vmem:[#allocation2 + $0x44c] sm:$0xf]  ;;  %4902 = vmatpush.bf16.msra.mxu3 %v6354_v19 }
0x1874   :  { %v4626_v3 = vmul.f32 %v8406_v10, %v8406_v10  ;;  %4889 = vmatpush.bf16.msrb.mxu2 %v6334_v13  ;;  %v6893_v13 = vld [vmem:[%s8593_s5 + $0x178] sm:$0xff] }
0x1876   :  { %4629 = vadd.xlane.f32.xlu1 %v4626_v3  ;;  %v6355_v3 = vld [vmem:[#allocation2 + $0x478] sm:$0xf0]  ;;  %4903 = vmatpush.bf16.msra.mxu3 %v6338_v44 }
0x1877   :  { %v6358_v38 = vor.u32 %v6859_v18, %v6355_v3  ;;  %v7138_v3 = vld [vmem:[%s8594_s6 + $0x20] ss:$0 sm:$0xff]  ;;  %v6901_v44 = vld [vmem:[%s8593_s5 + $0x1b8] sm:$0xff] }
0x1878   :  { %4890 = vmatpush.bf16.msrb.mxu2 %v6318_v50  ;;  %v6898_v50 = vld [vmem:[%s8593_s5 + $0x1a0] sm:$0xff] }
0x1879   :  { %4916 = vmatpush.bf16.msrb.mxu0 %v6358_v38 }
0x187a   :  { %4904 = vmatpush.bf16.msra.mxu3 %v6322_v0  ;;  %v6880_v0 = vld [vmem:[%s8593_s5 + $0x110] sm:$0xff] }
0x187c   :  { %4891 = vmatpush.bf16.msrb.mxu2 %v6302_v40  ;;  %v6902_v40 = vld [vmem:[%s8593_s5 + $0x1c0] sm:$0xff] }
0x187d   :  { %4917 = vmatpush.bf16.msrb.mxu0 %v6342_v32  ;;  %v6892_v32 = vld [vmem:[%s8593_s5 + $0x170] sm:$0xff] }
0x187e   :  { %4905 = vmatpush.bf16.msra.mxu3 %v6306_v16 }
0x1880   :  { %5277 = vmatpush.bf16.msra.mxu2 %v6893_v13 }
0x1881   :  { %4918 = vmatpush.bf16.msrb.mxu0 %v6326_v36  ;;  %v8489_v36 = vld [vmem:[%s8594_s6 + $0x21] sm:$0xf] }
0x1882   :  { %5291 = vmatpush.bf16.msrb.mxu3 %v6901_v44  ;;  %v4702_v59 = vperm.slane %v8489_v36, 0  ;;  %v4705_v54 = vperm.slane %v8489_v36, 3 }
0x1884   :  { %5278 = vmatpush.bf16.msra.mxu2 %v6892_v32 }
0x1885   :  { %4919 = vmatpush.bf16.msrb.mxu0 %v6310_v5 }
0x1886   :  { %5292 = vmatpush.bf16.msrb.mxu3 %v6900_v46 }
0x1888   :  { %5279 = vmatpush.bf16.msra.mxu2 %v6891_v45 }
0x1889   :  { %5305 = vmatpush.bf16.msra.mxu0 %v6909_v15 }
0x188a   :  { %5293 = vmatpush.bf16.msrb.mxu3 %v6899_v14 }
0x188d   :  { %5306 = vmatpush.bf16.msra.mxu0 %v6908_v20 }
0x188e   :  { %5294 = vmatpush.bf16.msrb.mxu3 %v6898_v50 }
0x1891   :  { %5307 = vmatpush.bf16.msra.mxu0 %v6907_v51 }
0x1895   :  { %5308 = vmatpush.bf16.msra.mxu0 %v6906_v24 }
0x1899   :  { %5309 = vmatpush.bf16.msra.mxu0 %v6905_v39 }
0x189d   :  { %5310 = vmatpush.bf16.msra.mxu0 %v6904_v8 }
0x18a1   :  { %5311 = vmatpush.bf16.msra.mxu0 %v6903_v26 }
0x18a5   :  { %5312 = vmatpush.bf16.msra.mxu0 %v6902_v40 }
0x18e1   :  { %v4628_v28 = vpop.xlane.xlu2 %4627 }
0x18e2   :  { %v4631_v37 = vmul.f32 %v4628_v28, %v7463_v12  ;;  %v6890_v28 = vld [vmem:[%s8593_s5 + $0x160] sm:$0xff] }
0x18e3   :  { %5280 = vmatpush.bf16.msra.mxu2 %v6890_v28 }
0x18e4   :  { %v4633_v47 = vadd.f32 1e-05, %v4631_v37  ;;  %v6897_v37 = vld [vmem:[%s8593_s5 + $0x198] sm:$0xff] }
0x18e5   :  { %5295 = vmatpush.bf16.msrb.mxu3 %v6897_v37 }
0x18e6   :  { %7307 = vrsqrt.f32 %v4633_v47  ;;  %vm4641_vm8 = vweird.f32 %v4633_v47 }
0x18e7   :  { %5281 = vmatpush.bf16.msra.mxu2 %v6889_v4 }
0x18e9   :  { %v4630_v43 = vpop.xlane.xlu1 %4629 }
0x18ea   :  { %v4632_v55 = vmul.f32 %v4630_v43, %v7463_v12  ;;  %v7137_v12 = vld [vmem:[%s8594_s6 + $0x1f] ss:$0 sm:$0xff] }
0x18eb   :  { %5282 = vmatpush.bf16.msra.mxu2 %v6888_v11 }
0x18ec   :  { %v7308_v56 = vpop.eup %7307  ;;  %v4634_v57 = vadd.f32 1e-05, %v4632_v55 }
0x18ed   :  { %v4636_v60 = vmul.f32 %v7308_v56, %v4633_v47  ;;  %vm4642_vm1 = vweird.f32 %v7308_v56  ;;  %v6896_v47 = vld [vmem:[%s8593_s5 + $0x190] sm:$0xff] }
0x18ee   :  { %7309 = vrsqrt.f32 %v4634_v57  ;;  %vm4643_vm12 = vmor %vm4641_vm8, %vm4642_vm1  ;;  %vm4651_vm15 = vweird.f32 %v4634_v57  ;;  %5296 = vmatpush.bf16.msrb.mxu3 %v6896_v47 }
0x18ef   :  { %v4637_v61 = vmul.f32 %v7308_v56, %v4636_v60  ;;  %5283 = vmatpush.bf16.msra.mxu2 %v6887_v63  ;;  %v6894_v60 = vld [vmem:[%s8593_s5 + $0x180] sm:$0xff] }
0x18f1   :  { %v4638_v62 = vmul.f32 0.5, %v4637_v61 }
0x18f2   :  { %5297 = vmatpush.bf16.msrb.mxu3 %v6895_v49 }
0x18f3   :  { %v4639_v21 = vsub.f32 1.5, %v4638_v62  ;;  %v4704_v62 = vperm.slane %v8489_v36, 2 }
0x18f4   :  { %v7310_v23 = vpop.eup %7309 }
0x18f5   :  { %v4640_v6 = vmul.f32 %v7308_v56, %v4639_v21  ;;  %v4646_v9 = vmul.f32 %v7310_v23, %v4634_v57  ;;  %vm4652_vm4 = vweird.f32 %v7310_v23  ;;  %v6886_v57 = vld [vmem:[%s8593_s5 + $0x140] sm:$0xff] }
0x18f6   :  { %vm4653_vm0 = vmor %vm4651_vm15, %vm4652_vm4  ;;  %5284 = vmatpush.bf16.msra.mxu2 %v6886_v57  ;;  %5298 = vmatpush.bf16.msrb.mxu3 %v6894_v60 }
0x18f7   :  { %v4647_v1 = vmul.f32 %v7310_v23, %v4646_v9  ;;  %v4644_v48 = vsel %vm4643_vm12, %v7308_v56, %v4640_v6  ;;  %v4703_v56 = vperm.slane %v8489_v36, 1 }
0x18f8   :  { %v4655_v53 = vmul.f32 %v4644_v48, %v8400_v25  ;;  %v6885_v25 = vld [vmem:[%s8593_s5 + $0x138] sm:$0xff] }
0x18f9   :  { %v4648_v35 = vmul.f32 0.5, %v4647_v1  ;;  %5263 = vmatpush.bf16.msra.mxu1 %v6885_v25 }
0x18fa   :  { %v4660_v38 = vmul.f32 %v7137_v12, %v4655_v53 }
0x18fb   :  { %v4649_v41 = vsub.f32 1.5, %v4648_v35 }
0x18fc   :  { %v4665_v27 = vadd.f32 %v7138_v3, %v4660_v38 }
0x18fd   :  { %v4650_v19 = vmul.f32 %v7310_v23, %v4649_v41 }
0x18ff   :  { %v4654_v18 = vsel %vm4653_vm0, %v7310_v23, %v4650_v19 }
0x1900   :  { %v4656_v42 = vmul.f32 %v4654_v18, %v8406_v10  ;;  %v6884_v10 = vld [vmem:[%s8593_s5 + $0x130] sm:$0xff] }
0x1901   :  { %5264 = vmatpush.bf16.msra.mxu1 %v6884_v10 }
0x1902   :  { %v4661_v33 = vmul.f32 %v7137_v12, %v4656_v42 }
0x1904   :  { %v4666_v31 = vadd.f32 %v7138_v3, %v4661_v33 }
0x1905   :  { %5265 = vmatpush.bf16.msra.mxu1 %v6883_v58 }
0x1906   :  { %v4667_v17 = vpack.c.bf16 %v4666_v31, %v4665_v27 }
0x1908   :  { %4878 = vmatmul.bf16.vlgmr.msrb.gmra.mxu1 %v4667_v17  ;;  %4892 = vmatmul.bf16.vlgmr.msrb.gmra.mxu2 %v4667_v17 }
0x1909   :  { %4906 = vmatmul.bf16.vlgmr.msra.gmra.mxu3 %v4667_v17  ;;  %4920 = vmatmul.bf16.vlgmr.msrb.gmra.mxu0 %v4667_v17 }
0x190a   :  { %5266 = vmatpush.bf16.msra.mxu1 %v6882_v52 }
0x190e   :  { %5267 = vmatpush.bf16.msra.mxu1 %v6881_v7 }
0x1912   :  { %5268 = vmatpush.bf16.msra.mxu1 %v6880_v0 }
0x1916   :  { %5269 = vmatpush.bf16.msra.mxu1 %v6879_v2 }
0x191a   :  { %5270 = vmatpush.bf16.msra.mxu1 %v6878_v22 }
0x1985   :  { %v4879_v34 = vpop.f32.mrf.mxu1 }
0x1986   :  { %v8517_v16 = vadd.f32 %v4879_v34, %v4702_v59  ;;  %v4921_v5 = vpop.f32.mrf.mxu0 }
0x1987   :  { %v8519_v43 = vadd.f32 %v4921_v5, %v4705_v54 }
0x1988   :  { %v4934_v55 = vmul.f32 0.044715, %v8517_v16  ;;  %v4926_v57 = vmul.f32 0.5, %v8517_v16 }
0x1989   :  { %v4937_v61 = vmul.f32 0.044715, %v8519_v43 }
0x198a   :  { %v4942_v21 = vmul.f32 %v4934_v55, %v8517_v16 }
0x198b   :  { %v4945_v23 = vmul.f32 %v4937_v61, %v8519_v43  ;;  %v4893_v6 = vpop.f32.mrf.mxu2 }
0x198c   :  { %v4950_v9 = vmul.f32 %v4942_v21, %v8517_v16  ;;  %v8534_v1 = vadd.f32 %v4893_v6, %v4703_v56  ;;  %v4907_v48 = vpop.f32.mrf.mxu3  ;;  %v4929_v21 = vmul.f32 0.5, %v8519_v43 }
0x198d   :  { %v4953_v35 = vmul.f32 %v4945_v23, %v8519_v43  ;;  %v8537_v41 = vadd.f32 %v4907_v48, %v4704_v62  ;;  %v4881_v12 = vpop.f32.mrf.mxu1 }
0x198e   :  { %v4958_v53 = vadd.f32 %v4950_v9, %v8517_v16  ;;  %v4935_v19 = vmul.f32 0.044715, %v8534_v1  ;;  %v4882_v18 = vadd.f32 %v4881_v12, %v4702_v59  ;;  %v4923_v3 = vpop.f32.mrf.mxu0  ;;  %v4927_v16 = vmul.f32 0.5, %v8534_v1 }
0x198f   :  { %v4961_v38 = vadd.f32 %v4953_v35, %v8519_v43  ;;  %v4936_v42 = vmul.f32 0.044715, %v8537_v41  ;;  %v4924_v33 = vadd.f32 %v4923_v3, %v4705_v54  ;;  %v4928_v43 = vmul.f32 0.5, %v8537_v41 }
0x1990   :  { %v4943_v27 = vmul.f32 %v4935_v19, %v8534_v1  ;;  %v4938_v31 = vmul.f32 0.044715, %v4882_v18  ;;  %v4966_v15 = vmul.f32 0.7978846, %v4958_v53  ;;  %v4930_v60 = vmul.f32 0.5, %v4882_v18 }
0x1991   :  { %v4944_v17 = vmul.f32 %v4936_v42, %v8537_v41  ;;  %v4941_v25 = vmul.f32 0.044715, %v4924_v33  ;;  %v4969_v13 = vmul.f32 0.7978846, %v4961_v38  ;;  %v4933_v23 = vmul.f32 0.5, %v4924_v33 }
0x1992   :  { %v4951_v10 = vmul.f32 %v4943_v27, %v8534_v1  ;;  %v4946_v20 = vmul.f32 %v4938_v31, %v4882_v18  ;;  %7311 = vtanh.f32 %v4966_v15 }
0x1993   :  { %v4952_v44 = vmul.f32 %v4944_v17, %v8537_v41  ;;  %v4949_v58 = vmul.f32 %v4941_v25, %v4924_v33  ;;  %v4895_v51 = vpop.f32.mrf.mxu2  ;;  %7313 = vtanh.f32 %v4969_v13 }
0x1994   :  { %v4959_v32 = vadd.f32 %v4951_v10, %v8534_v1  ;;  %v4954_v46 = vmul.f32 %v4946_v20, %v4882_v18  ;;  %v4896_v52 = vadd.f32 %v4895_v51, %v4703_v56  ;;  %v4909_v24 = vpop.f32.mrf.mxu3  ;;  %v6917_v1 = vld [vmem:[%s8595_s7 + $0x38] sm:$0xff]  ;;  %v6915_v51 = vld [vmem:[%s8595_s7 + $0x28] sm:$0xff] }
0x1995   :  { %v4960_v45 = vadd.f32 %v4952_v44, %v8537_v41  ;;  %v4957_v14 = vmul.f32 %v4949_v58, %v4924_v33  ;;  %v4910_v7 = vadd.f32 %v4909_v24, %v4704_v62  ;;  %5390 = vmatpush.bf16.msrb.mxu1 %v6917_v1  ;;  %v6916_v41 = vld [vmem:[%s8595_s7 + $0x30] sm:$0xff]  ;;  %v6911_v24 = vld [vmem:[%s8595_s7 + $0x8] sm:$0xff] }
0x1996   :  { %v4962_v39 = vadd.f32 %v4954_v46, %v4882_v18  ;;  %v4939_v28 = vmul.f32 0.044715, %v4896_v52  ;;  %v4967_v8 = vmul.f32 0.7978846, %v4959_v32  ;;  %v4931_v18 = vmul.f32 0.5, %v4896_v52  ;;  %v6914_v32 = vld [vmem:[%s8595_s7 + $0x20] sm:$0xff] }
0x1997   :  { %v4965_v50 = vadd.f32 %v4957_v14, %v4924_v33  ;;  %v4940_v0 = vmul.f32 0.044715, %v4910_v7  ;;  %v4968_v36 = vmul.f32 0.7978846, %v4960_v45  ;;  %v4932_v33 = vmul.f32 0.5, %v4910_v7  ;;  %v6913_v46 = vld [vmem:[%s8595_s7 + $0x18] sm:$0xff] }
0x1998   :  { %v4970_v4 = vmul.f32 0.7978846, %v4962_v39  ;;  %v4947_v37 = vmul.f32 %v4939_v28, %v4896_v52  ;;  %v7312_v59 = vpop.eup %7311  ;;  %v6910_v45 = vld [vmem:[%s8595_s7] sm:$0xff] }
0x1999   :  { %v4973_v2 = vmul.f32 0.7978846, %v4965_v50  ;;  %v4948_v26 = vmul.f32 %v4940_v0, %v4910_v7  ;;  %v7314_v22 = vpop.eup %7313  ;;  %v4982_v63 = vadd.f32 1.0, %v7312_v59  ;;  %5391 = vmatpush.bf16.msrb.mxu1 %v6916_v41 }
0x199a   :  { %7315 = vtanh.f32 %v4970_v4  ;;  %v4955_v11 = vmul.f32 %v4947_v37, %v4896_v52  ;;  %v4985_v55 = vadd.f32 1.0, %v7314_v22 }
0x199b   :  { %7317 = vtanh.f32 %v4973_v2  ;;  %v4956_v47 = vmul.f32 %v4948_v26, %v4910_v7  ;;  %v4990_v48 = vmul.f32 %v4982_v63, %v4926_v57 }
0x199c   :  { %7319 = vtanh.f32 %v4967_v8  ;;  %v4963_v54 = vadd.f32 %v4955_v11, %v4896_v52  ;;  %v4993_v12 = vmul.f32 %v4985_v55, %v4929_v21  ;;  %v6912_v52 = vld [vmem:[%s8595_s7 + $0x10] sm:$0xff] }
0x199d   :  { %7321 = vtanh.f32 %v4968_v36  ;;  %v4964_v40 = vadd.f32 %v4956_v47, %v4910_v7  ;;  %5392 = vmatpush.bf16.msrb.mxu1 %v6915_v51  ;;  %v7139_v7 = vld [vmem:[%s8594_s6 + $0x25] ss:$0 sm:$0xff] }
0x199e   :  { %v4971_v34 = vmul.f32 0.7978846, %v4963_v54 }
0x199f   :  { %v4972_v49 = vmul.f32 0.7978846, %v4964_v40 }
0x19a0   :  { %v7316_v5 = vpop.eup %7315  ;;  %7323 = vtanh.f32 %v4971_v34 }
0x19a1   :  { %v7318_v56 = vpop.eup %7317  ;;  %v4986_v61 = vadd.f32 1.0, %v7316_v5  ;;  %7325 = vtanh.f32 %v4972_v49  ;;  %5393 = vmatpush.bf16.msrb.mxu1 %v6914_v32  ;;  %v7140_v49 = vld [vmem:[%s8596_s8] ss:$0 sm:$0xff] }
0x19a2   :  { %v7320_v62 = vpop.eup %7319  ;;  %v4989_v6 = vadd.f32 1.0, %v7318_v56 }
0x19a3   :  { %v7322_v9 = vpop.eup %7321  ;;  %v4994_v35 = vmul.f32 %v4986_v61, %v4930_v60  ;;  %v4983_v19 = vadd.f32 1.0, %v7320_v62 }
0x19a4   :  { %v4997_v53 = vmul.f32 %v4989_v6, %v4933_v23  ;;  %v4984_v42 = vadd.f32 1.0, %v7322_v9 }
0x19a5   :  { %v4998_v3 = vpack.c.bf16 %v4994_v35, %v4990_v48  ;;  %v4991_v15 = vmul.f32 %v4983_v19, %v4927_v16  ;;  %5394 = vmatpush.bf16.msrb.mxu1 %v6913_v46 }
0x19a6   :  { %v7324_v38 = vpop.eup %7323  ;;  %v5001_v27 = vpack.c.bf16 %v4997_v53, %v4993_v12  ;;  %v4992_v20 = vmul.f32 %v4984_v42, %v4928_v43 }
0x19a7   :  { %v7326_v31 = vpop.eup %7325  ;;  %v4987_v17 = vadd.f32 1.0, %v7324_v38  ;;  %5271 = vmatmul.bf16.vlgmr.msra.gmra.mxu1 %v4998_v3 }
0x19a8   :  { %v4988_v25 = vadd.f32 1.0, %v7326_v31  ;;  %5313 = vmatmul.bf16.vlgmr.msra.gmra.mxu0 %v5001_v27 }
0x19a9   :  { %v4995_v10 = vmul.f32 %v4987_v17, %v4931_v18  ;;  %5395 = vmatpush.bf16.msrb.mxu1 %v6912_v52 }
0x19aa   :  { %v4996_v13 = vmul.f32 %v4988_v25, %v4932_v33 }
0x19ab   :  { %v4999_v44 = vpack.c.bf16 %v4995_v10, %v4991_v15 }
0x19ac   :  { %v5000_v58 = vpack.c.bf16 %v4996_v13, %v4992_v20 }
0x19ad   :  { %5285 = vmatmul.bf16.vlgmr.msra.gmra.mxu2 %v4999_v44  ;;  %5396 = vmatpush.bf16.msrb.mxu1 %v6911_v24 }
0x19ae   :  { %5299 = vmatmul.bf16.vlgmr.msrb.gmra.mxu3 %v5000_v58 }
0x19b1   :  { %5397 = vmatpush.bf16.msrb.mxu1 %v6910_v45 }
0x1a24   :  { %v5272_v14 = vpop.f32.mrf.mxu1 }
0x1a25   :  { %v5273_v28 = vadd.f32 %v7139_v7, %v5272_v14  ;;  %v5314_v0 = vpop.f32.mrf.mxu0 }
0x1a2c   :  { %v5274_v4 = vpop.f32.mrf.mxu1 }
0x1a2d   :  { %v5275_v37 = vadd.f32 %v7139_v7, %v5274_v4  ;;  %v5316_v54 = vpop.f32.mrf.mxu0 }
0x1a30   :  { %v5286_v39 = vpop.f32.mrf.mxu2 }
0x1a31   :  { %v5300_v50 = vpop.f32.mrf.mxu3  ;;  %v5287_v8 = vadd.f32 %v5286_v39, %v5273_v28 }
0x1a33   :  { %v5301_v36 = vadd.f32 %v5300_v50, %v5287_v8 }
0x1a35   :  { %v5315_v47 = vadd.f32 %v5314_v0, %v5301_v36 }
0x1a37   :  { %v5319_v40 = vadd.f32 %v5315_v47, %v8391_v29 }
0x1a38   :  { %v5288_v2 = vpop.f32.mrf.mxu2 }
0x1a39   :  { %v5289_v26 = vadd.f32 %v5288_v2, %v5275_v37  ;;  %v5302_v11 = vpop.f32.mrf.mxu3 }
0x1a3b   :  { %v5303_v59 = vadd.f32 %v5302_v11, %v5289_v26 }
0x1a3d   :  { %v5317_v22 = vadd.f32 %v5316_v54, %v5303_v59 }
0x1a3f   :  { %v5320_v34 = vadd.f32 %v5317_v22, %v8395_v30 }
0x1a41   :  { %v5321_v63 = vpack.c.bf16 %v5320_v34, %v5319_v40 }
0x1a43   :  { %5398 = vmatmul.bf16.vlgmr.msrb.gmra.mxu1 %v5321_v63 }
0x1ac0   :  { %v5399_v5 = vpop.f32.mrf.mxu1 }
0x1ac1   :  { %v5400_v55 = vadd.f32 %v7140_v49, %v5399_v5 }
0x1ac3   :  { %5404 = vst [vmem:[#allocation5] sm:$0xff] %v5400_v55 }
0x1ac8   :  { %v5401_v56 = vpop.f32.mrf.mxu1 }
0x1ac9   :  { %v5402_v29 = vadd.f32 %v7140_v49, %v5401_v56 }
0x1acb   :  { %5405 = vst [vmem:[#allocation5 + $0x8] sm:$0xff] %v5402_v29 }
0x1acc   :  { %5418 = dma.vmem_to_hbm [thread:$0]  %s5411_s17, 256, %s5413_s19, [#allocation4], %s7390_s4, %s7390_s4, %s7391_s20  }
0x1acd   :  { %7379 = dma.done.wait [#allocation4], 256  }
0x1ace   :  { %7380 = vsyncadd [#allocation4], 4294967040 }
0x1acf   :  { %5423 = vsyncpa [#allocation3], 1 }
0x1ad0   :  { %5424 = vsyncpa [#allocation4], 1 }

</bundles_post_ra>
